<compile_context>
chip_gen: v7x
topology: tpu7x:2x2x1
jax: 0.10.0
libtpu: 0.0.40
codegen_flags: <defaults>
</compile_context>

<pallas_src>
import functools
import math

import jax
import jax.numpy as jnp
from jax import lax
from jax.experimental import pallas as pl
from jax.experimental.pallas import tpu as pltpu


# Flip to jnp.bfloat16 on v6e/v7x for ~3-4x MXU throughput (f32 accumulation kept either way,
# and the ProbSparse Q-norm/rank path stays f32 regardless).  Kept f32 to hold the in-script
# 1e-3 reference tolerance.
MXU_DTYPE = jnp.float32
# Flip to jnp.bfloat16 to halve weight DMA bytes / double-buffered VMEM residency
# (biggest relative win on v5e HBM bandwidth and v7x's 64 MiB VMEM).
WEIGHT_DTYPE = jnp.float32


def _tpu_vmem_bytes():
    try:
        return int(pltpu.get_tpu_info().vmem_capacity_bytes)
    except Exception:
        return 64 * 1024 * 1024          # conservative default (v7x per-core VMEM)


_VMEM_BYTES = _tpu_vmem_bytes()
_VMEM_LIMIT = min(max(32 * 1024 * 1024, (_VMEM_BYTES * 3) // 4), 128 * 1024 * 1024)
_FF_MAX_ROW_TILE = 256 if _VMEM_BYTES <= 64 * 1024 * 1024 else 512


def _mm(a, b):
    return jnp.dot(a.astype(MXU_DTYPE), b.astype(MXU_DTYPE),
                   preferred_element_type=jnp.float32)


def _mm_nt(a, b):
    # a @ b.T without an explicit transpose (contract on the last dims).
    return lax.dot_general(a.astype(MXU_DTYPE), b.astype(MXU_DTYPE),
                           (((1,), (1,)), ((), ())),
                           preferred_element_type=jnp.float32)


# ----------------------------------------------------------------------------
# Fused Pallas kernels
# ----------------------------------------------------------------------------

def _attn_block_kernel(*refs, n_heads, u_part, eps, self_kv):
    """One batch element: Q/KV proj -> ProbSparse attention (all heads) ->
    single fused out-projection -> residual add -> LayerNorm."""
    if self_kv:
        (x_ref, wq_ref, bq_ref, wkv_ref, bkv_ref, wo_ref, bo_ref,
         g_ref, bln_ref, o_ref) = refs
    else:
        (x_ref, kv_ref, wq_ref, bq_ref, wkv_ref, bkv_ref, wo_ref, bo_ref,
         g_ref, bln_ref, o_ref) = refs

    x = x_ref[0].astype(jnp.float32)                         # (L, D) queries / residual
    kv_in = x if self_kv else kv_ref[0].astype(jnp.float32)  # (L, D) key/value source
    L, D = x.shape
    dk = D // n_heads

    # Q projection stays f32: the ProbSparse top-U selection is a discrete decision, so the
    # norm/rank computation must be exact even when MXU_DTYPE is flipped to bf16.
    # The 1/sqrt(dk) scale is pre-folded into wq_t / bq (no per-element score scaling below).
    q_all = jnp.dot(x, wq_ref[...].astype(jnp.float32),
                    preferred_element_type=jnp.float32) + bq_ref[...]        # (L, D)
    # Fused K|V projection: one (L, D) @ (D, 2D) matmul.
    kv_all = _mm(kv_in, wkv_ref[...]) + bkv_ref[...]                         # (L, 2D)

    row_i = lax.broadcasted_iota(jnp.int32, (L, L), 0)
    col_j = lax.broadcasted_iota(jnp.int32, (L, L), 1)
    neg = jnp.float32(-1e30)

    # TODO(synk): at production shapes (dk a multiple of 128) move this loop onto a grid axis
    # (B, n_heads) with head-sliced weight BlockSpecs to bound vreg live ranges; at dk < 128
    # the head-sliced weight blocks would violate the (8,128) lane constraint.
    ctxs = []
    for h in range(n_heads):                                 # static unroll over heads
        qh = q_all[:, h * dk:(h + 1) * dk]                   # (L, dk)
        kh = kv_all[:, h * dk:(h + 1) * dk]                  # (L, dk)
        vh = kv_all[:, D + h * dk:D + (h + 1) * dk]          # (L, dk)

        # --- ProbSparse selection: rank positions by squared query norm.
        # beats[i, j] == True iff j outranks i (strict total order, lower index wins ties).
        # The key-column mask is the query-row mask transposed -> one (L,L) reduction total.
        nsq = jnp.sum(qh * qh, axis=-1, keepdims=True)       # (L, 1)
        nsq_r = nsq.reshape(1, L)                            # transpose, no recompute
        beats = (nsq_r > nsq) | ((nsq_r == nsq) & (col_j < row_i))
        rank = jnp.sum(beats.astype(jnp.int32), axis=1, keepdims=True)   # (L, 1)
        sel_row = rank < u_part                              # (L, 1) selected queries
        sel_col = rank.reshape(1, L) < u_part                # (1, L) selected keys

        # --- attention over all positions with non-selected key columns masked.
        scores = _mm_nt(qh, kh)                              # (L, L); scale folded into wq
        masked = jnp.where(sel_col, scores, neg)
        m = jnp.max(masked, axis=-1, keepdims=True)
        e = jnp.exp(masked - m)
        s = jnp.sum(e, axis=-1, keepdims=True)
        r = pl.reciprocal(s, approx=True)                    # EUP slot
        r = r * (2.0 - s * r)                                # one Newton step -> f32 accuracy
        attn = e * r

        ctx_h = _mm(attn, vh)                                # (L, dk)
        ctxs.append(jnp.where(sel_row, ctx_h, 0.0))          # zero unselected query rows

    # Single fused out-projection: one (L, D) @ (D, D) MXU contraction (not H dk-wide ones).
    ctx = jnp.concatenate(ctxs, axis=-1)                     # (L, D)
    out = _mm(ctx, wo_ref[...]) + bo_ref[...]

    # Residual add + LayerNorm, fused.
    y = x + out
    mean = jnp.mean(y, axis=-1, keepdims=True)
    yc = y - mean
    var = jnp.mean(yc * yc, axis=-1, keepdims=True)
    o_ref[0] = (yc * lax.rsqrt(var + eps) * g_ref[...] + bln_ref[...]).astype(o_ref.dtype)


def _ff_block_kernel(x_ref, w1_ref, b1_ref, w2_ref, b2_ref, g_ref, bln_ref,
                     o_ref, acc_ref, *, eps):
    """Row tile x d_ff chunk: accumulate relu(x @ w1[:, c]) @ w2[c, :] over chunks,
    then residual add + LayerNorm at the last chunk."""
    k = pl.program_id(1)

    @pl.when(k == 0)
    def _():
        acc_ref[...] = jnp.zeros_like(acc_ref)

    x = x_ref[...].astype(jnp.float32)                       # (TN, D)
    h = jnp.maximum(_mm(x, w1_ref[...]) + b1_ref[...], 0.0)  # (TN, CK)
    acc_ref[...] += _mm(h, w2_ref[...])                      # (TN, D)

    @pl.when(k == pl.num_programs(1) - 1)
    def _():
        y = x + acc_ref[...] + b2_ref[...]
        mean = jnp.mean(y, axis=-1, keepdims=True)
        yc = y - mean
        var = jnp.mean(yc * yc, axis=-1, keepdims=True)
        o_ref[...] = (yc * lax.rsqrt(var + eps) * g_ref[...] + bln_ref[...]).astype(o_ref.dtype)


# ----------------------------------------------------------------------------
# Pallas wrappers
# ----------------------------------------------------------------------------

def _const_spec(arr):
    nd = arr.ndim
    return pl.BlockSpec(arr.shape, lambda *_: (0,) * nd)


def pallas_attention_block(x, kv, ap, gamma, beta, n_heads, *, eps=1e-5):
    """Fused [Q/KV-proj + ProbSparse attn + out-proj + residual + LN]; grid over batch.
    kv=None -> self-attention: x_ref is reused as the KV source (no duplicated operand)."""
    B, L, D = x.shape
    u_part = max(1, int(L * 0.5))
    self_kv = kv is None
    kern = functools.partial(_attn_block_kernel, n_heads=n_heads, u_part=u_part,
                             eps=eps, self_kv=self_kv)
    act_spec = pl.BlockSpec((1, L, D), lambda b: (b, 0, 0))
    w_specs = [_const_spec(ap["wq_t"]), _const_spec(ap["bq"]),
               _const_spec(ap["wkv_t"]), _const_spec(ap["bkv"]),
               _const_spec(ap["wo_t"]), _const_spec(ap["bo"]),
               _const_spec(gamma), _const_spec(beta)]
    in_specs = [act_spec] + ([] if self_kv else [act_spec]) + w_specs
    operands = ([x] + ([] if self_kv else [kv]) +
                [ap["wq_t"], ap["bq"], ap["wkv_t"], ap["bkv"],
                 ap["wo_t"], ap["bo"], gamma, beta])
    # NOTE: grid=(B,) "parallel" shards across v7x's 2 TensorCores when B >= 2.
    return pl.pallas_call(
        kern,
        out_shape=jax.ShapeDtypeStruct((B, L, D), x.dtype),
        grid=(B,),
        in_specs=in_specs,
        out_specs=act_spec,
        compiler_params=pltpu.CompilerParams(
            dimension_semantics=("parallel",),
            vmem_limit_bytes=_VMEM_LIMIT),
    )(*operands)


def _row_tile(n):
    max_tile = _FF_MAX_ROW_TILE
    if n <= max_tile:
        return n                           # block == full array dim -> layout-legal
    for t in range(max_tile, 7, -8):       # largest multiple-of-8 tile that divides n
        if n % t == 0:
            return t
    return max_tile                        # ragged trailing block (Pallas-masked), never untiled


def _ff_chunk(d_ff, max_chunk=512):
    if d_ff <= max_chunk:
        return d_ff
    for c in range(max_chunk, 127, -128):  # multiple-of-128 exact divisor
        if d_ff % c == 0:
            return c
    return d_ff                            # no clean divisor -> untiled reduction


def pallas_ff_block(x2d, p, gamma, beta, *, eps=1e-5):
    """Fused [FF + residual + LN]; grid = (row tiles of B*L, d_ff chunks)."""
    n, d = x2d.shape
    d_ff = p["ff_w1"].shape[1]
    tn = _row_tile(n)
    ck = _ff_chunk(d_ff)
    kern = functools.partial(_ff_block_kernel, eps=eps)
    x_spec = pl.BlockSpec((tn, d), lambda i, k: (i, 0))
    return pl.pallas_call(
        kern,
        out_shape=jax.ShapeDtypeStruct((n, d), x2d.dtype),
        grid=(pl.cdiv(n, tn), d_ff // ck),
        in_specs=[x_spec,
                  pl.BlockSpec((d, ck), lambda i, k: (0, k)),   # ff_w1 column chunk
                  pl.BlockSpec((1, ck), lambda i, k: (0, k)),   # ff_b1 chunk
                  pl.BlockSpec((ck, d), lambda i, k: (k, 0)),   # ff_w2 row chunk
                  pl.BlockSpec((1, d), lambda i, k: (0, 0)),    # ff_b2
                  pl.BlockSpec((1, d), lambda i, k: (0, 0)),    # gamma
                  pl.BlockSpec((1, d), lambda i, k: (0, 0))],   # beta
        out_specs=x_spec,
        scratch_shapes=[pltpu.VMEM((tn, d), jnp.float32)],
        compiler_params=pltpu.CompilerParams(
            dimension_semantics=("parallel", "arbitrary"),
            vmem_limit_bytes=_VMEM_LIMIT),
    )(x2d, p["ff_w1"], p["ff_b1"], p["ff_w2"], p["ff_b2"], gamma, beta)


# ----------------------------------------------------------------------------
# Model (3 fused pallas_calls per decoder layer)
# ----------------------------------------------------------------------------

def decoder_layer(p, x, cross, n_heads):
    B, L, D = x.shape
    x = pallas_attention_block(x, None, p["self_attn"], p["ln1_g"], p["ln1_b"], n_heads)
    x = pallas_attention_block(x, cross, p["cross_attn"], p["ln2_g"], p["ln2_b"], n_heads)
    x = pallas_ff_block(x.reshape(B * L, D), p, p["ln3_g"], p["ln3_b"]).reshape(B, L, D)
    return x


def informer_decoder(params, x, cross, n_heads):
    for p in params:
        x = decoder_layer(p, x, cross, n_heads)
    return x


# ----------------------------------------------------------------------------
# Parameter init (torch nn.Linear-style) + one-time Pallas layout preparation
# ----------------------------------------------------------------------------

def _init_linear(key, d_in, d_out):
    k1, k2 = jax.random.split(key)
    s = 1.0 / math.sqrt(d_in)
    w = jax.random.uniform(k1, (d_out, d_in), jnp.float32, -s, s)
    b = jax.random.uniform(k2, (d_out,), jnp.float32, -s, s)
    return w, b


def _init_attn(key, d_model):
    ks = jax.random.split(key, 4)
    wq, bq = _init_linear(ks[0], d_model, d_model)
    wk, bk = _init_linear(ks[1], d_model, d_model)
    wv, bv = _init_linear(ks[2], d_model, d_model)
    wo, bo = _init_linear(ks[3], d_model, d_model)
    return dict(wq=wq, bq=bq, wk=wk, bk=bk, wv=wv, bv=bv, wo=wo, bo=bo)


def init_decoder_params(key, d_model, d_ff, n_heads, d_layers):
    params = []
    keys = jax.random.split(key, d_layers)
    for lk in keys:
        ks = jax.random.split(lk, 4)
        w1, bf1 = _init_linear(ks[2], d_model, d_ff)
        w2, bf2 = _init_linear(ks[3], d_ff, d_model)
        params.append(dict(
            self_attn=_init_attn(ks[0], d_model),
            cross_attn=_init_attn(ks[1], d_model),
            w1=w1, bf1=bf1, w2=w2, bf2=bf2,
            g1=jnp.ones((d_model,), jnp.float32), b1=jnp.zeros((d_model,), jnp.float32),
            g2=jnp.ones((d_model,), jnp.float32), b2=jnp.zeros((d_model,), jnp.float32),
            g3=jnp.ones((d_model,), jnp.float32), b3=jnp.zeros((d_model,), jnp.float32),
        ))
    return params


def _prepare_attn(a, n_heads):
    d = a["wq"].shape[0]
    scale = 1.0 / math.sqrt(d // n_heads)                # folded into Q proj (rank-preserving)
    return dict(
        wq_t=(a["wq"].T * scale).astype(WEIGHT_DTYPE),                    # (D, D)  x @ w layout
        bq=(a["bq"] * scale).reshape(1, d),
        wkv_t=jnp.concatenate([a["wk"].T, a["wv"].T], axis=1).astype(WEIGHT_DTYPE),  # (D, 2D)
        bkv=jnp.concatenate([a["bk"], a["bv"]]).reshape(1, 2 * d),
        wo_t=a["wo"].T.astype(WEIGHT_DTYPE),                              # (D, D)
        bo=a["bo"].reshape(1, d),
    )


def prepare_decoder_params(params, n_heads):
    """One-time layout prep: pre-transpose weights, fuse K/V, fold 1/sqrt(dk) into Q proj,
    pre-reshape biases, optionally down-cast weights to WEIGHT_DTYPE."""
    prepared = []
    for p in params:
        d = p["g1"].shape[0]
        prepared.append(dict(
            self_attn=_prepare_attn(p["self_attn"], n_heads),
            cross_attn=_prepare_attn(p["cross_attn"], n_heads),
            ff_w1=p["w1"].T.astype(WEIGHT_DTYPE), ff_b1=p["bf1"].reshape(1, -1),
            ff_w2=p["w2"].T.astype(WEIGHT_DTYPE), ff_b2=p["bf2"].reshape(1, -1),
            ln1_g=p["g1"].reshape(1, d), ln1_b=p["b1"].reshape(1, d),
            ln2_g=p["g2"].reshape(1, d), ln2_b=p["b2"].reshape(1, d),
            ln3_g=p["g3"].reshape(1, d), ln3_b=p["b3"].reshape(1, d),
        ))
    return prepared


# ----------------------------------------------------------------------------
# Pure-JAX reference (mirrors the PyTorch forward exactly, dropout = identity)
# ----------------------------------------------------------------------------

def _ref_probsparse(p, queries, keys, values, n_heads):
    B, L, D = queries.shape
    dk = D // n_heads
    lin = lambda x, w, b: x @ w.T + b
    reshape_heads = lambda t: t.reshape(B, L, n_heads, dk).transpose(0, 2, 1, 3)
    q = reshape_heads(lin(queries, p["wq"], p["bq"]))
    k = reshape_heads(lin(keys, p["wk"], p["bk"]))
    v = reshape_heads(lin(values, p["wv"], p["bv"]))
    U = max(1, int(L * 0.5))
    qn = jnp.linalg.norm(q, axis=-1)
    _, idx = lax.top_k(qn, U)                                   # (B, H, U)
    take = lambda t: jnp.take_along_axis(t, idx[..., None], axis=2)
    qs, ks, vs = take(q), take(k), take(v)
    sc = jnp.einsum("bhud,bhwd->bhuw", qs, ks) / dk ** 0.5
    at = jax.nn.softmax(sc, axis=-1)
    ctx = jnp.einsum("bhuw,bhwd->bhud", at, vs)
    zeros = jnp.zeros((B, n_heads, L, dk), jnp.float32)
    b_idx = jnp.arange(B)[:, None, None]
    h_idx = jnp.arange(n_heads)[None, :, None]
    zeros = zeros.at[b_idx, h_idx, idx].set(ctx)
    ctx_full = zeros.transpose(0, 2, 1, 3).reshape(B, L, D)
    return lin(ctx_full, p["wo"], p["bo"])


def _ref_ln(x, g, b, eps=1e-5):
    m = jnp.mean(x, axis=-1, keepdims=True)
    v = jnp.mean((x - m) ** 2, axis=-1, keepdims=True)
    return (x - m) / jnp.sqrt(v + eps) * g + b


def ref_informer_decoder(params, x, cross, n_heads):
    for p in params:
        x2 = _ref_probsparse(p["self_attn"], x, x, x, n_heads)
        x = _ref_ln(x + x2, p["g1"], p["b1"])
        x2 = _ref_probsparse(p["cross_attn"], x, cross, cross, n_heads)
        x = _ref_ln(x + x2, p["g2"], p["b2"])
        h = jnp.maximum(x @ p["w1"].T + p["bf1"], 0.0)
        x2 = h @ p["w2"].T + p["bf2"]
        x = _ref_ln(x + x2, p["g3"], p["b3"])
    return x


# ----------------------------------------------------------------------------

if __name__ == "__main__":
    d_model, d_ff, n_heads, d_layers = 32, 64, 4, 2
    B, L = 2, 8

    key = jax.random.PRNGKey(0)
    kx, kc, kp = jax.random.split(key, 3)
    x = jax.random.normal(kx, (B, L, d_model), jnp.float32)
    cross = jax.random.normal(kc, (B, L, d_model), jnp.float32)
    params = init_decoder_params(kp, d_model, d_ff, n_heads, d_layers)
    prep = prepare_decoder_params(params, n_heads)   # one-time weight layout prep

    fwd = jax.jit(lambda pp, a, c: informer_decoder(pp, a, c, n_heads))
    out = jax.block_until_ready(fwd(prep, x, cross))

    ref = ref_informer_decoder(params, x, cross, n_heads)
    assert out.shape == (B, L, d_model)
    max_err = float(jnp.max(jnp.abs(out - ref)))
    assert jnp.allclose(out, ref, atol=1e-3, rtol=1e-3), f"max_err={max_err}"

    print("KERNEL_OK")
</pallas_src>

<mosaic_0001>
module attributes {stable_mosaic.version = 11 : i64} {
  func.func @_ff_block_kernel(%arg0: i32, %arg1: i32, %arg2: memref<16x32xf32, #tpu.memory_space<vmem>>, %arg3: memref<32x64xf32, #tpu.memory_space<vmem>>, %arg4: memref<1x64xf32, #tpu.memory_space<vmem>>, %arg5: memref<64x32xf32, #tpu.memory_space<vmem>>, %arg6: memref<1x32xf32, #tpu.memory_space<vmem>>, %arg7: memref<1x32xf32, #tpu.memory_space<vmem>>, %arg8: memref<1x32xf32, #tpu.memory_space<vmem>>, %arg9: memref<16x32xf32, #tpu.memory_space<vmem>>, %arg10: memref<16x32xf32, #tpu.memory_space<vmem>>) attributes {dimension_semantics = [#tpu.dimension_semantics<parallel>, #tpu.dimension_semantics<arbitrary>], iteration_bounds = array<i64: 1, 1>, scalar_prefetch = 0 : i64, scratch_operands = 1 : i64, tpu.core_type = #tpu.core_type<tc>, window_params = [{transform_indices = @transform_0, window_bounds = array<i64: 16, 32>}, {transform_indices = @transform_1, window_bounds = array<i64: 32, 64>}, {transform_indices = @transform_2, window_bounds = array<i64: 1, 64>}, {transform_indices = @transform_3, window_bounds = array<i64: 64, 32>}, {pipeline_mode = #tpu.pipeline_mode<synchronous>, transform_indices = @transform_4, window_bounds = array<i64: 1, 32>}, {pipeline_mode = #tpu.pipeline_mode<synchronous>, transform_indices = @transform_5, window_bounds = array<i64: 1, 32>}, {pipeline_mode = #tpu.pipeline_mode<synchronous>, transform_indices = @transform_6, window_bounds = array<i64: 1, 32>}, {transform_indices = @transform_7, window_bounds = array<i64: 16, 32>}]} {
    %c0_i32 = arith.constant 0 : i32
    %0 = arith.cmpi eq, %arg1, %c0_i32 : i32
    %1 = arith.extui %0 : i1 to i32
    %c0_i32_0 = arith.constant 0 : i32
    %2 = arith.cmpi ne, %1, %c0_i32_0 : i32
    scf.if %2 {
      %cst_16 = arith.constant 0.000000e+00 : f32
      %19 = vector.broadcast %cst_16 : f32 to vector<16x32xf32>
      %c0_17 = arith.constant 0 : index
      %c0_18 = arith.constant 0 : index
      %20 = vector.load %arg10[%c0_17, %c0_18] : memref<16x32xf32, #tpu.memory_space<vmem>>, vector<16x32xf32>
      tpu.vector_store %arg10[%c0_17, %c0_18], %19 {strides = array<i32>} : memref<16x32xf32, #tpu.memory_space<vmem>>, vector<16x32xf32>,
    } else {
    }
    %c0 = arith.constant 0 : index
    %c0_1 = arith.constant 0 : index
    %3 = vector.load %arg2[%c0, %c0_1] : memref<16x32xf32, #tpu.memory_space<vmem>>, vector<16x32xf32>
    %c0_2 = arith.constant 0 : index
    %c0_3 = arith.constant 0 : index
    %4 = vector.load %arg3[%c0_2, %c0_3] : memref<32x64xf32, #tpu.memory_space<vmem>>, vector<32x64xf32>
    %cst = arith.constant dense<0.000000e+00> : vector<16x64xf32>
    %5 = tpu.matmul %3, %4, %cst {dimension_numbers = #tpu.dot_dimension_numbers<[1], [0], [0], [1], [0, 0, 1, 1], [], []>} : vector<16x32xf32>, vector<32x64xf32>, vector<16x64xf32> -> vector<16x64xf32>
    %c0_4 = arith.constant 0 : index
    %c0_5 = arith.constant 0 : index
    %6 = vector.load %arg4[%c0_4, %c0_5] : memref<1x64xf32, #tpu.memory_space<vmem>>, vector<1x64xf32>
    %7 = vector.broadcast %6 : vector<1x64xf32> to vector<16x64xf32>
    %8 = arith.addf %5, %7 : vector<16x64xf32>
    %cst_6 = arith.constant 0.000000e+00 : f32
    %9 = vector.broadcast %cst_6 : f32 to vector<16x64xf32>
    %10 = arith.maximumf %8, %9 : vector<16x64xf32>
    %c0_7 = arith.constant 0 : index
    %c0_8 = arith.constant 0 : index
    %11 = vector.load %arg10[%c0_7, %c0_8] : memref<16x32xf32, #tpu.memory_space<vmem>>, vector<16x32xf32>
    %c0_9 = arith.constant 0 : index
    %c0_10 = arith.constant 0 : index
    %12 = vector.load %arg5[%c0_9, %c0_10] : memref<64x32xf32, #tpu.memory_space<vmem>>, vector<64x32xf32>
    %cst_11 = arith.constant dense<0.000000e+00> : vector<16x32xf32>
    %13 = tpu.matmul %10, %12, %cst_11 {dimension_numbers = #tpu.dot_dimension_numbers<[1], [0], [0], [1], [0, 0, 1, 1], [], []>} : vector<16x64xf32>, vector<64x32xf32>, vector<16x32xf32> -> vector<16x32xf32>
    %14 = arith.addf %11, %13 : vector<16x32xf32>
    %c0_12 = arith.constant 0 : index
    %c0_13 = arith.constant 0 : index
    %15 = vector.load %arg10[%c0_12, %c0_13] : memref<16x32xf32, #tpu.memory_space<vmem>>, vector<16x32xf32>
    tpu.vector_store %arg10[%c0_12, %c0_13], %14 {strides = array<i32>} : memref<16x32xf32, #tpu.memory_space<vmem>>, vector<16x32xf32>,
    %c0_i32_14 = arith.constant 0 : i32
    %16 = arith.cmpi eq, %arg1, %c0_i32_14 : i32
    %17 = arith.extui %16 : i1 to i32
    %c0_i32_15 = arith.constant 0 : i32
    %18 = arith.cmpi ne, %17, %c0_i32_15 : i32
    scf.if %18 {
      %c0_16 = arith.constant 0 : index
      %c0_17 = arith.constant 0 : index
      %19 = vector.load %arg10[%c0_16, %c0_17] : memref<16x32xf32, #tpu.memory_space<vmem>>, vector<16x32xf32>
      %20 = arith.addf %3, %19 : vector<16x32xf32>
      %c0_18 = arith.constant 0 : index
      %c0_19 = arith.constant 0 : index
      %21 = vector.load %arg6[%c0_18, %c0_19] : memref<1x32xf32, #tpu.memory_space<vmem>>, vector<1x32xf32>
      %22 = vector.broadcast %21 : vector<1x32xf32> to vector<16x32xf32>
      %23 = arith.addf %20, %22 : vector<16x32xf32>
      %cst_20 = arith.constant dense<0.000000e+00> : vector<16xf32>
      %24 = vector.multi_reduction <add>, %23, %cst_20 [1] : vector<16x32xf32> to vector<16xf32>
      %25 = vector.shape_cast %24 : vector<16xf32> to vector<16x1xf32>
      %cst_21 = arith.constant 3.200000e+01 : f32
      %26 = vector.broadcast %cst_21 : f32 to vector<16x1xf32>
      %27 = arith.divf %25, %26 : vector<16x1xf32>
      %28 = vector.broadcast %27 : vector<16x1xf32> to vector<16x32xf32>
      %29 = arith.subf %23, %28 : vector<16x32xf32>
      %30 = arith.mulf %29, %29 : vector<16x32xf32>
      %cst_22 = arith.constant dense<0.000000e+00> : vector<16xf32>
      %31 = vector.multi_reduction <add>, %30, %cst_22 [1] : vector<16x32xf32> to vector<16xf32>
      %32 = vector.shape_cast %31 : vector<16xf32> to vector<16x1xf32>
      %cst_23 = arith.constant 3.200000e+01 : f32
      %33 = vector.broadcast %cst_23 : f32 to vector<16x1xf32>
      %34 = arith.divf %32, %33 : vector<16x1xf32>
      %cst_24 = arith.constant 9.99999974E-6 : f32
      %35 = vector.broadcast %cst_24 : f32 to vector<16x1xf32>
      %36 = arith.addf %34, %35 : vector<16x1xf32>
      %37 = math.rsqrt %36 : vector<16x1xf32>
      %38 = vector.broadcast %37 : vector<16x1xf32> to vector<16x32xf32>
      %39 = arith.mulf %29, %38 : vector<16x32xf32>
      %c0_25 = arith.constant 0 : index
      %c0_26 = arith.constant 0 : index
      %40 = vector.load %arg7[%c0_25, %c0_26] : memref<1x32xf32, #tpu.memory_space<vmem>>, vector<1x32xf32>
      %41 = vector.broadcast %40 : vector<1x32xf32> to vector<16x32xf32>
      %42 = arith.mulf %39, %41 : vector<16x32xf32>
      %c0_27 = arith.constant 0 : index
      %c0_28 = arith.constant 0 : index
      %43 = vector.load %arg8[%c0_27, %c0_28] : memref<1x32xf32, #tpu.memory_space<vmem>>, vector<1x32xf32>
      %44 = vector.broadcast %43 : vector<1x32xf32> to vector<16x32xf32>
      %45 = arith.addf %42, %44 : vector<16x32xf32>
      %c0_29 = arith.constant 0 : index
      %c0_30 = arith.constant 0 : index
      %46 = vector.load %arg9[%c0_29, %c0_30] : memref<16x32xf32, #tpu.memory_space<vmem>>, vector<16x32xf32>
      tpu.vector_store %arg9[%c0_29, %c0_30], %45 {strides = array<i32>} : memref<16x32xf32, #tpu.memory_space<vmem>>, vector<16x32xf32>,
    } else {
    }
    return
  }
  func.func @transform_0(%arg0: i32, %arg1: i32) -> (i32, i32) {
    %c0_i32 = arith.constant 0 : i32
    %c0_i32_0 = arith.constant 0 : i32
    return %arg0, %c0_i32 : i32, i32
  }
  func.func @transform_1(%arg0: i32, %arg1: i32) -> (i32, i32) {
    %c0_i32 = arith.constant 0 : i32
    %c0_i32_0 = arith.constant 0 : i32
    return %c0_i32, %arg1 : i32, i32
  }
  func.func @transform_2(%arg0: i32, %arg1: i32) -> (i32, i32) {
    %c0_i32 = arith.constant 0 : i32
    %c0_i32_0 = arith.constant 0 : i32
    return %c0_i32, %arg1 : i32, i32
  }
  func.func @transform_3(%arg0: i32, %arg1: i32) -> (i32, i32) {
    %c0_i32 = arith.constant 0 : i32
    %c0_i32_0 = arith.constant 0 : i32
    return %arg1, %c0_i32 : i32, i32
  }
  func.func @transform_4(%arg0: i32, %arg1: i32) -> (i32, i32) {
    %c0_i32 = arith.constant 0 : i32
    %c0_i32_0 = arith.constant 0 : i32
    %c0_i32_1 = arith.constant 0 : i32
    return %c0_i32, %c0_i32_0 : i32, i32
  }
  func.func @transform_5(%arg0: i32, %arg1: i32) -> (i32, i32) {
    %c0_i32 = arith.constant 0 : i32
    %c0_i32_0 = arith.constant 0 : i32
    %c0_i32_1 = arith.constant 0 : i32
    return %c0_i32, %c0_i32_0 : i32, i32
  }
  func.func @transform_6(%arg0: i32, %arg1: i32) -> (i32, i32) {
    %c0_i32 = arith.constant 0 : i32
    %c0_i32_0 = arith.constant 0 : i32
    %c0_i32_1 = arith.constant 0 : i32
    return %c0_i32, %c0_i32_0 : i32, i32
  }
  func.func @transform_7(%arg0: i32, %arg1: i32) -> (i32, i32) {
    %c0_i32 = arith.constant 0 : i32
    %c0_i32_0 = arith.constant 0 : i32
    return %arg0, %c0_i32 : i32, i32
  }
}

module attributes {stable_mosaic.version = 11 : i64} {
  func.func @_attn_block_kernel(%arg0: i32, %arg1: memref<1x8x32xf32, #tpu.memory_space<vmem>>, %arg2: memref<1x8x32xf32, #tpu.memory_space<vmem>>, %arg3: memref<32x32xf32, #tpu.memory_space<vmem>>, %arg4: memref<1x32xf32, #tpu.memory_space<vmem>>, %arg5: memref<32x64xf32, #tpu.memory_space<vmem>>, %arg6: memref<1x64xf32, #tpu.memory_space<vmem>>, %arg7: memref<32x32xf32, #tpu.memory_space<vmem>>, %arg8: memref<1x32xf32, #tpu.memory_space<vmem>>, %arg9: memref<1x32xf32, #tpu.memory_space<vmem>>, %arg10: memref<1x32xf32, #tpu.memory_space<vmem>>, %arg11: memref<1x8x32xf32, #tpu.memory_space<vmem>>) attributes {dimension_semantics = [#tpu.dimension_semantics<parallel>], iteration_bounds = array<i64: 2>, scalar_prefetch = 0 : i64, scratch_operands = 0 : i64, tpu.core_type = #tpu.core_type<tc>, window_params = [{transform_indices = @transform_0, window_bounds = array<i64: 1, 8, 32>}, {transform_indices = @transform_1, window_bounds = array<i64: 1, 8, 32>}, {pipeline_mode = #tpu.pipeline_mode<synchronous>, transform_indices = @transform_2, window_bounds = array<i64: 32, 32>}, {pipeline_mode = #tpu.pipeline_mode<synchronous>, transform_indices = @transform_3, window_bounds = array<i64: 1, 32>}, {pipeline_mode = #tpu.pipeline_mode<synchronous>, transform_indices = @transform_4, window_bounds = array<i64: 32, 64>}, {pipeline_mode = #tpu.pipeline_mode<synchronous>, transform_indices = @transform_5, window_bounds = array<i64: 1, 64>}, {pipeline_mode = #tpu.pipeline_mode<synchronous>, transform_indices = @transform_6, window_bounds = array<i64: 32, 32>}, {pipeline_mode = #tpu.pipeline_mode<synchronous>, transform_indices = @transform_7, window_bounds = array<i64: 1, 32>}, {pipeline_mode = #tpu.pipeline_mode<synchronous>, transform_indices = @transform_8, window_bounds = array<i64: 1, 32>}, {pipeline_mode = #tpu.pipeline_mode<synchronous>, transform_indices = @transform_9, window_bounds = array<i64: 1, 32>}, {transform_indices = @transform_10, window_bounds = array<i64: 1, 8, 32>}]} {
    %c0 = arith.constant 0 : index
    %c0_0 = arith.constant 0 : index
    %c0_1 = arith.constant 0 : index
    %0 = vector.load %arg1[%c0, %c0_0, %c0_1] : memref<1x8x32xf32, #tpu.memory_space<vmem>>, vector<1x8x32xf32>
    %1 = vector.shape_cast %0 : vector<1x8x32xf32> to vector<8x32xf32>
    %c0_2 = arith.constant 0 : index
    %c0_3 = arith.constant 0 : index
    %c0_4 = arith.constant 0 : index
    %2 = vector.load %arg2[%c0_2, %c0_3, %c0_4] : memref<1x8x32xf32, #tpu.memory_space<vmem>>, vector<1x8x32xf32>
    %3 = vector.shape_cast %2 : vector<1x8x32xf32> to vector<8x32xf32>
    %c0_5 = arith.constant 0 : index
    %c0_6 = arith.constant 0 : index
    %4 = vector.load %arg3[%c0_5, %c0_6] : memref<32x32xf32, #tpu.memory_space<vmem>>, vector<32x32xf32>
    %cst = arith.constant dense<0.000000e+00> : vector<8x32xf32>
    %5 = tpu.matmul %1, %4, %cst {dimension_numbers = #tpu.dot_dimension_numbers<[1], [0], [0], [1], [0, 0, 1, 1], [], []>} : vector<8x32xf32>, vector<32x32xf32>, vector<8x32xf32> -> vector<8x32xf32>
    %c0_7 = arith.constant 0 : index
    %c0_8 = arith.constant 0 : index
    %6 = vector.load %arg4[%c0_7, %c0_8] : memref<1x32xf32, #tpu.memory_space<vmem>>, vector<1x32xf32>
    %7 = vector.broadcast %6 : vector<1x32xf32> to vector<8x32xf32>
    %8 = arith.addf %5, %7 : vector<8x32xf32>
    %c0_9 = arith.constant 0 : index
    %c0_10 = arith.constant 0 : index
    %9 = vector.load %arg5[%c0_9, %c0_10] : memref<32x64xf32, #tpu.memory_space<vmem>>, vector<32x64xf32>
    %cst_11 = arith.constant dense<0.000000e+00> : vector<8x64xf32>
    %10 = tpu.matmul %3, %9, %cst_11 {dimension_numbers = #tpu.dot_dimension_numbers<[1], [0], [0], [1], [0, 0, 1, 1], [], []>} : vector<8x32xf32>, vector<32x64xf32>, vector<8x64xf32> -> vector<8x64xf32>
    %c0_12 = arith.constant 0 : index
    %c0_13 = arith.constant 0 : index
    %11 = vector.load %arg6[%c0_12, %c0_13] : memref<1x64xf32, #tpu.memory_space<vmem>>, vector<1x64xf32>
    %12 = vector.broadcast %11 : vector<1x64xf32> to vector<8x64xf32>
    %13 = arith.addf %10, %12 : vector<8x64xf32>
    %14 = tpu.iota {dimensions = array<i32: 0>} : vector<8x8xi32>
    %15 = tpu.iota {dimensions = array<i32: 1>} : vector<8x8xi32>
    %16 = vector.extract_strided_slice %8 {offsets = [0, 0], sizes = [8, 8], strides = [1, 1]} : vector<8x32xf32> to vector<8x8xf32>
    %17 = vector.extract_strided_slice %13 {offsets = [0, 0], sizes = [8, 8], strides = [1, 1]} : vector<8x64xf32> to vector<8x8xf32>
    %18 = vector.extract_strided_slice %13 {offsets = [0, 32], sizes = [8, 8], strides = [1, 1]} : vector<8x64xf32> to vector<8x8xf32>
    %19 = arith.mulf %16, %16 : vector<8x8xf32>
    %cst_14 = arith.constant dense<0.000000e+00> : vector<8xf32>
    %20 = vector.multi_reduction <add>, %19, %cst_14 [1] : vector<8x8xf32> to vector<8xf32>
    %21 = vector.shape_cast %20 : vector<8xf32> to vector<8x1xf32>
    %22 = vector.shape_cast %21 : vector<8x1xf32> to vector<1x8xf32>
    %23 = vector.broadcast %22 : vector<1x8xf32> to vector<8x8xf32>
    %24 = vector.broadcast %21 : vector<8x1xf32> to vector<8x8xf32>
    %25 = arith.cmpf ogt, %23, %24 : vector<8x8xf32>
    %26 = vector.broadcast %22 : vector<1x8xf32> to vector<8x8xf32>
    %27 = vector.broadcast %21 : vector<8x1xf32> to vector<8x8xf32>
    %28 = arith.cmpf oeq, %26, %27 : vector<8x8xf32>
    %29 = arith.cmpi slt, %15, %14 : vector<8x8xi32>
    %30 = arith.andi %28, %29 : vector<8x8xi1>
    %31 = arith.ori %25, %30 : vector<8x8xi1>
    %32 = arith.extui %31 : vector<8x8xi1> to vector<8x8xi32>
    %cst_15 = arith.constant dense<0> : vector<8xi32>
    %33 = vector.multi_reduction <add>, %32, %cst_15 [1] : vector<8x8xi32> to vector<8xi32>
    %34 = vector.shape_cast %33 : vector<8xi32> to vector<8x1xi32>
    %c4_i32 = arith.constant 4 : i32
    %35 = vector.broadcast %c4_i32 : i32 to vector<8x1xi32>
    %36 = arith.cmpi slt, %34, %35 : vector<8x1xi32>
    %37 = vector.shape_cast %34 : vector<8x1xi32> to vector<1x8xi32>
    %c4_i32_16 = arith.constant 4 : i32
    %38 = vector.broadcast %c4_i32_16 : i32 to vector<1x8xi32>
    %39 = arith.cmpi slt, %37, %38 : vector<1x8xi32>
    %cst_17 = arith.constant dense<0.000000e+00> : vector<8x8xf32>
    %40 = tpu.matmul %16, %17, %cst_17 {dimension_numbers = #tpu.dot_dimension_numbers<[1], [1], [0], [0], [0, 0, 1, 0], [], []>} : vector<8x8xf32>, vector<8x8xf32>, vector<8x8xf32> -> vector<8x8xf32>
    %cst_18 = arith.constant -1.000000e+30 : f32
    %41 = vector.shape_cast %39 : vector<1x8xi1> to vector<1x8xi1>
    %42 = vector.broadcast %41 : vector<1x8xi1> to vector<8x8xi1>
    %43 = vector.broadcast %cst_18 : f32 to vector<8x8xf32>
    %44 = arith.select %42, %40, %43 : vector<8x8xi1>, vector<8x8xf32>
    %cst_19 = arith.constant dense<0xFF800000> : vector<8xf32>
    %45 = vector.multi_reduction <maximumf>, %44, %cst_19 [1] : vector<8x8xf32> to vector<8xf32>
    %46 = vector.shape_cast %45 : vector<8xf32> to vector<8x1xf32>
    %47 = vector.broadcast %46 : vector<8x1xf32> to vector<8x8xf32>
    %48 = arith.subf %44, %47 : vector<8x8xf32>
    %49 = math.exp %48 : vector<8x8xf32>
    %cst_20 = arith.constant dense<0.000000e+00> : vector<8xf32>
    %50 = vector.multi_reduction <add>, %49, %cst_20 [1] : vector<8x8xf32> to vector<8xf32>
    %51 = vector.shape_cast %50 : vector<8xf32> to vector<8x1xf32>
    %52 = tpu.reciprocal %51 {approx = true} : vector<8x1xf32> -> vector<8x1xf32>
    %53 = arith.mulf %51, %52 : vector<8x1xf32>
    %cst_21 = arith.constant 2.000000e+00 : f32
    %54 = vector.broadcast %cst_21 : f32 to vector<8x1xf32>
    %55 = arith.subf %54, %53 : vector<8x1xf32>
    %56 = arith.mulf %52, %55 : vector<8x1xf32>
    %57 = vector.broadcast %56 : vector<8x1xf32> to vector<8x8xf32>
    %58 = arith.mulf %49, %57 : vector<8x8xf32>
    %cst_22 = arith.constant dense<0.000000e+00> : vector<8x8xf32>
    %59 = tpu.matmul %58, %18, %cst_22 {dimension_numbers = #tpu.dot_dimension_numbers<[1], [0], [0], [1], [0, 0, 1, 1], [], []>} : vector<8x8xf32>, vector<8x8xf32>, vector<8x8xf32> -> vector<8x8xf32>
    %cst_23 = arith.constant 0.000000e+00 : f32
    %60 = vector.shape_cast %36 : vector<8x1xi1> to vector<8x1xi1>
    %61 = vector.broadcast %60 : vector<8x1xi1> to vector<8x8xi1>
    %62 = vector.broadcast %cst_23 : f32 to vector<8x8xf32>
    %63 = arith.select %61, %59, %62 : vector<8x8xi1>, vector<8x8xf32>
    %64 = vector.extract_strided_slice %8 {offsets = [0, 8], sizes = [8, 8], strides = [1, 1]} : vector<8x32xf32> to vector<8x8xf32>
    %65 = vector.extract_strided_slice %13 {offsets = [0, 8], sizes = [8, 8], strides = [1, 1]} : vector<8x64xf32> to vector<8x8xf32>
    %66 = vector.extract_strided_slice %13 {offsets = [0, 40], sizes = [8, 8], strides = [1, 1]} : vector<8x64xf32> to vector<8x8xf32>
    %67 = arith.mulf %64, %64 : vector<8x8xf32>
    %cst_24 = arith.constant dense<0.000000e+00> : vector<8xf32>
    %68 = vector.multi_reduction <add>, %67, %cst_24 [1] : vector<8x8xf32> to vector<8xf32>
    %69 = vector.shape_cast %68 : vector<8xf32> to vector<8x1xf32>
    %70 = vector.shape_cast %69 : vector<8x1xf32> to vector<1x8xf32>
    %71 = vector.broadcast %70 : vector<1x8xf32> to vector<8x8xf32>
    %72 = vector.broadcast %69 : vector<8x1xf32> to vector<8x8xf32>
    %73 = arith.cmpf ogt, %71, %72 : vector<8x8xf32>
    %74 = vector.broadcast %70 : vector<1x8xf32> to vector<8x8xf32>
    %75 = vector.broadcast %69 : vector<8x1xf32> to vector<8x8xf32>
    %76 = arith.cmpf oeq, %74, %75 : vector<8x8xf32>
    %77 = arith.cmpi slt, %15, %14 : vector<8x8xi32>
    %78 = arith.andi %76, %77 : vector<8x8xi1>
    %79 = arith.ori %73, %78 : vector<8x8xi1>
    %80 = arith.extui %79 : vector<8x8xi1> to vector<8x8xi32>
    %cst_25 = arith.constant dense<0> : vector<8xi32>
    %81 = vector.multi_reduction <add>, %80, %cst_25 [1] : vector<8x8xi32> to vector<8xi32>
    %82 = vector.shape_cast %81 : vector<8xi32> to vector<8x1xi32>
    %c4_i32_26 = arith.constant 4 : i32
    %83 = vector.broadcast %c4_i32_26 : i32 to vector<8x1xi32>
    %84 = arith.cmpi slt, %82, %83 : vector<8x1xi32>
    %85 = vector.shape_cast %82 : vector<8x1xi32> to vector<1x8xi32>
    %c4_i32_27 = arith.constant 4 : i32
    %86 = vector.broadcast %c4_i32_27 : i32 to vector<1x8xi32>
    %87 = arith.cmpi slt, %85, %86 : vector<1x8xi32>
    %cst_28 = arith.constant dense<0.000000e+00> : vector<8x8xf32>
    %88 = tpu.matmul %64, %65, %cst_28 {dimension_numbers = #tpu.dot_dimension_numbers<[1], [1], [0], [0], [0, 0, 1, 0], [], []>} : vector<8x8xf32>, vector<8x8xf32>, vector<8x8xf32> -> vector<8x8xf32>
    %cst_29 = arith.constant -1.000000e+30 : f32
    %89 = vector.shape_cast %87 : vector<1x8xi1> to vector<1x8xi1>
    %90 = vector.broadcast %89 : vector<1x8xi1> to vector<8x8xi1>
    %91 = vector.broadcast %cst_29 : f32 to vector<8x8xf32>
    %92 = arith.select %90, %88, %91 : vector<8x8xi1>, vector<8x8xf32>
    %cst_30 = arith.constant dense<0xFF800000> : vector<8xf32>
    %93 = vector.multi_reduction <maximumf>, %92, %cst_30 [1] : vector<8x8xf32> to vector<8xf32>
    %94 = vector.shape_cast %93 : vector<8xf32> to vector<8x1xf32>
    %95 = vector.broadcast %94 : vector<8x1xf32> to vector<8x8xf32>
    %96 = arith.subf %92, %95 : vector<8x8xf32>
    %97 = math.exp %96 : vector<8x8xf32>
    %cst_31 = arith.constant dense<0.000000e+00> : vector<8xf32>
    %98 = vector.multi_reduction <add>, %97, %cst_31 [1] : vector<8x8xf32> to vector<8xf32>
    %99 = vector.shape_cast %98 : vector<8xf32> to vector<8x1xf32>
    %100 = tpu.reciprocal %99 {approx = true} : vector<8x1xf32> -> vector<8x1xf32>
    %101 = arith.mulf %99, %100 : vector<8x1xf32>
    %cst_32 = arith.constant 2.000000e+00 : f32
    %102 = vector.broadcast %cst_32 : f32 to vector<8x1xf32>
    %103 = arith.subf %102, %101 : vector<8x1xf32>
    %104 = arith.mulf %100, %103 : vector<8x1xf32>
    %105 = vector.broadcast %104 : vector<8x1xf32> to vector<8x8xf32>
    %106 = arith.mulf %97, %105 : vector<8x8xf32>
    %cst_33 = arith.constant dense<0.000000e+00> : vector<8x8xf32>
    %107 = tpu.matmul %106, %66, %cst_33 {dimension_numbers = #tpu.dot_dimension_numbers<[1], [0], [0], [1], [0, 0, 1, 1], [], []>} : vector<8x8xf32>, vector<8x8xf32>, vector<8x8xf32> -> vector<8x8xf32>
    %cst_34 = arith.constant 0.000000e+00 : f32
    %108 = vector.shape_cast %84 : vector<8x1xi1> to vector<8x1xi1>
    %109 = vector.broadcast %108 : vector<8x1xi1> to vector<8x8xi1>
    %110 = vector.broadcast %cst_34 : f32 to vector<8x8xf32>
    %111 = arith.select %109, %107, %110 : vector<8x8xi1>, vector<8x8xf32>
    %112 = vector.extract_strided_slice %8 {offsets = [0, 16], sizes = [8, 8], strides = [1, 1]} : vector<8x32xf32> to vector<8x8xf32>
    %113 = vector.extract_strided_slice %13 {offsets = [0, 16], sizes = [8, 8], strides = [1, 1]} : vector<8x64xf32> to vector<8x8xf32>
    %114 = vector.extract_strided_slice %13 {offsets = [0, 48], sizes = [8, 8], strides = [1, 1]} : vector<8x64xf32> to vector<8x8xf32>
    %115 = arith.mulf %112, %112 : vector<8x8xf32>
    %cst_35 = arith.constant dense<0.000000e+00> : vector<8xf32>
    %116 = vector.multi_reduction <add>, %115, %cst_35 [1] : vector<8x8xf32> to vector<8xf32>
    %117 = vector.shape_cast %116 : vector<8xf32> to vector<8x1xf32>
    %118 = vector.shape_cast %117 : vector<8x1xf32> to vector<1x8xf32>
    %119 = vector.broadcast %118 : vector<1x8xf32> to vector<8x8xf32>
    %120 = vector.broadcast %117 : vector<8x1xf32> to vector<8x8xf32>
    %121 = arith.cmpf ogt, %119, %120 : vector<8x8xf32>
    %122 = vector.broadcast %118 : vector<1x8xf32> to vector<8x8xf32>
    %123 = vector.broadcast %117 : vector<8x1xf32> to vector<8x8xf32>
    %124 = arith.cmpf oeq, %122, %123 : vector<8x8xf32>
    %125 = arith.cmpi slt, %15, %14 : vector<8x8xi32>
    %126 = arith.andi %124, %125 : vector<8x8xi1>
    %127 = arith.ori %121, %126 : vector<8x8xi1>
    %128 = arith.extui %127 : vector<8x8xi1> to vector<8x8xi32>
    %cst_36 = arith.constant dense<0> : vector<8xi32>
    %129 = vector.multi_reduction <add>, %128, %cst_36 [1] : vector<8x8xi32> to vector<8xi32>
    %130 = vector.shape_cast %129 : vector<8xi32> to vector<8x1xi32>
    %c4_i32_37 = arith.constant 4 : i32
    %131 = vector.broadcast %c4_i32_37 : i32 to vector<8x1xi32>
    %132 = arith.cmpi slt, %130, %131 : vector<8x1xi32>
    %133 = vector.shape_cast %130 : vector<8x1xi32> to vector<1x8xi32>
    %c4_i32_38 = arith.constant 4 : i32
    %134 = vector.broadcast %c4_i32_38 : i32 to vector<1x8xi32>
    %135 = arith.cmpi slt, %133, %134 : vector<1x8xi32>
    %cst_39 = arith.constant dense<0.000000e+00> : vector<8x8xf32>
    %136 = tpu.matmul %112, %113, %cst_39 {dimension_numbers = #tpu.dot_dimension_numbers<[1], [1], [0], [0], [0, 0, 1, 0], [], []>} : vector<8x8xf32>, vector<8x8xf32>, vector<8x8xf32> -> vector<8x8xf32>
    %cst_40 = arith.constant -1.000000e+30 : f32
    %137 = vector.shape_cast %135 : vector<1x8xi1> to vector<1x8xi1>
    %138 = vector.broadcast %137 : vector<1x8xi1> to vector<8x8xi1>
    %139 = vector.broadcast %cst_40 : f32 to vector<8x8xf32>
    %140 = arith.select %138, %136, %139 : vector<8x8xi1>, vector<8x8xf32>
    %cst_41 = arith.constant dense<0xFF800000> : vector<8xf32>
    %141 = vector.multi_reduction <maximumf>, %140, %cst_41 [1] : vector<8x8xf32> to vector<8xf32>
    %142 = vector.shape_cast %141 : vector<8xf32> to vector<8x1xf32>
    %143 = vector.broadcast %142 : vector<8x1xf32> to vector<8x8xf32>
    %144 = arith.subf %140, %143 : vector<8x8xf32>
    %145 = math.exp %144 : vector<8x8xf32>
    %cst_42 = arith.constant dense<0.000000e+00> : vector<8xf32>
    %146 = vector.multi_reduction <add>, %145, %cst_42 [1] : vector<8x8xf32> to vector<8xf32>
    %147 = vector.shape_cast %146 : vector<8xf32> to vector<8x1xf32>
    %148 = tpu.reciprocal %147 {approx = true} : vector<8x1xf32> -> vector<8x1xf32>
    %149 = arith.mulf %147, %148 : vector<8x1xf32>
    %cst_43 = arith.constant 2.000000e+00 : f32
    %150 = vector.broadcast %cst_43 : f32 to vector<8x1xf32>
    %151 = arith.subf %150, %149 : vector<8x1xf32>
    %152 = arith.mulf %148, %151 : vector<8x1xf32>
    %153 = vector.broadcast %152 : vector<8x1xf32> to vector<8x8xf32>
    %154 = arith.mulf %145, %153 : vector<8x8xf32>
    %cst_44 = arith.constant dense<0.000000e+00> : vector<8x8xf32>
    %155 = tpu.matmul %154, %114, %cst_44 {dimension_numbers = #tpu.dot_dimension_numbers<[1], [0], [0], [1], [0, 0, 1, 1], [], []>} : vector<8x8xf32>, vector<8x8xf32>, vector<8x8xf32> -> vector<8x8xf32>
    %cst_45 = arith.constant 0.000000e+00 : f32
    %156 = vector.shape_cast %132 : vector<8x1xi1> to vector<8x1xi1>
    %157 = vector.broadcast %156 : vector<8x1xi1> to vector<8x8xi1>
    %158 = vector.broadcast %cst_45 : f32 to vector<8x8xf32>
    %159 = arith.select %157, %155, %158 : vector<8x8xi1>, vector<8x8xf32>
    %160 = vector.extract_strided_slice %8 {offsets = [0, 24], sizes = [8, 8], strides = [1, 1]} : vector<8x32xf32> to vector<8x8xf32>
    %161 = vector.extract_strided_slice %13 {offsets = [0, 24], sizes = [8, 8], strides = [1, 1]} : vector<8x64xf32> to vector<8x8xf32>
    %162 = vector.extract_strided_slice %13 {offsets = [0, 56], sizes = [8, 8], strides = [1, 1]} : vector<8x64xf32> to vector<8x8xf32>
    %163 = arith.mulf %160, %160 : vector<8x8xf32>
    %cst_46 = arith.constant dense<0.000000e+00> : vector<8xf32>
    %164 = vector.multi_reduction <add>, %163, %cst_46 [1] : vector<8x8xf32> to vector<8xf32>
    %165 = vector.shape_cast %164 : vector<8xf32> to vector<8x1xf32>
    %166 = vector.shape_cast %165 : vector<8x1xf32> to vector<1x8xf32>
    %167 = vector.broadcast %166 : vector<1x8xf32> to vector<8x8xf32>
    %168 = vector.broadcast %165 : vector<8x1xf32> to vector<8x8xf32>
    %169 = arith.cmpf ogt, %167, %168 : vector<8x8xf32>
    %170 = vector.broadcast %166 : vector<1x8xf32> to vector<8x8xf32>
    %171 = vector.broadcast %165 : vector<8x1xf32> to vector<8x8xf32>
    %172 = arith.cmpf oeq, %170, %171 : vector<8x8xf32>
    %173 = arith.cmpi slt, %15, %14 : vector<8x8xi32>
    %174 = arith.andi %172, %173 : vector<8x8xi1>
    %175 = arith.ori %169, %174 : vector<8x8xi1>
    %176 = arith.extui %175 : vector<8x8xi1> to vector<8x8xi32>
    %cst_47 = arith.constant dense<0> : vector<8xi32>
    %177 = vector.multi_reduction <add>, %176, %cst_47 [1] : vector<8x8xi32> to vector<8xi32>
    %178 = vector.shape_cast %177 : vector<8xi32> to vector<8x1xi32>
    %c4_i32_48 = arith.constant 4 : i32
    %179 = vector.broadcast %c4_i32_48 : i32 to vector<8x1xi32>
    %180 = arith.cmpi slt, %178, %179 : vector<8x1xi32>
    %181 = vector.shape_cast %178 : vector<8x1xi32> to vector<1x8xi32>
    %c4_i32_49 = arith.constant 4 : i32
    %182 = vector.broadcast %c4_i32_49 : i32 to vector<1x8xi32>
    %183 = arith.cmpi slt, %181, %182 : vector<1x8xi32>
    %cst_50 = arith.constant dense<0.000000e+00> : vector<8x8xf32>
    %184 = tpu.matmul %160, %161, %cst_50 {dimension_numbers = #tpu.dot_dimension_numbers<[1], [1], [0], [0], [0, 0, 1, 0], [], []>} : vector<8x8xf32>, vector<8x8xf32>, vector<8x8xf32> -> vector<8x8xf32>
    %cst_51 = arith.constant -1.000000e+30 : f32
    %185 = vector.shape_cast %183 : vector<1x8xi1> to vector<1x8xi1>
    %186 = vector.broadcast %185 : vector<1x8xi1> to vector<8x8xi1>
    %187 = vector.broadcast %cst_51 : f32 to vector<8x8xf32>
    %188 = arith.select %186, %184, %187 : vector<8x8xi1>, vector<8x8xf32>
    %cst_52 = arith.constant dense<0xFF800000> : vector<8xf32>
    %189 = vector.multi_reduction <maximumf>, %188, %cst_52 [1] : vector<8x8xf32> to vector<8xf32>
    %190 = vector.shape_cast %189 : vector<8xf32> to vector<8x1xf32>
    %191 = vector.broadcast %190 : vector<8x1xf32> to vector<8x8xf32>
    %192 = arith.subf %188, %191 : vector<8x8xf32>
    %193 = math.exp %192 : vector<8x8xf32>
    %cst_53 = arith.constant dense<0.000000e+00> : vector<8xf32>
    %194 = vector.multi_reduction <add>, %193, %cst_53 [1] : vector<8x8xf32> to vector<8xf32>
    %195 = vector.shape_cast %194 : vector<8xf32> to vector<8x1xf32>
    %196 = tpu.reciprocal %195 {approx = true} : vector<8x1xf32> -> vector<8x1xf32>
    %197 = arith.mulf %195, %196 : vector<8x1xf32>
    %cst_54 = arith.constant 2.000000e+00 : f32
    %198 = vector.broadcast %cst_54 : f32 to vector<8x1xf32>
    %199 = arith.subf %198, %197 : vector<8x1xf32>
    %200 = arith.mulf %196, %199 : vector<8x1xf32>
    %201 = vector.broadcast %200 : vector<8x1xf32> to vector<8x8xf32>
    %202 = arith.mulf %193, %201 : vector<8x8xf32>
    %cst_55 = arith.constant dense<0.000000e+00> : vector<8x8xf32>
    %203 = tpu.matmul %202, %162, %cst_55 {dimension_numbers = #tpu.dot_dimension_numbers<[1], [0], [0], [1], [0, 0, 1, 1], [], []>} : vector<8x8xf32>, vector<8x8xf32>, vector<8x8xf32> -> vector<8x8xf32>
    %cst_56 = arith.constant 0.000000e+00 : f32
    %204 = vector.shape_cast %180 : vector<8x1xi1> to vector<8x1xi1>
    %205 = vector.broadcast %204 : vector<8x1xi1> to vector<8x8xi1>
    %206 = vector.broadcast %cst_56 : f32 to vector<8x8xf32>
    %207 = arith.select %205, %203, %206 : vector<8x8xi1>, vector<8x8xf32>
    %208 = tpu.concatenate %63, %111, %159, %207 in 1 : vector<8x8xf32>, vector<8x8xf32>, vector<8x8xf32>, vector<8x8xf32> -> vector<8x32xf32>
    %c0_57 = arith.constant 0 : index
    %c0_58 = arith.constant 0 : index
    %209 = vector.load %arg7[%c0_57, %c0_58] : memref<32x32xf32, #tpu.memory_space<vmem>>, vector<32x32xf32>
    %cst_59 = arith.constant dense<0.000000e+00> : vector<8x32xf32>
    %210 = tpu.matmul %208, %209, %cst_59 {dimension_numbers = #tpu.dot_dimension_numbers<[1], [0], [0], [1], [0, 0, 1, 1], [], []>} : vector<8x32xf32>, vector<32x32xf32>, vector<8x32xf32> -> vector<8x32xf32>
    %c0_60 = arith.constant 0 : index
    %c0_61 = arith.constant 0 : index
    %211 = vector.load %arg8[%c0_60, %c0_61] : memref<1x32xf32, #tpu.memory_space<vmem>>, vector<1x32xf32>
    %212 = vector.broadcast %211 : vector<1x32xf32> to vector<8x32xf32>
    %213 = arith.addf %210, %212 : vector<8x32xf32>
    %214 = arith.addf %1, %213 : vector<8x32xf32>
    %cst_62 = arith.constant dense<0.000000e+00> : vector<8xf32>
    %215 = vector.multi_reduction <add>, %214, %cst_62 [1] : vector<8x32xf32> to vector<8xf32>
    %216 = vector.shape_cast %215 : vector<8xf32> to vector<8x1xf32>
    %cst_63 = arith.constant 3.200000e+01 : f32
    %217 = vector.broadcast %cst_63 : f32 to vector<8x1xf32>
    %218 = arith.divf %216, %217 : vector<8x1xf32>
    %219 = vector.broadcast %218 : vector<8x1xf32> to vector<8x32xf32>
    %220 = arith.subf %214, %219 : vector<8x32xf32>
    %221 = arith.mulf %220, %220 : vector<8x32xf32>
    %cst_64 = arith.constant dense<0.000000e+00> : vector<8xf32>
    %222 = vector.multi_reduction <add>, %221, %cst_64 [1] : vector<8x32xf32> to vector<8xf32>
    %223 = vector.shape_cast %222 : vector<8xf32> to vector<8x1xf32>
    %cst_65 = arith.constant 3.200000e+01 : f32
    %224 = vector.broadcast %cst_65 : f32 to vector<8x1xf32>
    %225 = arith.divf %223, %224 : vector<8x1xf32>
    %cst_66 = arith.constant 9.99999974E-6 : f32
    %226 = vector.broadcast %cst_66 : f32 to vector<8x1xf32>
    %227 = arith.addf %225, %226 : vector<8x1xf32>
    %228 = math.rsqrt %227 : vector<8x1xf32>
    %229 = vector.broadcast %228 : vector<8x1xf32> to vector<8x32xf32>
    %230 = arith.mulf %220, %229 : vector<8x32xf32>
    %c0_67 = arith.constant 0 : index
    %c0_68 = arith.constant 0 : index
    %231 = vector.load %arg9[%c0_67, %c0_68] : memref<1x32xf32, #tpu.memory_space<vmem>>, vector<1x32xf32>
    %232 = vector.broadcast %231 : vector<1x32xf32> to vector<8x32xf32>
    %233 = arith.mulf %230, %232 : vector<8x32xf32>
    %c0_69 = arith.constant 0 : index
    %c0_70 = arith.constant 0 : index
    %234 = vector.load %arg10[%c0_69, %c0_70] : memref<1x32xf32, #tpu.memory_space<vmem>>, vector<1x32xf32>
    %235 = vector.broadcast %234 : vector<1x32xf32> to vector<8x32xf32>
    %236 = arith.addf %233, %235 : vector<8x32xf32>
    %c0_71 = arith.constant 0 : index
    %c0_72 = arith.constant 0 : index
    %c0_73 = arith.constant 0 : index
    %237 = vector.load %arg11[%c0_71, %c0_72, %c0_73] : memref<1x8x32xf32, #tpu.memory_space<vmem>>, vector<1x8x32xf32>
    %238 = vector.shape_cast %237 : vector<1x8x32xf32> to vector<8x32xf32>
    %239 = vector.shape_cast %236 : vector<8x32xf32> to vector<1x8x32xf32>
    tpu.vector_store %arg11[%c0_71, %c0_72, %c0_73], %239 {strides = array<i32>} : memref<1x8x32xf32, #tpu.memory_space<vmem>>, vector<1x8x32xf32>,
    return
  }
  func.func @transform_0(%arg0: i32) -> (i32, i32, i32) {
    %c0_i32 = arith.constant 0 : i32
    %c0_i32_0 = arith.constant 0 : i32
    %c0_i32_1 = arith.constant 0 : i32
    return %arg0, %c0_i32, %c0_i32_0 : i32, i32, i32
  }
  func.func @transform_1(%arg0: i32) -> (i32, i32, i32) {
    %c0_i32 = arith.constant 0 : i32
    %c0_i32_0 = arith.constant 0 : i32
    %c0_i32_1 = arith.constant 0 : i32
    return %arg0, %c0_i32, %c0_i32_0 : i32, i32, i32
  }
  func.func @transform_2(%arg0: i32) -> (i32, i32) {
    %c0_i32 = arith.constant 0 : i32
    %c0_i32_0 = arith.constant 0 : i32
    %c0_i32_1 = arith.constant 0 : i32
    return %c0_i32, %c0_i32_0 : i32, i32
  }
  func.func @transform_3(%arg0: i32) -> (i32, i32) {
    %c0_i32 = arith.constant 0 : i32
    %c0_i32_0 = arith.constant 0 : i32
    %c0_i32_1 = arith.constant 0 : i32
    return %c0_i32, %c0_i32_0 : i32, i32
  }
  func.func @transform_4(%arg0: i32) -> (i32, i32) {
    %c0_i32 = arith.constant 0 : i32
    %c0_i32_0 = arith.constant 0 : i32
    %c0_i32_1 = arith.constant 0 : i32
    return %c0_i32, %c0_i32_0 : i32, i32
  }
  func.func @transform_5(%arg0: i32) -> (i32, i32) {
    %c0_i32 = arith.constant 0 : i32
    %c0_i32_0 = arith.constant 0 : i32
    %c0_i32_1 = arith.constant 0 : i32
    return %c0_i32, %c0_i32_0 : i32, i32
  }
  func.func @transform_6(%arg0: i32) -> (i32, i32) {
    %c0_i32 = arith.constant 0 : i32
    %c0_i32_0 = arith.constant 0 : i32
    %c0_i32_1 = arith.constant 0 : i32
    return %c0_i32, %c0_i32_0 : i32, i32
  }
  func.func @transform_7(%arg0: i32) -> (i32, i32) {
    %c0_i32 = arith.constant 0 : i32
    %c0_i32_0 = arith.constant 0 : i32
    %c0_i32_1 = arith.constant 0 : i32
    return %c0_i32, %c0_i32_0 : i32, i32
  }
  func.func @transform_8(%arg0: i32) -> (i32, i32) {
    %c0_i32 = arith.constant 0 : i32
    %c0_i32_0 = arith.constant 0 : i32
    %c0_i32_1 = arith.constant 0 : i32
    return %c0_i32, %c0_i32_0 : i32, i32
  }
  func.func @transform_9(%arg0: i32) -> (i32, i32) {
    %c0_i32 = arith.constant 0 : i32
    %c0_i32_0 = arith.constant 0 : i32
    %c0_i32_1 = arith.constant 0 : i32
    return %c0_i32, %c0_i32_0 : i32, i32
  }
  func.func @transform_10(%arg0: i32) -> (i32, i32, i32) {
    %c0_i32 = arith.constant 0 : i32
    %c0_i32_0 = arith.constant 0 : i32
    %c0_i32_1 = arith.constant 0 : i32
    return %arg0, %c0_i32, %c0_i32_0 : i32, i32, i32
  }
}

module attributes {stable_mosaic.version = 11 : i64} {
  func.func @_attn_block_kernel(%arg0: i32, %arg1: memref<1x8x32xf32, #tpu.memory_space<vmem>>, %arg2: memref<32x32xf32, #tpu.memory_space<vmem>>, %arg3: memref<1x32xf32, #tpu.memory_space<vmem>>, %arg4: memref<32x64xf32, #tpu.memory_space<vmem>>, %arg5: memref<1x64xf32, #tpu.memory_space<vmem>>, %arg6: memref<32x32xf32, #tpu.memory_space<vmem>>, %arg7: memref<1x32xf32, #tpu.memory_space<vmem>>, %arg8: memref<1x32xf32, #tpu.memory_space<vmem>>, %arg9: memref<1x32xf32, #tpu.memory_space<vmem>>, %arg10: memref<1x8x32xf32, #tpu.memory_space<vmem>>) attributes {dimension_semantics = [#tpu.dimension_semantics<parallel>], iteration_bounds = array<i64: 2>, scalar_prefetch = 0 : i64, scratch_operands = 0 : i64, tpu.core_type = #tpu.core_type<tc>, window_params = [{transform_indices = @transform_0, window_bounds = array<i64: 1, 8, 32>}, {pipeline_mode = #tpu.pipeline_mode<synchronous>, transform_indices = @transform_1, window_bounds = array<i64: 32, 32>}, {pipeline_mode = #tpu.pipeline_mode<synchronous>, transform_indices = @transform_2, window_bounds = array<i64: 1, 32>}, {pipeline_mode = #tpu.pipeline_mode<synchronous>, transform_indices = @transform_3, window_bounds = array<i64: 32, 64>}, {pipeline_mode = #tpu.pipeline_mode<synchronous>, transform_indices = @transform_4, window_bounds = array<i64: 1, 64>}, {pipeline_mode = #tpu.pipeline_mode<synchronous>, transform_indices = @transform_5, window_bounds = array<i64: 32, 32>}, {pipeline_mode = #tpu.pipeline_mode<synchronous>, transform_indices = @transform_6, window_bounds = array<i64: 1, 32>}, {pipeline_mode = #tpu.pipeline_mode<synchronous>, transform_indices = @transform_7, window_bounds = array<i64: 1, 32>}, {pipeline_mode = #tpu.pipeline_mode<synchronous>, transform_indices = @transform_8, window_bounds = array<i64: 1, 32>}, {transform_indices = @transform_9, window_bounds = array<i64: 1, 8, 32>}]} {
    %c0 = arith.constant 0 : index
    %c0_0 = arith.constant 0 : index
    %c0_1 = arith.constant 0 : index
    %0 = vector.load %arg1[%c0, %c0_0, %c0_1] : memref<1x8x32xf32, #tpu.memory_space<vmem>>, vector<1x8x32xf32>
    %1 = vector.shape_cast %0 : vector<1x8x32xf32> to vector<8x32xf32>
    %c0_2 = arith.constant 0 : index
    %c0_3 = arith.constant 0 : index
    %2 = vector.load %arg2[%c0_2, %c0_3] : memref<32x32xf32, #tpu.memory_space<vmem>>, vector<32x32xf32>
    %cst = arith.constant dense<0.000000e+00> : vector<8x32xf32>
    %3 = tpu.matmul %1, %2, %cst {dimension_numbers = #tpu.dot_dimension_numbers<[1], [0], [0], [1], [0, 0, 1, 1], [], []>} : vector<8x32xf32>, vector<32x32xf32>, vector<8x32xf32> -> vector<8x32xf32>
    %c0_4 = arith.constant 0 : index
    %c0_5 = arith.constant 0 : index
    %4 = vector.load %arg3[%c0_4, %c0_5] : memref<1x32xf32, #tpu.memory_space<vmem>>, vector<1x32xf32>
    %5 = vector.broadcast %4 : vector<1x32xf32> to vector<8x32xf32>
    %6 = arith.addf %3, %5 : vector<8x32xf32>
    %c0_6 = arith.constant 0 : index
    %c0_7 = arith.constant 0 : index
    %7 = vector.load %arg4[%c0_6, %c0_7] : memref<32x64xf32, #tpu.memory_space<vmem>>, vector<32x64xf32>
    %cst_8 = arith.constant dense<0.000000e+00> : vector<8x64xf32>
    %8 = tpu.matmul %1, %7, %cst_8 {dimension_numbers = #tpu.dot_dimension_numbers<[1], [0], [0], [1], [0, 0, 1, 1], [], []>} : vector<8x32xf32>, vector<32x64xf32>, vector<8x64xf32> -> vector<8x64xf32>
    %c0_9 = arith.constant 0 : index
    %c0_10 = arith.constant 0 : index
    %9 = vector.load %arg5[%c0_9, %c0_10] : memref<1x64xf32, #tpu.memory_space<vmem>>, vector<1x64xf32>
    %10 = vector.broadcast %9 : vector<1x64xf32> to vector<8x64xf32>
    %11 = arith.addf %8, %10 : vector<8x64xf32>
    %12 = tpu.iota {dimensions = array<i32: 0>} : vector<8x8xi32>
    %13 = tpu.iota {dimensions = array<i32: 1>} : vector<8x8xi32>
    %14 = vector.extract_strided_slice %6 {offsets = [0, 0], sizes = [8, 8], strides = [1, 1]} : vector<8x32xf32> to vector<8x8xf32>
    %15 = vector.extract_strided_slice %11 {offsets = [0, 0], sizes = [8, 8], strides = [1, 1]} : vector<8x64xf32> to vector<8x8xf32>
    %16 = vector.extract_strided_slice %11 {offsets = [0, 32], sizes = [8, 8], strides = [1, 1]} : vector<8x64xf32> to vector<8x8xf32>
    %17 = arith.mulf %14, %14 : vector<8x8xf32>
    %cst_11 = arith.constant dense<0.000000e+00> : vector<8xf32>
    %18 = vector.multi_reduction <add>, %17, %cst_11 [1] : vector<8x8xf32> to vector<8xf32>
    %19 = vector.shape_cast %18 : vector<8xf32> to vector<8x1xf32>
    %20 = vector.shape_cast %19 : vector<8x1xf32> to vector<1x8xf32>
    %21 = vector.broadcast %20 : vector<1x8xf32> to vector<8x8xf32>
    %22 = vector.broadcast %19 : vector<8x1xf32> to vector<8x8xf32>
    %23 = arith.cmpf ogt, %21, %22 : vector<8x8xf32>
    %24 = vector.broadcast %20 : vector<1x8xf32> to vector<8x8xf32>
    %25 = vector.broadcast %19 : vector<8x1xf32> to vector<8x8xf32>
    %26 = arith.cmpf oeq, %24, %25 : vector<8x8xf32>
    %27 = arith.cmpi slt, %13, %12 : vector<8x8xi32>
    %28 = arith.andi %26, %27 : vector<8x8xi1>
    %29 = arith.ori %23, %28 : vector<8x8xi1>
    %30 = arith.extui %29 : vector<8x8xi1> to vector<8x8xi32>
    %cst_12 = arith.constant dense<0> : vector<8xi32>
    %31 = vector.multi_reduction <add>, %30, %cst_12 [1] : vector<8x8xi32> to vector<8xi32>
    %32 = vector.shape_cast %31 : vector<8xi32> to vector<8x1xi32>
    %c4_i32 = arith.constant 4 : i32
    %33 = vector.broadcast %c4_i32 : i32 to vector<8x1xi32>
    %34 = arith.cmpi slt, %32, %33 : vector<8x1xi32>
    %35 = vector.shape_cast %32 : vector<8x1xi32> to vector<1x8xi32>
    %c4_i32_13 = arith.constant 4 : i32
    %36 = vector.broadcast %c4_i32_13 : i32 to vector<1x8xi32>
    %37 = arith.cmpi slt, %35, %36 : vector<1x8xi32>
    %cst_14 = arith.constant dense<0.000000e+00> : vector<8x8xf32>
    %38 = tpu.matmul %14, %15, %cst_14 {dimension_numbers = #tpu.dot_dimension_numbers<[1], [1], [0], [0], [0, 0, 1, 0], [], []>} : vector<8x8xf32>, vector<8x8xf32>, vector<8x8xf32> -> vector<8x8xf32>
    %cst_15 = arith.constant -1.000000e+30 : f32
    %39 = vector.shape_cast %37 : vector<1x8xi1> to vector<1x8xi1>
    %40 = vector.broadcast %39 : vector<1x8xi1> to vector<8x8xi1>
    %41 = vector.broadcast %cst_15 : f32 to vector<8x8xf32>
    %42 = arith.select %40, %38, %41 : vector<8x8xi1>, vector<8x8xf32>
    %cst_16 = arith.constant dense<0xFF800000> : vector<8xf32>
    %43 = vector.multi_reduction <maximumf>, %42, %cst_16 [1] : vector<8x8xf32> to vector<8xf32>
    %44 = vector.shape_cast %43 : vector<8xf32> to vector<8x1xf32>
    %45 = vector.broadcast %44 : vector<8x1xf32> to vector<8x8xf32>
    %46 = arith.subf %42, %45 : vector<8x8xf32>
    %47 = math.exp %46 : vector<8x8xf32>
    %cst_17 = arith.constant dense<0.000000e+00> : vector<8xf32>
    %48 = vector.multi_reduction <add>, %47, %cst_17 [1] : vector<8x8xf32> to vector<8xf32>
    %49 = vector.shape_cast %48 : vector<8xf32> to vector<8x1xf32>
    %50 = tpu.reciprocal %49 {approx = true} : vector<8x1xf32> -> vector<8x1xf32>
    %51 = arith.mulf %49, %50 : vector<8x1xf32>
    %cst_18 = arith.constant 2.000000e+00 : f32
    %52 = vector.broadcast %cst_18 : f32 to vector<8x1xf32>
    %53 = arith.subf %52, %51 : vector<8x1xf32>
    %54 = arith.mulf %50, %53 : vector<8x1xf32>
    %55 = vector.broadcast %54 : vector<8x1xf32> to vector<8x8xf32>
    %56 = arith.mulf %47, %55 : vector<8x8xf32>
    %cst_19 = arith.constant dense<0.000000e+00> : vector<8x8xf32>
    %57 = tpu.matmul %56, %16, %cst_19 {dimension_numbers = #tpu.dot_dimension_numbers<[1], [0], [0], [1], [0, 0, 1, 1], [], []>} : vector<8x8xf32>, vector<8x8xf32>, vector<8x8xf32> -> vector<8x8xf32>
    %cst_20 = arith.constant 0.000000e+00 : f32
    %58 = vector.shape_cast %34 : vector<8x1xi1> to vector<8x1xi1>
    %59 = vector.broadcast %58 : vector<8x1xi1> to vector<8x8xi1>
    %60 = vector.broadcast %cst_20 : f32 to vector<8x8xf32>
    %61 = arith.select %59, %57, %60 : vector<8x8xi1>, vector<8x8xf32>
    %62 = vector.extract_strided_slice %6 {offsets = [0, 8], sizes = [8, 8], strides = [1, 1]} : vector<8x32xf32> to vector<8x8xf32>
    %63 = vector.extract_strided_slice %11 {offsets = [0, 8], sizes = [8, 8], strides = [1, 1]} : vector<8x64xf32> to vector<8x8xf32>
    %64 = vector.extract_strided_slice %11 {offsets = [0, 40], sizes = [8, 8], strides = [1, 1]} : vector<8x64xf32> to vector<8x8xf32>
    %65 = arith.mulf %62, %62 : vector<8x8xf32>
    %cst_21 = arith.constant dense<0.000000e+00> : vector<8xf32>
    %66 = vector.multi_reduction <add>, %65, %cst_21 [1] : vector<8x8xf32> to vector<8xf32>
    %67 = vector.shape_cast %66 : vector<8xf32> to vector<8x1xf32>
    %68 = vector.shape_cast %67 : vector<8x1xf32> to vector<1x8xf32>
    %69 = vector.broadcast %68 : vector<1x8xf32> to vector<8x8xf32>
    %70 = vector.broadcast %67 : vector<8x1xf32> to vector<8x8xf32>
    %71 = arith.cmpf ogt, %69, %70 : vector<8x8xf32>
    %72 = vector.broadcast %68 : vector<1x8xf32> to vector<8x8xf32>
    %73 = vector.broadcast %67 : vector<8x1xf32> to vector<8x8xf32>
    %74 = arith.cmpf oeq, %72, %73 : vector<8x8xf32>
    %75 = arith.cmpi slt, %13, %12 : vector<8x8xi32>
    %76 = arith.andi %74, %75 : vector<8x8xi1>
    %77 = arith.ori %71, %76 : vector<8x8xi1>
    %78 = arith.extui %77 : vector<8x8xi1> to vector<8x8xi32>
    %cst_22 = arith.constant dense<0> : vector<8xi32>
    %79 = vector.multi_reduction <add>, %78, %cst_22 [1] : vector<8x8xi32> to vector<8xi32>
    %80 = vector.shape_cast %79 : vector<8xi32> to vector<8x1xi32>
    %c4_i32_23 = arith.constant 4 : i32
    %81 = vector.broadcast %c4_i32_23 : i32 to vector<8x1xi32>
    %82 = arith.cmpi slt, %80, %81 : vector<8x1xi32>
    %83 = vector.shape_cast %80 : vector<8x1xi32> to vector<1x8xi32>
    %c4_i32_24 = arith.constant 4 : i32
    %84 = vector.broadcast %c4_i32_24 : i32 to vector<1x8xi32>
    %85 = arith.cmpi slt, %83, %84 : vector<1x8xi32>
    %cst_25 = arith.constant dense<0.000000e+00> : vector<8x8xf32>
    %86 = tpu.matmul %62, %63, %cst_25 {dimension_numbers = #tpu.dot_dimension_numbers<[1], [1], [0], [0], [0, 0, 1, 0], [], []>} : vector<8x8xf32>, vector<8x8xf32>, vector<8x8xf32> -> vector<8x8xf32>
    %cst_26 = arith.constant -1.000000e+30 : f32
    %87 = vector.shape_cast %85 : vector<1x8xi1> to vector<1x8xi1>
    %88 = vector.broadcast %87 : vector<1x8xi1> to vector<8x8xi1>
    %89 = vector.broadcast %cst_26 : f32 to vector<8x8xf32>
    %90 = arith.select %88, %86, %89 : vector<8x8xi1>, vector<8x8xf32>
    %cst_27 = arith.constant dense<0xFF800000> : vector<8xf32>
    %91 = vector.multi_reduction <maximumf>, %90, %cst_27 [1] : vector<8x8xf32> to vector<8xf32>
    %92 = vector.shape_cast %91 : vector<8xf32> to vector<8x1xf32>
    %93 = vector.broadcast %92 : vector<8x1xf32> to vector<8x8xf32>
    %94 = arith.subf %90, %93 : vector<8x8xf32>
    %95 = math.exp %94 : vector<8x8xf32>
    %cst_28 = arith.constant dense<0.000000e+00> : vector<8xf32>
    %96 = vector.multi_reduction <add>, %95, %cst_28 [1] : vector<8x8xf32> to vector<8xf32>
    %97 = vector.shape_cast %96 : vector<8xf32> to vector<8x1xf32>
    %98 = tpu.reciprocal %97 {approx = true} : vector<8x1xf32> -> vector<8x1xf32>
    %99 = arith.mulf %97, %98 : vector<8x1xf32>
    %cst_29 = arith.constant 2.000000e+00 : f32
    %100 = vector.broadcast %cst_29 : f32 to vector<8x1xf32>
    %101 = arith.subf %100, %99 : vector<8x1xf32>
    %102 = arith.mulf %98, %101 : vector<8x1xf32>
    %103 = vector.broadcast %102 : vector<8x1xf32> to vector<8x8xf32>
    %104 = arith.mulf %95, %103 : vector<8x8xf32>
    %cst_30 = arith.constant dense<0.000000e+00> : vector<8x8xf32>
    %105 = tpu.matmul %104, %64, %cst_30 {dimension_numbers = #tpu.dot_dimension_numbers<[1], [0], [0], [1], [0, 0, 1, 1], [], []>} : vector<8x8xf32>, vector<8x8xf32>, vector<8x8xf32> -> vector<8x8xf32>
    %cst_31 = arith.constant 0.000000e+00 : f32
    %106 = vector.shape_cast %82 : vector<8x1xi1> to vector<8x1xi1>
    %107 = vector.broadcast %106 : vector<8x1xi1> to vector<8x8xi1>
    %108 = vector.broadcast %cst_31 : f32 to vector<8x8xf32>
    %109 = arith.select %107, %105, %108 : vector<8x8xi1>, vector<8x8xf32>
    %110 = vector.extract_strided_slice %6 {offsets = [0, 16], sizes = [8, 8], strides = [1, 1]} : vector<8x32xf32> to vector<8x8xf32>
    %111 = vector.extract_strided_slice %11 {offsets = [0, 16], sizes = [8, 8], strides = [1, 1]} : vector<8x64xf32> to vector<8x8xf32>
    %112 = vector.extract_strided_slice %11 {offsets = [0, 48], sizes = [8, 8], strides = [1, 1]} : vector<8x64xf32> to vector<8x8xf32>
    %113 = arith.mulf %110, %110 : vector<8x8xf32>
    %cst_32 = arith.constant dense<0.000000e+00> : vector<8xf32>
    %114 = vector.multi_reduction <add>, %113, %cst_32 [1] : vector<8x8xf32> to vector<8xf32>
    %115 = vector.shape_cast %114 : vector<8xf32> to vector<8x1xf32>
    %116 = vector.shape_cast %115 : vector<8x1xf32> to vector<1x8xf32>
    %117 = vector.broadcast %116 : vector<1x8xf32> to vector<8x8xf32>
    %118 = vector.broadcast %115 : vector<8x1xf32> to vector<8x8xf32>
    %119 = arith.cmpf ogt, %117, %118 : vector<8x8xf32>
    %120 = vector.broadcast %116 : vector<1x8xf32> to vector<8x8xf32>
    %121 = vector.broadcast %115 : vector<8x1xf32> to vector<8x8xf32>
    %122 = arith.cmpf oeq, %120, %121 : vector<8x8xf32>
    %123 = arith.cmpi slt, %13, %12 : vector<8x8xi32>
    %124 = arith.andi %122, %123 : vector<8x8xi1>
    %125 = arith.ori %119, %124 : vector<8x8xi1>
    %126 = arith.extui %125 : vector<8x8xi1> to vector<8x8xi32>
    %cst_33 = arith.constant dense<0> : vector<8xi32>
    %127 = vector.multi_reduction <add>, %126, %cst_33 [1] : vector<8x8xi32> to vector<8xi32>
    %128 = vector.shape_cast %127 : vector<8xi32> to vector<8x1xi32>
    %c4_i32_34 = arith.constant 4 : i32
    %129 = vector.broadcast %c4_i32_34 : i32 to vector<8x1xi32>
    %130 = arith.cmpi slt, %128, %129 : vector<8x1xi32>
    %131 = vector.shape_cast %128 : vector<8x1xi32> to vector<1x8xi32>
    %c4_i32_35 = arith.constant 4 : i32
    %132 = vector.broadcast %c4_i32_35 : i32 to vector<1x8xi32>
    %133 = arith.cmpi slt, %131, %132 : vector<1x8xi32>
    %cst_36 = arith.constant dense<0.000000e+00> : vector<8x8xf32>
    %134 = tpu.matmul %110, %111, %cst_36 {dimension_numbers = #tpu.dot_dimension_numbers<[1], [1], [0], [0], [0, 0, 1, 0], [], []>} : vector<8x8xf32>, vector<8x8xf32>, vector<8x8xf32> -> vector<8x8xf32>
    %cst_37 = arith.constant -1.000000e+30 : f32
    %135 = vector.shape_cast %133 : vector<1x8xi1> to vector<1x8xi1>
    %136 = vector.broadcast %135 : vector<1x8xi1> to vector<8x8xi1>
    %137 = vector.broadcast %cst_37 : f32 to vector<8x8xf32>
    %138 = arith.select %136, %134, %137 : vector<8x8xi1>, vector<8x8xf32>
    %cst_38 = arith.constant dense<0xFF800000> : vector<8xf32>
    %139 = vector.multi_reduction <maximumf>, %138, %cst_38 [1] : vector<8x8xf32> to vector<8xf32>
    %140 = vector.shape_cast %139 : vector<8xf32> to vector<8x1xf32>
    %141 = vector.broadcast %140 : vector<8x1xf32> to vector<8x8xf32>
    %142 = arith.subf %138, %141 : vector<8x8xf32>
    %143 = math.exp %142 : vector<8x8xf32>
    %cst_39 = arith.constant dense<0.000000e+00> : vector<8xf32>
    %144 = vector.multi_reduction <add>, %143, %cst_39 [1] : vector<8x8xf32> to vector<8xf32>
    %145 = vector.shape_cast %144 : vector<8xf32> to vector<8x1xf32>
    %146 = tpu.reciprocal %145 {approx = true} : vector<8x1xf32> -> vector<8x1xf32>
    %147 = arith.mulf %145, %146 : vector<8x1xf32>
    %cst_40 = arith.constant 2.000000e+00 : f32
    %148 = vector.broadcast %cst_40 : f32 to vector<8x1xf32>
    %149 = arith.subf %148, %147 : vector<8x1xf32>
    %150 = arith.mulf %146, %149 : vector<8x1xf32>
    %151 = vector.broadcast %150 : vector<8x1xf32> to vector<8x8xf32>
    %152 = arith.mulf %143, %151 : vector<8x8xf32>
    %cst_41 = arith.constant dense<0.000000e+00> : vector<8x8xf32>
    %153 = tpu.matmul %152, %112, %cst_41 {dimension_numbers = #tpu.dot_dimension_numbers<[1], [0], [0], [1], [0, 0, 1, 1], [], []>} : vector<8x8xf32>, vector<8x8xf32>, vector<8x8xf32> -> vector<8x8xf32>
    %cst_42 = arith.constant 0.000000e+00 : f32
    %154 = vector.shape_cast %130 : vector<8x1xi1> to vector<8x1xi1>
    %155 = vector.broadcast %154 : vector<8x1xi1> to vector<8x8xi1>
    %156 = vector.broadcast %cst_42 : f32 to vector<8x8xf32>
    %157 = arith.select %155, %153, %156 : vector<8x8xi1>, vector<8x8xf32>
    %158 = vector.extract_strided_slice %6 {offsets = [0, 24], sizes = [8, 8], strides = [1, 1]} : vector<8x32xf32> to vector<8x8xf32>
    %159 = vector.extract_strided_slice %11 {offsets = [0, 24], sizes = [8, 8], strides = [1, 1]} : vector<8x64xf32> to vector<8x8xf32>
    %160 = vector.extract_strided_slice %11 {offsets = [0, 56], sizes = [8, 8], strides = [1, 1]} : vector<8x64xf32> to vector<8x8xf32>
    %161 = arith.mulf %158, %158 : vector<8x8xf32>
    %cst_43 = arith.constant dense<0.000000e+00> : vector<8xf32>
    %162 = vector.multi_reduction <add>, %161, %cst_43 [1] : vector<8x8xf32> to vector<8xf32>
    %163 = vector.shape_cast %162 : vector<8xf32> to vector<8x1xf32>
    %164 = vector.shape_cast %163 : vector<8x1xf32> to vector<1x8xf32>
    %165 = vector.broadcast %164 : vector<1x8xf32> to vector<8x8xf32>
    %166 = vector.broadcast %163 : vector<8x1xf32> to vector<8x8xf32>
    %167 = arith.cmpf ogt, %165, %166 : vector<8x8xf32>
    %168 = vector.broadcast %164 : vector<1x8xf32> to vector<8x8xf32>
    %169 = vector.broadcast %163 : vector<8x1xf32> to vector<8x8xf32>
    %170 = arith.cmpf oeq, %168, %169 : vector<8x8xf32>
    %171 = arith.cmpi slt, %13, %12 : vector<8x8xi32>
    %172 = arith.andi %170, %171 : vector<8x8xi1>
    %173 = arith.ori %167, %172 : vector<8x8xi1>
    %174 = arith.extui %173 : vector<8x8xi1> to vector<8x8xi32>
    %cst_44 = arith.constant dense<0> : vector<8xi32>
    %175 = vector.multi_reduction <add>, %174, %cst_44 [1] : vector<8x8xi32> to vector<8xi32>
    %176 = vector.shape_cast %175 : vector<8xi32> to vector<8x1xi32>
    %c4_i32_45 = arith.constant 4 : i32
    %177 = vector.broadcast %c4_i32_45 : i32 to vector<8x1xi32>
    %178 = arith.cmpi slt, %176, %177 : vector<8x1xi32>
    %179 = vector.shape_cast %176 : vector<8x1xi32> to vector<1x8xi32>
    %c4_i32_46 = arith.constant 4 : i32
    %180 = vector.broadcast %c4_i32_46 : i32 to vector<1x8xi32>
    %181 = arith.cmpi slt, %179, %180 : vector<1x8xi32>
    %cst_47 = arith.constant dense<0.000000e+00> : vector<8x8xf32>
    %182 = tpu.matmul %158, %159, %cst_47 {dimension_numbers = #tpu.dot_dimension_numbers<[1], [1], [0], [0], [0, 0, 1, 0], [], []>} : vector<8x8xf32>, vector<8x8xf32>, vector<8x8xf32> -> vector<8x8xf32>
    %cst_48 = arith.constant -1.000000e+30 : f32
    %183 = vector.shape_cast %181 : vector<1x8xi1> to vector<1x8xi1>
    %184 = vector.broadcast %183 : vector<1x8xi1> to vector<8x8xi1>
    %185 = vector.broadcast %cst_48 : f32 to vector<8x8xf32>
    %186 = arith.select %184, %182, %185 : vector<8x8xi1>, vector<8x8xf32>
    %cst_49 = arith.constant dense<0xFF800000> : vector<8xf32>
    %187 = vector.multi_reduction <maximumf>, %186, %cst_49 [1] : vector<8x8xf32> to vector<8xf32>
    %188 = vector.shape_cast %187 : vector<8xf32> to vector<8x1xf32>
    %189 = vector.broadcast %188 : vector<8x1xf32> to vector<8x8xf32>
    %190 = arith.subf %186, %189 : vector<8x8xf32>
    %191 = math.exp %190 : vector<8x8xf32>
    %cst_50 = arith.constant dense<0.000000e+00> : vector<8xf32>
    %192 = vector.multi_reduction <add>, %191, %cst_50 [1] : vector<8x8xf32> to vector<8xf32>
    %193 = vector.shape_cast %192 : vector<8xf32> to vector<8x1xf32>
    %194 = tpu.reciprocal %193 {approx = true} : vector<8x1xf32> -> vector<8x1xf32>
    %195 = arith.mulf %193, %194 : vector<8x1xf32>
    %cst_51 = arith.constant 2.000000e+00 : f32
    %196 = vector.broadcast %cst_51 : f32 to vector<8x1xf32>
    %197 = arith.subf %196, %195 : vector<8x1xf32>
    %198 = arith.mulf %194, %197 : vector<8x1xf32>
    %199 = vector.broadcast %198 : vector<8x1xf32> to vector<8x8xf32>
    %200 = arith.mulf %191, %199 : vector<8x8xf32>
    %cst_52 = arith.constant dense<0.000000e+00> : vector<8x8xf32>
    %201 = tpu.matmul %200, %160, %cst_52 {dimension_numbers = #tpu.dot_dimension_numbers<[1], [0], [0], [1], [0, 0, 1, 1], [], []>} : vector<8x8xf32>, vector<8x8xf32>, vector<8x8xf32> -> vector<8x8xf32>
    %cst_53 = arith.constant 0.000000e+00 : f32
    %202 = vector.shape_cast %178 : vector<8x1xi1> to vector<8x1xi1>
    %203 = vector.broadcast %202 : vector<8x1xi1> to vector<8x8xi1>
    %204 = vector.broadcast %cst_53 : f32 to vector<8x8xf32>
    %205 = arith.select %203, %201, %204 : vector<8x8xi1>, vector<8x8xf32>
    %206 = tpu.concatenate %61, %109, %157, %205 in 1 : vector<8x8xf32>, vector<8x8xf32>, vector<8x8xf32>, vector<8x8xf32> -> vector<8x32xf32>
    %c0_54 = arith.constant 0 : index
    %c0_55 = arith.constant 0 : index
    %207 = vector.load %arg6[%c0_54, %c0_55] : memref<32x32xf32, #tpu.memory_space<vmem>>, vector<32x32xf32>
    %cst_56 = arith.constant dense<0.000000e+00> : vector<8x32xf32>
    %208 = tpu.matmul %206, %207, %cst_56 {dimension_numbers = #tpu.dot_dimension_numbers<[1], [0], [0], [1], [0, 0, 1, 1], [], []>} : vector<8x32xf32>, vector<32x32xf32>, vector<8x32xf32> -> vector<8x32xf32>
    %c0_57 = arith.constant 0 : index
    %c0_58 = arith.constant 0 : index
    %209 = vector.load %arg7[%c0_57, %c0_58] : memref<1x32xf32, #tpu.memory_space<vmem>>, vector<1x32xf32>
    %210 = vector.broadcast %209 : vector<1x32xf32> to vector<8x32xf32>
    %211 = arith.addf %208, %210 : vector<8x32xf32>
    %212 = arith.addf %1, %211 : vector<8x32xf32>
    %cst_59 = arith.constant dense<0.000000e+00> : vector<8xf32>
    %213 = vector.multi_reduction <add>, %212, %cst_59 [1] : vector<8x32xf32> to vector<8xf32>
    %214 = vector.shape_cast %213 : vector<8xf32> to vector<8x1xf32>
    %cst_60 = arith.constant 3.200000e+01 : f32
    %215 = vector.broadcast %cst_60 : f32 to vector<8x1xf32>
    %216 = arith.divf %214, %215 : vector<8x1xf32>
    %217 = vector.broadcast %216 : vector<8x1xf32> to vector<8x32xf32>
    %218 = arith.subf %212, %217 : vector<8x32xf32>
    %219 = arith.mulf %218, %218 : vector<8x32xf32>
    %cst_61 = arith.constant dense<0.000000e+00> : vector<8xf32>
    %220 = vector.multi_reduction <add>, %219, %cst_61 [1] : vector<8x32xf32> to vector<8xf32>
    %221 = vector.shape_cast %220 : vector<8xf32> to vector<8x1xf32>
    %cst_62 = arith.constant 3.200000e+01 : f32
    %222 = vector.broadcast %cst_62 : f32 to vector<8x1xf32>
    %223 = arith.divf %221, %222 : vector<8x1xf32>
    %cst_63 = arith.constant 9.99999974E-6 : f32
    %224 = vector.broadcast %cst_63 : f32 to vector<8x1xf32>
    %225 = arith.addf %223, %224 : vector<8x1xf32>
    %226 = math.rsqrt %225 : vector<8x1xf32>
    %227 = vector.broadcast %226 : vector<8x1xf32> to vector<8x32xf32>
    %228 = arith.mulf %218, %227 : vector<8x32xf32>
    %c0_64 = arith.constant 0 : index
    %c0_65 = arith.constant 0 : index
    %229 = vector.load %arg8[%c0_64, %c0_65] : memref<1x32xf32, #tpu.memory_space<vmem>>, vector<1x32xf32>
    %230 = vector.broadcast %229 : vector<1x32xf32> to vector<8x32xf32>
    %231 = arith.mulf %228, %230 : vector<8x32xf32>
    %c0_66 = arith.constant 0 : index
    %c0_67 = arith.constant 0 : index
    %232 = vector.load %arg9[%c0_66, %c0_67] : memref<1x32xf32, #tpu.memory_space<vmem>>, vector<1x32xf32>
    %233 = vector.broadcast %232 : vector<1x32xf32> to vector<8x32xf32>
    %234 = arith.addf %231, %233 : vector<8x32xf32>
    %c0_68 = arith.constant 0 : index
    %c0_69 = arith.constant 0 : index
    %c0_70 = arith.constant 0 : index
    %235 = vector.load %arg10[%c0_68, %c0_69, %c0_70] : memref<1x8x32xf32, #tpu.memory_space<vmem>>, vector<1x8x32xf32>
    %236 = vector.shape_cast %235 : vector<1x8x32xf32> to vector<8x32xf32>
    %237 = vector.shape_cast %234 : vector<8x32xf32> to vector<1x8x32xf32>
    tpu.vector_store %arg10[%c0_68, %c0_69, %c0_70], %237 {strides = array<i32>} : memref<1x8x32xf32, #tpu.memory_space<vmem>>, vector<1x8x32xf32>,
    return
  }
  func.func @transform_0(%arg0: i32) -> (i32, i32, i32) {
    %c0_i32 = arith.constant 0 : i32
    %c0_i32_0 = arith.constant 0 : i32
    %c0_i32_1 = arith.constant 0 : i32
    return %arg0, %c0_i32, %c0_i32_0 : i32, i32, i32
  }
  func.func @transform_1(%arg0: i32) -> (i32, i32) {
    %c0_i32 = arith.constant 0 : i32
    %c0_i32_0 = arith.constant 0 : i32
    %c0_i32_1 = arith.constant 0 : i32
    return %c0_i32, %c0_i32_0 : i32, i32
  }
  func.func @transform_2(%arg0: i32) -> (i32, i32) {
    %c0_i32 = arith.constant 0 : i32
    %c0_i32_0 = arith.constant 0 : i32
    %c0_i32_1 = arith.constant 0 : i32
    return %c0_i32, %c0_i32_0 : i32, i32
  }
  func.func @transform_3(%arg0: i32) -> (i32, i32) {
    %c0_i32 = arith.constant 0 : i32
    %c0_i32_0 = arith.constant 0 : i32
    %c0_i32_1 = arith.constant 0 : i32
    return %c0_i32, %c0_i32_0 : i32, i32
  }
  func.func @transform_4(%arg0: i32) -> (i32, i32) {
    %c0_i32 = arith.constant 0 : i32
    %c0_i32_0 = arith.constant 0 : i32
    %c0_i32_1 = arith.constant 0 : i32
    return %c0_i32, %c0_i32_0 : i32, i32
  }
  func.func @transform_5(%arg0: i32) -> (i32, i32) {
    %c0_i32 = arith.constant 0 : i32
    %c0_i32_0 = arith.constant 0 : i32
    %c0_i32_1 = arith.constant 0 : i32
    return %c0_i32, %c0_i32_0 : i32, i32
  }
  func.func @transform_6(%arg0: i32) -> (i32, i32) {
    %c0_i32 = arith.constant 0 : i32
    %c0_i32_0 = arith.constant 0 : i32
    %c0_i32_1 = arith.constant 0 : i32
    return %c0_i32, %c0_i32_0 : i32, i32
  }
  func.func @transform_7(%arg0: i32) -> (i32, i32) {
    %c0_i32 = arith.constant 0 : i32
    %c0_i32_0 = arith.constant 0 : i32
    %c0_i32_1 = arith.constant 0 : i32
    return %c0_i32, %c0_i32_0 : i32, i32
  }
  func.func @transform_8(%arg0: i32) -> (i32, i32) {
    %c0_i32 = arith.constant 0 : i32
    %c0_i32_0 = arith.constant 0 : i32
    %c0_i32_1 = arith.constant 0 : i32
    return %c0_i32, %c0_i32_0 : i32, i32
  }
  func.func @transform_9(%arg0: i32) -> (i32, i32, i32) {
    %c0_i32 = arith.constant 0 : i32
    %c0_i32_0 = arith.constant 0 : i32
    %c0_i32_1 = arith.constant 0 : i32
    return %arg0, %c0_i32, %c0_i32_0 : i32, i32, i32
  }
}

module attributes {stable_mosaic.version = 11 : i64} {
  func.func @_attn_block_kernel(%arg0: i32, %arg1: memref<1x8x32xf32, #tpu.memory_space<vmem>>, %arg2: memref<32x32xf32, #tpu.memory_space<vmem>>, %arg3: memref<1x32xf32, #tpu.memory_space<vmem>>, %arg4: memref<32x64xf32, #tpu.memory_space<vmem>>, %arg5: memref<1x64xf32, #tpu.memory_space<vmem>>, %arg6: memref<32x32xf32, #tpu.memory_space<vmem>>, %arg7: memref<1x32xf32, #tpu.memory_space<vmem>>, %arg8: memref<1x32xf32, #tpu.memory_space<vmem>>, %arg9: memref<1x32xf32, #tpu.memory_space<vmem>>, %arg10: memref<1x8x32xf32, #tpu.memory_space<vmem>>) attributes {dimension_semantics = [#tpu.dimension_semantics<parallel>], iteration_bounds = array<i64: 2>, scalar_prefetch = 0 : i64, scratch_operands = 0 : i64, tpu.core_type = #tpu.core_type<tc>, window_params = [{transform_indices = @transform_0, window_bounds = array<i64: 1, 8, 32>}, {pipeline_mode = #tpu.pipeline_mode<synchronous>, transform_indices = @transform_1, window_bounds = array<i64: 32, 32>}, {pipeline_mode = #tpu.pipeline_mode<synchronous>, transform_indices = @transform_2, window_bounds = array<i64: 1, 32>}, {pipeline_mode = #tpu.pipeline_mode<synchronous>, transform_indices = @transform_3, window_bounds = array<i64: 32, 64>}, {pipeline_mode = #tpu.pipeline_mode<synchronous>, transform_indices = @transform_4, window_bounds = array<i64: 1, 64>}, {pipeline_mode = #tpu.pipeline_mode<synchronous>, transform_indices = @transform_5, window_bounds = array<i64: 32, 32>}, {pipeline_mode = #tpu.pipeline_mode<synchronous>, transform_indices = @transform_6, window_bounds = array<i64: 1, 32>}, {pipeline_mode = #tpu.pipeline_mode<synchronous>, transform_indices = @transform_7, window_bounds = array<i64: 1, 32>}, {pipeline_mode = #tpu.pipeline_mode<synchronous>, transform_indices = @transform_8, window_bounds = array<i64: 1, 32>}, {transform_indices = @transform_9, window_bounds = array<i64: 1, 8, 32>}]} {
    %c0 = arith.constant 0 : index
    %c0_0 = arith.constant 0 : index
    %c0_1 = arith.constant 0 : index
    %0 = vector.load %arg1[%c0, %c0_0, %c0_1] : memref<1x8x32xf32, #tpu.memory_space<vmem>>, vector<1x8x32xf32>
    %1 = vector.shape_cast %0 : vector<1x8x32xf32> to vector<8x32xf32>
    %c0_2 = arith.constant 0 : index
    %c0_3 = arith.constant 0 : index
    %2 = vector.load %arg2[%c0_2, %c0_3] : memref<32x32xf32, #tpu.memory_space<vmem>>, vector<32x32xf32>
    %cst = arith.constant dense<0.000000e+00> : vector<8x32xf32>
    %3 = tpu.matmul %1, %2, %cst {dimension_numbers = #tpu.dot_dimension_numbers<[1], [0], [0], [1], [0, 0, 1, 1], [], []>} : vector<8x32xf32>, vector<32x32xf32>, vector<8x32xf32> -> vector<8x32xf32>
    %c0_4 = arith.constant 0 : index
    %c0_5 = arith.constant 0 : index
    %4 = vector.load %arg3[%c0_4, %c0_5] : memref<1x32xf32, #tpu.memory_space<vmem>>, vector<1x32xf32>
    %5 = vector.broadcast %4 : vector<1x32xf32> to vector<8x32xf32>
    %6 = arith.addf %3, %5 : vector<8x32xf32>
    %c0_6 = arith.constant 0 : index
    %c0_7 = arith.constant 0 : index
    %7 = vector.load %arg4[%c0_6, %c0_7] : memref<32x64xf32, #tpu.memory_space<vmem>>, vector<32x64xf32>
    %cst_8 = arith.constant dense<0.000000e+00> : vector<8x64xf32>
    %8 = tpu.matmul %1, %7, %cst_8 {dimension_numbers = #tpu.dot_dimension_numbers<[1], [0], [0], [1], [0, 0, 1, 1], [], []>} : vector<8x32xf32>, vector<32x64xf32>, vector<8x64xf32> -> vector<8x64xf32>
    %c0_9 = arith.constant 0 : index
    %c0_10 = arith.constant 0 : index
    %9 = vector.load %arg5[%c0_9, %c0_10] : memref<1x64xf32, #tpu.memory_space<vmem>>, vector<1x64xf32>
    %10 = vector.broadcast %9 : vector<1x64xf32> to vector<8x64xf32>
    %11 = arith.addf %8, %10 : vector<8x64xf32>
    %12 = tpu.iota {dimensions = array<i32: 0>} : vector<8x8xi32>
    %13 = tpu.iota {dimensions = array<i32: 1>} : vector<8x8xi32>
    %14 = vector.extract_strided_slice %6 {offsets = [0, 0], sizes = [8, 8], strides = [1, 1]} : vector<8x32xf32> to vector<8x8xf32>
    %15 = vector.extract_strided_slice %11 {offsets = [0, 0], sizes = [8, 8], strides = [1, 1]} : vector<8x64xf32> to vector<8x8xf32>
    %16 = vector.extract_strided_slice %11 {offsets = [0, 32], sizes = [8, 8], strides = [1, 1]} : vector<8x64xf32> to vector<8x8xf32>
    %17 = arith.mulf %14, %14 : vector<8x8xf32>
    %cst_11 = arith.constant dense<0.000000e+00> : vector<8xf32>
    %18 = vector.multi_reduction <add>, %17, %cst_11 [1] : vector<8x8xf32> to vector<8xf32>
    %19 = vector.shape_cast %18 : vector<8xf32> to vector<8x1xf32>
    %20 = vector.shape_cast %19 : vector<8x1xf32> to vector<1x8xf32>
    %21 = vector.broadcast %20 : vector<1x8xf32> to vector<8x8xf32>
    %22 = vector.broadcast %19 : vector<8x1xf32> to vector<8x8xf32>
    %23 = arith.cmpf ogt, %21, %22 : vector<8x8xf32>
    %24 = vector.broadcast %20 : vector<1x8xf32> to vector<8x8xf32>
    %25 = vector.broadcast %19 : vector<8x1xf32> to vector<8x8xf32>
    %26 = arith.cmpf oeq, %24, %25 : vector<8x8xf32>
    %27 = arith.cmpi slt, %13, %12 : vector<8x8xi32>
    %28 = arith.andi %26, %27 : vector<8x8xi1>
    %29 = arith.ori %23, %28 : vector<8x8xi1>
    %30 = arith.extui %29 : vector<8x8xi1> to vector<8x8xi32>
    %cst_12 = arith.constant dense<0> : vector<8xi32>
    %31 = vector.multi_reduction <add>, %30, %cst_12 [1] : vector<8x8xi32> to vector<8xi32>
    %32 = vector.shape_cast %31 : vector<8xi32> to vector<8x1xi32>
    %c4_i32 = arith.constant 4 : i32
    %33 = vector.broadcast %c4_i32 : i32 to vector<8x1xi32>
    %34 = arith.cmpi slt, %32, %33 : vector<8x1xi32>
    %35 = vector.shape_cast %32 : vector<8x1xi32> to vector<1x8xi32>
    %c4_i32_13 = arith.constant 4 : i32
    %36 = vector.broadcast %c4_i32_13 : i32 to vector<1x8xi32>
    %37 = arith.cmpi slt, %35, %36 : vector<1x8xi32>
    %cst_14 = arith.constant dense<0.000000e+00> : vector<8x8xf32>
    %38 = tpu.matmul %14, %15, %cst_14 {dimension_numbers = #tpu.dot_dimension_numbers<[1], [1], [0], [0], [0, 0, 1, 0], [], []>} : vector<8x8xf32>, vector<8x8xf32>, vector<8x8xf32> -> vector<8x8xf32>
    %cst_15 = arith.constant -1.000000e+30 : f32
    %39 = vector.shape_cast %37 : vector<1x8xi1> to vector<1x8xi1>
    %40 = vector.broadcast %39 : vector<1x8xi1> to vector<8x8xi1>
    %41 = vector.broadcast %cst_15 : f32 to vector<8x8xf32>
    %42 = arith.select %40, %38, %41 : vector<8x8xi1>, vector<8x8xf32>
    %cst_16 = arith.constant dense<0xFF800000> : vector<8xf32>
    %43 = vector.multi_reduction <maximumf>, %42, %cst_16 [1] : vector<8x8xf32> to vector<8xf32>
    %44 = vector.shape_cast %43 : vector<8xf32> to vector<8x1xf32>
    %45 = vector.broadcast %44 : vector<8x1xf32> to vector<8x8xf32>
    %46 = arith.subf %42, %45 : vector<8x8xf32>
    %47 = math.exp %46 : vector<8x8xf32>
    %cst_17 = arith.constant dense<0.000000e+00> : vector<8xf32>
    %48 = vector.multi_reduction <add>, %47, %cst_17 [1] : vector<8x8xf32> to vector<8xf32>
    %49 = vector.shape_cast %48 : vector<8xf32> to vector<8x1xf32>
    %50 = tpu.reciprocal %49 {approx = true} : vector<8x1xf32> -> vector<8x1xf32>
    %51 = arith.mulf %49, %50 : vector<8x1xf32>
    %cst_18 = arith.constant 2.000000e+00 : f32
    %52 = vector.broadcast %cst_18 : f32 to vector<8x1xf32>
    %53 = arith.subf %52, %51 : vector<8x1xf32>
    %54 = arith.mulf %50, %53 : vector<8x1xf32>
    %55 = vector.broadcast %54 : vector<8x1xf32> to vector<8x8xf32>
    %56 = arith.mulf %47, %55 : vector<8x8xf32>
    %cst_19 = arith.constant dense<0.000000e+00> : vector<8x8xf32>
    %57 = tpu.matmul %56, %16, %cst_19 {dimension_numbers = #tpu.dot_dimension_numbers<[1], [0], [0], [1], [0, 0, 1, 1], [], []>} : vector<8x8xf32>, vector<8x8xf32>, vector<8x8xf32> -> vector<8x8xf32>
    %cst_20 = arith.constant 0.000000e+00 : f32
    %58 = vector.shape_cast %34 : vector<8x1xi1> to vector<8x1xi1>
    %59 = vector.broadcast %58 : vector<8x1xi1> to vector<8x8xi1>
    %60 = vector.broadcast %cst_20 : f32 to vector<8x8xf32>
    %61 = arith.select %59, %57, %60 : vector<8x8xi1>, vector<8x8xf32>
    %62 = vector.extract_strided_slice %6 {offsets = [0, 8], sizes = [8, 8], strides = [1, 1]} : vector<8x32xf32> to vector<8x8xf32>
    %63 = vector.extract_strided_slice %11 {offsets = [0, 8], sizes = [8, 8], strides = [1, 1]} : vector<8x64xf32> to vector<8x8xf32>
    %64 = vector.extract_strided_slice %11 {offsets = [0, 40], sizes = [8, 8], strides = [1, 1]} : vector<8x64xf32> to vector<8x8xf32>
    %65 = arith.mulf %62, %62 : vector<8x8xf32>
    %cst_21 = arith.constant dense<0.000000e+00> : vector<8xf32>
    %66 = vector.multi_reduction <add>, %65, %cst_21 [1] : vector<8x8xf32> to vector<8xf32>
    %67 = vector.shape_cast %66 : vector<8xf32> to vector<8x1xf32>
    %68 = vector.shape_cast %67 : vector<8x1xf32> to vector<1x8xf32>
    %69 = vector.broadcast %68 : vector<1x8xf32> to vector<8x8xf32>
    %70 = vector.broadcast %67 : vector<8x1xf32> to vector<8x8xf32>
    %71 = arith.cmpf ogt, %69, %70 : vector<8x8xf32>
    %72 = vector.broadcast %68 : vector<1x8xf32> to vector<8x8xf32>
    %73 = vector.broadcast %67 : vector<8x1xf32> to vector<8x8xf32>
    %74 = arith.cmpf oeq, %72, %73 : vector<8x8xf32>
    %75 = arith.cmpi slt, %13, %12 : vector<8x8xi32>
    %76 = arith.andi %74, %75 : vector<8x8xi1>
    %77 = arith.ori %71, %76 : vector<8x8xi1>
    %78 = arith.extui %77 : vector<8x8xi1> to vector<8x8xi32>
    %cst_22 = arith.constant dense<0> : vector<8xi32>
    %79 = vector.multi_reduction <add>, %78, %cst_22 [1] : vector<8x8xi32> to vector<8xi32>
    %80 = vector.shape_cast %79 : vector<8xi32> to vector<8x1xi32>
    %c4_i32_23 = arith.constant 4 : i32
    %81 = vector.broadcast %c4_i32_23 : i32 to vector<8x1xi32>
    %82 = arith.cmpi slt, %80, %81 : vector<8x1xi32>
    %83 = vector.shape_cast %80 : vector<8x1xi32> to vector<1x8xi32>
    %c4_i32_24 = arith.constant 4 : i32
    %84 = vector.broadcast %c4_i32_24 : i32 to vector<1x8xi32>
    %85 = arith.cmpi slt, %83, %84 : vector<1x8xi32>
    %cst_25 = arith.constant dense<0.000000e+00> : vector<8x8xf32>
    %86 = tpu.matmul %62, %63, %cst_25 {dimension_numbers = #tpu.dot_dimension_numbers<[1], [1], [0], [0], [0, 0, 1, 0], [], []>} : vector<8x8xf32>, vector<8x8xf32>, vector<8x8xf32> -> vector<8x8xf32>
    %cst_26 = arith.constant -1.000000e+30 : f32
    %87 = vector.shape_cast %85 : vector<1x8xi1> to vector<1x8xi1>
    %88 = vector.broadcast %87 : vector<1x8xi1> to vector<8x8xi1>
    %89 = vector.broadcast %cst_26 : f32 to vector<8x8xf32>
    %90 = arith.select %88, %86, %89 : vector<8x8xi1>, vector<8x8xf32>
    %cst_27 = arith.constant dense<0xFF800000> : vector<8xf32>
    %91 = vector.multi_reduction <maximumf>, %90, %cst_27 [1] : vector<8x8xf32> to vector<8xf32>
    %92 = vector.shape_cast %91 : vector<8xf32> to vector<8x1xf32>
    %93 = vector.broadcast %92 : vector<8x1xf32> to vector<8x8xf32>
    %94 = arith.subf %90, %93 : vector<8x8xf32>
    %95 = math.exp %94 : vector<8x8xf32>
    %cst_28 = arith.constant dense<0.000000e+00> : vector<8xf32>
    %96 = vector.multi_reduction <add>, %95, %cst_28 [1] : vector<8x8xf32> to vector<8xf32>
    %97 = vector.shape_cast %96 : vector<8xf32> to vector<8x1xf32>
    %98 = tpu.reciprocal %97 {approx = true} : vector<8x1xf32> -> vector<8x1xf32>
    %99 = arith.mulf %97, %98 : vector<8x1xf32>
    %cst_29 = arith.constant 2.000000e+00 : f32
    %100 = vector.broadcast %cst_29 : f32 to vector<8x1xf32>
    %101 = arith.subf %100, %99 : vector<8x1xf32>
    %102 = arith.mulf %98, %101 : vector<8x1xf32>
    %103 = vector.broadcast %102 : vector<8x1xf32> to vector<8x8xf32>
    %104 = arith.mulf %95, %103 : vector<8x8xf32>
    %cst_30 = arith.constant dense<0.000000e+00> : vector<8x8xf32>
    %105 = tpu.matmul %104, %64, %cst_30 {dimension_numbers = #tpu.dot_dimension_numbers<[1], [0], [0], [1], [0, 0, 1, 1], [], []>} : vector<8x8xf32>, vector<8x8xf32>, vector<8x8xf32> -> vector<8x8xf32>
    %cst_31 = arith.constant 0.000000e+00 : f32
    %106 = vector.shape_cast %82 : vector<8x1xi1> to vector<8x1xi1>
    %107 = vector.broadcast %106 : vector<8x1xi1> to vector<8x8xi1>
    %108 = vector.broadcast %cst_31 : f32 to vector<8x8xf32>
    %109 = arith.select %107, %105, %108 : vector<8x8xi1>, vector<8x8xf32>
    %110 = vector.extract_strided_slice %6 {offsets = [0, 16], sizes = [8, 8], strides = [1, 1]} : vector<8x32xf32> to vector<8x8xf32>
    %111 = vector.extract_strided_slice %11 {offsets = [0, 16], sizes = [8, 8], strides = [1, 1]} : vector<8x64xf32> to vector<8x8xf32>
    %112 = vector.extract_strided_slice %11 {offsets = [0, 48], sizes = [8, 8], strides = [1, 1]} : vector<8x64xf32> to vector<8x8xf32>
    %113 = arith.mulf %110, %110 : vector<8x8xf32>
    %cst_32 = arith.constant dense<0.000000e+00> : vector<8xf32>
    %114 = vector.multi_reduction <add>, %113, %cst_32 [1] : vector<8x8xf32> to vector<8xf32>
    %115 = vector.shape_cast %114 : vector<8xf32> to vector<8x1xf32>
    %116 = vector.shape_cast %115 : vector<8x1xf32> to vector<1x8xf32>
    %117 = vector.broadcast %116 : vector<1x8xf32> to vector<8x8xf32>
    %118 = vector.broadcast %115 : vector<8x1xf32> to vector<8x8xf32>
    %119 = arith.cmpf ogt, %117, %118 : vector<8x8xf32>
    %120 = vector.broadcast %116 : vector<1x8xf32> to vector<8x8xf32>
    %121 = vector.broadcast %115 : vector<8x1xf32> to vector<8x8xf32>
    %122 = arith.cmpf oeq, %120, %121 : vector<8x8xf32>
    %123 = arith.cmpi slt, %13, %12 : vector<8x8xi32>
    %124 = arith.andi %122, %123 : vector<8x8xi1>
    %125 = arith.ori %119, %124 : vector<8x8xi1>
    %126 = arith.extui %125 : vector<8x8xi1> to vector<8x8xi32>
    %cst_33 = arith.constant dense<0> : vector<8xi32>
    %127 = vector.multi_reduction <add>, %126, %cst_33 [1] : vector<8x8xi32> to vector<8xi32>
    %128 = vector.shape_cast %127 : vector<8xi32> to vector<8x1xi32>
    %c4_i32_34 = arith.constant 4 : i32
    %129 = vector.broadcast %c4_i32_34 : i32 to vector<8x1xi32>
    %130 = arith.cmpi slt, %128, %129 : vector<8x1xi32>
    %131 = vector.shape_cast %128 : vector<8x1xi32> to vector<1x8xi32>
    %c4_i32_35 = arith.constant 4 : i32
    %132 = vector.broadcast %c4_i32_35 : i32 to vector<1x8xi32>
    %133 = arith.cmpi slt, %131, %132 : vector<1x8xi32>
    %cst_36 = arith.constant dense<0.000000e+00> : vector<8x8xf32>
    %134 = tpu.matmul %110, %111, %cst_36 {dimension_numbers = #tpu.dot_dimension_numbers<[1], [1], [0], [0], [0, 0, 1, 0], [], []>} : vector<8x8xf32>, vector<8x8xf32>, vector<8x8xf32> -> vector<8x8xf32>
    %cst_37 = arith.constant -1.000000e+30 : f32
    %135 = vector.shape_cast %133 : vector<1x8xi1> to vector<1x8xi1>
    %136 = vector.broadcast %135 : vector<1x8xi1> to vector<8x8xi1>
    %137 = vector.broadcast %cst_37 : f32 to vector<8x8xf32>
    %138 = arith.select %136, %134, %137 : vector<8x8xi1>, vector<8x8xf32>
    %cst_38 = arith.constant dense<0xFF800000> : vector<8xf32>
    %139 = vector.multi_reduction <maximumf>, %138, %cst_38 [1] : vector<8x8xf32> to vector<8xf32>
    %140 = vector.shape_cast %139 : vector<8xf32> to vector<8x1xf32>
    %141 = vector.broadcast %140 : vector<8x1xf32> to vector<8x8xf32>
    %142 = arith.subf %138, %141 : vector<8x8xf32>
    %143 = math.exp %142 : vector<8x8xf32>
    %cst_39 = arith.constant dense<0.000000e+00> : vector<8xf32>
    %144 = vector.multi_reduction <add>, %143, %cst_39 [1] : vector<8x8xf32> to vector<8xf32>
    %145 = vector.shape_cast %144 : vector<8xf32> to vector<8x1xf32>
    %146 = tpu.reciprocal %145 {approx = true} : vector<8x1xf32> -> vector<8x1xf32>
    %147 = arith.mulf %145, %146 : vector<8x1xf32>
    %cst_40 = arith.constant 2.000000e+00 : f32
    %148 = vector.broadcast %cst_40 : f32 to vector<8x1xf32>
    %149 = arith.subf %148, %147 : vector<8x1xf32>
    %150 = arith.mulf %146, %149 : vector<8x1xf32>
    %151 = vector.broadcast %150 : vector<8x1xf32> to vector<8x8xf32>
    %152 = arith.mulf %143, %151 : vector<8x8xf32>
    %cst_41 = arith.constant dense<0.000000e+00> : vector<8x8xf32>
    %153 = tpu.matmul %152, %112, %cst_41 {dimension_numbers = #tpu.dot_dimension_numbers<[1], [0], [0], [1], [0, 0, 1, 1], [], []>} : vector<8x8xf32>, vector<8x8xf32>, vector<8x8xf32> -> vector<8x8xf32>
    %cst_42 = arith.constant 0.000000e+00 : f32
    %154 = vector.shape_cast %130 : vector<8x1xi1> to vector<8x1xi1>
    %155 = vector.broadcast %154 : vector<8x1xi1> to vector<8x8xi1>
    %156 = vector.broadcast %cst_42 : f32 to vector<8x8xf32>
    %157 = arith.select %155, %153, %156 : vector<8x8xi1>, vector<8x8xf32>
    %158 = vector.extract_strided_slice %6 {offsets = [0, 24], sizes = [8, 8], strides = [1, 1]} : vector<8x32xf32> to vector<8x8xf32>
    %159 = vector.extract_strided_slice %11 {offsets = [0, 24], sizes = [8, 8], strides = [1, 1]} : vector<8x64xf32> to vector<8x8xf32>
    %160 = vector.extract_strided_slice %11 {offsets = [0, 56], sizes = [8, 8], strides = [1, 1]} : vector<8x64xf32> to vector<8x8xf32>
    %161 = arith.mulf %158, %158 : vector<8x8xf32>
    %cst_43 = arith.constant dense<0.000000e+00> : vector<8xf32>
    %162 = vector.multi_reduction <add>, %161, %cst_43 [1] : vector<8x8xf32> to vector<8xf32>
    %163 = vector.shape_cast %162 : vector<8xf32> to vector<8x1xf32>
    %164 = vector.shape_cast %163 : vector<8x1xf32> to vector<1x8xf32>
    %165 = vector.broadcast %164 : vector<1x8xf32> to vector<8x8xf32>
    %166 = vector.broadcast %163 : vector<8x1xf32> to vector<8x8xf32>
    %167 = arith.cmpf ogt, %165, %166 : vector<8x8xf32>
    %168 = vector.broadcast %164 : vector<1x8xf32> to vector<8x8xf32>
    %169 = vector.broadcast %163 : vector<8x1xf32> to vector<8x8xf32>
    %170 = arith.cmpf oeq, %168, %169 : vector<8x8xf32>
    %171 = arith.cmpi slt, %13, %12 : vector<8x8xi32>
    %172 = arith.andi %170, %171 : vector<8x8xi1>
    %173 = arith.ori %167, %172 : vector<8x8xi1>
    %174 = arith.extui %173 : vector<8x8xi1> to vector<8x8xi32>
    %cst_44 = arith.constant dense<0> : vector<8xi32>
    %175 = vector.multi_reduction <add>, %174, %cst_44 [1] : vector<8x8xi32> to vector<8xi32>
    %176 = vector.shape_cast %175 : vector<8xi32> to vector<8x1xi32>
    %c4_i32_45 = arith.constant 4 : i32
    %177 = vector.broadcast %c4_i32_45 : i32 to vector<8x1xi32>
    %178 = arith.cmpi slt, %176, %177 : vector<8x1xi32>
    %179 = vector.shape_cast %176 : vector<8x1xi32> to vector<1x8xi32>
    %c4_i32_46 = arith.constant 4 : i32
    %180 = vector.broadcast %c4_i32_46 : i32 to vector<1x8xi32>
    %181 = arith.cmpi slt, %179, %180 : vector<1x8xi32>
    %cst_47 = arith.constant dense<0.000000e+00> : vector<8x8xf32>
    %182 = tpu.matmul %158, %159, %cst_47 {dimension_numbers = #tpu.dot_dimension_numbers<[1], [1], [0], [0], [0, 0, 1, 0], [], []>} : vector<8x8xf32>, vector<8x8xf32>, vector<8x8xf32> -> vector<8x8xf32>
    %cst_48 = arith.constant -1.000000e+30 : f32
    %183 = vector.shape_cast %181 : vector<1x8xi1> to vector<1x8xi1>
    %184 = vector.broadcast %183 : vector<1x8xi1> to vector<8x8xi1>
    %185 = vector.broadcast %cst_48 : f32 to vector<8x8xf32>
    %186 = arith.select %184, %182, %185 : vector<8x8xi1>, vector<8x8xf32>
    %cst_49 = arith.constant dense<0xFF800000> : vector<8xf32>
    %187 = vector.multi_reduction <maximumf>, %186, %cst_49 [1] : vector<8x8xf32> to vector<8xf32>
    %188 = vector.shape_cast %187 : vector<8xf32> to vector<8x1xf32>
    %189 = vector.broadcast %188 : vector<8x1xf32> to vector<8x8xf32>
    %190 = arith.subf %186, %189 : vector<8x8xf32>
    %191 = math.exp %190 : vector<8x8xf32>
    %cst_50 = arith.constant dense<0.000000e+00> : vector<8xf32>
    %192 = vector.multi_reduction <add>, %191, %cst_50 [1] : vector<8x8xf32> to vector<8xf32>
    %193 = vector.shape_cast %192 : vector<8xf32> to vector<8x1xf32>
    %194 = tpu.reciprocal %193 {approx = true} : vector<8x1xf32> -> vector<8x1xf32>
    %195 = arith.mulf %193, %194 : vector<8x1xf32>
    %cst_51 = arith.constant 2.000000e+00 : f32
    %196 = vector.broadcast %cst_51 : f32 to vector<8x1xf32>
    %197 = arith.subf %196, %195 : vector<8x1xf32>
    %198 = arith.mulf %194, %197 : vector<8x1xf32>
    %199 = vector.broadcast %198 : vector<8x1xf32> to vector<8x8xf32>
    %200 = arith.mulf %191, %199 : vector<8x8xf32>
    %cst_52 = arith.constant dense<0.000000e+00> : vector<8x8xf32>
    %201 = tpu.matmul %200, %160, %cst_52 {dimension_numbers = #tpu.dot_dimension_numbers<[1], [0], [0], [1], [0, 0, 1, 1], [], []>} : vector<8x8xf32>, vector<8x8xf32>, vector<8x8xf32> -> vector<8x8xf32>
    %cst_53 = arith.constant 0.000000e+00 : f32
    %202 = vector.shape_cast %178 : vector<8x1xi1> to vector<8x1xi1>
    %203 = vector.broadcast %202 : vector<8x1xi1> to vector<8x8xi1>
    %204 = vector.broadcast %cst_53 : f32 to vector<8x8xf32>
    %205 = arith.select %203, %201, %204 : vector<8x8xi1>, vector<8x8xf32>
    %206 = tpu.concatenate %61, %109, %157, %205 in 1 : vector<8x8xf32>, vector<8x8xf32>, vector<8x8xf32>, vector<8x8xf32> -> vector<8x32xf32>
    %c0_54 = arith.constant 0 : index
    %c0_55 = arith.constant 0 : index
    %207 = vector.load %arg6[%c0_54, %c0_55] : memref<32x32xf32, #tpu.memory_space<vmem>>, vector<32x32xf32>
    %cst_56 = arith.constant dense<0.000000e+00> : vector<8x32xf32>
    %208 = tpu.matmul %206, %207, %cst_56 {dimension_numbers = #tpu.dot_dimension_numbers<[1], [0], [0], [1], [0, 0, 1, 1], [], []>} : vector<8x32xf32>, vector<32x32xf32>, vector<8x32xf32> -> vector<8x32xf32>
    %c0_57 = arith.constant 0 : index
    %c0_58 = arith.constant 0 : index
    %209 = vector.load %arg7[%c0_57, %c0_58] : memref<1x32xf32, #tpu.memory_space<vmem>>, vector<1x32xf32>
    %210 = vector.broadcast %209 : vector<1x32xf32> to vector<8x32xf32>
    %211 = arith.addf %208, %210 : vector<8x32xf32>
    %212 = arith.addf %1, %211 : vector<8x32xf32>
    %cst_59 = arith.constant dense<0.000000e+00> : vector<8xf32>
    %213 = vector.multi_reduction <add>, %212, %cst_59 [1] : vector<8x32xf32> to vector<8xf32>
    %214 = vector.shape_cast %213 : vector<8xf32> to vector<8x1xf32>
    %cst_60 = arith.constant 3.200000e+01 : f32
    %215 = vector.broadcast %cst_60 : f32 to vector<8x1xf32>
    %216 = arith.divf %214, %215 : vector<8x1xf32>
    %217 = vector.broadcast %216 : vector<8x1xf32> to vector<8x32xf32>
    %218 = arith.subf %212, %217 : vector<8x32xf32>
    %219 = arith.mulf %218, %218 : vector<8x32xf32>
    %cst_61 = arith.constant dense<0.000000e+00> : vector<8xf32>
    %220 = vector.multi_reduction <add>, %219, %cst_61 [1] : vector<8x32xf32> to vector<8xf32>
    %221 = vector.shape_cast %220 : vector<8xf32> to vector<8x1xf32>
    %cst_62 = arith.constant 3.200000e+01 : f32
    %222 = vector.broadcast %cst_62 : f32 to vector<8x1xf32>
    %223 = arith.divf %221, %222 : vector<8x1xf32>
    %cst_63 = arith.constant 9.99999974E-6 : f32
    %224 = vector.broadcast %cst_63 : f32 to vector<8x1xf32>
    %225 = arith.addf %223, %224 : vector<8x1xf32>
    %226 = math.rsqrt %225 : vector<8x1xf32>
    %227 = vector.broadcast %226 : vector<8x1xf32> to vector<8x32xf32>
    %228 = arith.mulf %218, %227 : vector<8x32xf32>
    %c0_64 = arith.constant 0 : index
    %c0_65 = arith.constant 0 : index
    %229 = vector.load %arg8[%c0_64, %c0_65] : memref<1x32xf32, #tpu.memory_space<vmem>>, vector<1x32xf32>
    %230 = vector.broadcast %229 : vector<1x32xf32> to vector<8x32xf32>
    %231 = arith.mulf %228, %230 : vector<8x32xf32>
    %c0_66 = arith.constant 0 : index
    %c0_67 = arith.constant 0 : index
    %232 = vector.load %arg9[%c0_66, %c0_67] : memref<1x32xf32, #tpu.memory_space<vmem>>, vector<1x32xf32>
    %233 = vector.broadcast %232 : vector<1x32xf32> to vector<8x32xf32>
    %234 = arith.addf %231, %233 : vector<8x32xf32>
    %c0_68 = arith.constant 0 : index
    %c0_69 = arith.constant 0 : index
    %c0_70 = arith.constant 0 : index
    %235 = vector.load %arg10[%c0_68, %c0_69, %c0_70] : memref<1x8x32xf32, #tpu.memory_space<vmem>>, vector<1x8x32xf32>
    %236 = vector.shape_cast %235 : vector<1x8x32xf32> to vector<8x32xf32>
    %237 = vector.shape_cast %234 : vector<8x32xf32> to vector<1x8x32xf32>
    tpu.vector_store %arg10[%c0_68, %c0_69, %c0_70], %237 {strides = array<i32>} : memref<1x8x32xf32, #tpu.memory_space<vmem>>, vector<1x8x32xf32>,
    return
  }
  func.func @transform_0(%arg0: i32) -> (i32, i32, i32) {
    %c0_i32 = arith.constant 0 : i32
    %c0_i32_0 = arith.constant 0 : i32
    %c0_i32_1 = arith.constant 0 : i32
    return %arg0, %c0_i32, %c0_i32_0 : i32, i32, i32
  }
  func.func @transform_1(%arg0: i32) -> (i32, i32) {
    %c0_i32 = arith.constant 0 : i32
    %c0_i32_0 = arith.constant 0 : i32
    %c0_i32_1 = arith.constant 0 : i32
    return %c0_i32, %c0_i32_0 : i32, i32
  }
  func.func @transform_2(%arg0: i32) -> (i32, i32) {
    %c0_i32 = arith.constant 0 : i32
    %c0_i32_0 = arith.constant 0 : i32
    %c0_i32_1 = arith.constant 0 : i32
    return %c0_i32, %c0_i32_0 : i32, i32
  }
  func.func @transform_3(%arg0: i32) -> (i32, i32) {
    %c0_i32 = arith.constant 0 : i32
    %c0_i32_0 = arith.constant 0 : i32
    %c0_i32_1 = arith.constant 0 : i32
    return %c0_i32, %c0_i32_0 : i32, i32
  }
  func.func @transform_4(%arg0: i32) -> (i32, i32) {
    %c0_i32 = arith.constant 0 : i32
    %c0_i32_0 = arith.constant 0 : i32
    %c0_i32_1 = arith.constant 0 : i32
    return %c0_i32, %c0_i32_0 : i32, i32
  }
  func.func @transform_5(%arg0: i32) -> (i32, i32) {
    %c0_i32 = arith.constant 0 : i32
    %c0_i32_0 = arith.constant 0 : i32
    %c0_i32_1 = arith.constant 0 : i32
    return %c0_i32, %c0_i32_0 : i32, i32
  }
  func.func @transform_6(%arg0: i32) -> (i32, i32) {
    %c0_i32 = arith.constant 0 : i32
    %c0_i32_0 = arith.constant 0 : i32
    %c0_i32_1 = arith.constant 0 : i32
    return %c0_i32, %c0_i32_0 : i32, i32
  }
  func.func @transform_7(%arg0: i32) -> (i32, i32) {
    %c0_i32 = arith.constant 0 : i32
    %c0_i32_0 = arith.constant 0 : i32
    %c0_i32_1 = arith.constant 0 : i32
    return %c0_i32, %c0_i32_0 : i32, i32
  }
  func.func @transform_8(%arg0: i32) -> (i32, i32) {
    %c0_i32 = arith.constant 0 : i32
    %c0_i32_0 = arith.constant 0 : i32
    %c0_i32_1 = arith.constant 0 : i32
    return %c0_i32, %c0_i32_0 : i32, i32
  }
  func.func @transform_9(%arg0: i32) -> (i32, i32, i32) {
    %c0_i32 = arith.constant 0 : i32
    %c0_i32_0 = arith.constant 0 : i32
    %c0_i32_1 = arith.constant 0 : i32
    return %arg0, %c0_i32, %c0_i32_0 : i32, i32, i32
  }
}

module attributes {stable_mosaic.version = 11 : i64} {
  func.func @_ff_block_kernel(%arg0: i32, %arg1: i32, %arg2: memref<16x32xf32, #tpu.memory_space<vmem>>, %arg3: memref<32x64xf32, #tpu.memory_space<vmem>>, %arg4: memref<1x64xf32, #tpu.memory_space<vmem>>, %arg5: memref<64x32xf32, #tpu.memory_space<vmem>>, %arg6: memref<1x32xf32, #tpu.memory_space<vmem>>, %arg7: memref<1x32xf32, #tpu.memory_space<vmem>>, %arg8: memref<1x32xf32, #tpu.memory_space<vmem>>, %arg9: memref<16x32xf32, #tpu.memory_space<vmem>>, %arg10: memref<16x32xf32, #tpu.memory_space<vmem>>) attributes {dimension_semantics = [#tpu.dimension_semantics<parallel>, #tpu.dimension_semantics<arbitrary>], iteration_bounds = array<i64: 1, 1>, scalar_prefetch = 0 : i64, scratch_operands = 1 : i64, tpu.core_type = #tpu.core_type<tc>, window_params = [{transform_indices = @transform_0, window_bounds = array<i64: 16, 32>}, {transform_indices = @transform_1, window_bounds = array<i64: 32, 64>}, {transform_indices = @transform_2, window_bounds = array<i64: 1, 64>}, {transform_indices = @transform_3, window_bounds = array<i64: 64, 32>}, {pipeline_mode = #tpu.pipeline_mode<synchronous>, transform_indices = @transform_4, window_bounds = array<i64: 1, 32>}, {pipeline_mode = #tpu.pipeline_mode<synchronous>, transform_indices = @transform_5, window_bounds = array<i64: 1, 32>}, {pipeline_mode = #tpu.pipeline_mode<synchronous>, transform_indices = @transform_6, window_bounds = array<i64: 1, 32>}, {transform_indices = @transform_7, window_bounds = array<i64: 16, 32>}]} {
    %c0_i32 = arith.constant 0 : i32
    %0 = arith.cmpi eq, %arg1, %c0_i32 : i32
    %1 = arith.extui %0 : i1 to i32
    %c0_i32_0 = arith.constant 0 : i32
    %2 = arith.cmpi ne, %1, %c0_i32_0 : i32
    scf.if %2 {
      %cst_16 = arith.constant 0.000000e+00 : f32
      %19 = vector.broadcast %cst_16 : f32 to vector<16x32xf32>
      %c0_17 = arith.constant 0 : index
      %c0_18 = arith.constant 0 : index
      %20 = vector.load %arg10[%c0_17, %c0_18] : memref<16x32xf32, #tpu.memory_space<vmem>>, vector<16x32xf32>
      tpu.vector_store %arg10[%c0_17, %c0_18], %19 {strides = array<i32>} : memref<16x32xf32, #tpu.memory_space<vmem>>, vector<16x32xf32>,
    } else {
    }
    %c0 = arith.constant 0 : index
    %c0_1 = arith.constant 0 : index
    %3 = vector.load %arg2[%c0, %c0_1] : memref<16x32xf32, #tpu.memory_space<vmem>>, vector<16x32xf32>
    %c0_2 = arith.constant 0 : index
    %c0_3 = arith.constant 0 : index
    %4 = vector.load %arg3[%c0_2, %c0_3] : memref<32x64xf32, #tpu.memory_space<vmem>>, vector<32x64xf32>
    %cst = arith.constant dense<0.000000e+00> : vector<16x64xf32>
    %5 = tpu.matmul %3, %4, %cst {dimension_numbers = #tpu.dot_dimension_numbers<[1], [0], [0], [1], [0, 0, 1, 1], [], []>} : vector<16x32xf32>, vector<32x64xf32>, vector<16x64xf32> -> vector<16x64xf32>
    %c0_4 = arith.constant 0 : index
    %c0_5 = arith.constant 0 : index
    %6 = vector.load %arg4[%c0_4, %c0_5] : memref<1x64xf32, #tpu.memory_space<vmem>>, vector<1x64xf32>
    %7 = vector.broadcast %6 : vector<1x64xf32> to vector<16x64xf32>
    %8 = arith.addf %5, %7 : vector<16x64xf32>
    %cst_6 = arith.constant 0.000000e+00 : f32
    %9 = vector.broadcast %cst_6 : f32 to vector<16x64xf32>
    %10 = arith.maximumf %8, %9 : vector<16x64xf32>
    %c0_7 = arith.constant 0 : index
    %c0_8 = arith.constant 0 : index
    %11 = vector.load %arg10[%c0_7, %c0_8] : memref<16x32xf32, #tpu.memory_space<vmem>>, vector<16x32xf32>
    %c0_9 = arith.constant 0 : index
    %c0_10 = arith.constant 0 : index
    %12 = vector.load %arg5[%c0_9, %c0_10] : memref<64x32xf32, #tpu.memory_space<vmem>>, vector<64x32xf32>
    %cst_11 = arith.constant dense<0.000000e+00> : vector<16x32xf32>
    %13 = tpu.matmul %10, %12, %cst_11 {dimension_numbers = #tpu.dot_dimension_numbers<[1], [0], [0], [1], [0, 0, 1, 1], [], []>} : vector<16x64xf32>, vector<64x32xf32>, vector<16x32xf32> -> vector<16x32xf32>
    %14 = arith.addf %11, %13 : vector<16x32xf32>
    %c0_12 = arith.constant 0 : index
    %c0_13 = arith.constant 0 : index
    %15 = vector.load %arg10[%c0_12, %c0_13] : memref<16x32xf32, #tpu.memory_space<vmem>>, vector<16x32xf32>
    tpu.vector_store %arg10[%c0_12, %c0_13], %14 {strides = array<i32>} : memref<16x32xf32, #tpu.memory_space<vmem>>, vector<16x32xf32>,
    %c0_i32_14 = arith.constant 0 : i32
    %16 = arith.cmpi eq, %arg1, %c0_i32_14 : i32
    %17 = arith.extui %16 : i1 to i32
    %c0_i32_15 = arith.constant 0 : i32
    %18 = arith.cmpi ne, %17, %c0_i32_15 : i32
    scf.if %18 {
      %c0_16 = arith.constant 0 : index
      %c0_17 = arith.constant 0 : index
      %19 = vector.load %arg10[%c0_16, %c0_17] : memref<16x32xf32, #tpu.memory_space<vmem>>, vector<16x32xf32>
      %20 = arith.addf %3, %19 : vector<16x32xf32>
      %c0_18 = arith.constant 0 : index
      %c0_19 = arith.constant 0 : index
      %21 = vector.load %arg6[%c0_18, %c0_19] : memref<1x32xf32, #tpu.memory_space<vmem>>, vector<1x32xf32>
      %22 = vector.broadcast %21 : vector<1x32xf32> to vector<16x32xf32>
      %23 = arith.addf %20, %22 : vector<16x32xf32>
      %cst_20 = arith.constant dense<0.000000e+00> : vector<16xf32>
      %24 = vector.multi_reduction <add>, %23, %cst_20 [1] : vector<16x32xf32> to vector<16xf32>
      %25 = vector.shape_cast %24 : vector<16xf32> to vector<16x1xf32>
      %cst_21 = arith.constant 3.200000e+01 : f32
      %26 = vector.broadcast %cst_21 : f32 to vector<16x1xf32>
      %27 = arith.divf %25, %26 : vector<16x1xf32>
      %28 = vector.broadcast %27 : vector<16x1xf32> to vector<16x32xf32>
      %29 = arith.subf %23, %28 : vector<16x32xf32>
      %30 = arith.mulf %29, %29 : vector<16x32xf32>
      %cst_22 = arith.constant dense<0.000000e+00> : vector<16xf32>
      %31 = vector.multi_reduction <add>, %30, %cst_22 [1] : vector<16x32xf32> to vector<16xf32>
      %32 = vector.shape_cast %31 : vector<16xf32> to vector<16x1xf32>
      %cst_23 = arith.constant 3.200000e+01 : f32
      %33 = vector.broadcast %cst_23 : f32 to vector<16x1xf32>
      %34 = arith.divf %32, %33 : vector<16x1xf32>
      %cst_24 = arith.constant 9.99999974E-6 : f32
      %35 = vector.broadcast %cst_24 : f32 to vector<16x1xf32>
      %36 = arith.addf %34, %35 : vector<16x1xf32>
      %37 = math.rsqrt %36 : vector<16x1xf32>
      %38 = vector.broadcast %37 : vector<16x1xf32> to vector<16x32xf32>
      %39 = arith.mulf %29, %38 : vector<16x32xf32>
      %c0_25 = arith.constant 0 : index
      %c0_26 = arith.constant 0 : index
      %40 = vector.load %arg7[%c0_25, %c0_26] : memref<1x32xf32, #tpu.memory_space<vmem>>, vector<1x32xf32>
      %41 = vector.broadcast %40 : vector<1x32xf32> to vector<16x32xf32>
      %42 = arith.mulf %39, %41 : vector<16x32xf32>
      %c0_27 = arith.constant 0 : index
      %c0_28 = arith.constant 0 : index
      %43 = vector.load %arg8[%c0_27, %c0_28] : memref<1x32xf32, #tpu.memory_space<vmem>>, vector<1x32xf32>
      %44 = vector.broadcast %43 : vector<1x32xf32> to vector<16x32xf32>
      %45 = arith.addf %42, %44 : vector<16x32xf32>
      %c0_29 = arith.constant 0 : index
      %c0_30 = arith.constant 0 : index
      %46 = vector.load %arg9[%c0_29, %c0_30] : memref<16x32xf32, #tpu.memory_space<vmem>>, vector<16x32xf32>
      tpu.vector_store %arg9[%c0_29, %c0_30], %45 {strides = array<i32>} : memref<16x32xf32, #tpu.memory_space<vmem>>, vector<16x32xf32>,
    } else {
    }
    return
  }
  func.func @transform_0(%arg0: i32, %arg1: i32) -> (i32, i32) {
    %c0_i32 = arith.constant 0 : i32
    %c0_i32_0 = arith.constant 0 : i32
    return %arg0, %c0_i32 : i32, i32
  }
  func.func @transform_1(%arg0: i32, %arg1: i32) -> (i32, i32) {
    %c0_i32 = arith.constant 0 : i32
    %c0_i32_0 = arith.constant 0 : i32
    return %c0_i32, %arg1 : i32, i32
  }
  func.func @transform_2(%arg0: i32, %arg1: i32) -> (i32, i32) {
    %c0_i32 = arith.constant 0 : i32
    %c0_i32_0 = arith.constant 0 : i32
    return %c0_i32, %arg1 : i32, i32
  }
  func.func @transform_3(%arg0: i32, %arg1: i32) -> (i32, i32) {
    %c0_i32 = arith.constant 0 : i32
    %c0_i32_0 = arith.constant 0 : i32
    return %arg1, %c0_i32 : i32, i32
  }
  func.func @transform_4(%arg0: i32, %arg1: i32) -> (i32, i32) {
    %c0_i32 = arith.constant 0 : i32
    %c0_i32_0 = arith.constant 0 : i32
    %c0_i32_1 = arith.constant 0 : i32
    return %c0_i32, %c0_i32_0 : i32, i32
  }
  func.func @transform_5(%arg0: i32, %arg1: i32) -> (i32, i32) {
    %c0_i32 = arith.constant 0 : i32
    %c0_i32_0 = arith.constant 0 : i32
    %c0_i32_1 = arith.constant 0 : i32
    return %c0_i32, %c0_i32_0 : i32, i32
  }
  func.func @transform_6(%arg0: i32, %arg1: i32) -> (i32, i32) {
    %c0_i32 = arith.constant 0 : i32
    %c0_i32_0 = arith.constant 0 : i32
    %c0_i32_1 = arith.constant 0 : i32
    return %c0_i32, %c0_i32_0 : i32, i32
  }
  func.func @transform_7(%arg0: i32, %arg1: i32) -> (i32, i32) {
    %c0_i32 = arith.constant 0 : i32
    %c0_i32_0 = arith.constant 0 : i32
    return %arg0, %c0_i32 : i32, i32
  }
}

</mosaic_0001>

<bundles_post_ra>
// kernel: _lambda_.8
= control target key start
LH: loop header
LB: loop body
LE: loop exit
PB: predicated region body
PF: predicated region fallthrough
CT: control target
= control target key end

     0   :  { %vm30_vm0 = vcmask 261120   ;;  %v376_v20 = vmov 0.0   ;;  %vm140_vm1 = vcmask 523264   ;;  %s489_s1 = inlined_call_operand.vmem [shape: f32[32,64], index: 1, kind: input, shape index: {}]   ;;  %s490_s0 = inlined_call_operand.vmem [shape: f32[16,32], index: 0, kind: input, shape index: {}]   ;;  %s491_s3 = inlined_call_operand.vmem [shape: f32[64,32], index: 3, kind: input, shape index: {}]   ;;  %s492_s2 = inlined_call_operand.vmem [shape: f32[1,64], index: 2, kind: input, shape index: {}]   ;;  %s493_s4 = inlined_call_operand.vmem [shape: f32[1,32], index: 4, kind: input, shape index: {}]   ;;  %s494_s5 = inlined_call_operand.vmem [shape: f32[1,32], index: 5, kind: input, shape index: {}]   ;;  %s495_s6 = inlined_call_operand.vmem [shape: f32[1,32], index: 6, kind: input, shape index: {}]   ;;  %s496_s7 = inlined_call_operand.vmem [shape: f32[16,32], index: 7, kind: output, shape index: {}]  }
   0x1   :  { %v35_v0 = vld [vmem:[%s489_s1] sm:$0xff]  ;;  %v36_v1 = vld [vmem:[%s489_s1 + $0x8] sm:$0xff]  ;;  %v37_v2 = vld [vmem:[%s489_s1 + $0x10] sm:$0xff]  ;;  %32 = vst.msk [vmem:[#allocation2 + $0x8] sm:$0xff] %vm30_vm0, %v376_v20 }
   0x2   :  { %v347_v3 = vpack.c.bf16 %v36_v1, %v35_v0  ;;  %v38_v4 = vld [vmem:[%s489_s1 + $0x18] sm:$0xff]  ;;  %v33_v5 = vld [vmem:[%s490_s0] sm:$0xff]  ;;  %v133_v8 = vld [vmem:[%s491_s3 + $0x8] sm:$0xff]  ;;  %31 = vst.msk [vmem:[#allocation2] sm:$0xff] %vm30_vm0, %v376_v20 }
   0x3   :  { %v351_v6 = vpack.c.bf16 %v38_v4, %v37_v2  ;;  %325 = vmatprep.mubr.msk.f32.mxu0 %vm30_vm0, %v33_v5  ;;  %v132_v7 = vld [vmem:[%s491_s3] sm:$0xff]  ;;  %v134_v9 = vld [vmem:[%s491_s3 + $0x10] sm:$0xff]  ;;  %v135_v11 = vld [vmem:[%s491_s3 + $0x18] sm:$0xff] }
   0x4   :  { %348 = vmatprep.subr.bf16.mxu0 %v347_v3  ;;  %v355_v10 = vpack.c.bf16 %v133_v8, %v132_v7  ;;  %v359_v12 = vpack.c.bf16 %v135_v11, %v134_v9  ;;  %v136_v13 = vld [vmem:[%s491_s3 + $0x20] sm:$0xff]  ;;  %v137_v14 = vld [vmem:[%s491_s3 + $0x28] sm:$0xff]  ;;  %v138_v17 = vld [vmem:[%s491_s3 + $0x30] sm:$0xff] }
   0x5   :  { %350 = vmatpush3.bf16.msra.mxu0 %v347_v3  ;;  %v363_v15 = vpack.c.bf16 %v137_v14, %v136_v13  ;;  %v34_v16 = vld [vmem:[%s490_s0 + $0x8] sm:$0xff]  ;;  %v139_v18 = vld [vmem:[%s491_s3 + $0x38] sm:$0xff]  ;;  %v293_v21 = vld [vmem:[%s492_s2] ss:$0 sm:$0xff] }
   0x6   :  { %352 = vmatprep.subr.bf16.mxu0 %v351_v6  ;;  %356 = vmatprep.subr.bf16.mxu1 %v355_v10  ;;  %v367_v19 = vpack.c.bf16 %v139_v18, %v138_v17  ;;  %v298_v36 = vld [vmem:[%s493_s4] ss:$0 sm:$0xff] }
   0x7   :  { %358 = vmatpush3.bf16.msra.mxu1 %v355_v10  ;;  %v299_v60 = vld [vmem:[%s494_s5] ss:$0 sm:$0xff] }
   0x8   :  { %360 = vmatprep.subr.bf16.mxu1 %v359_v12  ;;  %v131_v28 = vld [vmem:[#allocation2 + $0x8] sm:$0xff]  ;;  %v300_v62 = vld [vmem:[%s495_s6] ss:$0 sm:$0xff] }
   0x9   :  { %354 = vmatpush3.bf16.msra.mxu0 %v351_v6  ;;  %v130_v29 = vld [vmem:[#allocation2] sm:$0xff] }
   0xb   :  { %362 = vmatpush3.bf16.msra.mxu1 %v359_v12 }
   0xc   :  { %326 = vmatmul.mubr.msk.f32.vlgmr.msra.gmra.mrb[0].mxu0 %vm30_vm0, %v34_v16  ;;  %364 = vmatprep.subr.bf16.mxu1 %v363_v15 }
   0xf   :  { %366 = vmatpush3.bf16.msra.mxu1 %v363_v15 }
  0x10   :  { %368 = vmatprep.subr.bf16.mxu1 %v367_v19 }
  0x13   :  { %370 = vmatpush3.bf16.msra.mxu1 %v367_v19 }
  0xdf   :  { %v327_v22 = vpop.f32.mrb[0].mxu0 }
  0xe0   :  { %v125_v23 = vadd.f32 %v327_v22, %v293_v21  ;;  %v119_v24 = vpop.f32.mrb[1].mxu0 }
  0xe1   :  { %v120_v25 = vadd.f32 %v293_v21, %v119_v24 }
  0xe2   :  { %v129_v27 = vmax.f32 %v125_v23, 0.0 }
  0xe3   :  { %v128_v26 = vmax.f32 %v120_v25, 0.0 }
  0xe5   :  { %344 = vmatprep.mubr.msk.f32.mxu1 %vm140_vm1, %v128_v26 }
  0xe6   :  { %345 = vmatmul.mubr.msk.f32.vlgmr.msra.gmra.mrb[0].mxu1 %vm140_vm1, %v129_v27 }
 0x1b9   :  { %v346_v30 = vpop.f32.mrb[0].mxu1 }
 0x1ba   :  { %v223_v31 = vadd.f32 %v346_v30, %v131_v28  ;;  %v213_v32 = vpop.f32.mrb[1].mxu1 }
 0x1bb   :  { %v222_v33 = vadd.f32 %v213_v32, %v130_v29 }
 0x1bc   :  { %225 = vst.msk [vmem:[#allocation2 + $0x8] sm:$0xff] %vm30_vm0, %v223_v31 }
 0x1bd   :  { %224 = vst.msk [vmem:[#allocation2] sm:$0xff] %vm30_vm0, %v222_v33 }
 0x1c3   :  { %v230_v34 = vld [vmem:[#allocation2 + $0x8] sm:$0xff] }
 0x1c4   :  { %v229_v35 = vld [vmem:[#allocation2] sm:$0xff]  ;;  %v232_v38 = vadd.f32 %v230_v34, %v34_v16 }
 0x1c5   :  { %v231_v37 = vadd.f32 %v229_v35, %v33_v5 }
 0x1c6   :  { %v241_v41 = vadd.f32 %v298_v36, %v232_v38 }
 0x1c7   :  { %v240_v39 = vadd.f32 %v298_v36, %v231_v37 }
 0x1c8   :  { %v245_v42 = vsel %vm30_vm0, %v241_v41, 0.0 }
 0x1c9   :  { %v242_v40 = vsel %vm30_vm0, %v240_v39, 0.0 }
 0x1ca   :  { %243 = vadd.xlane.f32.xlu0 %v242_v40 }
 0x1ce   :  { %246 = vadd.xlane.f32.xlu0 %v245_v42 }
 0x257   :  { %v244_v43 = vpop.xlane.xlu0 %243 }
 0x258   :  { %v249_v44 = vmul.f32 0.03125, %v244_v43 }
 0x25a   :  { %v251_v45 = vsub.f32 %v240_v39, %v249_v44 }
 0x25b   :  { %v247_v46 = vpop.xlane.xlu0 %246 }
 0x25c   :  { %v250_v47 = vmul.f32 0.03125, %v247_v46  ;;  %v253_v48 = vmul.f32 %v251_v45, %v251_v45 }
 0x25e   :  { %v252_v49 = vsub.f32 %v241_v41, %v250_v47  ;;  %v255_v50 = vsel %vm30_vm0, %v253_v48, 0.0 }
 0x25f   :  { %256 = vadd.xlane.f32.xlu1 %v255_v50 }
 0x260   :  { %v254_v51 = vmul.f32 %v252_v49, %v252_v49 }
 0x262   :  { %v258_v52 = vsel %vm30_vm0, %v254_v51, 0.0 }
 0x263   :  { %259 = vadd.xlane.f32.xlu1 %v258_v52 }
 0x2ec   :  { %v257_v53 = vpop.xlane.xlu1 %256 }
 0x2ed   :  { %v261_v54 = vmul.f32 0.03125, %v257_v53 }
 0x2ef   :  { %v263_v55 = vadd.f32 1e-05, %v261_v54 }
 0x2f0   :  { %v260_v56 = vpop.xlane.xlu1 %259 }
 0x2f1   :  { %372 = vrsqrt.f32 %v263_v55  ;;  %v262_v57 = vmul.f32 0.03125, %v260_v56 }
 0x2f3   :  { %v264_v58 = vadd.f32 1e-05, %v262_v57 }
 0x2f5   :  { %374 = vrsqrt.f32 %v264_v58 }
 0x2fb   :  { %v373_v59 = vpop.eup %372 }
 0x2fc   :  { %v267_v61 = vmul.f32 %v373_v59, %v251_v45 }
 0x2fe   :  { %v276_v63 = vmul.f32 %v299_v60, %v267_v61 }
 0x2ff   :  { %v375_v0 = vpop.eup %374 }
 0x300   :  { %v285_v1 = vadd.f32 %v300_v62, %v276_v63  ;;  %v268_v2 = vmul.f32 %v375_v0, %v252_v49 }
 0x302   :  { %287 = vst.msk [vmem:[%s496_s7] sm:$0xff] %vm30_vm0, %v285_v1  ;;  %v277_v3 = vmul.f32 %v299_v60, %v268_v2 }
 0x304   :  { %v286_v4 = vadd.f32 %v300_v62, %v277_v3 }
 0x306   :  { %288 = vst.msk [vmem:[%s496_s7 + $0x8] sm:$0xff] %vm30_vm0, %v286_v4 }

// kernel: _lambda_.11
= control target key start
LH: loop header
LB: loop body
LE: loop exit
PB: predicated region body
PF: predicated region fallthrough
CT: control target
= control target key end

     0   :  { %vm31_vm0 = vcmask 261120   ;;  %s538_s0 = inlined_call_operand.vmem [shape: f32[16,32], index: 0, kind: input, shape index: {}]   ;;  %s539_s1 = inlined_call_operand.vmem [shape: f32[32,64], index: 1, kind: input, shape index: {}]   ;;  %s540_s2 = inlined_call_operand.vmem [shape: f32[1,64], index: 2, kind: input, shape index: {}]   ;;  %s541_s3 = inlined_call_operand.vmem [shape: f32[64,32], index: 3, kind: input, shape index: {}]   ;;  %s542_s4 = inlined_call_operand.vmem [shape: f32[1,32], index: 4, kind: input, shape index: {}]   ;;  %s543_s5 = inlined_call_operand.vmem [shape: f32[1,32], index: 5, kind: input, shape index: {}]   ;;  %s544_s6 = inlined_call_operand.vmem [shape: f32[1,32], index: 6, kind: input, shape index: {}]   ;;  %s545_s7 = inlined_call_operand.hbm [shape: f32[16,32], index: 7, kind: output, shape index: {}]  }
   0x1   :  { %v36_v0 = vld [vmem:[%s539_s1] sm:$0xff]  ;;  %v37_v1 = vld [vmem:[%s539_s1 + $0x8] sm:$0xff]  ;;  %v38_v2 = vld [vmem:[%s539_s1 + $0x10] sm:$0xff] }
   0x2   :  { %v360_v3 = vpack.c.bf16 %v37_v1, %v36_v0  ;;  %v39_v4 = vld [vmem:[%s539_s1 + $0x18] sm:$0xff]  ;;  %v34_v5 = vld [vmem:[%s538_s0] sm:$0xff]  ;;  %v134_v8 = vld [vmem:[%s541_s3 + $0x8] sm:$0xff] }
   0x3   :  { %v364_v6 = vpack.c.bf16 %v39_v4, %v38_v2  ;;  %338 = vmatprep.mubr.msk.f32.mxu0 %vm31_vm0, %v34_v5  ;;  %v133_v7 = vld [vmem:[%s541_s3] sm:$0xff]  ;;  %v135_v9 = vld [vmem:[%s541_s3 + $0x10] sm:$0xff]  ;;  %v136_v11 = vld [vmem:[%s541_s3 + $0x18] sm:$0xff] }
   0x4   :  { %361 = vmatprep.subr.bf16.mxu0 %v360_v3  ;;  %v368_v10 = vpack.c.bf16 %v134_v8, %v133_v7  ;;  %v372_v12 = vpack.c.bf16 %v136_v11, %v135_v9  ;;  %v137_v13 = vld [vmem:[%s541_s3 + $0x20] sm:$0xff]  ;;  %v138_v14 = vld [vmem:[%s541_s3 + $0x28] sm:$0xff] }
   0x5   :  { %363 = vmatpush3.bf16.msra.mxu0 %v360_v3 }
   0x6   :  { %12 = vsyncpa [#allocation4], 0  ;;  %365 = vmatprep.subr.bf16.mxu0 %v364_v6  ;;  %369 = vmatprep.subr.bf16.mxu1 %v368_v10  ;;  %v376_v15 = vpack.c.bf16 %v138_v14, %v137_v13  ;;  %v35_v16 = vld [vmem:[%s538_s0 + $0x8] sm:$0xff]  ;;  %v139_v17 = vld [vmem:[%s541_s3 + $0x30] sm:$0xff]  ;;  %v416_v20 = vmov 0.0   ;;  %vm141_vm1 = vcmask 523264  }
   0x7   :  { %371 = vmatpush3.bf16.msra.mxu1 %v368_v10  ;;  %v140_v18 = vld [vmem:[%s541_s3 + $0x38] sm:$0xff]  ;;  %33 = vst.msk [vmem:[#allocation2 + $0x8] sm:$0xff] %vm31_vm0, %v416_v20  ;;  %32 = vst.msk [vmem:[#allocation2] sm:$0xff] %vm31_vm0, %v416_v20  ;;  %v306_v21 = vld [vmem:[%s540_s2] ss:$0 sm:$0xff]  ;;  %s417_s9 = smov [#allocation3]  }
   0x8   :  { %373 = vmatprep.subr.bf16.mxu1 %v372_v12  ;;  %v380_v19 = vpack.c.bf16 %v140_v18, %v139_v17  ;;  %v311_v36 = vld [vmem:[%s542_s4] ss:$0 sm:$0xff]  ;;  %s295_s10 = sshll.u32 %s417_s9, 4  ;;  %s296_s10 = int_to_ptr.vmem [resolvable:$true] %s295_s10 }
   0x9   :  { %367 = vmatpush3.bf16.msra.mxu0 %v364_v6  ;;  %v312_v60 = vld [vmem:[%s543_s5] ss:$0 sm:$0xff]  ;;  %s392_s11 = scalar_lea.vmem %s296_s10, 256  ;;  %p397_p1 = scmp.lt.s32.totalorder %s296_s10, %s296_s10 }
   0xa   :  { %v313_v62 = vld [vmem:[%s544_s6] ss:$0 sm:$0xff]  ;;  %p393_p0 = scmp.ne.s32.totalorder %s296_s10, %s392_s11  ;;  %p398_p2 = scmp.lt.s32.totalorder %s392_s11, %s392_s11 }
   0xb   :  { %375 = vmatpush3.bf16.msra.mxu1 %v372_v12 }
   0xc   :  { %339 = vmatmul.mubr.msk.f32.vlgmr.msra.gmra.mrb[0].mxu0 %vm31_vm0, %v35_v16  ;;  %377 = vmatprep.subr.bf16.mxu1 %v376_v15  ;;  %p399_p3 = por %p398_p2, %p397_p1 }
   0xe   :  { %v132_v28 = vld [vmem:[#allocation2 + $0x8] sm:$0xff]  ;;  %v131_v29 = vld [vmem:[#allocation2] sm:$0xff]  ;;  %p400_p4 = pnand %p399_p3, %p393_p0 }
   0xf   :  { %379 = vmatpush3.bf16.msra.mxu1 %v376_v15 }
  0x10   :  { %381 = vmatprep.subr.bf16.mxu1 %v380_v19 }
  0x13   :  { %383 = vmatpush3.bf16.msra.mxu1 %v380_v19 }
  0xdf   :  { %v340_v22 = vpop.f32.mrb[0].mxu0 }
  0xe0   :  { %v126_v23 = vadd.f32 %v340_v22, %v306_v21  ;;  %v120_v24 = vpop.f32.mrb[1].mxu0 }
  0xe1   :  { %v121_v25 = vadd.f32 %v306_v21, %v120_v24 }
  0xe2   :  { %v130_v27 = vmax.f32 %v126_v23, 0.0 }
  0xe3   :  { %v129_v26 = vmax.f32 %v121_v25, 0.0 }
  0xe5   :  { %357 = vmatprep.mubr.msk.f32.mxu1 %vm141_vm1, %v129_v26 }
  0xe6   :  { %358 = vmatmul.mubr.msk.f32.vlgmr.msra.gmra.mrb[0].mxu1 %vm141_vm1, %v130_v27 }
 0x1b9   :  { %v359_v30 = vpop.f32.mrb[0].mxu1 }
 0x1ba   :  { %v224_v31 = vadd.f32 %v359_v30, %v132_v28  ;;  %v214_v32 = vpop.f32.mrb[1].mxu1 }
 0x1bb   :  { %v223_v33 = vadd.f32 %v214_v32, %v131_v29 }
 0x1bc   :  { %226 = vst.msk [vmem:[#allocation2 + $0x8] sm:$0xff] %vm31_vm0, %v224_v31 }
 0x1bd   :  { %225 = vst.msk [vmem:[#allocation2] sm:$0xff] %vm31_vm0, %v223_v33 }
 0x1c3   :  { %v231_v34 = vld [vmem:[#allocation2 + $0x8] sm:$0xff] }
 0x1c4   :  { %v230_v35 = vld [vmem:[#allocation2] sm:$0xff]  ;;  %v233_v38 = vadd.f32 %v231_v34, %v35_v16 }
 0x1c5   :  { %v232_v37 = vadd.f32 %v230_v35, %v34_v5 }
 0x1c6   :  { %v242_v41 = vadd.f32 %v311_v36, %v233_v38 }
 0x1c7   :  { %v241_v39 = vadd.f32 %v311_v36, %v232_v37 }
 0x1c8   :  { %v246_v42 = vsel %vm31_vm0, %v242_v41, 0.0 }
 0x1c9   :  { %v243_v40 = vsel %vm31_vm0, %v241_v39, 0.0 }
 0x1ca   :  { %244 = vadd.xlane.f32.xlu0 %v243_v40 }
 0x1ce   :  { %247 = vadd.xlane.f32.xlu0 %v246_v42 }
 0x257   :  { %v245_v43 = vpop.xlane.xlu0 %244 }
 0x258   :  { %v250_v44 = vmul.f32 0.03125, %v245_v43 }
 0x25a   :  { %v252_v45 = vsub.f32 %v241_v39, %v250_v44 }
 0x25b   :  { %v248_v46 = vpop.xlane.xlu0 %247 }
 0x25c   :  { %v251_v47 = vmul.f32 0.03125, %v248_v46  ;;  %v254_v48 = vmul.f32 %v252_v45, %v252_v45 }
 0x25e   :  { %v253_v49 = vsub.f32 %v242_v41, %v251_v47  ;;  %v256_v50 = vsel %vm31_vm0, %v254_v48, 0.0 }
 0x25f   :  { %257 = vadd.xlane.f32.xlu1 %v256_v50 }
 0x260   :  { %v255_v51 = vmul.f32 %v253_v49, %v253_v49 }
 0x262   :  { %v259_v52 = vsel %vm31_vm0, %v255_v51, 0.0 }
 0x263   :  { %260 = vadd.xlane.f32.xlu1 %v259_v52 }
 0x2ec   :  { %v258_v53 = vpop.xlane.xlu1 %257 }
 0x2ed   :  { %v262_v54 = vmul.f32 0.03125, %v258_v53 }
 0x2ef   :  { %v264_v55 = vadd.f32 1e-05, %v262_v54 }
 0x2f0   :  { %v261_v56 = vpop.xlane.xlu1 %260 }
 0x2f1   :  { %388 = vrsqrt.f32 %v264_v55  ;;  %v263_v57 = vmul.f32 0.03125, %v261_v56 }
 0x2f3   :  { %v265_v58 = vadd.f32 1e-05, %v263_v57 }
 0x2f5   :  { %390 = vrsqrt.f32 %v265_v58 }
 0x2fb   :  { %v389_v59 = vpop.eup %388 }
 0x2fc   :  { %v268_v61 = vmul.f32 %v389_v59, %v252_v45 }
 0x2fe   :  { %v277_v63 = vmul.f32 %v312_v60, %v268_v61 }
 0x2ff   :  { %v391_v0 = vpop.eup %390 }
 0x300   :  { %v269_v1 = vmul.f32 %v391_v0, %v253_v49  ;;  %v286_v2 = vadd.f32 %v313_v62, %v277_v63 }
 0x302   :  { %v278_v3 = vmul.f32 %v312_v60, %v269_v1  ;;  %288 = vst.msk [vmem:[#allocation3] sm:$0xff] %vm31_vm0, %v286_v2 }
 0x304   :  { %v287_v4 = vadd.f32 %v313_v62, %v278_v3 }
 0x306   :  { %289 = vst.msk [vmem:[#allocation3 + $0x8] sm:$0xff] %vm31_vm0, %v287_v4 }
 0x307   :  { %403 = shalt.err (!%p400_p4)
}
 0x308   :  { %s404_s12 = scalar_lea.hbm %s545_s7, 256 }
 0x309   :  { %p405_p5 = scmp.ne.s32.totalorder %s545_s7, %s404_s12  ;;  %p408_p6 = scmp.lt.u32.totalorder %s404_s12, %s545_s7 }
 0x30b   :  { %p410_p7 = pnand %p408_p6, %p405_p5 }
 0x30d   :  { %413 = shalt.err (!%p410_p7)
}
 0x30e   :  { %s418_s1 = smov 128   ;;  %s419_s17 = smov 8  }
 0x30f   :  { %301 = dma.vmem_to_hbm [thread:$0]  %s296_s10, 256, %s545_s7, [#allocation4], %s418_s1, %s418_s1, %s419_s17  }
 0x310   :  { %414 = dma.done.wait [#allocation4], 256  }
 0x311   :  { %415 = vsyncadd [#allocation4], 4294967040 }
 0x312   :  { %305 = vsyncpa [#allocation4], 1 }

// kernel: _lambda_.7
= control target key start
LH: loop header
LB: loop body
LE: loop exit
PB: predicated region body
PF: predicated region fallthrough
CT: control target
= control target key end

     0   :  { %s4072_s13 = smov 0   ;;  %s5244_s0 = inlined_call_operand.vmem [shape: f32[2,8,32], index: 0, kind: input, shape index: {}]   ;;  %s5245_s1 = inlined_call_operand.vmem [shape: f32[2,8,32], index: 1, kind: input, shape index: {}]   ;;  %s5246_s2 = inlined_call_operand.vmem [shape: f32[32,32], index: 2, kind: input, shape index: {}]   ;;  %s5247_s3 = inlined_call_operand.vmem [shape: f32[1,32], index: 3, kind: input, shape index: {}]   ;;  %s5248_s4 = inlined_call_operand.vmem [shape: f32[32,64], index: 4, kind: input, shape index: {}]   ;;  %s5249_s5 = inlined_call_operand.vmem [shape: f32[1,64], index: 5, kind: input, shape index: {}]   ;;  %s5250_s6 = inlined_call_operand.vmem [shape: f32[32,32], index: 6, kind: input, shape index: {}]   ;;  %s5251_s7 = inlined_call_operand.vmem [shape: f32[1,32], index: 7, kind: input, shape index: {}]   ;;  %s5252_s8 = inlined_call_operand.vmem [shape: f32[1,32], index: 8, kind: input, shape index: {}]   ;;  %s5253_s9 = inlined_call_operand.vmem [shape: f32[1,32], index: 9, kind: input, shape index: {}]   ;;  %s5254_s10 = inlined_call_operand.vmem [shape: f32[2,8,32], index: 10, kind: output, shape index: {}]  }
   0x1 LB: > { %s3744_s14 = sadd.s32 4294967295, %s4001_s13   ;;  %p3748_p0 = scmp.ge.s32.totalorder %s4001_s13, 1  ;;  %s4001_s13 = sphi %s4072_s13, %s20_s13  }
   0x2   : > { %p320_p1 = scmp.lt.s32.totalorder %s4001_s13, 3 }
   0x4   : > { %p321_p2 = pnand %p3748_p0, %p320_p1 }
   0x6   : > { %324 = sbr.rel (%p321_p2) target bundleno = 2517 (0x9d5), region = 60 }
   0xd   : > { %v459_v0 = vld [vmem:[%s5248_s4] sm:$0xff]  ;;  %v460_v1 = vld [vmem:[%s5248_s4 + $0x8] sm:$0xff]  ;;  %v543_v3 = vlaneseq  ;;  %v5263_v4 = vmov 0.0|0.0   ;;  %v461_v7 = vld [vmem:[%s5248_s4 + $0x10] sm:$0xff]  ;;  %p360_p3 = scmp.lt.s32.totalorder %s3744_s14, 1  ;;  %vm5256_vm0 = vmmov 0  }
   0xe   : > { %v374_v2 = vld [vmem:[%s5246_s2] sm:$0xff]  ;;  %3884 = vmatprep.subr.bf16.mxu1 %v5263_v4  ;;  %v3885_v5 = vpack.c.bf16 %v460_v1, %v459_v0  ;;  %3878 = vmatprep.subr.bf16.mxu0 %v5263_v4  ;;  %v375_v6 = vld [vmem:[%s5246_s2 + $0x8] sm:$0xff]  ;;  %v462_v8 = vld [vmem:[%s5248_s4 + $0x18] sm:$0xff]  ;;  %v5264_v10 = vmov 0.0   ;;  %v4006_v16 = vmov 0   ;;  %vm5255_vm2 = vcmask 261120  }
   0xf   : > { %v3879_v9 = vpack.c.bf16 %v375_v6, %v374_v2  ;;  %3824 = vmatprep.mubr.msk.f32.mxu1 %vm5256_vm0, %v5264_v10  ;;  %v376_v11 = vld [vmem:[%s5246_s2 + $0x10] sm:$0xff]  ;;  %v377_v12 = vld [vmem:[%s5246_s2 + $0x18] sm:$0xff]  ;;  %3813 = vmatprep.mubr.msk.f32.mxu0 %vm5256_vm0, %v5264_v10  ;;  %v544_v13 = vshrl.u32 %v543_v3, 7  ;;  %v546_v14 = vand.u32 127, %v543_v3  ;;  %v3888_v15 = vpack.c.bf16 %v462_v8, %v461_v7  ;;  %s5306_s14 = smov (!%p360_p3, %s3744_s14), 1  ;;  %s4007_s23 = smov 112  }
  0x10   : > { %3886 = vmatpush3.bf16.msra.mxu1 %v3885_v5  ;;  %3919 = vset.pattern.permute.xlu0 %v4006_v16  ;;  %v3882_v17 = vpack.c.bf16 %v377_v12, %v376_v11  ;;  %s4115_s11 = sshll.u32 %s5306_s14, 3  ;;  %v3754_v38 = vld [vmem:[%s5249_s5] ss:$0 sm:$0xff]  ;;  %vm5258_vm3 = vcmask 64512   ;;  %s4008_s24 = smov 120  }
  0x11   : > { %3880 = vmatpush3.bf16.msra.mxu0 %v3879_v9  ;;  %3887 = vmatprep.subr.bf16.mxu1 %v5263_v4  ;;  %v4112_v18 = vsub.s32 1, %v544_v13  ;;  %v4117_v19 = vsub.s32 2, %v544_v13  ;;  %vm609_vm1 = vcmp.lt.s32.totalorder %v546_v14, %v544_v13  ;;  %s367_s16 = scalar_lea.vmem %s5245_s1, %s4115_s11  ;;  %v4124_v20 = vsub.s32 3, %v544_v13  ;;  %s4135_s18 = scalar_lea.vmem %s5244_s0, %s4115_s11  ;;  %v3752_v40 = vld [vmem:[%s5247_s3] ss:$0 sm:$0xff] }
  0x12   : > { %3881 = vmatprep.subr.bf16.mxu0 %v5263_v4  ;;  %3918 = vset.pattern.permute.xlu1 %v4006_v16  ;;  %v610_v21 = vsel %vm609_vm1, 1, %v4006_v16  ;;  %v4127_v22 = vsub.s32 %v546_v14, %v544_v13  ;;  %v4129_v23 = vsub.s32 0, %v544_v13  ;;  %v373_v24 = vld [vmem:[%s367_s16] sm:$0xff]  ;;  %v4140_v28 = vsub.s32 4, %v544_v13  ;;  %s4009_s25 = smov 104   ;;  %s4010_s26 = smov 96  }
  0x13   : > { %v621_v25 = vrot.slane %v610_v21, %v4112_v18  ;;  %v372_v26 = vld [vmem:[%s4135_s18] sm:$0xff]  ;;  %v628_v29 = vrot.slane %v610_v21, %v4117_v19  ;;  %v4145_v30 = vsub.s32 5, %v544_v13  ;;  %v635_v31 = vrot.slane %v610_v21, %v4124_v20  ;;  %s4011_s27 = smov 88   ;;  %s4012_s28 = smov 80  }
  0x14   : > { %3889 = vmatpush3.bf16.msra.mxu1 %v3888_v15  ;;  %v614_v27 = vrot.slane %v610_v21, %v4129_v23  ;;  %v4154_v32 = vsub.s32 6, %v544_v13  ;;  %v642_v33 = vrot.slane %v610_v21, %v4140_v28  ;;  %v4157_v34 = vsub.s32 7, %v544_v13  ;;  %s4013_s29 = smov 72   ;;  %s4014_s21 = smov 8  }
  0x15   : > { %3883 = vmatpush3.bf16.msra.mxu0 %v3882_v17  ;;  %623 = vbcast.lane.b32.xlu1 %v621_v25, 256  ;;  %v649_v35 = vrot.slane %v610_v21, %v4145_v30  ;;  %s4015_s22 = smov 16   ;;  %s371_s12 = scalar_lea.vmem %s5254_s10, %s4115_s11 }
  0x16   : > { %3827 = vmatprep.subr.mxu1 %v5264_v10  ;;  %616 = vbcast.lane.b32.xlu0 %v614_v27, 256  ;;  %v656_v36 = vrot.slane %v610_v21, %v4154_v32  ;;  %v663_v37 = vrot.slane %v610_v21, %v4157_v34 }
  0x17   : > { %3825 = vmatmul.mubr.msk.f32.vlgmr.msra.gmra.mrb[0].mxu1 %vm5255_vm2, %v373_v24  ;;  %3837 = vmatprep.subr.mxu0 %v5264_v10 }
  0x18   : > { %3814 = vmatmul.mubr.msk.f32.vlgmr.msra.gmra.mrb[0].mxu0 %vm5255_vm2, %v372_v26  ;;  %3829 = vmatprep.mubr.msk.f32.mxu1 %vm5256_vm0, %v5264_v10 }
  0x19   : > { %3839 = vmatprep.mubr.msk.f32.mxu0 %vm5256_vm0, %v5264_v10  ;;  %630 = vbcast.lane.b32.xlu1 %v628_v29, 256 }
  0x1a   : > { %637 = vbcast.lane.b32.xlu0 %v635_v31, 256 }
  0x1d   : > { %644 = vbcast.lane.b32.xlu1 %v642_v33, 256 }
  0x1e   : > { %651 = vbcast.lane.b32.xlu0 %v649_v35, 256 }
  0x21   : > { %658 = vbcast.lane.b32.xlu1 %v656_v36, 256 }
  0x22   : > { %665 = vbcast.lane.b32.xlu0 %v663_v37, 256 }
  0x87   : > { %v4180_v48 = vpop.permute.xlu1 %623 }
  0x88   : > { %v4182_v49 = vpop.permute.xlu0 %616  ;;  %vm5262_vm4 = vcmp.ne.s32.totalorder %v4180_v48, 0 }
  0x89   : > { %vm667_vm10 = vcmp.ne.s32.totalorder %v4182_v49, 0 }
  0x8b   : > { %v4184_v50 = vpop.permute.xlu1 %630 }
  0x8c   : > { %v4186_v51 = vpop.permute.xlu0 %637 }
  0x8f   : > { %v4188_v52 = vpop.permute.xlu1 %644 }
  0x90   : > { %v4190_v53 = vpop.permute.xlu0 %651  ;;  %vm5259_vm15 = vcmp.ne.s32.totalorder %v4188_v52, 0 }
  0x93   : > { %v4192_v54 = vpop.permute.xlu1 %658 }
  0x94   : > { %v4194_v55 = vpop.permute.xlu0 %665 }
  0xea   : > { %v539_v39 = vpop.f32.mrb[0].mxu1 }
  0xeb   : > { %v4168_v41 = vadd.f32 %v3754_v38, %v539_v39  ;;  %v3826_v42 = vpop.f32.mrb[1].mxu1  ;;  %v455_v43 = vpop.f32.mrb[0].mxu0 }
  0xec   : > { %v3815_v44 = vpop.f32.mrb[1].mxu0  ;;  %v456_v45 = vadd.f32 %v3752_v40, %v455_v43 }
  0xed   : > { %2248 = vrot.lane.b32.xlu1 %v4168_v41, %s4007_s23  ;;  %1516 = vrot.lane.b32.xlu0 %v4168_v41, %s4008_s24 }
  0xee   : > { %3828 = vmatpush3.xpose.msk.msra.mxu1 %vm5258_vm3, %v4168_v41  ;;  %v547_v46 = vmul.f32 %v456_v45, %v456_v45 }
  0xef   : > { %3832 = vmatprep.subr.mxu1 %v5264_v10 }
  0xf0   : > { %v549_v47 = vsel %vm5258_vm3, %v547_v46, 0.0 }
  0xf1   : > { %3830 = vmatmul.mubr.msk.f32.vlgmr.msra.gmra.mrb[2].mxu1 %vm5258_vm3, %v456_v45  ;;  %2246 = vrot.lane.b32.xlu1 %v456_v45, %s4007_s23 }
  0xf2   : > { %1514 = vrot.lane.b32.xlu0 %v456_v45, %s4008_s24  ;;  %3834 = vmatprep.mubr.msk.f32.mxu1 %vm5256_vm0, %v5264_v10 }
  0xf5   : > { %2978 = vrot.lane.b32.xlu1 %v456_v45, %s4009_s25 }
  0xf6   : > { %2980 = vrot.lane.b32.xlu0 %v4168_v41, %s4009_s25 }
  0xf9   : > { %2082 = vrot.lane.b32.xlu1 %v547_v46, %s4007_s23  ;;  %s4016_s23 = smov 24  }
  0xfa   : > { %1350 = vrot.lane.b32.xlu0 %v547_v46, %s4008_s24 }
  0xfe   : > { %2814 = vrot.lane.b32.xlu0 %v547_v46, %s4009_s25 }
 0x11d   : > { %550 = vadd.xlane.f32.xlu1 %v549_v47 }
 0x15f   : > { %v2249_v56 = vpop.permute.xlu1 %2248  ;;  %v1517_v57 = vpop.permute.xlu0 %1516 }
 0x160   : > { %3838 = vmatpush3.xpose.msk.msra.mxu0 %vm5258_vm3, %v1517_v57 }
 0x161   : > { %3847 = vmatprep.subr.mxu0 %v5264_v10 }
 0x163   : > { %v2247_v58 = vpop.permute.xlu1 %2246 }
 0x164   : > { %v1515_v59 = vpop.permute.xlu0 %1514 }
 0x165   : > { %3840 = vmatmul.mubr.msk.f32.vlgmr.msra.gmra.mrb[2].mxu0 %vm5258_vm3, %v1515_v59 }
 0x166   : > { %3848 = vmatpush3.xpose.msk.msra.mxu0 %vm5258_vm3, %v2249_v56  ;;  %3849 = vmatprep.mubr.msk.f32.mxu0 %vm5256_vm0, %v5264_v10 }
 0x167   : > { %3857 = vmatprep.subr.mxu0 %v5264_v10  ;;  %v2979_v60 = vpop.permute.xlu1 %2978 }
 0x168   : > { %v2981_v61 = vpop.permute.xlu0 %2980 }
 0x169   : > { %3850 = vmatmul.mubr.msk.f32.vlgmr.msra.gmra.mrb[4].mxu0 %vm5258_vm3, %v2247_v58 }
 0x16a   : > { %3858 = vmatpush3.xpose.msk.msra.mxu0 %vm5258_vm3, %v2981_v61  ;;  %3859 = vmatprep.mubr.msk.f32.mxu0 %vm5256_vm0, %v5264_v10 }
 0x16b   : > { %3890 = vmatprep.subr.bf16.mxu0 %v5263_v4  ;;  %v2083_v0 = vpop.permute.xlu1 %2082 }
 0x16c   : > { %v1351_v62 = vpop.permute.xlu0 %1350  ;;  %v2085_v2 = vsel %vm5258_vm3, %v2083_v0, 0.0 }
 0x16d   : > { %3860 = vmatmul.mubr.msk.f32.vlgmr.msra.gmra.mrb[6].mxu0 %vm5258_vm3, %v2979_v60  ;;  %v1353_v63 = vsel %vm5258_vm3, %v1351_v62, 0.0 }
 0x16e   : > { %1354 = vadd.xlane.f32.xlu0 %v1353_v63  ;;  %3875 = vmatprep.mubr.msk.f32.mxu0 %vm5256_vm0, %v5264_v10 }
 0x170   : > { %v2815_v1 = vpop.permute.xlu0 %2814 }
 0x171   : > { %v2817_v3 = vsel %vm5258_vm3, %v2815_v1, 0.0 }
 0x172   : > { %2086 = vadd.xlane.f32.xlu0 %v2085_v2  ;;  %2818 = vadd.xlane.f32.xlu1 %v2817_v3 }
 0x1aa   : > { %v551_v5 = vpop.xlane.xlu1 %550 }
 0x1ab   : > { %v560_v6 = vrot.slane %v551_v5, %v4112_v18  ;;  %v556_v7 = vrot.slane %v551_v5, %v4129_v23  ;;  %v572_v8 = vrot.slane %v551_v5, %v4140_v28  ;;  %v564_v9 = vrot.slane %v551_v5, %v4117_v19 }
 0x1ac   : > { %v580_v11 = vrot.slane %v551_v5, %v4154_v32  ;;  %v568_v13 = vrot.slane %v551_v5, %v4124_v20  ;;  %v584_v15 = vrot.slane %v551_v5, %v4157_v34  ;;  %v576_v21 = vrot.slane %v551_v5, %v4145_v30 }
 0x1ad   : > { %vm594_vm5 = vcmp.gt.f32.partialorder %v551_v5, %v560_v6  ;;  %vm602_vm6 = vcmp.eq.f32.partialorder %v551_v5, %v560_v6  ;;  %vm601_vm7 = vcmp.eq.f32.partialorder %v551_v5, %v556_v7  ;;  %vm593_vm9 = vcmp.gt.f32.partialorder %v551_v5, %v556_v7 }
 0x1ae   : > { %vm676_vm8 = vmand %vm602_vm6, %vm5262_vm4  ;;  %vm605_vm12 = vcmp.eq.f32.partialorder %v551_v5, %v572_v8  ;;  %vm597_vm14 = vcmp.gt.f32.partialorder %v551_v5, %v572_v8  ;;  %vm603_vm2 = vcmp.eq.f32.partialorder %v551_v5, %v564_v9  ;;  %vm595_vm6 = vcmp.gt.f32.partialorder %v551_v5, %v564_v9 }
 0x1af   : > { %vm684_vm11 = vmor %vm594_vm5, %vm676_vm8  ;;  %vm5260_vm8 = vcmp.ne.s32.totalorder %v4184_v50, 0  ;;  %vm607_vm0 = vcmp.eq.f32.partialorder %v551_v5, %v580_v11  ;;  %vm604_vm3 = vcmp.eq.f32.partialorder %v551_v5, %v568_v13 }
 0x1b0   : > { %v692_v12 = vsel %vm684_vm11, 1, %v4006_v16  ;;  %vm675_vm13 = vmand %vm601_vm7, %vm667_vm10 }
 0x1b1   : > { %703 = vperm.xlu0 %3919, %v692_v12   ;;  %vm683_vm1 = vmor %vm593_vm9, %vm675_vm13  ;;  %vm599_vm9 = vcmp.gt.f32.partialorder %v551_v5, %v580_v11  ;;  %vm5261_vm13 = vcmp.ne.s32.totalorder %v4192_v54, 0 }
 0x1b2   : > { %v691_v14 = vsel %vm683_vm1, 1, %v4006_v16  ;;  %vm679_vm5 = vmand %vm605_vm12, %vm5259_vm15  ;;  %vm608_vm15 = vcmp.eq.f32.partialorder %v551_v5, %v584_v15 }
 0x1b3   : > { %700 = vperm.xlu1 %3918, %v691_v14   ;;  %vm687_vm11 = vmor %vm597_vm14, %vm679_vm5  ;;  %vm596_vm14 = vcmp.gt.f32.partialorder %v551_v5, %v568_v13  ;;  %vm670_vm5 = vcmp.ne.s32.totalorder %v4186_v51, 0 }
 0x1b4   : > { %v695_v17 = vsel %vm687_vm11, 1, %v4006_v16  ;;  %vm677_vm7 = vmand %vm603_vm2, %vm5260_vm8 }
 0x1b5   : > { %712 = vperm.xlu0 %3919, %v695_v17   ;;  %vm685_vm1 = vmor %vm595_vm6, %vm677_vm7  ;;  %vm600_vm6 = vcmp.gt.f32.partialorder %v551_v5, %v584_v15  ;;  %vm674_vm7 = vcmp.ne.s32.totalorder %v4194_v55, 0 }
 0x1b6   : > { %v693_v24 = vsel %vm685_vm1, 1, %v4006_v16  ;;  %vm681_vm12 = vmand %vm607_vm0, %vm5261_vm13  ;;  %vm606_vm1 = vcmp.eq.f32.partialorder %v551_v5, %v576_v21  ;;  %vm598_vm13 = vcmp.gt.f32.partialorder %v551_v5, %v576_v21 }
 0x1b7   : > { %706 = vperm.xlu1 %3918, %v693_v24   ;;  %vm689_vm11 = vmor %vm599_vm9, %vm681_vm12  ;;  %vm672_vm9 = vcmp.ne.s32.totalorder %v4190_v53, 0 }
 0x1b8   : > { %v697_v25 = vsel %vm689_vm11, 1, %v4006_v16  ;;  %vm678_vm2 = vmand %vm604_vm3, %vm670_vm5 }
 0x1b9   : > { %718 = vperm.xlu0 %3919, %v697_v25   ;;  %vm686_vm8 = vmor %vm596_vm14, %vm678_vm2 }
 0x1ba   : > { %v694_v26 = vsel %vm686_vm8, 1, %v4006_v16  ;;  %vm682_vm0 = vmand %vm608_vm15, %vm674_vm7 }
 0x1bb   : > { %709 = vperm.xlu1 %3918, %v694_v26   ;;  %vm690_vm12 = vmor %vm600_vm6, %vm682_vm0 }
 0x1bc   : > { %v698_v27 = vsel %vm690_vm12, 1, %v4006_v16  ;;  %vm680_vm3 = vmand %vm606_vm1, %vm672_vm9 }
 0x1bd   : > { %721 = vperm.xlu0 %3919, %v698_v27   ;;  %vm688_vm11 = vmor %vm598_vm13, %vm680_vm3 }
 0x1be   : > { %v696_v29 = vsel %vm688_vm11, 1, %v4006_v16 }
 0x1bf   : > { %715 = vperm.xlu1 %3918, %v696_v29  }
 0x1c4   : > { %v855_v31 = vpop.f32.mrb[2].mxu1 }
 0x1c5   : > { %v3831_v33 = vpop.f32.mrb[3].mxu1  ;;  %v872_v35 = vrot.slane %v855_v31, %v4112_v18  ;;  %v865_v36 = vrot.slane %v855_v31, %v4129_v23  ;;  %v893_v37 = vrot.slane %v855_v31, %v4140_v28  ;;  %v879_v38 = vrot.slane %v855_v31, %v4117_v19 }
 0x1c6   : > { %v907_v39 = vrot.slane %v855_v31, %v4154_v32  ;;  %v886_v40 = vrot.slane %v855_v31, %v4124_v20  ;;  %v914_v42 = vrot.slane %v855_v31, %v4157_v34  ;;  %v900_v43 = vrot.slane %v855_v31, %v4145_v30 }
 0x1c7   : > { %874 = vbcast.lane.b32.xlu0 %v872_v35, 256  ;;  %867 = vbcast.lane.b32.xlu1 %v865_v36, 256 }
 0x1cb   : > { %895 = vbcast.lane.b32.xlu0 %v893_v37, 256  ;;  %881 = vbcast.lane.b32.xlu1 %v879_v38, 256 }
 0x1cf   : > { %909 = vbcast.lane.b32.xlu0 %v907_v39, 256  ;;  %888 = vbcast.lane.b32.xlu1 %v886_v40, 256 }
 0x1d3   : > { %916 = vbcast.lane.b32.xlu0 %v914_v42, 256  ;;  %902 = vbcast.lane.b32.xlu1 %v900_v43, 256 }
 0x1fb   : > { %v4262_v44 = vpop.xlane.xlu0 %1354 }
 0x1fc   : > { %v1360_v45 = vrot.slane %v4262_v44, %v4129_v23  ;;  %v1364_v46 = vrot.slane %v4262_v44, %v4112_v18  ;;  %v1376_v47 = vrot.slane %v4262_v44, %v4140_v28  ;;  %v1368_v56 = vrot.slane %v4262_v44, %v4117_v19 }
 0x1fd   : > { %v1372_v60 = vrot.slane %v4262_v44, %v4124_v20  ;;  %v1384_v62 = vrot.slane %v4262_v44, %v4154_v32  ;;  %v1380_v0 = vrot.slane %v4262_v44, %v4145_v30  ;;  %v1388_v2 = vrot.slane %v4262_v44, %v4157_v34 }
 0x1fe   : > { %vm1397_vm15 = vcmp.gt.f32.partialorder %v4262_v44, %v1360_v45  ;;  %vm1405_vm8 = vcmp.eq.f32.partialorder %v4262_v44, %v1360_v45  ;;  %vm1406_vm13 = vcmp.eq.f32.partialorder %v4262_v44, %v1364_v46  ;;  %vm1398_vm2 = vcmp.gt.f32.partialorder %v4262_v44, %v1364_v46 }
 0x1ff   : > { %v4275_v57 = vpop.xlane.xlu0 %2086  ;;  %vm1413_vm14 = vmand %vm1405_vm8, %vm667_vm10  ;;  %vm1409_vm1 = vcmp.eq.f32.partialorder %v4262_v44, %v1376_v47  ;;  %vm1401_vm12 = vcmp.gt.f32.partialorder %v4262_v44, %v1376_v47  ;;  %vm1407_vm11 = vcmp.eq.f32.partialorder %v4262_v44, %v1368_v56  ;;  %v4332_v11 = vpop.xlane.xlu1 %2818 }
 0x200   : > { %vm1421_vm6 = vmor %vm1397_vm15, %vm1413_vm14  ;;  %v2092_v58 = vrot.slane %v4275_v57, %v4129_v23  ;;  %vm5268_vm15 = vcmp.ne.s32.totalorder %v4188_v52, 0  ;;  %vm1399_vm14 = vcmp.gt.f32.partialorder %v4262_v44, %v1368_v56  ;;  %v2096_v5 = vrot.slane %v4275_v57, %v4112_v18 }
 0x201   : > { %v1429_v59 = vsel %vm1421_vm6, 1, %v4006_v16  ;;  %vm1414_vm0 = vmand %vm1406_vm13, %vm5262_vm4  ;;  %v2108_v7 = vrot.slane %v4275_v57, %v4140_v28  ;;  %v2100_v9 = vrot.slane %v4275_v57, %v4117_v19  ;;  %v2104_v13 = vrot.slane %v4275_v57, %v4124_v20 }
 0x202   : > { %1438 = vperm.xlu0 %3919, %v1429_v59   ;;  %vm1422_vm3 = vmor %vm1398_vm2, %vm1414_vm0  ;;  %vm2137_vm13 = vcmp.eq.f32.partialorder %v4275_v57, %v2092_v58  ;;  %vm5269_vm2 = vcmp.ne.s32.totalorder %v4184_v50, 0  ;;  %vm2129_vm4 = vcmp.gt.f32.partialorder %v4275_v57, %v2092_v58  ;;  %v2824_v15 = vrot.slane %v4332_v11, %v4129_v23 }
 0x203   : > { %v1430_v61 = vsel %vm1422_vm3, 1, %v4006_v16  ;;  %vm1417_vm8 = vmand %vm1409_vm1, %vm5268_vm15  ;;  %vm1408_vm1 = vcmp.eq.f32.partialorder %v4262_v44, %v1372_v60  ;;  %vm1400_vm15 = vcmp.gt.f32.partialorder %v4262_v44, %v1372_v60  ;;  %v2112_v21 = vrot.slane %v4275_v57, %v4145_v30 }
 0x204   : > { %1441 = vperm.xlu1 %3918, %v1430_v61   ;;  %vm1425_vm6 = vmor %vm1401_vm12, %vm1417_vm8  ;;  %v2116_v25 = vrot.slane %v4275_v57, %v4154_v32  ;;  %v2828_v27 = vrot.slane %v4332_v11, %v4112_v18  ;;  %v2120_v29 = vrot.slane %v4275_v57, %v4157_v34  ;;  %v2832_v49 = vrot.slane %v4332_v11, %v4117_v19 }
 0x205   : > { %v1433_v63 = vsel %vm1425_vm6, 1, %v4006_v16  ;;  %vm1415_vm0 = vmand %vm1407_vm11, %vm5269_vm2  ;;  %vm1411_vm11 = vcmp.eq.f32.partialorder %v4262_v44, %v1384_v62  ;;  %vm1403_vm6 = vcmp.gt.f32.partialorder %v4262_v44, %v1384_v62  ;;  %v2840_v35 = vrot.slane %v4332_v11, %v4140_v28 }
 0x206   : > { %1450 = vperm.xlu0 %3919, %v1433_v63   ;;  %vm1423_vm3 = vmor %vm1399_vm14, %vm1415_vm0  ;;  %v2836_v38 = vrot.slane %v4332_v11, %v4124_v20  ;;  %v2844_v42 = vrot.slane %v4332_v11, %v4145_v30 }
 0x207   : > { %v1431_v1 = vsel %vm1423_vm3, 1, %v4006_v16  ;;  %vm2145_vm12 = vmand %vm2137_vm13, %vm667_vm10  ;;  %vm1410_vm13 = vcmp.eq.f32.partialorder %v4262_v44, %v1380_v0  ;;  %vm1402_vm3 = vcmp.gt.f32.partialorder %v4262_v44, %v1380_v0 }
 0x208   : > { %1444 = vperm.xlu1 %3918, %v1431_v1   ;;  %vm2153_vm8 = vmor %vm2129_vm4, %vm2145_vm12  ;;  %vm5270_vm4 = vcmp.ne.s32.totalorder %v4192_v54, 0 }
 0x209   : > { %v2161_v3 = vsel %vm2153_vm8, 1, %v4006_v16  ;;  %vm1416_vm14 = vmand %vm1408_vm1, %vm670_vm5  ;;  %vm1412_vm1 = vcmp.eq.f32.partialorder %v4262_v44, %v1388_v2  ;;  %vm1404_vm8 = vcmp.gt.f32.partialorder %v4262_v44, %v1388_v2 }
 0x20a   : > { %2170 = vperm.xlu0 %3919, %v2161_v3   ;;  %vm1424_vm2 = vmor %vm1400_vm15, %vm1416_vm14 }
 0x20b   : > { %v1432_v6 = vsel %vm1424_vm2, 1, %v4006_v16  ;;  %vm1419_vm0 = vmand %vm1411_vm11, %vm5270_vm4  ;;  %vm2138_vm11 = vcmp.eq.f32.partialorder %v4275_v57, %v2096_v5  ;;  %vm2130_vm2 = vcmp.gt.f32.partialorder %v4275_v57, %v2096_v5  ;;  %vm2141_vm4 = vcmp.eq.f32.partialorder %v4275_v57, %v2108_v7 }
 0x20c   : > { %1447 = vperm.xlu1 %3918, %v1432_v6   ;;  %vm1427_vm12 = vmor %vm1403_vm6, %vm1419_vm0  ;;  %vm5271_vm0 = vcmp.ne.s32.totalorder %v4180_v48, 0 }
 0x20d   : > { %v1435_v8 = vsel %vm1427_vm12, 1, %v4006_v16  ;;  %vm1418_vm15 = vmand %vm1410_vm13, %vm672_vm9  ;;  %vm2133_vm12 = vcmp.gt.f32.partialorder %v4275_v57, %v2108_v7 }
 0x20e   : > { %1456 = vperm.xlu0 %3919, %v1435_v8   ;;  %vm1426_vm14 = vmor %vm1402_vm3, %vm1418_vm15 }
 0x20f   : > { %v1434_v12 = vsel %vm1426_vm14, 1, %v4006_v16  ;;  %vm1420_vm6 = vmand %vm1412_vm1, %vm674_vm7  ;;  %vm2139_vm1 = vcmp.eq.f32.partialorder %v4275_v57, %v2100_v9 }
 0x210   : > { %1453 = vperm.xlu1 %3918, %v1434_v12   ;;  %vm1428_vm13 = vmor %vm1404_vm8, %vm1420_vm6  ;;  %vm5272_vm8 = vcmp.ne.s32.totalorder %v4188_v52, 0  ;;  %vm2131_vm6 = vcmp.gt.f32.partialorder %v4275_v57, %v2100_v9 }
 0x211   : > { %v1436_v14 = vsel %vm1428_vm13, 1, %v4006_v16  ;;  %vm2146_vm3 = vmand %vm2138_vm11, %vm5271_vm0  ;;  %vm2140_vm11 = vcmp.eq.f32.partialorder %v4275_v57, %v2104_v13 }
 0x212   : > { %1459 = vperm.xlu0 %3919, %v1436_v14   ;;  %vm2154_vm15 = vmor %vm2130_vm2, %vm2146_vm3  ;;  %vm5273_vm2 = vcmp.ne.s32.totalorder %v4184_v50, 0  ;;  %vm2132_vm3 = vcmp.gt.f32.partialorder %v4275_v57, %v2104_v13 }
 0x213   : > { %v2162_v17 = vsel %vm2154_vm15, 1, %v4006_v16  ;;  %vm2149_vm14 = vmand %vm2141_vm4, %vm5272_vm8  ;;  %vm2869_vm4 = vcmp.eq.f32.partialorder %v4332_v11, %v2824_v15  ;;  %vm2861_vm8 = vcmp.gt.f32.partialorder %v4332_v11, %v2824_v15 }
 0x214   : > { %2173 = vperm.xlu1 %3918, %v2162_v17   ;;  %vm2157_vm13 = vmor %vm2133_vm12, %vm2149_vm14 }
 0x215   : > { %v2165_v24 = vsel %vm2157_vm13, 1, %v4006_v16  ;;  %vm2147_vm0 = vmand %vm2139_vm1, %vm5273_vm2  ;;  %vm2142_vm1 = vcmp.eq.f32.partialorder %v4275_v57, %v2112_v21  ;;  %vm2134_vm13 = vcmp.gt.f32.partialorder %v4275_v57, %v2112_v21 }
 0x216   : > { %2182 = vperm.xlu0 %3919, %v2165_v24   ;;  %vm2155_vm15 = vmor %vm2131_vm6, %vm2147_vm0  ;;  %vm2143_vm0 = vcmp.eq.f32.partialorder %v4275_v57, %v2116_v25 }
 0x217   : > { %v2163_v26 = vsel %vm2155_vm15, 1, %v4006_v16  ;;  %vm2148_vm12 = vmand %vm2140_vm11, %vm670_vm5  ;;  %vm2870_vm15 = vcmp.eq.f32.partialorder %v4332_v11, %v2828_v27 }
 0x218   : > { %2176 = vperm.xlu1 %3918, %v2163_v26   ;;  %vm2156_vm14 = vmor %vm2132_vm3, %vm2148_vm12  ;;  %vm2135_vm3 = vcmp.gt.f32.partialorder %v4275_v57, %v2116_v25 }
 0x219   : > { %vm2877_vm6 = vmand %vm2869_vm4, %vm667_vm10  ;;  %v2164_v31 = vsel %vm2156_vm14, 1, %v4006_v16  ;;  %vm5274_vm4 = vcmp.ne.s32.totalorder %v4192_v54, 0 }
 0x21a   : > { %vm2885_vm2 = vmor %vm2861_vm8, %vm2877_vm6  ;;  %vm2862_vm8 = vcmp.gt.f32.partialorder %v4332_v11, %v2828_v27  ;;  %vm2144_vm6 = vcmp.eq.f32.partialorder %v4275_v57, %v2120_v29 }
 0x21b   : > { %v2893_v33 = vsel %vm2885_vm2, 1, %v4006_v16  ;;  %vm2150_vm11 = vmand %vm2142_vm1, %vm672_vm9  ;;  %vm5275_vm1 = vcmp.ne.s32.totalorder %v4180_v48, 0  ;;  %vm2136_vm2 = vcmp.gt.f32.partialorder %v4275_v57, %v2120_v29  ;;  %v2848_v48 = vrot.slane %v4332_v11, %v4154_v32 }
 0x21c   : > { %2179 = vperm.xlu1 %3918, %v2164_v31   ;;  %2902 = vperm.xlu0 %3919, %v2893_v33   ;;  %vm2158_vm10 = vmor %vm2134_vm13, %vm2150_vm11  ;;  %vm2871_vm11 = vcmp.eq.f32.partialorder %v4332_v11, %v2832_v49 }
 0x21d   : > { %vm2151_vm12 = vmand %vm2143_vm0, %vm5274_vm4  ;;  %v2166_v36 = vsel %vm2158_vm10, 1, %v4006_v16  ;;  %vm2863_vm10 = vcmp.gt.f32.partialorder %v4332_v11, %v2832_v49 }
 0x21e   : > { %vm2159_vm14 = vmor %vm2135_vm3, %vm2151_vm12  ;;  %vm2873_vm12 = vcmp.eq.f32.partialorder %v4332_v11, %v2840_v35 }
 0x21f   : > { %v2167_v37 = vsel %vm2159_vm14, 1, %v4006_v16  ;;  %vm2878_vm13 = vmand %vm2870_vm15, %vm5275_vm1  ;;  %vm5276_vm15 = vcmp.ne.s32.totalorder %v4184_v50, 0  ;;  %vm2865_vm14 = vcmp.gt.f32.partialorder %v4332_v11, %v2840_v35  ;;  %vm2872_vm1 = vcmp.eq.f32.partialorder %v4332_v11, %v2836_v38 }
 0x220   : > { %2185 = vperm.xlu1 %3918, %v2166_v36   ;;  %2188 = vperm.xlu0 %3919, %v2167_v37   ;;  %vm2886_vm0 = vmor %vm2862_vm8, %vm2878_vm13  ;;  %vm5277_vm13 = vcmp.ne.s32.totalorder %v4188_v52, 0  ;;  %v2852_v50 = vrot.slane %v4332_v11, %v4157_v34 }
 0x221   : > { %vm2152_vm3 = vmand %vm2144_vm6, %vm674_vm7  ;;  %v2894_v39 = vsel %vm2886_vm0, 1, %v4006_v16  ;;  %vm2864_vm0 = vcmp.gt.f32.partialorder %v4332_v11, %v2836_v38 }
 0x222   : > { %vm2160_vm4 = vmor %vm2136_vm2, %vm2152_vm3 }
 0x223   : > { %v2168_v40 = vsel %vm2160_vm4, 1, %v4006_v16  ;;  %vm2879_vm8 = vmand %vm2871_vm11, %vm5276_vm15  ;;  %vm2875_vm4 = vcmp.eq.f32.partialorder %v4332_v11, %v2848_v48  ;;  %vm2874_vm15 = vcmp.eq.f32.partialorder %v4332_v11, %v2844_v42 }
 0x224   : > { %2905 = vperm.xlu1 %3918, %v2894_v39   ;;  %2191 = vperm.xlu0 %3919, %v2168_v40   ;;  %vm2887_vm6 = vmor %vm2863_vm10, %vm2879_vm8  ;;  %vm2867_vm10 = vcmp.gt.f32.partialorder %v4332_v11, %v2848_v48  ;;  %vm5278_vm8 = vcmp.ne.s32.totalorder %v4192_v54, 0 }
 0x225   : > { %vm2881_vm2 = vmand %vm2873_vm12, %vm5277_vm13  ;;  %v2895_v43 = vsel %vm2887_vm6, 1, %v4006_v16  ;;  %vm2866_vm13 = vcmp.gt.f32.partialorder %v4332_v11, %v2844_v42  ;;  %vm2876_vm6 = vcmp.eq.f32.partialorder %v4332_v11, %v2852_v50 }
 0x226   : > { %vm2889_vm3 = vmor %vm2865_vm14, %vm2881_vm2 }
 0x227   : > { %v2897_v44 = vsel %vm2889_vm3, 1, %v4006_v16  ;;  %vm2880_vm11 = vmand %vm2872_vm1, %vm670_vm5 }
 0x228   : > { %2908 = vperm.xlu1 %3918, %v2895_v43   ;;  %2914 = vperm.xlu0 %3919, %v2897_v44   ;;  %vm2888_vm12 = vmor %vm2864_vm0, %vm2880_vm11  ;;  %vm2868_vm0 = vcmp.gt.f32.partialorder %v4332_v11, %v2852_v50  ;;  %vm759_vm11 = vcmask 1043459  }
 0x229   : > { %vm2883_vm14 = vmand %vm2875_vm4, %vm5278_vm8  ;;  %v2896_v52 = vsel %vm2888_vm12, 1, %v4006_v16  ;;  %vm763_vm12 = vcmask 1045509   ;;  %vm767_vm8 = vcmask 1047559  }
 0x22a   : > { %vm2891_vm2 = vmor %vm2867_vm10, %vm2883_vm14  ;;  %vm761_vm10 = vcmask 1044484   ;;  %vm5279_vm14 = vcmask 64512  }
 0x22b   : > { %v2899_v51 = vsel %vm2891_vm2, 1, %v4006_v16  ;;  %vm2882_vm5 = vmand %vm2874_vm15, %vm672_vm9  ;;  %vm755_vm9 = vcmask 1041409   ;;  %vm765_vm15 = vcmask 1046534  }
 0x22c   : > { %2911 = vperm.xlu1 %3918, %v2896_v52   ;;  %2920 = vperm.xlu0 %3919, %v2899_v51   ;;  %vm2890_vm1 = vmor %vm2866_vm13, %vm2882_vm5 }
 0x22d   : > { %vm2884_vm3 = vmand %vm2876_vm6, %vm674_vm7  ;;  %v2898_v54 = vsel %vm2890_vm1, 1, %v4006_v16  ;;  %vm757_vm7 = vcmask 1042434  }
 0x22e   : > { %vm2892_vm4 = vmor %vm2868_vm0, %vm2884_vm3 }
 0x22f   : > { %v2900_v47 = vsel %vm2892_vm4, 1, %v4006_v16  ;;  %vm5280_vm13 = vmmov %vm5279_vm14 }
 0x230   : > { %2917 = vperm.xlu1 %3918, %v2898_v54   ;;  %v704_v45 = vpop.permute.xlu0 %703  ;;  %vm5281_vm2 = vmmov %vm5280_vm13 }
 0x231   : > { %v730_v57 = vrot.slane %v704_v45, %v4127_v22  ;;  %vm5282_vm6 = vmmov %vm5281_vm2 }
 0x232   : > { %v701_v46 = vpop.permute.xlu1 %700  ;;  %vm5285_vm4 = vmmov %vm5281_vm2 }
 0x233   : > { %v726_v58 = vrot.slane %v701_v46, %v4127_v22 }
 0x234   : > { %2923 = vperm.xlu1 %3918, %v2900_v47   ;;  %v713_v56 = vpop.permute.xlu0 %712 }
 0x235   : > { %v756_v63 = vsel %vm755_vm9, %v730_v57, %v726_v58  ;;  %v742_v5 = vrot.slane %v713_v56, %v4127_v22 }
 0x236   : > { %v707_v53 = vpop.permute.xlu1 %706 }
 0x237   : > { %v734_v59 = vrot.slane %v707_v53, %v4127_v22 }
 0x238   : > { %v1588_v55 = vpop.f32.mrb[2].mxu0  ;;  %v719_v60 = vpop.permute.xlu0 %718 }
 0x239   : > { %v3841_v61 = vpop.f32.mrb[3].mxu0  ;;  %v758_v0 = vsel %vm757_vm7, %v734_v59, %v756_v63  ;;  %v750_v9 = vrot.slane %v719_v60, %v4127_v22  ;;  %v1598_v31 = vrot.slane %v1588_v55, %v4129_v23  ;;  %v1626_v33 = vrot.slane %v1588_v55, %v4140_v28 }
 0x23a   : > { %v710_v62 = vpop.permute.xlu1 %709  ;;  %v1605_v49 = vrot.slane %v1588_v55, %v4112_v18  ;;  %v1640_v35 = vrot.slane %v1588_v55, %v4154_v32  ;;  %v1612_v37 = vrot.slane %v1588_v55, %v4117_v19  ;;  %v1647_v38 = vrot.slane %v1588_v55, %v4157_v34 }
 0x23b   : > { %v738_v16 = vrot.slane %v710_v62, %v4127_v22  ;;  %v1619_v39 = vrot.slane %v1588_v55, %v4124_v20  ;;  %v1633_v43 = vrot.slane %v1588_v55, %v4145_v30 }
 0x23c   : > { %v4442_v1 = vpop.f32.mrb[4].mxu0  ;;  %v722_v6 = vpop.permute.xlu0 %721 }
 0x23d   : > { %v760_v2 = vsel %vm759_vm11, %v738_v16, %v758_v0  ;;  %v3851_v3 = vpop.f32.mrb[5].mxu0  ;;  %v754_v13 = vrot.slane %v722_v6, %v4127_v22  ;;  %v2330_v40 = vrot.slane %v4442_v1, %v4129_v23  ;;  %v2358_v44 = vrot.slane %v4442_v1, %v4140_v28 }
 0x23e   : > { %v716_v7 = vpop.permute.xlu1 %715  ;;  %v762_v11 = vsel %vm761_vm10, %v742_v5, %v760_v2  ;;  %v2337_v51 = vrot.slane %v4442_v1, %v4112_v18  ;;  %v2372_v54 = vrot.slane %v4442_v1, %v4154_v32  ;;  %v2344_v46 = vrot.slane %v4442_v1, %v4117_v19 }
 0x23f   : > { %v746_v8 = vrot.slane %v716_v7, %v4127_v22  ;;  %v2379_v47 = vrot.slane %v4442_v1, %v4157_v34  ;;  %v2351_v57 = vrot.slane %v4442_v1, %v4124_v20  ;;  %v2365_v60 = vrot.slane %v4442_v1, %v4145_v30 }
 0x240   : > { %v4449_v12 = vpop.f32.mrb[6].mxu0  ;;  %v4460_v36 = vpop.permute.xlu0 %874 }
 0x241   : > { %v764_v14 = vsel %vm763_vm12, %v746_v8, %v762_v11  ;;  %v3861_v15 = vpop.f32.mrb[7].mxu0  ;;  %v3062_v58 = vrot.slane %v4449_v12, %v4129_v23  ;;  %v3090_v61 = vrot.slane %v4449_v12, %v4140_v28  ;;  %v3069_v16 = vrot.slane %v4449_v12, %v4112_v18 }
 0x242   : > { %v766_v17 = vsel %vm765_vm15, %v750_v9, %v764_v14  ;;  %v4464_v48 = vpop.permute.xlu1 %867  ;;  %v3104_v0 = vrot.slane %v4449_v12, %v4154_v32  ;;  %v3076_v1 = vrot.slane %v4449_v12, %v4117_v19  ;;  %v3083_v11 = vrot.slane %v4449_v12, %v4124_v20 }
 0x243   : > { %v768_v21 = vsel %vm767_vm8, %v754_v13, %v766_v17 }
 0x244   : > { %v769_v24 = vsel %vm5279_vm14, %v768_v21, 0  ;;  %v4469_v42 = vpop.permute.xlu0 %895  ;;  %vm5286_vm14 = vmmov %vm5281_vm2 }
 0x245   : > { %v771_v25 = vshrl.u32 %v769_v24, 16  ;;  %v770_v27 = vand.u32 65535, %v769_v24  ;;  %v3097_v24 = vrot.slane %v4449_v12, %v4145_v30 }
 0x246   : > { %v4471_v50 = vpop.permute.xlu1 %881 }
 0x247   : > { %v773_v26 = vcvt.s32.f32 %v771_v25  ;;  %v772_v29 = vcvt.s32.f32 %v770_v27 }
 0x248   : > { %v4476_v52 = vpop.permute.xlu0 %909 }
 0x24a   : > { %v4482_v45 = vpop.permute.xlu1 %888 }
 0x24b   : > { %776 = vadd.xlane.f32.xlu0 %v773_v26 }
 0x24c   : > { %v4488_v56 = vpop.permute.xlu0 %916 }
 0x24e   : > { %v4490_v53 = vpop.permute.xlu1 %902 }
 0x258   : > { %774 = vadd.xlane.f32.xlu1 %v772_v29 }
 0x261   : > { %1600 = vbcast.lane.b32.xlu0 %v1598_v31, 256 }
 0x265   : > { %1628 = vbcast.lane.b32.xlu0 %v1626_v33, 256 }
 0x269   : > { %1607 = vbcast.lane.b32.xlu1 %v1605_v49, 256  ;;  %1642 = vbcast.lane.b32.xlu0 %v1640_v35, 256  ;;  %v3111_v35 = vrot.slane %v4449_v12, %v4157_v34 }
 0x26d   : > { %1614 = vbcast.lane.b32.xlu1 %v1612_v37, 256  ;;  %1649 = vbcast.lane.b32.xlu0 %v1647_v38, 256 }
 0x271   : > { %1621 = vbcast.lane.b32.xlu1 %v1619_v39, 256  ;;  %2332 = vbcast.lane.b32.xlu0 %v2330_v40, 256 }
 0x275   : > { %1635 = vbcast.lane.b32.xlu1 %v1633_v43, 256  ;;  %2360 = vbcast.lane.b32.xlu0 %v2358_v44, 256 }
 0x279   : > { %2339 = vbcast.lane.b32.xlu1 %v2337_v51, 256  ;;  %2374 = vbcast.lane.b32.xlu0 %v2372_v54, 256 }
 0x27d   : > { %2346 = vbcast.lane.b32.xlu1 %v2344_v46, 256  ;;  %2381 = vbcast.lane.b32.xlu0 %v2379_v47, 256 }
 0x281   : > { %2353 = vbcast.lane.b32.xlu1 %v2351_v57, 256  ;;  %3064 = vbcast.lane.b32.xlu0 %v3062_v58, 256  ;;  %v1439_v59 = vpop.permute.xlu0 %1438 }
 0x282   : > { %v1464_v6 = vrot.slane %v1439_v59, %v4127_v22 }
 0x283   : > { %v1442_v55 = vpop.permute.xlu1 %1441 }
 0x284   : > { %v1468_v7 = vrot.slane %v1442_v55, %v4127_v22 }
 0x285   : > { %2367 = vbcast.lane.b32.xlu1 %v2365_v60, 256  ;;  %3092 = vbcast.lane.b32.xlu0 %v3090_v61, 256  ;;  %v1451_v62 = vpop.permute.xlu0 %1450 }
 0x286   : > { %v1493_v15 = vsel %vm755_vm9, %v1468_v7, %v1464_v6  ;;  %v1480_v27 = vrot.slane %v1451_v62, %v4127_v22 }
 0x287   : > { %v1445_v63 = vpop.permute.xlu1 %1444 }
 0x288   : > { %v1472_v8 = vrot.slane %v1445_v63, %v4127_v22 }
 0x289   : > { %3071 = vbcast.lane.b32.xlu1 %v3069_v16, 256  ;;  %3106 = vbcast.lane.b32.xlu0 %v3104_v0, 256  ;;  %v2171_v2 = vpop.permute.xlu0 %2170 }
 0x28a   : > { %v1494_v17 = vsel %vm757_vm7, %v1472_v8, %v1493_v15  ;;  %v2196_v43 = vrot.slane %v2171_v2, %v4127_v22 }
 0x28b   : > { %v1448_v3 = vpop.permute.xlu1 %1447 }
 0x28c   : > { %v1476_v13 = vrot.slane %v1448_v3, %v4127_v22 }
 0x28d   : > { %3078 = vbcast.lane.b32.xlu1 %v3076_v1, 256  ;;  %v1457_v5 = vpop.permute.xlu0 %1456 }
 0x28e   : > { %v1495_v25 = vsel %vm759_vm11, %v1476_v13, %v1494_v17  ;;  %v1488_v31 = vrot.slane %v1457_v5, %v4127_v22 }
 0x28f   : > { %v1454_v9 = vpop.permute.xlu1 %1453  ;;  %v1496_v33 = vsel %vm761_vm10, %v1480_v27, %v1495_v25 }
 0x290   : > { %v1484_v26 = vrot.slane %v1454_v9, %v4127_v22 }
 0x291   : > { %3085 = vbcast.lane.b32.xlu1 %v3083_v11, 256  ;;  %v1460_v14 = vpop.permute.xlu0 %1459 }
 0x292   : > { %v1497_v37 = vsel %vm763_vm12, %v1484_v26, %v1496_v33  ;;  %v1492_v38 = vrot.slane %v1460_v14, %v4127_v22 }
 0x293   : > { %v2174_v21 = vpop.permute.xlu1 %2173  ;;  %v1498_v54 = vsel %vm765_vm15, %v1488_v31, %v1497_v37 }
 0x294   : > { %v2200_v39 = vrot.slane %v2174_v21, %v4127_v22  ;;  %v1499_v12 = vsel %vm767_vm8, %v1492_v38, %v1498_v54 }
 0x295   : > { %3099 = vbcast.lane.b32.xlu1 %v3097_v24, 256  ;;  %v2183_v29 = vpop.permute.xlu0 %2182  ;;  %v1500_v61 = vsel %vm5280_vm13, %v1499_v12, 0  ;;  %vm5287_vm13 = vmmov %vm5281_vm2 }
 0x296   : > { %v2225_v46 = vsel %vm755_vm9, %v2200_v39, %v2196_v43  ;;  %v2212_v59 = vrot.slane %v2183_v29, %v4127_v22  ;;  %v1502_v2 = vshrl.u32 %v1500_v61, 16  ;;  %v1501_v8 = vand.u32 65535, %v1500_v61 }
 0x297   : > { %v2177_v49 = vpop.permute.xlu1 %2176 }
 0x298   : > { %v2204_v40 = vrot.slane %v2177_v49, %v4127_v22  ;;  %v1504_v7 = vcvt.s32.f32 %v1502_v2  ;;  %v1503_v24 = vcvt.s32.f32 %v1501_v8 }
 0x299   : > { %3113 = vbcast.lane.b32.xlu1 %v3111_v35, 256 }
 0x29a   : > { %v2226_v57 = vsel %vm757_vm7, %v2204_v40, %v2225_v46 }
 0x29b   : > { %v2903_v44 = vpop.permute.xlu0 %2902  ;;  %v2180_v51 = vpop.permute.xlu1 %2179 }
 0x29c   : > { %v2208_v47 = vrot.slane %v2180_v51, %v4127_v22  ;;  %v2928_v17 = vrot.slane %v2903_v44, %v4127_v22 }
 0x29e   : > { %v2227_v58 = vsel %vm759_vm11, %v2208_v47, %v2226_v57 }
 0x29f   : > { %v2189_v55 = vpop.permute.xlu0 %2188  ;;  %v2186_v60 = vpop.permute.xlu1 %2185  ;;  %v2228_v16 = vsel %vm761_vm10, %v2212_v59, %v2227_v58 }
 0x2a0   : > { %v2216_v62 = vrot.slane %v2186_v60, %v4127_v22  ;;  %v2220_v63 = vrot.slane %v2189_v55, %v4127_v22 }
 0x2a2   : > { %v2229_v0 = vsel %vm763_vm12, %v2216_v62, %v2228_v16 }
 0x2a3   : > { %v2192_v3 = vpop.permute.xlu0 %2191  ;;  %v2906_v1 = vpop.permute.xlu1 %2905  ;;  %v2230_v6 = vsel %vm765_vm15, %v2220_v63, %v2229_v0 }
 0x2a4   : > { %v2224_v5 = vrot.slane %v2192_v3, %v4127_v22  ;;  %v2932_v14 = vrot.slane %v2906_v1, %v4127_v22 }
 0x2a6   : > { %v2231_v9 = vsel %vm767_vm8, %v2224_v5, %v2230_v6  ;;  %v2957_v27 = vsel %vm755_vm9, %v2932_v14, %v2928_v17 }
 0x2a7   : > { %v2909_v11 = vpop.permute.xlu1 %2908  ;;  %v2232_v13 = vsel %vm5281_vm2, %v2231_v9, 0  ;;  %v2915_v21 = vpop.permute.xlu0 %2914 }
 0x2a8   : > { %1507 = vadd.xlane.f32.xlu0 %v1504_v7  ;;  %v2936_v15 = vrot.slane %v2909_v11, %v4127_v22  ;;  %v2233_v25 = vand.u32 65535, %v2232_v13  ;;  %v2944_v35 = vrot.slane %v2915_v21, %v4127_v22  ;;  %v2234_v57 = vshrl.u32 %v2232_v13, 16 }
 0x2aa   : > { %v2958_v31 = vsel %vm757_vm7, %v2936_v15, %v2957_v27  ;;  %v2235_v49 = vcvt.s32.f32 %v2233_v25  ;;  %v2236_v55 = vcvt.s32.f32 %v2234_v57 }
 0x2ab   : > { %v2912_v26 = vpop.permute.xlu1 %2911  ;;  %v2921_v38 = vpop.permute.xlu0 %2920 }
 0x2ac   : > { %v2940_v29 = vrot.slane %v2912_v26, %v4127_v22  ;;  %1505 = vadd.xlane.f32.xlu0 %v1503_v24  ;;  %v2952_v44 = vrot.slane %v2921_v38, %v4127_v22 }
 0x2ae   : > { %v2959_v33 = vsel %vm759_vm11, %v2940_v29, %v2958_v31 }
 0x2af   : > { %v2918_v37 = vpop.permute.xlu1 %2917  ;;  %v2960_v40 = vsel %vm761_vm10, %v2944_v35, %v2959_v33 }
 0x2b0   : > { %v2948_v39 = vrot.slane %v2918_v37, %v4127_v22  ;;  %2237 = vadd.xlane.f32.xlu0 %v2235_v49 }
 0x2b2   : > { %v2961_v43 = vsel %vm763_vm12, %v2948_v39, %v2960_v40 }
 0x2b3   : > { %v2924_v51 = vpop.permute.xlu1 %2923  ;;  %v2962_v46 = vsel %vm765_vm15, %v2952_v44, %v2961_v43 }
 0x2b4   : > { %v2956_v54 = vrot.slane %v2924_v51, %v4127_v22 }
 0x2b6   : > { %v2963_v47 = vsel %vm767_vm8, %v2956_v54, %v2962_v46 }
 0x2b7   : > { %v2964_v12 = vsel %vm5282_vm6, %v2963_v47, 0  ;;  %vm5288_vm6 = vmmov %vm5281_vm2 }
 0x2b8   : > { %v2965_v58 = vand.u32 65535, %v2964_v12  ;;  %v2966_v60 = vshrl.u32 %v2964_v12, 16 }
 0x2ba   : > { %v2967_v59 = vcvt.s32.f32 %v2965_v58  ;;  %v2968_v61 = vcvt.s32.f32 %v2966_v60 }
 0x2bc   : > { %2969 = vadd.xlane.f32.xlu0 %v2967_v59 }
 0x2bd   : > { %2239 = vadd.xlane.f32.xlu1 %v2236_v55 }
 0x2c1   : > { %2971 = vadd.xlane.f32.xlu1 %v2968_v61 }
 0x2d8   : > { %v777_v62 = vpop.xlane.xlu0 %776 }
 0x2d9   : > { %v779_v63 = vcvt.f32.s32 %v777_v62 }
 0x2db   : > { %v780_v0 = vshll.u32 %v779_v63, 16 }
 0x2e5   : > { %v775_v16 = vpop.xlane.xlu1 %774 }
 0x2e6   : > { %v778_v2 = vcvt.f32.s32 %v775_v16 }
 0x2e8   : > { %v4560_v3 = vadd.s32 %v780_v0, %v778_v2 }
 0x2ea   : > { %5283 = vst [vmem:[#allocation2_spill] sm:$0xff] %v4560_v3  ;;  %vm782_vm5 = vcmp.lt.s32.totalorder %v4560_v3, 4 }
 0x2eb   : > { %v4566_v1 = vsel %vm782_vm5, %v4460_v36, -1e+30  ;;  %v4571_v5 = vsel %vm782_vm5, %v4464_v48, -1e+30  ;;  %v4578_v6 = vsel %vm782_vm5, %v4482_v45, -1e+30 }
 0x2ec   : > { %946 = vperm.xlu1 %3918, %v4566_v1   ;;  %943 = vperm.xlu0 %3919, %v4571_v5   ;;  %v4583_v7 = vsel %vm782_vm5, %v4471_v50, -1e+30  ;;  %v4590_v36 = vsel %vm782_vm5, %v4490_v53, -1e+30  ;;  %v4595_v48 = vsel %vm782_vm5, %v4469_v42, -1e+30  ;;  %v1601_v50 = vpop.permute.xlu0 %1600  ;;  %v1608_v42 = vpop.permute.xlu1 %1607 }
 0x2ed   : > { %v4602_v45 = vsel %vm782_vm5, %v4476_v52, -1e+30  ;;  %v4608_v53 = vsel %vm782_vm5, %v4488_v56, -1e+30 }
 0x2f0   : > { %952 = vperm.xlu1 %3918, %v4578_v6   ;;  %949 = vperm.xlu0 %3919, %v4583_v7   ;;  %v1629_v8 = vpop.permute.xlu0 %1628  ;;  %v1615_v11 = vpop.permute.xlu1 %1614 }
 0x2f4   : > { %958 = vperm.xlu1 %3918, %v4590_v36   ;;  %955 = vperm.xlu0 %3919, %v4595_v48   ;;  %v1643_v9 = vpop.permute.xlu0 %1642  ;;  %v1622_v14 = vpop.permute.xlu1 %1621 }
 0x2f8   : > { %961 = vperm.xlu0 %3919, %v4602_v45   ;;  %v1650_v13 = vpop.permute.xlu0 %1649  ;;  %v1636_v17 = vpop.permute.xlu1 %1635 }
 0x2fc   : > { %964 = vperm.xlu0 %3919, %v4608_v53   ;;  %v2333_v15 = vpop.permute.xlu0 %2332  ;;  %v2340_v52 = vpop.permute.xlu1 %2339 }
 0x300   : > { %v2361_v21 = vpop.permute.xlu0 %2360  ;;  %v2347_v25 = vpop.permute.xlu1 %2346 }
 0x304   : > { %v4611_v24 = vpop.permute.xlu0 %2374  ;;  %v2354_v27 = vpop.permute.xlu1 %2353 }
 0x308   : > { %v4613_v26 = vpop.permute.xlu0 %2381  ;;  %v2368_v56 = vpop.permute.xlu1 %2367 }
 0x30c   : > { %v3065_v29 = vpop.permute.xlu0 %3064  ;;  %v3072_v33 = vpop.permute.xlu1 %3071 }
 0x310   : > { %v4615_v31 = vpop.permute.xlu0 %3092  ;;  %v3079_v35 = vpop.permute.xlu1 %3078 }
 0x314   : > { %v4617_v49 = vpop.permute.xlu0 %3106  ;;  %v3086_v40 = vpop.permute.xlu1 %3085 }
 0x318   : > { %v3100_v47 = vpop.permute.xlu1 %3099 }
 0x31c   : > { %v3114_v58 = vpop.permute.xlu1 %3113 }
 0x335   : > { %v1508_v37 = vpop.xlane.xlu0 %1507 }
 0x336   : > { %v1510_v38 = vcvt.f32.s32 %v1508_v37 }
 0x338   : > { %v1511_v43 = vshll.u32 %v1510_v38, 16 }
 0x339   : > { %v1506_v39 = vpop.xlane.xlu0 %1505 }
 0x33a   : > { %v1509_v44 = vcvt.f32.s32 %v1506_v39 }
 0x33c   : > { %v4619_v51 = vadd.s32 %v1511_v43, %v1509_v44 }
 0x33d   : > { %v2238_v55 = vpop.xlane.xlu0 %2237 }
 0x33e   : > { %vm1513_vm1 = vcmp.lt.s32.totalorder %v4619_v51, 4  ;;  %v2241_v63 = vcvt.f32.s32 %v2238_v55 }
 0x33f   : > { %v4624_v54 = vsel %vm1513_vm1, %v1608_v42, -1e+30  ;;  %v4628_v46 = vsel %vm1513_vm1, %v1601_v50, -1e+30  ;;  %v4634_v12 = vsel %vm1513_vm1, %v1615_v11, -1e+30 }
 0x340   : > { %1679 = vperm.xlu1 %3918, %v4624_v54   ;;  %1676 = vperm.xlu0 %3919, %v4628_v46   ;;  %v4638_v57 = vsel %vm1513_vm1, %v1629_v8, -1e+30  ;;  %v4644_v59 = vsel %vm1513_vm1, %v1622_v14, -1e+30  ;;  %v4649_v62 = vsel %vm1513_vm1, %v1636_v17, -1e+30 }
 0x341   : > { %v4671_v17 = vsel %vm1513_vm1, %v1643_v9, -1e+30  ;;  %v4681_v38 = vsel %vm1513_vm1, %v1650_v13, -1e+30 }
 0x344   : > { %1682 = vperm.xlu1 %3918, %v4634_v12   ;;  %1688 = vperm.xlu0 %3919, %v4638_v57  }
 0x348   : > { %1685 = vperm.xlu1 %3918, %v4644_v59  }
 0x349   : > { %v2970_v11 = vpop.xlane.xlu0 %2969 }
 0x34a   : > { %v2240_v60 = vpop.xlane.xlu1 %2239 }
 0x34b   : > { %v2242_v61 = vcvt.f32.s32 %v2240_v60 }
 0x34c   : > { %1691 = vperm.xlu1 %3918, %v4649_v62  }
 0x34d   : > { %v2243_v16 = vshll.u32 %v2242_v61, 16 }
 0x34e   : > { %v2972_v2 = vpop.xlane.xlu1 %2971 }
 0x34f   : > { %v4652_v0 = vadd.s32 %v2243_v16, %v2241_v63  ;;  %v2974_v42 = vcvt.f32.s32 %v2972_v2 }
 0x351   : > { %vm2245_vm0 = vcmp.lt.s32.totalorder %v4652_v0, 4 }
 0x352   : > { %v4657_v50 = vsel %vm2245_vm0, %v2340_v52, -1e+30  ;;  %v4661_v8 = vsel %vm2245_vm0, %v2333_v15, -1e+30  ;;  %v4667_v14 = vsel %vm2245_vm0, %v2347_v25, -1e+30  ;;  %v2973_v15 = vcvt.f32.s32 %v2970_v11 }
 0x353   : > { %2411 = vperm.xlu1 %3918, %v4657_v50   ;;  %2408 = vperm.xlu0 %3919, %v4661_v8   ;;  %v2975_v52 = vshll.u32 %v2974_v42, 16  ;;  %v4677_v37 = vsel %vm2245_vm0, %v2354_v27, -1e+30  ;;  %v4689_v9 = vsel %vm2245_vm0, %v2368_v56, -1e+30 }
 0x354   : > { %v4693_v39 = vsel %vm2245_vm0, %v2361_v21, -1e+30  ;;  %v4715_v56 = vsel %vm2245_vm0, %v4611_v24, -1e+30 }
 0x355   : > { %v4683_v25 = vadd.s32 %v2975_v52, %v2973_v15 }
 0x357   : > { %2414 = vperm.xlu1 %3918, %v4667_v14   ;;  %1694 = vperm.xlu0 %3919, %v4671_v17   ;;  %5284 = vst [vmem:[#allocation3_spill] sm:$0xff] %v4683_v25  ;;  %vm2977_vm3 = vcmp.lt.s32.totalorder %v4683_v25, 4 }
 0x358   : > { %v4700_v13 = vsel %vm2977_vm3, %v3072_v33, -1e+30  ;;  %v4704_v27 = vsel %vm2977_vm3, %v3065_v29, -1e+30  ;;  %v4710_v21 = vsel %vm2977_vm3, %v3079_v35, -1e+30 }
 0x359   : > { %v4721_v29 = vsel %vm2977_vm3, %v3086_v40, -1e+30  ;;  %v4726_v33 = vsel %vm2245_vm0, %v4613_v26, -1e+30  ;;  %v4732_v24 = vsel %vm2977_vm3, %v3100_v47, -1e+30 }
 0x35a   : > { %v4737_v35 = vsel %vm2977_vm3, %v4615_v31, -1e+30  ;;  %v4743_v26 = vsel %vm2977_vm3, %v3114_v58, -1e+30  ;;  %v4748_v43 = vsel %vm2977_vm3, %v4617_v49, -1e+30 }
 0x35b   : > { %2417 = vperm.xlu1 %3918, %v4677_v37   ;;  %1697 = vperm.xlu0 %3919, %v4681_v38  }
 0x35f   : > { %2423 = vperm.xlu1 %3918, %v4689_v9   ;;  %2420 = vperm.xlu0 %3919, %v4693_v39  }
 0x363   : > { %3143 = vperm.xlu1 %3918, %v4700_v13   ;;  %3140 = vperm.xlu0 %3919, %v4704_v27  }
 0x367   : > { %3146 = vperm.xlu1 %3918, %v4710_v21   ;;  %2426 = vperm.xlu0 %3919, %v4715_v56  }
 0x36b   : > { %3149 = vperm.xlu1 %3918, %v4721_v29   ;;  %2429 = vperm.xlu0 %3919, %v4726_v33   ;;  %v944_v40 = vpop.permute.xlu0 %943  ;;  %v947_v44 = vpop.permute.xlu1 %946 }
 0x36c   : > { %v973_v60 = vrot.slane %v947_v44, %v4127_v22  ;;  %v969_v61 = vrot.slane %v944_v40, %v4127_v22 }
 0x36e   : > { %v998_v16 = vsel %vm755_vm9, %v973_v60, %v969_v61 }
 0x36f   : > { %3155 = vperm.xlu1 %3918, %v4732_v24   ;;  %3152 = vperm.xlu0 %3919, %v4737_v35   ;;  %v950_v31 = vpop.permute.xlu0 %949  ;;  %v953_v55 = vpop.permute.xlu1 %952 }
 0x370   : > { %v977_v58 = vrot.slane %v950_v31, %v4127_v22  ;;  %v981_v49 = vrot.slane %v953_v55, %v4127_v22 }
 0x372   : > { %v999_v2 = vsel %vm757_vm7, %v977_v58, %v998_v16 }
 0x373   : > { %3161 = vperm.xlu1 %3918, %v4743_v26   ;;  %3158 = vperm.xlu0 %3919, %v4748_v43   ;;  %v956_v47 = vpop.permute.xlu0 %955  ;;  %v959_v42 = vpop.permute.xlu1 %958  ;;  %v1000_v4 = vsel %vm759_vm11, %v981_v49, %v999_v2 }
 0x374   : > { %v985_v11 = vrot.slane %v956_v47, %v4127_v22  ;;  %v989_v15 = vrot.slane %v959_v42, %v4127_v22 }
 0x376   : > { %v1001_v44 = vsel %vm761_vm10, %v985_v11, %v1000_v4 }
 0x377   : > { %v962_v63 = vpop.permute.xlu0 %961  ;;  %v1002_v60 = vsel %vm763_vm12, %v989_v15, %v1001_v44 }
 0x378   : > { %v993_v40 = vrot.slane %v962_v63, %v4127_v22 }
 0x37a   : > { %v1003_v55 = vsel %vm765_vm15, %v993_v40, %v1002_v60 }
 0x37b   : > { %v965_v52 = vpop.permute.xlu0 %964 }
 0x37c   : > { %v997_v31 = vrot.slane %v965_v52, %v4127_v22 }
 0x37e   : > { %v1004_v61 = vsel %vm767_vm8, %v997_v31, %v1003_v55 }
 0x37f   : > { %v1006_v58 = vsel %vm5285_vm4, %v1004_v61, -inf  ;;  %vm5289_vm4 = vmmov %vm5281_vm2 }
 0x392   : > { %1007 = vmax.xlane.f32.xlu0 %v1006_v58 }
 0x3bf   : > { %v1680_v47 = vpop.permute.xlu1 %1679  ;;  %v1677_v42 = vpop.permute.xlu0 %1676 }
 0x3c0   : > { %v1706_v4 = vrot.slane %v1680_v47, %v4127_v22  ;;  %v1702_v63 = vrot.slane %v1677_v42, %v4127_v22 }
 0x3c2   : > { %v1731_v40 = vsel %vm755_vm9, %v1706_v4, %v1702_v63 }
 0x3c3   : > { %v1683_v16 = vpop.permute.xlu1 %1682  ;;  %v1689_v49 = vpop.permute.xlu0 %1688 }
 0x3c4   : > { %v1710_v11 = vrot.slane %v1683_v16, %v4127_v22  ;;  %v1718_v47 = vrot.slane %v1689_v49, %v4127_v22 }
 0x3c6   : > { %v1732_v31 = vsel %vm757_vm7, %v1710_v11, %v1731_v40 }
 0x3c7   : > { %v1686_v10 = vpop.permute.xlu1 %1685 }
 0x3c8   : > { %v1714_v44 = vrot.slane %v1686_v10, %v4127_v22 }
 0x3ca   : > { %v1733_v61 = vsel %vm759_vm11, %v1714_v44, %v1732_v31 }
 0x3cb   : > { %v1692_v2 = vpop.permute.xlu1 %1691  ;;  %v1734_v16 = vsel %vm761_vm10, %v1718_v47, %v1733_v61 }
 0x3cc   : > { %v1722_v58 = vrot.slane %v1692_v2, %v4127_v22 }
 0x3ce   : > { %v1735_v10 = vsel %vm763_vm12, %v1722_v58, %v1734_v16 }
 0x3d2   : > { %v2412_v52 = vpop.permute.xlu1 %2411  ;;  %v2409_v15 = vpop.permute.xlu0 %2408 }
 0x3d3   : > { %v2438_v49 = vrot.slane %v2412_v52, %v4127_v22  ;;  %v2434_v31 = vrot.slane %v2409_v15, %v4127_v22 }
 0x3d6   : > { %v2415_v60 = vpop.permute.xlu1 %2414  ;;  %v1695_v55 = vpop.permute.xlu0 %1694 }
 0x3d7   : > { %v1726_v42 = vrot.slane %v1695_v55, %v4127_v22  ;;  %v2442_v55 = vrot.slane %v2415_v60, %v4127_v22 }
 0x3d9   : > { %v1736_v63 = vsel %vm765_vm15, %v1726_v42, %v1735_v10  ;;  %v2463_v42 = vsel %vm755_vm9, %v2438_v49, %v2434_v31 }
 0x3da   : > { %v2418_v3 = vpop.permute.xlu1 %2417  ;;  %v1698_v25 = vpop.permute.xlu0 %1697  ;;  %v2464_v16 = vsel %vm757_vm7, %v2442_v55, %v2463_v42 }
 0x3db   : > { %v1730_v4 = vrot.slane %v1698_v25, %v4127_v22  ;;  %v2446_v58 = vrot.slane %v2418_v3, %v4127_v22 }
 0x3dd   : > { %v1737_v11 = vsel %vm767_vm8, %v1730_v4, %v1736_v63  ;;  %v2465_v63 = vsel %vm759_vm11, %v2446_v58, %v2464_v16 }
 0x3de   : > { %v2424_v40 = vpop.permute.xlu1 %2423  ;;  %v2421_v44 = vpop.permute.xlu0 %2420  ;;  %v1739_v2 = vsel %vm5286_vm14, %v1737_v11, -inf  ;;  %vm5290_vm14 = vmmov %vm5281_vm2 }
 0x3df   : > { %1740 = vmax.xlane.f32.xlu1 %v1739_v2  ;;  %v2450_v25 = vrot.slane %v2421_v44, %v4127_v22  ;;  %v2454_v52 = vrot.slane %v2424_v40, %v4127_v22 }
 0x3e1   : > { %v2466_v15 = vsel %vm761_vm10, %v2450_v25, %v2465_v63 }
 0x3e2   : > { %v3144_v61 = vpop.permute.xlu1 %3143  ;;  %v3141_v47 = vpop.permute.xlu0 %3140  ;;  %v2467_v55 = vsel %vm763_vm12, %v2454_v52, %v2466_v15 }
 0x3e3   : > { %v3170_v11 = vrot.slane %v3144_v61, %v4127_v22  ;;  %v3166_v3 = vrot.slane %v3141_v47, %v4127_v22 }
 0x3e5   : > { %v3195_v42 = vsel %vm755_vm9, %v3170_v11, %v3166_v3 }
 0x3e6   : > { %v3147_v10 = vpop.permute.xlu1 %3146  ;;  %v2427_v4 = vpop.permute.xlu0 %2426 }
 0x3e7   : > { %v2458_v60 = vrot.slane %v2427_v4, %v4127_v22  ;;  %v3174_v49 = vrot.slane %v3147_v10, %v4127_v22 }
 0x3e9   : > { %v2468_v40 = vsel %vm765_vm15, %v2458_v60, %v2467_v55  ;;  %v3196_v4 = vsel %vm757_vm7, %v3174_v49, %v3195_v42 }
 0x3ea   : > { %v3150_v2 = vpop.permute.xlu1 %3149  ;;  %v2430_v44 = vpop.permute.xlu0 %2429 }
 0x3eb   : > { %v2462_v31 = vrot.slane %v2430_v44, %v4127_v22  ;;  %v3178_v58 = vrot.slane %v3150_v2, %v4127_v22 }
 0x3ed   : > { %v2469_v25 = vsel %vm767_vm8, %v2462_v31, %v2468_v40  ;;  %v3197_v63 = vsel %vm759_vm11, %v3178_v58, %v3196_v4 }
 0x3ee   : > { %v3156_v16 = vpop.permute.xlu1 %3155  ;;  %v3153_v61 = vpop.permute.xlu0 %3152  ;;  %v2471_v47 = vsel %vm5287_vm13, %v2469_v25, -inf  ;;  %vm5291_vm13 = vmmov %vm5281_vm2 }
 0x3ef   : > { %v3182_v10 = vrot.slane %v3153_v61, %v4127_v22  ;;  %2472 = vmax.xlane.f32.xlu0 %v2471_v47  ;;  %v3186_v52 = vrot.slane %v3156_v16, %v4127_v22 }
 0x3f1   : > { %v3198_v15 = vsel %vm761_vm10, %v3182_v10, %v3197_v63 }
 0x3f2   : > { %v3162_v60 = vpop.permute.xlu1 %3161  ;;  %v3159_v2 = vpop.permute.xlu0 %3158  ;;  %v3199_v3 = vsel %vm763_vm12, %v3186_v52, %v3198_v15 }
 0x3f3   : > { %v3194_v44 = vrot.slane %v3162_v60, %v4127_v22  ;;  %v3190_v11 = vrot.slane %v3159_v2, %v4127_v22 }
 0x3f5   : > { %v3200_v31 = vsel %vm765_vm15, %v3190_v11, %v3199_v3 }
 0x3f6   : > { %v3201_v49 = vsel %vm767_vm8, %v3194_v44, %v3200_v31 }
 0x3f7   : > { %v3203_v55 = vsel %vm5281_vm2, %v3201_v49, -inf }
 0x3f8   : > { %3204 = vmax.xlane.f32.xlu0 %v3203_v55 }
 0x41f   : > { %v1008_v58 = vpop.xlane.xlu0 %1007 }
 0x420   : > { %v1013_v40 = vrot.slane %v1008_v58, %v4129_v23  ;;  %v1017_v25 = vrot.slane %v1008_v58, %v4112_v18  ;;  %v1021_v42 = vrot.slane %v1008_v58, %v4117_v19  ;;  %v1029_v16 = vrot.slane %v1008_v58, %v4140_v28 }
 0x421   : > { %v1025_v61 = vrot.slane %v1008_v58, %v4124_v20  ;;  %v1037_v63 = vrot.slane %v1008_v58, %v4154_v32  ;;  %v1033_v2 = vrot.slane %v1008_v58, %v4145_v30  ;;  %v1041_v3 = vrot.slane %v1008_v58, %v4157_v34 }
 0x422   : > { %v1050_v47 = vsub.f32 %v4571_v5, %v1013_v40  ;;  %v1051_v4 = vsub.f32 %v4566_v1, %v1017_v25  ;;  %v1052_v10 = vsub.f32 %v4583_v7, %v1021_v42  ;;  %v1054_v52 = vsub.f32 %v4595_v48, %v1029_v16 }
 0x423   : > { %v1053_v44 = vsub.f32 %v4578_v6, %v1025_v61  ;;  %v1056_v5 = vsub.f32 %v4602_v45, %v1037_v63  ;;  %v1055_v7 = vsub.f32 %v4590_v36, %v1033_v2  ;;  %v1057_v48 = vsub.f32 %v4608_v53, %v1041_v3 }
 0x424   : > { %v1058_v15 = vmul.f32 1.442695, %v1050_v47  ;;  %v1060_v60 = vmul.f32 1.442695, %v1051_v4  ;;  %v1062_v11 = vmul.f32 1.442695, %v1052_v10 }
 0x425   : > { %v1066_v1 = vmul.f32 1.442695, %v1054_v52  ;;  %v1064_v31 = vmul.f32 1.442695, %v1053_v44  ;;  %v1070_v49 = vmul.f32 1.442695, %v1056_v5 }
 0x426   : > { %3920 = vpow2.f32 %v1058_v15  ;;  %v1068_v55 = vmul.f32 1.442695, %v1055_v7  ;;  %v1072_v6 = vmul.f32 1.442695, %v1057_v48 }
 0x427   : > { %3922 = vpow2.f32 %v1060_v60 }
 0x428   : > { %3924 = vpow2.f32 %v1062_v11 }
 0x429   : > { %3926 = vpow2.f32 %v1066_v1 }
 0x42a   : > { %3928 = vpow2.f32 %v1064_v31 }
 0x42b   : > { %3930 = vpow2.f32 %v1070_v49 }
 0x42c   : > { %3932 = vpow2.f32 %v1068_v55 }
 0x42d   : > { %3934 = vpow2.f32 %v1072_v6 }
 0x430   : > { %v4832_v40 = vpop.eup %3920 }
 0x431   : > { %v4834_v25 = vpop.eup %3922  ;;  %1083 = vperm.xlu1 %3918, %v4832_v40  }
 0x432   : > { %1086 = vperm.xlu0 %3919, %v4834_v25   ;;  %v4838_v36 = vpop.eup %3924 }
 0x433   : > { %v4840_v45 = vpop.eup %3926 }
 0x434   : > { %v4844_v53 = vpop.eup %3928 }
 0x435   : > { %1089 = vperm.xlu1 %3918, %v4838_v36   ;;  %v4846_v58 = vpop.eup %3930 }
 0x436   : > { %1095 = vperm.xlu0 %3919, %v4840_v45   ;;  %v4850_v42 = vpop.eup %3932 }
 0x437   : > { %v4852_v16 = vpop.eup %3934 }
 0x439   : > { %1092 = vperm.xlu1 %3918, %v4844_v53  }
 0x43a   : > { %1101 = vperm.xlu0 %3919, %v4846_v58  }
 0x43d   : > { %1098 = vperm.xlu1 %3918, %v4850_v42  }
 0x43e   : > { %1104 = vperm.xlu0 %3919, %v4852_v16  }
 0x46c   : > { %v1741_v61 = vpop.xlane.xlu1 %1740 }
 0x46d   : > { %v1746_v47 = vrot.slane %v1741_v61, %v4129_v23  ;;  %v1750_v4 = vrot.slane %v1741_v61, %v4112_v18  ;;  %v1754_v10 = vrot.slane %v1741_v61, %v4117_v19  ;;  %v1762_v63 = vrot.slane %v1741_v61, %v4140_v28 }
 0x46e   : > { %v1758_v60 = vrot.slane %v1741_v61, %v4124_v20  ;;  %v1766_v1 = vrot.slane %v1741_v61, %v4145_v30  ;;  %v1770_v48 = vrot.slane %v1741_v61, %v4154_v32 }
 0x46f   : > { %v1783_v52 = vsub.f32 %v4628_v46, %v1746_v47  ;;  %v1784_v15 = vsub.f32 %v4624_v54, %v1750_v4  ;;  %v1785_v2 = vsub.f32 %v4634_v12, %v1754_v10  ;;  %v1787_v44 = vsub.f32 %v4638_v57, %v1762_v63 }
 0x470   : > { %v1786_v7 = vsub.f32 %v4644_v59, %v1758_v60  ;;  %v1788_v46 = vsub.f32 %v4649_v62, %v1766_v1  ;;  %v1774_v47 = vrot.slane %v1741_v61, %v4157_v34  ;;  %v1789_v4 = vsub.f32 %v4671_v17, %v1770_v48 }
 0x471   : > { %v1791_v11 = vmul.f32 1.442695, %v1783_v52  ;;  %v1793_v3 = vmul.f32 1.442695, %v1784_v15  ;;  %v1799_v5 = vmul.f32 1.442695, %v1787_v44 }
 0x472   : > { %v1795_v31 = vmul.f32 1.442695, %v1785_v2  ;;  %v1797_v54 = vmul.f32 1.442695, %v1786_v7  ;;  %v1801_v12 = vmul.f32 1.442695, %v1788_v46 }
 0x473   : > { %3936 = vpow2.f32 %v1791_v11  ;;  %v1803_v17 = vmul.f32 1.442695, %v1789_v4 }
 0x474   : > { %3938 = vpow2.f32 %v1793_v3 }
 0x475   : > { %3940 = vpow2.f32 %v1799_v5 }
 0x476   : > { %3942 = vpow2.f32 %v1795_v31 }
 0x477   : > { %3944 = vpow2.f32 %v1797_v54 }
 0x478   : > { %3946 = vpow2.f32 %v1801_v12 }
 0x47c   : > { %v4869_v57 = vpop.xlane.xlu0 %2472 }
 0x47d   : > { %v4871_v49 = vpop.eup %3936  ;;  %v2478_v55 = vrot.slane %v4869_v57, %v4129_v23  ;;  %v2482_v59 = vrot.slane %v4869_v57, %v4112_v18  ;;  %v2486_v6 = vrot.slane %v4869_v57, %v4117_v19  ;;  %v2490_v52 = vrot.slane %v4869_v57, %v4124_v20 }
 0x47e   : > { %v4879_v62 = vpop.eup %3938  ;;  %1816 = vperm.xlu0 %3919, %v4871_v49   ;;  %v2502_v12 = vrot.slane %v4869_v57, %v4154_v32 }
 0x47f   : > { %v2515_v10 = vsub.f32 %v4661_v8, %v2478_v55  ;;  %v2516_v63 = vsub.f32 %v4657_v50, %v2482_v59  ;;  %1819 = vperm.xlu1 %3918, %v4879_v62   ;;  %v2517_v15 = vsub.f32 %v4667_v14, %v2486_v6  ;;  %v4890_v60 = vpop.eup %3940  ;;  %v1790_v8 = vsub.f32 %v4681_v38, %v1774_v47 }
 0x480   : > { %v4892_v11 = vpop.eup %3942  ;;  %v2494_v50 = vrot.slane %v4869_v57, %v4140_v28  ;;  %v2498_v14 = vrot.slane %v4869_v57, %v4145_v30  ;;  %v2518_v61 = vsub.f32 %v4677_v37, %v2490_v52 }
 0x481   : > { %v2523_v2 = vmul.f32 1.442695, %v2515_v10  ;;  %v2525_v44 = vmul.f32 1.442695, %v2516_v63  ;;  %v2527_v3 = vmul.f32 1.442695, %v2517_v15  ;;  %v4904_v1 = vpop.eup %3944  ;;  %v2506_v10 = vrot.slane %v4869_v57, %v4157_v34 }
 0x482   : > { %1828 = vperm.xlu0 %3919, %v4890_v60   ;;  %v1805_v38 = vmul.f32 1.442695, %v1790_v8  ;;  %v2519_v7 = vsub.f32 %v4693_v39, %v2494_v50  ;;  %v2520_v46 = vsub.f32 %v4689_v9, %v2498_v14  ;;  %v2529_v54 = vmul.f32 1.442695, %v2518_v61  ;;  %v4913_v48 = vpop.eup %3946 }
 0x483   : > { %3948 = vpow2.f32 %v2523_v2  ;;  %1822 = vperm.xlu1 %3918, %v4892_v11   ;;  %v2522_v57 = vsub.f32 %v4726_v33, %v2506_v10 }
 0x484   : > { %3950 = vpow2.f32 %v2525_v44  ;;  %v2531_v55 = vmul.f32 1.442695, %v2519_v7  ;;  %v2533_v59 = vmul.f32 1.442695, %v2520_v46 }
 0x485   : > { %v4902_v5 = vpop.xlane.xlu0 %3204  ;;  %3952 = vpow2.f32 %v1803_v17  ;;  %v2537_v33 = vmul.f32 1.442695, %v2522_v57 }
 0x486   : > { %v3210_v31 = vrot.slane %v4902_v5, %v4129_v23  ;;  %3954 = vpow2.f32 %v2527_v3  ;;  %v3214_v37 = vrot.slane %v4902_v5, %v4112_v18  ;;  %v3218_v9 = vrot.slane %v4902_v5, %v4117_v19 }
 0x487   : > { %1825 = vperm.xlu1 %3918, %v4904_v1   ;;  %3956 = vpow2.f32 %v1805_v38  ;;  %v3222_v52 = vrot.slane %v4902_v5, %v4124_v20  ;;  %v3226_v8 = vrot.slane %v4902_v5, %v4140_v28  ;;  %v3230_v17 = vrot.slane %v4902_v5, %v4145_v30 }
 0x488   : > { %v3247_v39 = vsub.f32 %v4704_v27, %v3210_v31  ;;  %3958 = vpow2.f32 %v2529_v54  ;;  %v3248_v6 = vsub.f32 %v4700_v13, %v3214_v37  ;;  %v2521_v27 = vsub.f32 %v4715_v56, %v2502_v12 }
 0x489   : > { %3960 = vpow2.f32 %v2531_v55  ;;  %v3249_v13 = vsub.f32 %v4710_v21, %v3218_v9  ;;  %v3250_v21 = vsub.f32 %v4721_v29, %v3222_v52  ;;  %v3234_v3 = vrot.slane %v4902_v5, %v4154_v32 }
 0x48a   : > { %v3255_v63 = vmul.f32 1.442695, %v3247_v39  ;;  %3962 = vpow2.f32 %v2533_v59  ;;  %v3257_v15 = vmul.f32 1.442695, %v3248_v6  ;;  %v2535_v56 = vmul.f32 1.442695, %v2521_v27 }
 0x48b   : > { %1831 = vperm.xlu1 %3918, %v4913_v48   ;;  %v3259_v50 = vmul.f32 1.442695, %v3249_v13  ;;  %v3251_v38 = vsub.f32 %v4737_v35, %v3226_v8  ;;  %v3238_v29 = vrot.slane %v4902_v5, %v4157_v34  ;;  %v3252_v7 = vsub.f32 %v4732_v24, %v3230_v17 }
 0x48c   : > { %3964 = vpow2.f32 %v3255_v63  ;;  %v3261_v31 = vmul.f32 1.442695, %v3250_v21  ;;  %v3253_v37 = vsub.f32 %v4748_v43, %v3234_v3 }
 0x48d   : > { %v4922_v47 = vpop.eup %3948  ;;  %3966 = vpow2.f32 %v3257_v15  ;;  %v3263_v12 = vmul.f32 1.442695, %v3251_v38  ;;  %v3254_v35 = vsub.f32 %v4743_v26, %v3238_v29  ;;  %v3265_v5 = vmul.f32 1.442695, %v3252_v7 }
 0x48e   : > { %v4924_v4 = vpop.eup %3950  ;;  %2548 = vperm.xlu0 %3919, %v4922_v47   ;;  %3968 = vpow2.f32 %v2535_v56  ;;  %v3267_v39 = vmul.f32 1.442695, %v3253_v37 }
 0x48f   : > { %2551 = vperm.xlu1 %3918, %v4924_v4   ;;  %v4934_v2 = vpop.eup %3952  ;;  %3970 = vpow2.f32 %v3259_v50  ;;  %v3269_v59 = vmul.f32 1.442695, %v3254_v35 }
 0x490   : > { %v4936_v44 = vpop.eup %3954  ;;  %3972 = vpow2.f32 %v2537_v33 }
 0x491   : > { %v4946_v14 = vpop.eup %3956  ;;  %3974 = vpow2.f32 %v3261_v31 }
 0x492   : > { %1834 = vperm.xlu0 %3919, %v4934_v2   ;;  %v4948_v61 = vpop.eup %3958  ;;  %3976 = vpow2.f32 %v3263_v12 }
 0x493   : > { %2554 = vperm.xlu1 %3918, %v4936_v44   ;;  %v4958_v46 = vpop.eup %3960  ;;  %3978 = vpow2.f32 %v3265_v5 }
 0x494   : > { %v4960_v54 = vpop.eup %3962  ;;  %3980 = vpow2.f32 %v3267_v39 }
 0x495   : > { %3982 = vpow2.f32 %v3269_v59 }
 0x496   : > { %1837 = vperm.xlu0 %3919, %v4946_v14   ;;  %v4966_v55 = vpop.eup %3964 }
 0x497   : > { %2557 = vperm.xlu1 %3918, %v4948_v61   ;;  %v4968_v24 = vpop.eup %3966 }
 0x498   : > { %v4972_v43 = vpop.eup %3968 }
 0x499   : > { %v4974_v9 = vpop.eup %3970 }
 0x49a   : > { %2560 = vperm.xlu0 %3919, %v4958_v46   ;;  %v4978_v26 = vpop.eup %3972 }
 0x49b   : > { %2563 = vperm.xlu1 %3918, %v4960_v54   ;;  %v4980_v6 = vpop.eup %3974 }
 0x49c   : > { %v4984_v10 = vpop.eup %3976 }
 0x49d   : > { %v4986_v27 = vpop.eup %3978 }
 0x49e   : > { %3280 = vperm.xlu0 %3919, %v4966_v55   ;;  %v4990_v63 = vpop.eup %3980 }
 0x49f   : > { %3283 = vperm.xlu1 %3918, %v4968_v24   ;;  %v4992_v52 = vpop.eup %3982 }
 0x4a2   : > { %2566 = vperm.xlu0 %3919, %v4972_v43  }
 0x4a3   : > { %3286 = vperm.xlu1 %3918, %v4974_v9  }
 0x4a6   : > { %2569 = vperm.xlu0 %3919, %v4978_v26  }
 0x4a7   : > { %3289 = vperm.xlu1 %3918, %v4980_v6  }
 0x4aa   : > { %3292 = vperm.xlu0 %3919, %v4984_v10  }
 0x4ab   : > { %3295 = vperm.xlu1 %3918, %v4986_v27  }
 0x4ae   : > { %3298 = vperm.xlu0 %3919, %v4990_v63  }
 0x4af   : > { %3301 = vperm.xlu1 %3918, %v4992_v52  }
 0x4b0   : > { %v1084_v13 = vpop.permute.xlu1 %1083 }
 0x4b1   : > { %v1087_v15 = vpop.permute.xlu0 %1086  ;;  %v1109_v17 = vrot.slane %v1084_v13, %v4127_v22 }
 0x4b2   : > { %v1113_v21 = vrot.slane %v1087_v15, %v4127_v22 }
 0x4b4   : > { %v1090_v57 = vpop.permute.xlu1 %1089  ;;  %v1138_v38 = vsel %vm755_vm9, %v1113_v21, %v1109_v17 }
 0x4b5   : > { %v1096_v56 = vpop.permute.xlu0 %1095  ;;  %v1117_v50 = vrot.slane %v1090_v57, %v4127_v22 }
 0x4b6   : > { %v1125_v12 = vrot.slane %v1096_v56, %v4127_v22 }
 0x4b7   : > { %v1139_v29 = vsel %vm757_vm7, %v1117_v50, %v1138_v38 }
 0x4b8   : > { %v1093_v8 = vpop.permute.xlu1 %1092 }
 0x4b9   : > { %v1121_v33 = vrot.slane %v1093_v8, %v4127_v22  ;;  %v1102_v7 = vpop.permute.xlu0 %1101 }
 0x4ba   : > { %v1133_v39 = vrot.slane %v1102_v7, %v4127_v22 }
 0x4bb   : > { %v1140_v31 = vsel %vm759_vm11, %v1121_v33, %v1139_v29 }
 0x4bc   : > { %v1099_v3 = vpop.permute.xlu1 %1098  ;;  %v1141_v35 = vsel %vm761_vm10, %v1125_v12, %v1140_v31 }
 0x4bd   : > { %v1129_v37 = vrot.slane %v1099_v3, %v4127_v22  ;;  %v1105_v59 = vpop.permute.xlu0 %1104 }
 0x4be   : > { %v1137_v15 = vrot.slane %v1105_v59, %v4127_v22 }
 0x4bf   : > { %v1142_v5 = vsel %vm763_vm12, %v1129_v37, %v1141_v35 }
 0x4c0   : > { %v1143_v13 = vsel %vm765_vm15, %v1133_v39, %v1142_v5 }
 0x4c1   : > { %v1144_v57 = vsel %vm767_vm8, %v1137_v15, %v1143_v13 }
 0x4c2   : > { %v1146_v8 = vsel %vm5288_vm6, %v1144_v57, 0.0  ;;  %vm5293_vm6 = vmmov 0  }
 0x4cd   : > { %1147 = vadd.xlane.f32.xlu0 %v1146_v8 }
 0x4fd   : > { %v1817_v50 = vpop.permute.xlu0 %1816 }
 0x4fe   : > { %v1820_v17 = vpop.permute.xlu1 %1819  ;;  %v1842_v29 = vrot.slane %v1817_v50, %v4127_v22 }
 0x4ff   : > { %v1846_v38 = vrot.slane %v1820_v17, %v4127_v22 }
 0x501   : > { %v1829_v33 = vpop.permute.xlu0 %1828  ;;  %v1871_v35 = vsel %vm755_vm9, %v1846_v38, %v1842_v29 }
 0x502   : > { %v1823_v21 = vpop.permute.xlu1 %1822  ;;  %v1858_v57 = vrot.slane %v1829_v33, %v4127_v22 }
 0x503   : > { %v1850_v7 = vrot.slane %v1823_v21, %v4127_v22 }
 0x505   : > { %v1872_v5 = vsel %vm757_vm7, %v1850_v7, %v1871_v35 }
 0x506   : > { %v1826_v56 = vpop.permute.xlu1 %1825 }
 0x507   : > { %v1854_v37 = vrot.slane %v1826_v56, %v4127_v22 }
 0x509   : > { %v1873_v59 = vsel %vm759_vm11, %v1854_v37, %v1872_v5 }
 0x50a   : > { %v1832_v3 = vpop.permute.xlu1 %1831  ;;  %v1874_v17 = vsel %vm761_vm10, %v1858_v57, %v1873_v59 }
 0x50b   : > { %v1862_v13 = vrot.slane %v1832_v3, %v4127_v22 }
 0x50d   : > { %v2549_v31 = vpop.permute.xlu0 %2548  ;;  %v1875_v50 = vsel %vm763_vm12, %v1862_v13, %v1874_v17 }
 0x50e   : > { %v2552_v12 = vpop.permute.xlu1 %2551  ;;  %v2574_v5 = vrot.slane %v2549_v31, %v4127_v22 }
 0x50f   : > { %v2578_v33 = vrot.slane %v2552_v12, %v4127_v22 }
 0x511   : > { %v1835_v39 = vpop.permute.xlu0 %1834 }
 0x512   : > { %v2555_v15 = vpop.permute.xlu1 %2554  ;;  %v1866_v8 = vrot.slane %v1835_v39, %v4127_v22 }
 0x513   : > { %v2582_v39 = vrot.slane %v2555_v15, %v4127_v22 }
 0x514   : > { %v1876_v29 = vsel %vm765_vm15, %v1866_v8, %v1875_v50  ;;  %v2603_v8 = vsel %vm755_vm9, %v2578_v33, %v2574_v5 }
 0x515   : > { %v1838_v21 = vpop.permute.xlu0 %1837 }
 0x516   : > { %v2558_v56 = vpop.permute.xlu1 %2557  ;;  %v1870_v38 = vrot.slane %v1838_v21, %v4127_v22  ;;  %v2604_v21 = vsel %vm757_vm7, %v2582_v39, %v2603_v8 }
 0x517   : > { %v2586_v13 = vrot.slane %v2558_v56, %v4127_v22 }
 0x518   : > { %v1877_v7 = vsel %vm767_vm8, %v1870_v38, %v1876_v29 }
 0x519   : > { %v2561_v37 = vpop.permute.xlu0 %2560  ;;  %v1879_v3 = vsel %vm5289_vm4, %v1877_v7, 0.0  ;;  %v2605_v38 = vsel %vm759_vm11, %v2586_v13, %v2604_v21 }
 0x51a   : > { %v2564_v35 = vpop.permute.xlu1 %2563  ;;  %1880 = vadd.xlane.f32.xlu1 %v1879_v3  ;;  %v2590_v17 = vrot.slane %v2561_v37, %v4127_v22 }
 0x51b   : > { %v2594_v29 = vrot.slane %v2564_v35, %v4127_v22 }
 0x51c   : > { %v2606_v31 = vsel %vm761_vm10, %v2590_v17, %v2605_v38 }
 0x51d   : > { %v3281_v59 = vpop.permute.xlu0 %3280  ;;  %v2607_v39 = vsel %vm763_vm12, %v2594_v29, %v2606_v31 }
 0x51e   : > { %v3284_v57 = vpop.permute.xlu1 %3283  ;;  %v3306_v56 = vrot.slane %v3281_v59, %v4127_v22 }
 0x51f   : > { %v3310_v7 = vrot.slane %v3284_v57, %v4127_v22 }
 0x521   : > { %v2567_v50 = vpop.permute.xlu0 %2566  ;;  %v3335_v8 = vsel %vm755_vm9, %v3310_v7, %v3306_v56 }
 0x522   : > { %v3287_v12 = vpop.permute.xlu1 %3286  ;;  %v2598_v15 = vrot.slane %v2567_v50, %v4127_v22 }
 0x523   : > { %v3314_v37 = vrot.slane %v3287_v12, %v4127_v22 }
 0x524   : > { %v2608_v35 = vsel %vm765_vm15, %v2598_v15, %v2607_v39 }
 0x525   : > { %v2570_v3 = vpop.permute.xlu0 %2569  ;;  %v3336_v59 = vsel %vm757_vm7, %v3314_v37, %v3335_v8 }
 0x526   : > { %v3290_v33 = vpop.permute.xlu1 %3289  ;;  %v2602_v5 = vrot.slane %v2570_v3, %v4127_v22 }
 0x527   : > { %v3318_v13 = vrot.slane %v3290_v33, %v4127_v22 }
 0x528   : > { %v2609_v17 = vsel %vm767_vm8, %v2602_v5, %v2608_v35 }
 0x529   : > { %v3293_v21 = vpop.permute.xlu0 %3292  ;;  %v2611_v57 = vsel %vm5290_vm14, %v2609_v17, 0.0  ;;  %v3337_v12 = vsel %vm759_vm11, %v3318_v13, %v3336_v59 }
 0x52a   : > { %v3296_v50 = vpop.permute.xlu1 %3295  ;;  %v3322_v38 = vrot.slane %v3293_v21, %v4127_v22  ;;  %2612 = vadd.xlane.f32.xlu0 %v2611_v57 }
 0x52b   : > { %v3326_v29 = vrot.slane %v3296_v50, %v4127_v22 }
 0x52c   : > { %v3338_v31 = vsel %vm761_vm10, %v3322_v38, %v3337_v12 }
 0x52d   : > { %v3299_v15 = vpop.permute.xlu0 %3298  ;;  %v3339_v56 = vsel %vm763_vm12, %v3326_v29, %v3338_v31 }
 0x52e   : > { %v3302_v3 = vpop.permute.xlu1 %3301  ;;  %v3330_v33 = vrot.slane %v3299_v15, %v4127_v22 }
 0x52f   : > { %v3334_v7 = vrot.slane %v3302_v3, %v4127_v22 }
 0x530   : > { %v3340_v37 = vsel %vm765_vm15, %v3330_v33, %v3339_v56 }
 0x531   : > { %v3341_v5 = vsel %vm767_vm8, %v3334_v7, %v3340_v37 }
 0x532   : > { %v3343_v39 = vsel %vm5291_vm13, %v3341_v5, 0.0 }
 0x533   : > { %3344 = vadd.xlane.f32.xlu0 %v3343_v39 }
 0x549   : > { %1273 = vrot.lane.b32.xlu0 %v4168_v41, %s4010_s26 }
 0x55a   : > { %v1148_v13 = vpop.xlane.xlu0 %1147 }
 0x55b   : > { %3984 = vrcp.f32 %v1148_v13 }
 0x565   : > { %v3985_v35 = vpop.eup %3984 }
 0x566   : > { %v1150_v17 = vmul.f32 %v3985_v35, %v1148_v13 }
 0x568   : > { %v1151_v8 = vsub.f32 2.0, %v1150_v17 }
 0x56a   : > { %v1152_v21 = vmul.f32 %v3985_v35, %v1151_v8 }
 0x56c   : > { %v1161_v57 = vrot.slane %v1152_v21, %v4112_v18  ;;  %v1157_v59 = vrot.slane %v1152_v21, %v4129_v23  ;;  %v1173_v12 = vrot.slane %v1152_v21, %v4140_v28  ;;  %v1165_v29 = vrot.slane %v1152_v21, %v4117_v19 }
 0x56d   : > { %v1181_v3 = vrot.slane %v1152_v21, %v4154_v32  ;;  %v1169_v33 = vrot.slane %v1152_v21, %v4124_v20  ;;  %v1185_v7 = vrot.slane %v1152_v21, %v4157_v34  ;;  %v1177_v56 = vrot.slane %v1152_v21, %v4145_v30 }
 0x56e   : > { %v1195_v50 = vmul.f32 %v4834_v25, %v1161_v57  ;;  %v1194_v38 = vmul.f32 %v4832_v40, %v1157_v59  ;;  %v1198_v31 = vmul.f32 %v4840_v45, %v1173_v12  ;;  %v1196_v15 = vmul.f32 %v4838_v36, %v1165_v29 }
 0x56f   : > { %v1200_v25 = vmul.f32 %v4846_v58, %v1181_v3  ;;  %v1197_v40 = vmul.f32 %v4844_v53, %v1169_v33  ;;  %v1201_v45 = vmul.f32 %v4852_v16, %v1185_v7  ;;  %v1199_v36 = vmul.f32 %v4850_v42, %v1177_v56 }
 0x570   : > { %1214 = vperm.xlu0 %3919, %v1195_v50   ;;  %1211 = vperm.xlu1 %3918, %v1194_v38   ;;  %v5292_v3 = vmov 0.0  }
 0x574   : > { %1223 = vperm.xlu0 %3919, %v1198_v31   ;;  %1217 = vperm.xlu1 %3918, %v1196_v15  }
 0x578   : > { %1229 = vperm.xlu0 %3919, %v1200_v25   ;;  %1220 = vperm.xlu1 %3918, %v1197_v40  }
 0x57c   : > { %1232 = vperm.xlu0 %3919, %v1201_v45   ;;  %1226 = vperm.xlu1 %3918, %v1199_v36  }
 0x5a7   : > { %v1881_v37 = vpop.xlane.xlu1 %1880 }
 0x5a8   : > { %3986 = vrcp.f32 %v1881_v37 }
 0x5b2   : > { %v3987_v5 = vpop.eup %3986 }
 0x5b3   : > { %v1883_v39 = vmul.f32 %v3987_v5, %v1881_v37 }
 0x5b5   : > { %v1884_v13 = vsub.f32 2.0, %v1883_v39 }
 0x5b7   : > { %v1885_v58 = vmul.f32 %v3987_v5, %v1884_v13  ;;  %v2613_v35 = vpop.xlane.xlu0 %2612 }
 0x5b8   : > { %3988 = vrcp.f32 %v2613_v35 }
 0x5b9   : > { %v1890_v53 = vrot.slane %v1885_v58, %v4129_v23  ;;  %v1894_v17 = vrot.slane %v1885_v58, %v4112_v18  ;;  %v1906_v42 = vrot.slane %v1885_v58, %v4140_v28  ;;  %v1898_v21 = vrot.slane %v1885_v58, %v4117_v19 }
 0x5ba   : > { %v1902_v50 = vrot.slane %v1885_v58, %v4124_v20  ;;  %v1910_v29 = vrot.slane %v1885_v58, %v4145_v30  ;;  %v1914_v45 = vrot.slane %v1885_v58, %v4154_v32  ;;  %v1918_v37 = vrot.slane %v1885_v58, %v4157_v34 }
 0x5bb   : > { %v1927_v8 = vmul.f32 %v4871_v49, %v1890_v53  ;;  %v1928_v16 = vmul.f32 %v4879_v62, %v1894_v17  ;;  %v1931_v57 = vmul.f32 %v4890_v60, %v1906_v42  ;;  %v1929_v59 = vmul.f32 %v4892_v11, %v1898_v21 }
 0x5bc   : > { %v1930_v62 = vmul.f32 %v4904_v1, %v1902_v50  ;;  %v1932_v11 = vmul.f32 %v4913_v48, %v1910_v29  ;;  %v1933_v39 = vmul.f32 %v4934_v2, %v1914_v45 }
 0x5bd   : > { %1944 = vperm.xlu0 %3919, %v1927_v8   ;;  %1947 = vperm.xlu1 %3918, %v1928_v16  }
 0x5c0   : > { %v3345_v38 = vpop.xlane.xlu0 %3344 }
 0x5c1   : > { %3990 = vrcp.f32 %v3345_v38  ;;  %1956 = vperm.xlu0 %3919, %v1931_v57   ;;  %1950 = vperm.xlu1 %3918, %v1929_v59  }
 0x5c2   : > { %v3989_v12 = vpop.eup %3988 }
 0x5c3   : > { %v2615_v49 = vmul.f32 %v3989_v12, %v2613_v35 }
 0x5c4   : > { %v1274_v31 = vpop.permute.xlu0 %1273 }
 0x5c5   : > { %v2616_v15 = vsub.f32 2.0, %v2615_v49  ;;  %1953 = vperm.xlu1 %3918, %v1930_v62   ;;  %3833 = vmatpush3.msra.mxu1 %v1274_v31 }
 0x5c6   : > { %3842 = vmatprep.subr.mxu1 %v5292_v3 }
 0x5c7   : > { %v2617_v60 = vmul.f32 %v3989_v12, %v2616_v15 }
 0x5c9   : > { %1959 = vperm.xlu1 %3918, %v1932_v11   ;;  %v2626_v33 = vrot.slane %v2617_v60, %v4112_v18  ;;  %v2622_v25 = vrot.slane %v2617_v60, %v4129_v23  ;;  %v2630_v56 = vrot.slane %v2617_v60, %v4117_v19  ;;  %v2634_v13 = vrot.slane %v2617_v60, %v4124_v20 }
 0x5ca   : > { %v2642_v53 = vrot.slane %v2617_v60, %v4145_v30  ;;  %v2638_v17 = vrot.slane %v2617_v60, %v4140_v28  ;;  %v2646_v42 = vrot.slane %v2617_v60, %v4154_v32 }
 0x5cb   : > { %v3991_v40 = vpop.eup %3990  ;;  %v2660_v7 = vmul.f32 %v4924_v4, %v2626_v33  ;;  %v2659_v1 = vmul.f32 %v4922_v47, %v2622_v25  ;;  %v2661_v5 = vmul.f32 %v4936_v44, %v2630_v56  ;;  %v1934_v47 = vmul.f32 %v4946_v14, %v1918_v37 }
 0x5cc   : > { %v3347_v36 = vmul.f32 %v3991_v40, %v3345_v38  ;;  %v2662_v35 = vmul.f32 %v4948_v61, %v2634_v13  ;;  %v2664_v58 = vmul.f32 %v4960_v54, %v2642_v53  ;;  %v2663_v44 = vmul.f32 %v4958_v46, %v2638_v17 }
 0x5cd   : > { %2679 = vperm.xlu1 %3918, %v2660_v7   ;;  %2676 = vperm.xlu0 %3919, %v2659_v1   ;;  %v2665_v46 = vmul.f32 %v4972_v43, %v2646_v42 }
 0x5ce   : > { %v3348_v48 = vsub.f32 2.0, %v3347_v36 }
 0x5d0   : > { %v3349_v4 = vmul.f32 %v3991_v40, %v3348_v48 }
 0x5d1   : > { %2682 = vperm.xlu1 %3918, %v2661_v5   ;;  %1962 = vperm.xlu0 %3919, %v1933_v39  }
 0x5d2   : > { %v3358_v2 = vrot.slane %v3349_v4, %v4112_v18  ;;  %v3354_v8 = vrot.slane %v3349_v4, %v4129_v23  ;;  %v3362_v16 = vrot.slane %v3349_v4, %v4117_v19  ;;  %v3366_v18 = vrot.slane %v3349_v4, %v4124_v20 }
 0x5d3   : > { %v2650_v23 = vrot.slane %v2617_v60, %v4157_v34  ;;  %v3370_v19 = vrot.slane %v3349_v4, %v4140_v28  ;;  %v3374_v21 = vrot.slane %v3349_v4, %v4145_v30  ;;  %v3378_v20 = vrot.slane %v3349_v4, %v4154_v32 }
 0x5d4   : > { %v3392_v14 = vmul.f32 %v4968_v24, %v3358_v2  ;;  %v3391_v61 = vmul.f32 %v4966_v55, %v3354_v8  ;;  %v3393_v54 = vmul.f32 %v4974_v9, %v3362_v16  ;;  %v3394_v24 = vmul.f32 %v4980_v6, %v3366_v18 }
 0x5d5   : > { %2685 = vperm.xlu1 %3918, %v2662_v35   ;;  %1965 = vperm.xlu0 %3919, %v1934_v47   ;;  %v2666_v55 = vmul.f32 %v4978_v26, %v2650_v23  ;;  %v3395_v9 = vmul.f32 %v4984_v10, %v3370_v19  ;;  %v3396_v43 = vmul.f32 %v4986_v27, %v3374_v21 }
 0x5d6   : > { %v3382_v57 = vrot.slane %v3349_v4, %v4157_v34  ;;  %v3397_v6 = vmul.f32 %v4990_v63, %v3378_v20 }
 0x5d8   : > { %v3398_v26 = vmul.f32 %v4992_v52, %v3382_v57 }
 0x5d9   : > { %2691 = vperm.xlu1 %3918, %v2664_v58   ;;  %2688 = vperm.xlu0 %3919, %v2663_v44  }
 0x5dd   : > { %3411 = vperm.xlu1 %3918, %v3392_v14   ;;  %3408 = vperm.xlu0 %3919, %v3391_v61  }
 0x5e1   : > { %3414 = vperm.xlu1 %3918, %v3393_v54   ;;  %2694 = vperm.xlu0 %3919, %v2665_v46  }
 0x5e5   : > { %3417 = vperm.xlu1 %3918, %v3394_v24   ;;  %2697 = vperm.xlu0 %3919, %v2666_v55  }
 0x5e9   : > { %3420 = vperm.xlu1 %3918, %v3395_v9   ;;  %3423 = vperm.xlu0 %3919, %v3396_v43  }
 0x5ed   : > { %3426 = vperm.xlu1 %3918, %v3397_v6   ;;  %3429 = vperm.xlu0 %3919, %v3398_v26  }
 0x5ef   : > { %v1212_v28 = vpop.permute.xlu1 %1211  ;;  %v1215_v30 = vpop.permute.xlu0 %1214 }
 0x5f0   : > { %v1237_v34 = vrot.slane %v1212_v28, %v4127_v22  ;;  %v1241_v27 = vrot.slane %v1215_v30, %v4127_v22 }
 0x5f1   : > { %2006 = vrot.lane.b32.xlu1 %v4168_v41, %s4011_s27  ;;  %2738 = vrot.lane.b32.xlu0 %v4168_v41, %s4012_s28 }
 0x5f2   : > { %v1266_v50 = vsel %vm755_vm9, %v1241_v27, %v1237_v34 }
 0x5f3   : > { %v1218_v10 = vpop.permute.xlu1 %1217  ;;  %v1224_v32 = vpop.permute.xlu0 %1223 }
 0x5f4   : > { %v1245_v63 = vrot.slane %v1218_v10, %v4127_v22  ;;  %v1253_v62 = vrot.slane %v1224_v32, %v4127_v22 }
 0x5f5   : > { %3470 = vrot.lane.b32.xlu1 %v4168_v41, %s4013_s29 }
 0x5f6   : > { %v1267_v12 = vsel %vm757_vm7, %v1245_v63, %v1266_v50 }
 0x5f7   : > { %v1221_v52 = vpop.permute.xlu1 %1220  ;;  %v1230_v59 = vpop.permute.xlu0 %1229 }
 0x5f8   : > { %v1249_v38 = vrot.slane %v1221_v52, %v4127_v22  ;;  %v1261_v60 = vrot.slane %v1230_v59, %v4127_v22 }
 0x5fa   : > { %v1268_v49 = vsel %vm759_vm11, %v1249_v38, %v1267_v12 }
 0x5fb   : > { %v1227_v29 = vpop.permute.xlu1 %1226  ;;  %v1233_v31 = vpop.permute.xlu0 %1232  ;;  %v1269_v41 = vsel %vm761_vm10, %v1253_v62, %v1268_v49 }
 0x5fc   : > { %v1257_v15 = vrot.slane %v1227_v29, %v4127_v22  ;;  %v1265_v33 = vrot.slane %v1233_v31, %v4127_v22 }
 0x5fe   : > { %v1270_v11 = vsel %vm763_vm12, %v1257_v15, %v1269_v41 }
 0x5ff   : > { %v1271_v25 = vsel %vm765_vm15, %v1261_v60, %v1270_v11 }
 0x600   : > { %v1272_v40 = vsel %vm767_vm8, %v1265_v33, %v1271_v25 }
 0x601   : > { %3835 = vmatmul.mubr.msk.f32.vlgmr.msra.gmra.mrb[4].mxu1 %vm5281_vm2, %v1272_v40 }
 0x602   : > { %3844 = vmatprep.mubr.msk.f32.mxu1 %vm5293_vm6, %v5292_v3 }
 0x63c   : > { %v1948_v7 = vpop.permute.xlu1 %1947  ;;  %v1945_v56 = vpop.permute.xlu0 %1944 }
 0x63d   : > { %v1974_v8 = vrot.slane %v1948_v7, %v4127_v22  ;;  %v1970_v14 = vrot.slane %v1945_v56, %v4127_v22 }
 0x63f   : > { %v1999_v46 = vsel %vm755_vm9, %v1974_v8, %v1970_v14 }
 0x640   : > { %v1951_v1 = vpop.permute.xlu1 %1950  ;;  %v1957_v36 = vpop.permute.xlu0 %1956 }
 0x641   : > { %v1978_v42 = vrot.slane %v1951_v1, %v4127_v22  ;;  %v1986_v26 = vrot.slane %v1957_v36, %v4127_v22 }
 0x643   : > { %v2000_v24 = vsel %vm757_vm7, %v1978_v42, %v1999_v46 }
 0x644   : > { %v1954_v45 = vpop.permute.xlu1 %1953 }
 0x645   : > { %v1982_v54 = vrot.slane %v1954_v45, %v4127_v22 }
 0x647   : > { %v2001_v21 = vsel %vm759_vm11, %v1982_v54, %v2000_v24 }
 0x648   : > { %v1960_v37 = vpop.permute.xlu1 %1959  ;;  %v2002_v59 = vsel %vm761_vm10, %v1986_v26, %v2001_v21 }
 0x649   : > { %v1990_v43 = vrot.slane %v1960_v37, %v4127_v22 }
 0x64b   : > { %v2003_v12 = vsel %vm763_vm12, %v1990_v43, %v2002_v59 }
 0x64c   : > { %v2680_v48 = vpop.permute.xlu1 %2679  ;;  %v2677_v5 = vpop.permute.xlu0 %2676 }
 0x64d   : > { %v2706_v55 = vrot.slane %v2680_v48, %v4127_v22  ;;  %v2702_v19 = vrot.slane %v2677_v5, %v4127_v22 }
 0x64f   : > { %v2731_v27 = vsel %vm755_vm9, %v2706_v55, %v2702_v19 }
 0x650   : > { %v2683_v39 = vpop.permute.xlu1 %2682  ;;  %v1963_v13 = vpop.permute.xlu0 %1962 }
 0x651   : > { %v2710_v9 = vrot.slane %v2683_v39, %v4127_v22  ;;  %v1994_v28 = vrot.slane %v1963_v13, %v4127_v22 }
 0x653   : > { %v2732_v50 = vsel %vm757_vm7, %v2710_v9, %v2731_v27  ;;  %v2004_v31 = vsel %vm765_vm15, %v1994_v28, %v2003_v12 }
 0x654   : > { %v2686_v47 = vpop.permute.xlu1 %2685  ;;  %v1966_v4 = vpop.permute.xlu0 %1965 }
 0x655   : > { %v2714_v20 = vrot.slane %v2686_v47, %v4127_v22  ;;  %v1998_v63 = vrot.slane %v1966_v4, %v4127_v22 }
 0x657   : > { %v2733_v49 = vsel %vm759_vm11, %v2714_v20, %v2732_v50  ;;  %v2005_v33 = vsel %vm767_vm8, %v1998_v63, %v2004_v31 }
 0x658   : > { %v2692_v35 = vpop.permute.xlu1 %2691  ;;  %v2689_v53 = vpop.permute.xlu0 %2688 }
 0x659   : > { %v2718_v30 = vrot.slane %v2689_v53, %v4127_v22  ;;  %v2722_v62 = vrot.slane %v2692_v35, %v4127_v22 }
 0x65b   : > { %v2734_v15 = vsel %vm761_vm10, %v2718_v30, %v2733_v49 }
 0x65c   : > { %v3412_v17 = vpop.permute.xlu1 %3411  ;;  %v3409_v58 = vpop.permute.xlu0 %3408  ;;  %v2735_v36 = vsel %vm763_vm12, %v2722_v62, %v2734_v15  ;;  %v3771_v15 = vld [vmem:[%s5253_s9] ss:$0 sm:$0xff] }
 0x65d   : > { %v3438_v57 = vrot.slane %v3412_v17, %v4127_v22  ;;  %v3434_v6 = vrot.slane %v3409_v58, %v4127_v22  ;;  %v3563_v17 = vld [vmem:[%s5250_s6] sm:$0xff] }
 0x65f   : > { %v3463_v29 = vsel %vm755_vm9, %v3438_v57, %v3434_v6  ;;  %vm5294_vm9 = vmmov %vm5281_vm2  ;;  %v3768_v6 = vld [vmem:[%s5251_s7] ss:$0 sm:$0xff] }
 0x660   : > { %v3415_v44 = vpop.permute.xlu1 %3414  ;;  %v2695_v2 = vpop.permute.xlu0 %2694 }
 0x661   : > { %v3442_v10 = vrot.slane %v3415_v44, %v4127_v22  ;;  %v2726_v41 = vrot.slane %v2695_v2, %v4127_v22  ;;  %v5297_v44 = vmov 0.0|0.0   ;;  %v3566_v2 = vld [vmem:[%s5250_s6 + $0x18] sm:$0xff] }
 0x663   : > { %v3464_v60 = vsel %vm757_vm7, %v3442_v10, %v3463_v29  ;;  %v2736_v37 = vsel %vm765_vm15, %v2726_v41, %v2735_v36  ;;  %vm5295_vm7 = vmmov %vm5281_vm2  ;;  %v3994_v10 = vld [vmem:[%s4135_s18] sm:$0xff] }
 0x664   : > { %v3418_v61 = vpop.permute.xlu1 %3417  ;;  %v2698_v16 = vpop.permute.xlu0 %2697  ;;  %v3770_v29 = vld [vmem:[%s5252_s8] ss:$0 sm:$0xff] }
 0x665   : > { %v3446_v52 = vrot.slane %v3418_v61, %v4127_v22  ;;  %v2730_v40 = vrot.slane %v2698_v16, %v4127_v22 }
 0x667   : > { %v3465_v25 = vsel %vm759_vm11, %v3446_v52, %v3464_v60  ;;  %v2737_v5 = vsel %vm767_vm8, %v2730_v40, %v2736_v37  ;;  %vm5296_vm11 = vmmov %vm5281_vm2 }
 0x668   : > { %v3421_v18 = vpop.permute.xlu1 %3420  ;;  %v3424_v23 = vpop.permute.xlu0 %3423 }
 0x669   : > { %v3450_v38 = vrot.slane %v3421_v18, %v4127_v22  ;;  %v3454_v7 = vrot.slane %v3424_v23, %v4127_v22 }
 0x66b   : > { %v3466_v1 = vsel %vm761_vm10, %v3450_v38, %v3465_v25  ;;  %vm3559_vm10 = vcmask 130048  }
 0x66c   : > { %v3427_v32 = vpop.permute.xlu1 %3426  ;;  %v3430_v34 = vpop.permute.xlu0 %3429  ;;  %v3467_v39 = vsel %vm763_vm12, %v3454_v7, %v3466_v1  ;;  %vm3561_vm12 = vcmask 195584  }
 0x66d   : > { %v3458_v56 = vrot.slane %v3427_v32, %v4127_v22  ;;  %v3462_v13 = vrot.slane %v3430_v34, %v4127_v22  ;;  %v3564_v22 = vld [vmem:[%s5250_s6 + $0x8] sm:$0xff] }
 0x66e   : > { %v3891_v58 = vpack.c.bf16 %v3564_v22, %v3563_v17 }
 0x66f   : > { %v3468_v47 = vsel %vm765_vm15, %v3458_v56, %v3467_v39  ;;  %vm5300_vm15 = vmmov %vm5281_vm2 }
 0x670   : > { %v2007_v11 = vpop.permute.xlu1 %2006  ;;  %v2739_v45 = vpop.permute.xlu0 %2738  ;;  %v3469_v4 = vsel %vm767_vm8, %v3462_v13, %v3468_v47  ;;  %3892 = vmatpush3.bf16.msra.mxu0 %v3891_v58  ;;  %vm5301_vm8 = vcmask 261120  }
 0x671   : > { %3843 = vmatpush3.msra.mxu1 %v2007_v11  ;;  %3893 = vmatprep.subr.bf16.mxu0 %v5297_v44 }
 0x672   : > { %3845 = vmatmul.mubr.msk.f32.vlgmr.msra.gmra.mrb[6].mxu1 %vm5294_vm9, %v2005_v33  ;;  %3852 = vmatprep.subr.mxu1 %v5292_v3 }
 0x673   : > { %3853 = vmatpush3.msra.mxu1 %v2739_v45  ;;  %3854 = vmatprep.mubr.msk.f32.mxu1 %vm5293_vm6, %v5292_v3 }
 0x674   : > { %v3471_v48 = vpop.permute.xlu1 %3470  ;;  %3862 = vmatprep.subr.mxu1 %v5292_v3 }
 0x676   : > { %3855 = vmatmul.mubr.msk.f32.vlgmr.msra.gmra.mrb[8].mxu1 %vm5295_vm7, %v2737_v5 }
 0x677   : > { %3863 = vmatpush3.msra.mxu1 %v3471_v48  ;;  %3864 = vmatprep.mubr.msk.f32.mxu1 %vm5293_vm6, %v5292_v3  ;;  %v3565_v3 = vld [vmem:[%s5250_s6 + $0x10] sm:$0xff] }
 0x678   : > { %v3894_v8 = vpack.c.bf16 %v3566_v2, %v3565_v3 }
 0x67a   : > { %3865 = vmatmul.mubr.msk.f32.vlgmr.msra.gmra.mrb[10].mxu1 %vm5296_vm11, %v3469_v4  ;;  %3895 = vmatpush3.bf16.msra.mxu0 %v3894_v8 }
 0x6d4   : > { %v1344_v35 = vpop.f32.mrb[4].mxu1 }
 0x6d5   : > { %v3836_v53 = vpop.f32.mrb[5].mxu1  ;;  %v1348_v9 = vsel %vm782_vm5, %v1344_v35, 0.0 }
 0x745   : > { %v2077_v14 = vpop.f32.mrb[6].mxu1 }
 0x746   : > { %v2081_v61 = vsel %vm1513_vm1, %v2077_v14, 0.0  ;;  %v3846_v16 = vpop.f32.mrb[7].mxu1  ;;  %vm5302_vm1 = vmmov %vm5301_vm8 }
 0x747   : > { %3547 = vrot.lane.b32.xlu0 %v2081_v61, %s4014_s21  ;;  %vm5303_vm5 = vmmov %vm5302_vm1 }
 0x749   : > { %v2809_v42 = vpop.f32.mrb[8].mxu1 }
 0x74a   : > { %v2813_v54 = vsel %vm2245_vm0, %v2809_v42, 0.0  ;;  %v3856_v46 = vpop.f32.mrb[9].mxu1  ;;  %vm5304_vm0 = vmmov %vm5302_vm1 }
 0x74b   : > { %3551 = vrot.lane.b32.xlu1 %v2813_v54, %s4015_s22 }
 0x74d   : > { %v3541_v18 = vpop.f32.mrb[10].mxu1 }
 0x74e   : > { %v3545_v24 = vsel %vm2977_vm3, %v3541_v18, 0.0  ;;  %v3866_v55 = vpop.f32.mrb[11].mxu1 }
 0x74f   : > { %3555 = vrot.lane.b32.xlu0 %v3545_v24, %s4016_s23 }
 0x7b9   : > { %v3548_v51 = vpop.permute.xlu0 %3547 }
 0x7ba   : > { %v3558_v0 = vsel %vm5300_vm15, %v1348_v9, %v3548_v51 }
 0x7bd   : > { %v3552_v19 = vpop.permute.xlu1 %3551 }
 0x7be   : > { %v3560_v43 = vsel %vm3559_vm10, %v3558_v0, %v3552_v19 }
 0x7c1   : > { %v3556_v20 = vpop.permute.xlu0 %3555 }
 0x7c2   : > { %v3562_v57 = vsel %vm3561_vm12, %v3560_v43, %v3556_v20 }
 0x7c3   : > { %3876 = vmatmul.mubr.msk.f32.vlgmr.msra.gmra.mrb[8].mxu0 %vm5301_vm8, %v3562_v57 }
 0x896   : > { %v3643_v26 = vpop.f32.mrb[8].mxu0 }
 0x897   : > { %v3644_v28 = vadd.f32 %v3768_v6, %v3643_v26  ;;  %v3877_v30 = vpop.f32.mrb[9].mxu0 }
 0x899   : > { %v3647_v32 = vadd.f32 %v3994_v10, %v3644_v28 }
 0x89b   : > { %v3648_v34 = vsel %vm5302_vm1, %v3647_v32, 0.0 }
 0x89c   : > { %3649 = vadd.xlane.f32.xlu1 %v3648_v34 }
 0x929   : > { %v3650_v27 = vpop.xlane.xlu1 %3649 }
 0x92a   : > { %v3652_v63 = vmul.f32 0.03125, %v3650_v27 }
 0x92c   : > { %v3653_v52 = vsub.f32 %v3647_v32, %v3652_v63 }
 0x92e   : > { %v3654_v59 = vmul.f32 %v3653_v52, %v3653_v52 }
 0x930   : > { %v3655_v50 = vsel %vm5303_vm5, %v3654_v59, 0.0 }
 0x931   : > { %3656 = vadd.xlane.f32.xlu0 %v3655_v50 }
 0x9be   : > { %v3657_v38 = vpop.xlane.xlu0 %3656 }
 0x9bf   : > { %v3658_v12 = vmul.f32 0.03125, %v3657_v38 }
 0x9c1   : > { %v3659_v49 = vadd.f32 1e-05, %v3658_v12 }
 0x9c3   : > { %3992 = vrsqrt.f32 %v3659_v49 }
 0x9cd   : > { %v3993_v62 = vpop.eup %3992 }
 0x9ce   : > { %v3661_v31 = vmul.f32 %v3993_v62, %v3653_v52 }
 0x9d0   : > { %v3669_v60 = vmul.f32 %v3770_v29, %v3661_v31 }
 0x9d2   : > { %v3677_v41 = vadd.f32 %v3771_v15, %v3669_v60 }
 0x9d4   : > { %3678 = vst.msk [vmem:[%s371_s12] sm:$0xff] %vm5304_vm0, %v3677_v41 }
 0x9d5 PF: > { %s20_s13 = sadd.s32 1, %s4001_s13  }
 0x9d6   : > { %p17_p4 = scmp.ge.s32.totalorder %s20_s13, 4  }
 0x9d8   :  { %19 = sbr.rel (!%p17_p4) target bundleno = 1 (0x1), region = 93 }

// kernel: _lambda_.6
= control target key start
LH: loop header
LB: loop body
LE: loop exit
PB: predicated region body
PF: predicated region fallthrough
CT: control target
= control target key end

     0   :  { %14 = vsyncpa [#allocation3], 0  ;;  %s5645_s0 = inlined_call_operand.vmem [shape: f32[2,8,32], index: 0, kind: input, shape index: {}]   ;;  %s5646_s1 = inlined_call_operand.vmem [shape: f32[32,32], index: 1, kind: input, shape index: {}]   ;;  %s5647_s2 = inlined_call_operand.vmem [shape: f32[1,32], index: 2, kind: input, shape index: {}]   ;;  %s5648_s3 = inlined_call_operand.vmem [shape: f32[32,64], index: 3, kind: input, shape index: {}]   ;;  %s5649_s4 = inlined_call_operand.hbm [shape: f32[1,64], index: 4, kind: input, shape index: {}]   ;;  %s5650_s5 = inlined_call_operand.hbm [shape: f32[32,32], index: 5, kind: input, shape index: {}]   ;;  %s5651_s6 = inlined_call_operand.hbm [shape: f32[1,32], index: 6, kind: input, shape index: {}]   ;;  %s5652_s7 = inlined_call_operand.hbm [shape: f32[1,32], index: 7, kind: input, shape index: {}]   ;;  %s5653_s8 = inlined_call_operand.hbm [shape: f32[1,32], index: 8, kind: input, shape index: {}]   ;;  %s5654_s9 = inlined_call_operand.vmem [shape: f32[2,8,32], index: 9, kind: output, shape index: {}]  }
   0x1   :  { %15 = vsyncpa [#allocation5], 0 }
   0x2   :  { %16 = vsyncpa [#allocation8], 0  ;;  %s4343_s30 = smov 0  }
   0x3 LB: > { %s4272_s10 = smov [#allocation4]   ;;  %s4349_s12 = sadd.s32 4294967295, %s4270_s30   ;;  %s4270_s30 = sphi %s4343_s30, %s22_s30  }
   0x4   : > { %s279_s11 = sshll.u32 %s4272_s10, 4  ;;  %p3801_p0 = scmp.ge.s32.totalorder %s4270_s30, 1  ;;  %s4354_s11 = int_to_ptr.vmem [resolvable:$true] %s279_s11 }
   0x5   : > { %p247_p1 = scmp.lt.s32.totalorder %s4270_s30, 3  ;;  %p5655_p2 = scmp.eq.s32.totalorder %s4349_s12, 0 }
   0x6   : > { %s4273_s14 = smov [#allocation7]   ;;  %s4274_s17 = smov [#allocation2]  }
   0x7   : > { %p4356_p3 = pnand %p3801_p0, %p247_p1  ;;  %s304_s15 = sshll.u32 %s4273_s14, 4  ;;  %s4362_s15 = int_to_ptr.vmem [resolvable:$true] %s304_s15 }
   0x8   : > { %s269_s18 = sshll.u32 %s4274_s17, 4  ;;  %s4275_s19 = smov [#allocation6]   ;;  %s4370_s18 = int_to_ptr.vmem [resolvable:$true] %s269_s18 }
   0x9   : > { %s5670_s13 = scalar_select %p4356_p3, 1, 0 }
   0xa   : > { %p3980_p4 = pneg %p4356_p3  ;;  %s4372_s20 = sshll.u32 %s4275_s19, 4  ;;  %s294_s20 = int_to_ptr.vmem [resolvable:$true] %s4372_s20 }
   0xb   : > { %s4112_s23 = scalar_lea.hbm %s5650_s5, 512 }
   0xc   : > { %p4366_p5 = pnand %p5655_p2, %p3980_p4  ;;  %p4113_p6 = scmp.ne.s32.totalorder %s5650_s5, %s4112_s23 }
   0xd   : > { %p4119_p10 = scmp.lt.u32.totalorder %s4112_s23, %s5650_s5 }
   0xe   : > { %p4382_p7 = pneg %p4366_p5 }
  0x10   : > { %p4115_p8 = pnand %p4382_p7, %p4113_p6 }
  0x12   : > { %p4116_p9 = pneg %p4115_p8 }
  0x14   : > { %p4121_p11 = pnand %p4119_p10, %p4116_p9 }
  0x16   : > { %4124 = shalt.err (!%p4121_p11)
}
  0x17   : > { %s4125_s29 = scalar_lea.vmem %s4354_s11, 512  ;;  %p4133_p1 = scmp.lt.s32.totalorder %s4354_s11, %s4354_s11 }
  0x18   : > { %p4126_p12 = scmp.ne.s32.totalorder %s4354_s11, %s4125_s29  ;;  %p4134_p4 = scmp.lt.s32.totalorder %s4125_s29, %s4125_s29 }
  0x1a   : > { %p4128_p13 = pnand %p4126_p12, %p4382_p7  ;;  %p4135_p6 = por %p4134_p4, %p4133_p1 }
  0x1c   : > { %p4129_p0 = pneg %p4128_p13 }
  0x1e   : > { %p4136_p8 = pnand %p4135_p6, %p4129_p0 }
  0x20   : > { %4139 = shalt.err (!%p4136_p8)
}
  0x21   : > { %s4276_s10 = smov 128   ;;  %s4277_s14 = smov 8  }
  0x22   : > { %3986 = dma.hbm_to_vmem [thread:$0]  (!%p4366_p5), %s5650_s5, 512, %s4354_s11, [#allocation5], %s4276_s10, %s4276_s10, %s4277_s14  }
  0x23   : > { %s4140_s23 = scalar_lea.hbm %s5652_s7, 16 }
  0x24   : > { %p4141_p9 = scmp.ne.s32.totalorder %s5652_s7, %s4140_s23  ;;  %p4147_p12 = scmp.lt.u32.totalorder %s4140_s23, %s5652_s7 }
  0x26   : > { %p4143_p10 = pnand %p4141_p9, %p4382_p7 }
  0x28   : > { %p4144_p11 = pneg %p4143_p10 }
  0x2a   : > { %p4149_p13 = pnand %p4147_p12, %p4144_p11 }
  0x2c   : > { %4152 = shalt.err (!%p4149_p13)
}
  0x2d   : > { %s4153_s11 = scalar_lea.vmem %s4362_s15, 16  ;;  %s4160_s29 = scalar_lea.vmem %s4362_s15, 32 }
  0x2e   : > { %p4154_p0 = scmp.ne.s32.totalorder %s4362_s15, %s4153_s11  ;;  %p4161_p6 = scmp.lt.s32.totalorder %s4362_s15, %s4362_s15 }
  0x2f   : > { %p4162_p8 = scmp.lt.s32.totalorder %s4160_s29, %s4153_s11 }
  0x30   : > { %p4156_p1 = pnand %p4154_p0, %p4382_p7 }
  0x31   : > { %p4163_p9 = por %p4162_p8, %p4161_p6 }
  0x32   : > { %p4157_p4 = pneg %p4156_p1 }
  0x34   : > { %p4164_p10 = pnand %p4163_p9, %p4157_p4 }
  0x36   : > { %4167 = shalt.err (!%p4164_p10)
}
  0x37   : > { %3992 = dma.hbm_to_vmem [thread:$0]  (!%p4366_p5), %s5652_s7, 16, %s4362_s15, [#allocation8]  }
  0x38   : > { %s4168_s21 = scalar_lea.hbm %s5649_s4, 16 }
  0x39   : > { %p4169_p11 = scmp.ne.s32.totalorder %s5649_s4, %s4168_s21  ;;  %p4175_p0 = scmp.lt.u32.totalorder %s4168_s21, %s5649_s4 }
  0x3b   : > { %p4171_p12 = pnand %p4169_p11, %p4382_p7 }
  0x3d   : > { %p4172_p13 = pneg %p4171_p12 }
  0x3f   : > { %p4177_p1 = pnand %p4175_p0, %p4172_p13 }
  0x41   : > { %4180 = shalt.err (!%p4177_p1)
}
  0x42   : > { %s4181_s15 = scalar_lea.vmem %s4370_s18, 16  ;;  %s4188_s27 = scalar_lea.vmem %s4370_s18, 32 }
  0x43   : > { %p4182_p4 = scmp.ne.s32.totalorder %s4370_s18, %s4181_s15  ;;  %p4189_p9 = scmp.lt.s32.totalorder %s4370_s18, %s4370_s18 }
  0x44   : > { %p4190_p10 = scmp.lt.s32.totalorder %s4188_s27, %s4181_s15 }
  0x45   : > { %p4184_p6 = pnand %p4182_p4, %p4382_p7 }
  0x46   : > { %p4191_p11 = por %p4190_p10, %p4189_p9 }
  0x47   : > { %p4185_p8 = pneg %p4184_p6 }
  0x49   : > { %p4192_p12 = pnand %p4191_p11, %p4185_p8 }
  0x4b   : > { %4195 = shalt.err (!%p4192_p12)
}
  0x4c   : > { %3983 = dma.hbm_to_vmem [thread:$0]  (!%p4366_p5), %s5649_s4, 16, %s4370_s18, [#allocation3]  }
  0x4d   : > { %s4196_s14 = scalar_lea.hbm %s5651_s6, 16 }
  0x4e   : > { %p4197_p13 = scmp.ne.s32.totalorder %s5651_s6, %s4196_s14  ;;  %p4203_p4 = scmp.lt.u32.totalorder %s4196_s14, %s5651_s6 }
  0x50   : > { %p4199_p0 = pnand %p4197_p13, %p4382_p7 }
  0x52   : > { %p4200_p1 = pneg %p4199_p0 }
  0x54   : > { %p4205_p6 = pnand %p4203_p4, %p4200_p1 }
  0x56   : > { %4208 = shalt.err (!%p4205_p6)
}
  0x57   : > { %s4209_s23 = scalar_lea.vmem %s294_s20, 16  ;;  %s4216_s18 = scalar_lea.vmem %s294_s20, 32 }
  0x58   : > { %p4210_p8 = scmp.ne.s32.totalorder %s294_s20, %s4209_s23  ;;  %p4217_p11 = scmp.lt.s32.totalorder %s294_s20, %s294_s20 }
  0x59   : > { %p4218_p12 = scmp.lt.s32.totalorder %s4216_s18, %s4209_s23 }
  0x5a   : > { %p4212_p9 = pnand %p4210_p8, %p4382_p7 }
  0x5b   : > { %p4219_p2 = por %p4218_p12, %p4217_p11 }
  0x5c   : > { %p4213_p10 = pneg %p4212_p9 }
  0x5e   : > { %p4220_p3 = pnand %p4219_p2, %p4213_p10 }
  0x60   : > { %4223 = shalt.err (!%p4220_p3)
}
  0x61   : > { %3989 = dma.hbm_to_vmem [thread:$0]  (!%p4366_p5), %s5651_s6, 16, %s294_s20, [#allocation5]  }
  0x62   : > { %s4278_s15 = smov [#allocation9]   ;;  %s4224_s29 = scalar_lea.hbm %s5653_s8, 16 }
  0x63   : > { %s315_s27 = sshll.u32 %s4278_s15, 4  ;;  %p4225_p13 = scmp.ne.s32.totalorder %s5653_s8, %s4224_s29  ;;  %s316_s27 = int_to_ptr.vmem [resolvable:$true] %s315_s27 }
  0x64   : > { %p4231_p0 = scmp.lt.u32.totalorder %s4224_s29, %s5653_s8 }
  0x65   : > { %p4227_p2 = pnand %p4225_p13, %p4382_p7 }
  0x67   : > { %p4228_p3 = pneg %p4227_p2 }
  0x69   : > { %p4233_p1 = pnand %p4231_p0, %p4228_p3 }
  0x6b   : > { %4236 = shalt.err (!%p4233_p1)
}
  0x6c   : > { %s4237_s20 = scalar_lea.vmem %s316_s27, 16  ;;  %s4244_s21 = scalar_lea.vmem %s316_s27, 32 }
  0x6d   : > { %p4238_p4 = scmp.ne.s32.totalorder %s316_s27, %s4237_s20  ;;  %p4245_p9 = scmp.lt.s32.totalorder %s316_s27, %s316_s27 }
  0x6e   : > { %p4246_p10 = scmp.lt.s32.totalorder %s4244_s21, %s4237_s20 }
  0x6f   : > { %p4240_p6 = pnand %p4238_p4, %p4382_p7 }
  0x70   : > { %p4247_p11 = por %p4246_p10, %p4245_p9 }
  0x71   : > { %p4241_p8 = pneg %p4240_p6 }
  0x73   : > { %p4248_p12 = pnand %p4247_p11, %p4241_p8 }
  0x75   : > { %4251 = shalt.err (!%p4248_p12)
}
  0x76   : > { %3995 = dma.hbm_to_vmem [thread:$0]  (!%p4366_p5), %s5653_s8, 16, %s316_s27, [#allocation8]  }
  0x77   : > { %p5673_p13 = scmp.ne.s32.totalorder %s5670_s13, 0 }
  0x79   : > { %335 = sbr.rel (%p5673_p13) target bundleno = 2643 (0xa53), region = 56 }
  0x80   : > { %p5674_p2 = scmp.eq.s32.totalorder %s4349_s12, 0 }
  0x82   : > { %4257 = dma.done.wait (%p5674_p2), [#allocation3], 16   ;;  %p5675_p7 = pmov %p5674_p2 }
  0x83   : > { %p5676_p3 = pmov %p5674_p2 }
  0x84   : > { %4259 = vsyncadd (%p5675_p7), [#allocation3], 4294967280 }
  0x85   : > { %4261 = dma.done.wait (%p5676_p3), [#allocation5], 528   ;;  %p5677_p0 = pmov %p5674_p2 }
  0x87   : > { %4263 = vsyncadd (%p5677_p0), [#allocation5], 4294966768  ;;  %p5678_p1 = pmov %p5677_p0 }
  0x88   : > { %p5679_p5 = pmov %p5677_p0 }
  0x89   : > { %4265 = dma.done.wait (%p5678_p1), [#allocation8], 32  }
  0x8a   : > { %4267 = vsyncadd (%p5679_p5), [#allocation8], 4294967264  ;;  %p385_p4 = scmp.lt.s32.totalorder %s4349_s12, 1  ;;  %v560_v0 = vlaneseq  ;;  %v5665_v1 = vmov 0.0|0.0   ;;  %vm5658_vm0 = vmmov 0   ;;  %v5666_v2 = vmov 0.0  }
  0x8b   : > { %3948 = vmatprep.subr.bf16.mxu1 %v5665_v1  ;;  %3942 = vmatprep.subr.bf16.mxu0 %v5665_v1  ;;  %v4282_v5 = vmov 0   ;;  %v479_v12 = vld [vmem:[%s5648_s3] sm:$0xff]  ;;  %v480_v13 = vld [vmem:[%s5648_s3 + $0x8] sm:$0xff]  ;;  %v481_v18 = vld [vmem:[%s5648_s3 + $0x10] sm:$0xff]  ;;  %vm5657_vm2 = vcmask 261120   ;;  %vm5660_vm3 = vcmask 64512  }
  0x8c   : > { %3888 = vmatprep.mubr.msk.f32.mxu1 %vm5658_vm0, %v5666_v2  ;;  %3877 = vmatprep.mubr.msk.f32.mxu0 %vm5658_vm0, %v5666_v2  ;;  %v561_v3 = vshrl.u32 %v560_v0, 7  ;;  %v563_v4 = vand.u32 127, %v560_v0  ;;  %s5718_s12 = smov (!%p385_p4, %s4349_s12), 1  ;;  %v394_v14 = vld [vmem:[%s5646_s1] sm:$0xff]  ;;  %v3949_v16 = vpack.c.bf16 %v480_v13, %v479_v12  ;;  %v395_v17 = vld [vmem:[%s5646_s1 + $0x8] sm:$0xff]  ;;  %v482_v19 = vld [vmem:[%s5648_s3 + $0x18] sm:$0xff] }
  0x8d   : > { %4036 = vset.pattern.permute.xlu0 %v4282_v5  ;;  %4035 = vset.pattern.permute.xlu1 %v4282_v5  ;;  %s3814_s14 = sshll.u32 %s5718_s12, 3  ;;  %v3943_v21 = vpack.c.bf16 %v395_v17, %v394_v14  ;;  %v396_v22 = vld [vmem:[%s5646_s1 + $0x10] sm:$0xff]  ;;  %v397_v23 = vld [vmem:[%s5646_s1 + $0x18] sm:$0xff]  ;;  %v3952_v26 = vpack.c.bf16 %v482_v19, %v481_v18  ;;  %v3818_v37 = vld [vmem:[#allocation2] ss:$0 sm:$0xff]  ;;  %s4283_s18 = smov 112  }
  0x8e   : > { %v4516_v6 = vsub.s32 1, %v561_v3  ;;  %v4518_v7 = vsub.s32 2, %v561_v3  ;;  %vm626_vm1 = vcmp.lt.s32.totalorder %v563_v4, %v561_v3  ;;  %v4520_v8 = vsub.s32 3, %v561_v3  ;;  %3950 = vmatpush3.bf16.msra.mxu1 %v3949_v16  ;;  %s4566_s13 = scalar_lea.vmem %s5645_s0, %s3814_s14  ;;  %v3816_v39 = vld [vmem:[%s5647_s2] ss:$0 sm:$0xff]  ;;  %s4284_s24 = smov 120  }
  0x8f   : > { %v627_v9 = vsel %vm626_vm1, 1, %v4282_v5  ;;  %v4523_v10 = vsub.s32 %v563_v4, %v561_v3  ;;  %v4525_v11 = vsub.s32 0, %v561_v3  ;;  %v4554_v24 = vsub.s32 4, %v561_v3  ;;  %3944 = vmatpush3.bf16.msra.mxu0 %v3943_v21  ;;  %3951 = vmatprep.subr.bf16.mxu1 %v5665_v1  ;;  %v393_v32 = vld [vmem:[%s4566_s13] sm:$0xff]  ;;  %s4285_s25 = smov 104   ;;  %s4286_s15 = smov 96  }
  0x90   : > { %v638_v15 = vrot.slane %v627_v9, %v4516_v6  ;;  %v645_v25 = vrot.slane %v627_v9, %v4518_v7  ;;  %v4557_v27 = vsub.s32 5, %v561_v3  ;;  %v652_v28 = vrot.slane %v627_v9, %v4520_v8  ;;  %3945 = vmatprep.subr.bf16.mxu0 %v5665_v1  ;;  %s4287_s27 = smov 88   ;;  %s4288_s28 = smov 80  }
  0x91   : > { %v631_v20 = vrot.slane %v627_v9, %v4525_v11  ;;  %v3946_v29 = vpack.c.bf16 %v397_v23, %v396_v22  ;;  %v4569_v30 = vsub.s32 6, %v561_v3  ;;  %v659_v31 = vrot.slane %v627_v9, %v4554_v24  ;;  %s4289_s11 = smov 72   ;;  %s4290_s29 = smov 8  }
  0x92   : > { %640 = vbcast.lane.b32.xlu1 %v638_v15, 256  ;;  %3953 = vmatpush3.bf16.msra.mxu1 %v3952_v26  ;;  %v4573_v33 = vsub.s32 7, %v561_v3  ;;  %v666_v34 = vrot.slane %v627_v9, %v4557_v27  ;;  %s4291_s10 = smov 16   ;;  %s4292_s17 = smov 24  }
  0x93   : > { %633 = vbcast.lane.b32.xlu0 %v631_v20, 256  ;;  %3947 = vmatpush3.bf16.msra.mxu0 %v3946_v29  ;;  %v673_v35 = vrot.slane %v627_v9, %v4569_v30  ;;  %s392_s21 = scalar_lea.vmem %s5654_s9, %s3814_s14 }
  0x94   : > { %3891 = vmatprep.subr.mxu1 %v5666_v2  ;;  %3901 = vmatprep.subr.mxu0 %v5666_v2  ;;  %v680_v36 = vrot.slane %v627_v9, %v4573_v33 }
  0x95   : > { %3889 = vmatmul.mubr.msk.f32.vlgmr.msra.gmra.mrb[0].mxu1 %vm5657_vm2, %v393_v32 }
  0x96   : > { %647 = vbcast.lane.b32.xlu1 %v645_v25, 256  ;;  %3878 = vmatmul.mubr.msk.f32.vlgmr.msra.gmra.mrb[0].mxu0 %vm5657_vm2, %v393_v32 }
  0x97   : > { %654 = vbcast.lane.b32.xlu0 %v652_v28, 256  ;;  %3893 = vmatprep.mubr.msk.f32.mxu1 %vm5658_vm0, %v5666_v2 }
  0x98   : > { %3903 = vmatprep.mubr.msk.f32.mxu0 %vm5658_vm0, %v5666_v2 }
  0x9a   : > { %661 = vbcast.lane.b32.xlu1 %v659_v31, 256 }
  0x9b   : > { %668 = vbcast.lane.b32.xlu0 %v666_v34, 256 }
  0x9e   : > { %675 = vbcast.lane.b32.xlu1 %v673_v35, 256 }
  0x9f   : > { %682 = vbcast.lane.b32.xlu0 %v680_v36, 256 }
 0x104   : > { %v4601_v47 = vpop.permute.xlu1 %640 }
 0x105   : > { %v4603_v48 = vpop.permute.xlu0 %633  ;;  %vm5664_vm4 = vcmp.ne.s32.totalorder %v4601_v47, 0 }
 0x106   : > { %vm684_vm10 = vcmp.ne.s32.totalorder %v4603_v48, 0 }
 0x108   : > { %v4605_v49 = vpop.permute.xlu1 %647 }
 0x109   : > { %v4607_v50 = vpop.permute.xlu0 %654 }
 0x10c   : > { %v4609_v51 = vpop.permute.xlu1 %661 }
 0x10d   : > { %v4611_v52 = vpop.permute.xlu0 %668  ;;  %vm5661_vm15 = vcmp.ne.s32.totalorder %v4609_v51, 0 }
 0x110   : > { %v4613_v53 = vpop.permute.xlu1 %675 }
 0x111   : > { %v4615_v54 = vpop.permute.xlu0 %682 }
 0x168   : > { %v556_v38 = vpop.f32.mrb[0].mxu1 }
 0x169   : > { %v4589_v40 = vadd.f32 %v3818_v37, %v556_v38  ;;  %v3890_v41 = vpop.f32.mrb[1].mxu1  ;;  %v475_v42 = vpop.f32.mrb[0].mxu0 }
 0x16a   : > { %v3879_v43 = vpop.f32.mrb[1].mxu0  ;;  %v476_v44 = vadd.f32 %v3816_v39, %v475_v42 }
 0x16b   : > { %2265 = vrot.lane.b32.xlu1 %v4589_v40, %s4283_s18  ;;  %1533 = vrot.lane.b32.xlu0 %v4589_v40, %s4284_s24 }
 0x16c   : > { %3892 = vmatpush3.xpose.msk.msra.mxu1 %vm5660_vm3, %v4589_v40  ;;  %v564_v45 = vmul.f32 %v476_v44, %v476_v44 }
 0x16d   : > { %3896 = vmatprep.subr.mxu1 %v5666_v2 }
 0x16e   : > { %v566_v46 = vsel %vm5660_vm3, %v564_v45, 0.0 }
 0x16f   : > { %3894 = vmatmul.mubr.msk.f32.vlgmr.msra.gmra.mrb[2].mxu1 %vm5660_vm3, %v476_v44  ;;  %2263 = vrot.lane.b32.xlu1 %v476_v44, %s4283_s18 }
 0x170   : > { %1531 = vrot.lane.b32.xlu0 %v476_v44, %s4284_s24  ;;  %3898 = vmatprep.mubr.msk.f32.mxu1 %vm5658_vm0, %v5666_v2 }
 0x173   : > { %2995 = vrot.lane.b32.xlu1 %v476_v44, %s4285_s25 }
 0x174   : > { %2997 = vrot.lane.b32.xlu0 %v4589_v40, %s4285_s25 }
 0x177   : > { %2099 = vrot.lane.b32.xlu1 %v564_v45, %s4283_s18 }
 0x178   : > { %1367 = vrot.lane.b32.xlu0 %v564_v45, %s4284_s24 }
 0x17c   : > { %2831 = vrot.lane.b32.xlu0 %v564_v45, %s4285_s25 }
 0x19b   : > { %567 = vadd.xlane.f32.xlu1 %v566_v46 }
 0x1dd   : > { %v2266_v55 = vpop.permute.xlu1 %2265  ;;  %v1534_v56 = vpop.permute.xlu0 %1533 }
 0x1de   : > { %3902 = vmatpush3.xpose.msk.msra.mxu0 %vm5660_vm3, %v1534_v56 }
 0x1df   : > { %3911 = vmatprep.subr.mxu0 %v5666_v2 }
 0x1e1   : > { %v2264_v57 = vpop.permute.xlu1 %2263 }
 0x1e2   : > { %v1532_v58 = vpop.permute.xlu0 %1531 }
 0x1e3   : > { %3904 = vmatmul.mubr.msk.f32.vlgmr.msra.gmra.mrb[2].mxu0 %vm5660_vm3, %v1532_v58 }
 0x1e4   : > { %3912 = vmatpush3.xpose.msk.msra.mxu0 %vm5660_vm3, %v2266_v55  ;;  %3913 = vmatprep.mubr.msk.f32.mxu0 %vm5658_vm0, %v5666_v2 }
 0x1e5   : > { %3921 = vmatprep.subr.mxu0 %v5666_v2  ;;  %v2996_v59 = vpop.permute.xlu1 %2995 }
 0x1e6   : > { %v2998_v60 = vpop.permute.xlu0 %2997 }
 0x1e7   : > { %3914 = vmatmul.mubr.msk.f32.vlgmr.msra.gmra.mrb[4].mxu0 %vm5660_vm3, %v2264_v57 }
 0x1e8   : > { %3922 = vmatpush3.xpose.msk.msra.mxu0 %vm5660_vm3, %v2998_v60  ;;  %3923 = vmatprep.mubr.msk.f32.mxu0 %vm5658_vm0, %v5666_v2 }
 0x1e9   : > { %3954 = vmatprep.subr.bf16.mxu0 %v5665_v1  ;;  %v2100_v63 = vpop.permute.xlu1 %2099 }
 0x1ea   : > { %v1368_v61 = vpop.permute.xlu0 %1367  ;;  %v2102_v3 = vsel %vm5660_vm3, %v2100_v63, 0.0 }
 0x1eb   : > { %3924 = vmatmul.mubr.msk.f32.vlgmr.msra.gmra.mrb[6].mxu0 %vm5660_vm3, %v2996_v59  ;;  %v1370_v62 = vsel %vm5660_vm3, %v1368_v61, 0.0 }
 0x1ec   : > { %1371 = vadd.xlane.f32.xlu0 %v1370_v62  ;;  %3939 = vmatprep.mubr.msk.f32.mxu0 %vm5658_vm0, %v5666_v2 }
 0x1ee   : > { %v2832_v0 = vpop.permute.xlu0 %2831 }
 0x1ef   : > { %v2834_v4 = vsel %vm5660_vm3, %v2832_v0, 0.0 }
 0x1f0   : > { %2103 = vadd.xlane.f32.xlu0 %v2102_v3  ;;  %2835 = vadd.xlane.f32.xlu1 %v2834_v4 }
 0x228   : > { %v568_v9 = vpop.xlane.xlu1 %567 }
 0x229   : > { %v577_v12 = vrot.slane %v568_v9, %v4516_v6  ;;  %v573_v13 = vrot.slane %v568_v9, %v4525_v11  ;;  %v589_v14 = vrot.slane %v568_v9, %v4554_v24  ;;  %v581_v15 = vrot.slane %v568_v9, %v4518_v7 }
 0x22a   : > { %v597_v16 = vrot.slane %v568_v9, %v4569_v30  ;;  %v585_v18 = vrot.slane %v568_v9, %v4520_v8  ;;  %v601_v20 = vrot.slane %v568_v9, %v4573_v33  ;;  %v593_v22 = vrot.slane %v568_v9, %v4557_v27 }
 0x22b   : > { %vm611_vm5 = vcmp.gt.f32.partialorder %v568_v9, %v577_v12  ;;  %vm619_vm6 = vcmp.eq.f32.partialorder %v568_v9, %v577_v12  ;;  %vm618_vm7 = vcmp.eq.f32.partialorder %v568_v9, %v573_v13  ;;  %vm610_vm9 = vcmp.gt.f32.partialorder %v568_v9, %v573_v13 }
 0x22c   : > { %vm693_vm8 = vmand %vm619_vm6, %vm5664_vm4  ;;  %vm622_vm12 = vcmp.eq.f32.partialorder %v568_v9, %v589_v14  ;;  %vm614_vm14 = vcmp.gt.f32.partialorder %v568_v9, %v589_v14  ;;  %vm620_vm2 = vcmp.eq.f32.partialorder %v568_v9, %v581_v15  ;;  %vm612_vm6 = vcmp.gt.f32.partialorder %v568_v9, %v581_v15 }
 0x22d   : > { %vm701_vm11 = vmor %vm611_vm5, %vm693_vm8  ;;  %vm5662_vm8 = vcmp.ne.s32.totalorder %v4605_v49, 0  ;;  %vm624_vm0 = vcmp.eq.f32.partialorder %v568_v9, %v597_v16  ;;  %vm621_vm3 = vcmp.eq.f32.partialorder %v568_v9, %v585_v18 }
 0x22e   : > { %v709_v17 = vsel %vm701_vm11, 1, %v4282_v5  ;;  %vm692_vm13 = vmand %vm618_vm7, %vm684_vm10 }
 0x22f   : > { %720 = vperm.xlu0 %4036, %v709_v17   ;;  %vm700_vm1 = vmor %vm610_vm9, %vm692_vm13  ;;  %vm616_vm9 = vcmp.gt.f32.partialorder %v568_v9, %v597_v16  ;;  %vm5663_vm13 = vcmp.ne.s32.totalorder %v4613_v53, 0 }
 0x230   : > { %v708_v19 = vsel %vm700_vm1, 1, %v4282_v5  ;;  %vm696_vm5 = vmand %vm622_vm12, %vm5661_vm15  ;;  %vm625_vm15 = vcmp.eq.f32.partialorder %v568_v9, %v601_v20 }
 0x231   : > { %717 = vperm.xlu1 %4035, %v708_v19   ;;  %vm704_vm11 = vmor %vm614_vm14, %vm696_vm5  ;;  %vm613_vm14 = vcmp.gt.f32.partialorder %v568_v9, %v585_v18  ;;  %vm687_vm5 = vcmp.ne.s32.totalorder %v4607_v50, 0 }
 0x232   : > { %v712_v21 = vsel %vm704_vm11, 1, %v4282_v5  ;;  %vm694_vm7 = vmand %vm620_vm2, %vm5662_vm8 }
 0x233   : > { %729 = vperm.xlu0 %4036, %v712_v21   ;;  %vm702_vm1 = vmor %vm612_vm6, %vm694_vm7  ;;  %vm617_vm6 = vcmp.gt.f32.partialorder %v568_v9, %v601_v20  ;;  %vm691_vm7 = vcmp.ne.s32.totalorder %v4615_v54, 0 }
 0x234   : > { %v710_v23 = vsel %vm702_vm1, 1, %v4282_v5  ;;  %vm698_vm12 = vmand %vm624_vm0, %vm5663_vm13  ;;  %vm623_vm1 = vcmp.eq.f32.partialorder %v568_v9, %v593_v22  ;;  %vm615_vm13 = vcmp.gt.f32.partialorder %v568_v9, %v593_v22 }
 0x235   : > { %723 = vperm.xlu1 %4035, %v710_v23   ;;  %vm706_vm11 = vmor %vm616_vm9, %vm698_vm12  ;;  %vm689_vm9 = vcmp.ne.s32.totalorder %v4611_v52, 0 }
 0x236   : > { %v714_v25 = vsel %vm706_vm11, 1, %v4282_v5  ;;  %vm695_vm2 = vmand %vm621_vm3, %vm687_vm5 }
 0x237   : > { %735 = vperm.xlu0 %4036, %v714_v25   ;;  %vm703_vm8 = vmor %vm613_vm14, %vm695_vm2 }
 0x238   : > { %v711_v26 = vsel %vm703_vm8, 1, %v4282_v5  ;;  %vm699_vm0 = vmand %vm625_vm15, %vm691_vm7 }
 0x239   : > { %726 = vperm.xlu1 %4035, %v711_v26   ;;  %vm707_vm12 = vmor %vm617_vm6, %vm699_vm0 }
 0x23a   : > { %v715_v28 = vsel %vm707_vm12, 1, %v4282_v5  ;;  %vm697_vm3 = vmand %vm623_vm1, %vm689_vm9 }
 0x23b   : > { %738 = vperm.xlu0 %4036, %v715_v28   ;;  %vm705_vm11 = vmor %vm615_vm13, %vm697_vm3 }
 0x23c   : > { %v713_v29 = vsel %vm705_vm11, 1, %v4282_v5 }
 0x23d   : > { %732 = vperm.xlu1 %4035, %v713_v29  }
 0x242   : > { %v872_v31 = vpop.f32.mrb[2].mxu1 }
 0x243   : > { %v3895_v32 = vpop.f32.mrb[3].mxu1  ;;  %v889_v34 = vrot.slane %v872_v31, %v4516_v6  ;;  %v882_v35 = vrot.slane %v872_v31, %v4525_v11  ;;  %v910_v36 = vrot.slane %v872_v31, %v4554_v24  ;;  %v896_v37 = vrot.slane %v872_v31, %v4518_v7 }
 0x244   : > { %v924_v38 = vrot.slane %v872_v31, %v4569_v30  ;;  %v903_v39 = vrot.slane %v872_v31, %v4520_v8  ;;  %v931_v41 = vrot.slane %v872_v31, %v4573_v33  ;;  %v917_v42 = vrot.slane %v872_v31, %v4557_v27 }
 0x245   : > { %891 = vbcast.lane.b32.xlu0 %v889_v34, 256  ;;  %884 = vbcast.lane.b32.xlu1 %v882_v35, 256 }
 0x249   : > { %912 = vbcast.lane.b32.xlu0 %v910_v36, 256  ;;  %898 = vbcast.lane.b32.xlu1 %v896_v37, 256 }
 0x24d   : > { %926 = vbcast.lane.b32.xlu0 %v924_v38, 256  ;;  %905 = vbcast.lane.b32.xlu1 %v903_v39, 256 }
 0x251   : > { %933 = vbcast.lane.b32.xlu0 %v931_v41, 256  ;;  %919 = vbcast.lane.b32.xlu1 %v917_v42, 256 }
 0x279   : > { %v4683_v43 = vpop.xlane.xlu0 %1371 }
 0x27a   : > { %v1377_v44 = vrot.slane %v4683_v43, %v4525_v11  ;;  %v1381_v45 = vrot.slane %v4683_v43, %v4516_v6  ;;  %v1393_v46 = vrot.slane %v4683_v43, %v4554_v24  ;;  %v1385_v55 = vrot.slane %v4683_v43, %v4518_v7 }
 0x27b   : > { %v1389_v59 = vrot.slane %v4683_v43, %v4520_v8  ;;  %v1401_v61 = vrot.slane %v4683_v43, %v4569_v30  ;;  %v1397_v63 = vrot.slane %v4683_v43, %v4557_v27  ;;  %v1405_v3 = vrot.slane %v4683_v43, %v4573_v33 }
 0x27c   : > { %vm1414_vm15 = vcmp.gt.f32.partialorder %v4683_v43, %v1377_v44  ;;  %vm1422_vm8 = vcmp.eq.f32.partialorder %v4683_v43, %v1377_v44  ;;  %vm1423_vm13 = vcmp.eq.f32.partialorder %v4683_v43, %v1381_v45  ;;  %vm1415_vm2 = vcmp.gt.f32.partialorder %v4683_v43, %v1381_v45 }
 0x27d   : > { %v4696_v56 = vpop.xlane.xlu0 %2103  ;;  %vm1430_vm14 = vmand %vm1422_vm8, %vm684_vm10  ;;  %vm1426_vm1 = vcmp.eq.f32.partialorder %v4683_v43, %v1393_v46  ;;  %vm1418_vm12 = vcmp.gt.f32.partialorder %v4683_v43, %v1393_v46  ;;  %vm1424_vm11 = vcmp.eq.f32.partialorder %v4683_v43, %v1385_v55  ;;  %v4753_v16 = vpop.xlane.xlu1 %2835 }
 0x27e   : > { %vm1438_vm6 = vmor %vm1414_vm15, %vm1430_vm14  ;;  %v2109_v57 = vrot.slane %v4696_v56, %v4525_v11  ;;  %vm5680_vm15 = vcmp.ne.s32.totalorder %v4609_v51, 0  ;;  %vm1416_vm14 = vcmp.gt.f32.partialorder %v4683_v43, %v1385_v55  ;;  %v2113_v9 = vrot.slane %v4696_v56, %v4516_v6 }
 0x27f   : > { %v1446_v58 = vsel %vm1438_vm6, 1, %v4282_v5  ;;  %vm1431_vm0 = vmand %vm1423_vm13, %vm5664_vm4  ;;  %v2125_v13 = vrot.slane %v4696_v56, %v4554_v24  ;;  %v2117_v15 = vrot.slane %v4696_v56, %v4518_v7  ;;  %v2121_v18 = vrot.slane %v4696_v56, %v4520_v8 }
 0x280   : > { %1455 = vperm.xlu0 %4036, %v1446_v58   ;;  %vm1439_vm3 = vmor %vm1415_vm2, %vm1431_vm0  ;;  %vm2154_vm13 = vcmp.eq.f32.partialorder %v4696_v56, %v2109_v57  ;;  %vm5681_vm2 = vcmp.ne.s32.totalorder %v4605_v49, 0  ;;  %vm2146_vm4 = vcmp.gt.f32.partialorder %v4696_v56, %v2109_v57  ;;  %v2841_v20 = vrot.slane %v4753_v16, %v4525_v11 }
 0x281   : > { %v1447_v60 = vsel %vm1439_vm3, 1, %v4282_v5  ;;  %vm1434_vm8 = vmand %vm1426_vm1, %vm5680_vm15  ;;  %vm1425_vm1 = vcmp.eq.f32.partialorder %v4683_v43, %v1389_v59  ;;  %vm1417_vm15 = vcmp.gt.f32.partialorder %v4683_v43, %v1389_v59  ;;  %v2129_v22 = vrot.slane %v4696_v56, %v4557_v27 }
 0x282   : > { %1458 = vperm.xlu1 %4035, %v1447_v60   ;;  %vm1442_vm6 = vmor %vm1418_vm12, %vm1434_vm8  ;;  %v2133_v25 = vrot.slane %v4696_v56, %v4569_v30  ;;  %v2845_v28 = vrot.slane %v4753_v16, %v4516_v6  ;;  %v2137_v29 = vrot.slane %v4696_v56, %v4573_v33  ;;  %v2849_v48 = vrot.slane %v4753_v16, %v4518_v7 }
 0x283   : > { %v1450_v62 = vsel %vm1442_vm6, 1, %v4282_v5  ;;  %vm1432_vm0 = vmand %vm1424_vm11, %vm5681_vm2  ;;  %vm1428_vm11 = vcmp.eq.f32.partialorder %v4683_v43, %v1401_v61  ;;  %vm1420_vm6 = vcmp.gt.f32.partialorder %v4683_v43, %v1401_v61  ;;  %v2857_v34 = vrot.slane %v4753_v16, %v4554_v24 }
 0x284   : > { %1467 = vperm.xlu0 %4036, %v1450_v62   ;;  %vm1440_vm3 = vmor %vm1416_vm14, %vm1432_vm0  ;;  %v2853_v37 = vrot.slane %v4753_v16, %v4520_v8  ;;  %v2861_v41 = vrot.slane %v4753_v16, %v4557_v27 }
 0x285   : > { %v1448_v0 = vsel %vm1440_vm3, 1, %v4282_v5  ;;  %vm2162_vm12 = vmand %vm2154_vm13, %vm684_vm10  ;;  %vm1427_vm13 = vcmp.eq.f32.partialorder %v4683_v43, %v1397_v63  ;;  %vm1419_vm3 = vcmp.gt.f32.partialorder %v4683_v43, %v1397_v63 }
 0x286   : > { %1461 = vperm.xlu1 %4035, %v1448_v0   ;;  %vm2170_vm8 = vmor %vm2146_vm4, %vm2162_vm12  ;;  %vm5682_vm4 = vcmp.ne.s32.totalorder %v4613_v53, 0 }
 0x287   : > { %v2178_v4 = vsel %vm2170_vm8, 1, %v4282_v5  ;;  %vm1433_vm14 = vmand %vm1425_vm1, %vm687_vm5  ;;  %vm1429_vm1 = vcmp.eq.f32.partialorder %v4683_v43, %v1405_v3  ;;  %vm1421_vm8 = vcmp.gt.f32.partialorder %v4683_v43, %v1405_v3 }
 0x288   : > { %2187 = vperm.xlu0 %4036, %v2178_v4   ;;  %vm1441_vm2 = vmor %vm1417_vm15, %vm1433_vm14 }
 0x289   : > { %v1449_v12 = vsel %vm1441_vm2, 1, %v4282_v5  ;;  %vm1436_vm0 = vmand %vm1428_vm11, %vm5682_vm4  ;;  %vm2155_vm11 = vcmp.eq.f32.partialorder %v4696_v56, %v2113_v9  ;;  %vm2147_vm2 = vcmp.gt.f32.partialorder %v4696_v56, %v2113_v9  ;;  %vm2158_vm4 = vcmp.eq.f32.partialorder %v4696_v56, %v2125_v13 }
 0x28a   : > { %1464 = vperm.xlu1 %4035, %v1449_v12   ;;  %vm1444_vm12 = vmor %vm1420_vm6, %vm1436_vm0  ;;  %vm5683_vm0 = vcmp.ne.s32.totalorder %v4601_v47, 0 }
 0x28b   : > { %v1452_v14 = vsel %vm1444_vm12, 1, %v4282_v5  ;;  %vm1435_vm15 = vmand %vm1427_vm13, %vm689_vm9  ;;  %vm2150_vm12 = vcmp.gt.f32.partialorder %v4696_v56, %v2125_v13 }
 0x28c   : > { %1473 = vperm.xlu0 %4036, %v1452_v14   ;;  %vm1443_vm14 = vmor %vm1419_vm3, %vm1435_vm15 }
 0x28d   : > { %v1451_v17 = vsel %vm1443_vm14, 1, %v4282_v5  ;;  %vm1437_vm6 = vmand %vm1429_vm1, %vm691_vm7  ;;  %vm2156_vm1 = vcmp.eq.f32.partialorder %v4696_v56, %v2117_v15 }
 0x28e   : > { %1470 = vperm.xlu1 %4035, %v1451_v17   ;;  %vm1445_vm13 = vmor %vm1421_vm8, %vm1437_vm6  ;;  %vm5684_vm8 = vcmp.ne.s32.totalorder %v4609_v51, 0  ;;  %vm2148_vm6 = vcmp.gt.f32.partialorder %v4696_v56, %v2117_v15 }
 0x28f   : > { %v1453_v19 = vsel %vm1445_vm13, 1, %v4282_v5  ;;  %vm2163_vm3 = vmand %vm2155_vm11, %vm5683_vm0  ;;  %vm2157_vm11 = vcmp.eq.f32.partialorder %v4696_v56, %v2121_v18 }
 0x290   : > { %1476 = vperm.xlu0 %4036, %v1453_v19   ;;  %vm2171_vm15 = vmor %vm2147_vm2, %vm2163_vm3  ;;  %vm5685_vm2 = vcmp.ne.s32.totalorder %v4605_v49, 0  ;;  %vm2149_vm3 = vcmp.gt.f32.partialorder %v4696_v56, %v2121_v18 }
 0x291   : > { %v2179_v21 = vsel %vm2171_vm15, 1, %v4282_v5  ;;  %vm2166_vm14 = vmand %vm2158_vm4, %vm5684_vm8  ;;  %vm2886_vm4 = vcmp.eq.f32.partialorder %v4753_v16, %v2841_v20  ;;  %vm2878_vm8 = vcmp.gt.f32.partialorder %v4753_v16, %v2841_v20 }
 0x292   : > { %2190 = vperm.xlu1 %4035, %v2179_v21   ;;  %vm2174_vm13 = vmor %vm2150_vm12, %vm2166_vm14 }
 0x293   : > { %v2182_v23 = vsel %vm2174_vm13, 1, %v4282_v5  ;;  %vm2164_vm0 = vmand %vm2156_vm1, %vm5685_vm2  ;;  %vm2159_vm1 = vcmp.eq.f32.partialorder %v4696_v56, %v2129_v22  ;;  %vm2151_vm13 = vcmp.gt.f32.partialorder %v4696_v56, %v2129_v22 }
 0x294   : > { %2199 = vperm.xlu0 %4036, %v2182_v23   ;;  %vm2172_vm15 = vmor %vm2148_vm6, %vm2164_vm0  ;;  %vm2160_vm0 = vcmp.eq.f32.partialorder %v4696_v56, %v2133_v25 }
 0x295   : > { %v2180_v26 = vsel %vm2172_vm15, 1, %v4282_v5  ;;  %vm2165_vm12 = vmand %vm2157_vm11, %vm687_vm5  ;;  %vm2887_vm15 = vcmp.eq.f32.partialorder %v4753_v16, %v2845_v28 }
 0x296   : > { %2193 = vperm.xlu1 %4035, %v2180_v26   ;;  %vm2173_vm14 = vmor %vm2149_vm3, %vm2165_vm12  ;;  %vm2152_vm3 = vcmp.gt.f32.partialorder %v4696_v56, %v2133_v25 }
 0x297   : > { %vm2894_vm6 = vmand %vm2886_vm4, %vm684_vm10  ;;  %v2181_v31 = vsel %vm2173_vm14, 1, %v4282_v5  ;;  %vm5686_vm4 = vcmp.ne.s32.totalorder %v4613_v53, 0 }
 0x298   : > { %vm2902_vm2 = vmor %vm2878_vm8, %vm2894_vm6  ;;  %vm2879_vm8 = vcmp.gt.f32.partialorder %v4753_v16, %v2845_v28  ;;  %vm2161_vm6 = vcmp.eq.f32.partialorder %v4696_v56, %v2137_v29 }
 0x299   : > { %v2910_v32 = vsel %vm2902_vm2, 1, %v4282_v5  ;;  %vm2167_vm11 = vmand %vm2159_vm1, %vm689_vm9  ;;  %vm5687_vm1 = vcmp.ne.s32.totalorder %v4601_v47, 0  ;;  %vm2153_vm2 = vcmp.gt.f32.partialorder %v4696_v56, %v2137_v29  ;;  %v2865_v47 = vrot.slane %v4753_v16, %v4569_v30 }
 0x29a   : > { %2196 = vperm.xlu1 %4035, %v2181_v31   ;;  %2919 = vperm.xlu0 %4036, %v2910_v32   ;;  %vm2175_vm10 = vmor %vm2151_vm13, %vm2167_vm11  ;;  %vm2888_vm11 = vcmp.eq.f32.partialorder %v4753_v16, %v2849_v48 }
 0x29b   : > { %vm2168_vm12 = vmand %vm2160_vm0, %vm5686_vm4  ;;  %v2183_v35 = vsel %vm2175_vm10, 1, %v4282_v5  ;;  %vm2880_vm10 = vcmp.gt.f32.partialorder %v4753_v16, %v2849_v48 }
 0x29c   : > { %vm2176_vm14 = vmor %vm2152_vm3, %vm2168_vm12  ;;  %vm2890_vm12 = vcmp.eq.f32.partialorder %v4753_v16, %v2857_v34 }
 0x29d   : > { %v2184_v36 = vsel %vm2176_vm14, 1, %v4282_v5  ;;  %vm2895_vm13 = vmand %vm2887_vm15, %vm5687_vm1  ;;  %vm5688_vm15 = vcmp.ne.s32.totalorder %v4605_v49, 0  ;;  %vm2882_vm14 = vcmp.gt.f32.partialorder %v4753_v16, %v2857_v34  ;;  %vm2889_vm1 = vcmp.eq.f32.partialorder %v4753_v16, %v2853_v37 }
 0x29e   : > { %2202 = vperm.xlu1 %4035, %v2183_v35   ;;  %2205 = vperm.xlu0 %4036, %v2184_v36   ;;  %vm2903_vm0 = vmor %vm2879_vm8, %vm2895_vm13  ;;  %vm5689_vm13 = vcmp.ne.s32.totalorder %v4609_v51, 0  ;;  %v2869_v49 = vrot.slane %v4753_v16, %v4573_v33 }
 0x29f   : > { %vm2169_vm3 = vmand %vm2161_vm6, %vm691_vm7  ;;  %v2911_v38 = vsel %vm2903_vm0, 1, %v4282_v5  ;;  %vm2881_vm0 = vcmp.gt.f32.partialorder %v4753_v16, %v2853_v37 }
 0x2a0   : > { %vm2177_vm4 = vmor %vm2153_vm2, %vm2169_vm3 }
 0x2a1   : > { %v2185_v39 = vsel %vm2177_vm4, 1, %v4282_v5  ;;  %vm2896_vm8 = vmand %vm2888_vm11, %vm5688_vm15  ;;  %vm2892_vm4 = vcmp.eq.f32.partialorder %v4753_v16, %v2865_v47  ;;  %vm2891_vm15 = vcmp.eq.f32.partialorder %v4753_v16, %v2861_v41 }
 0x2a2   : > { %2922 = vperm.xlu1 %4035, %v2911_v38   ;;  %2208 = vperm.xlu0 %4036, %v2185_v39   ;;  %vm2904_vm6 = vmor %vm2880_vm10, %vm2896_vm8  ;;  %vm2884_vm10 = vcmp.gt.f32.partialorder %v4753_v16, %v2865_v47  ;;  %vm5690_vm8 = vcmp.ne.s32.totalorder %v4613_v53, 0 }
 0x2a3   : > { %vm2898_vm2 = vmand %vm2890_vm12, %vm5689_vm13  ;;  %v2912_v42 = vsel %vm2904_vm6, 1, %v4282_v5  ;;  %vm2883_vm13 = vcmp.gt.f32.partialorder %v4753_v16, %v2861_v41  ;;  %vm2893_vm6 = vcmp.eq.f32.partialorder %v4753_v16, %v2869_v49 }
 0x2a4   : > { %vm2906_vm3 = vmor %vm2882_vm14, %vm2898_vm2 }
 0x2a5   : > { %v2914_v43 = vsel %vm2906_vm3, 1, %v4282_v5  ;;  %vm2897_vm11 = vmand %vm2889_vm1, %vm687_vm5 }
 0x2a6   : > { %2925 = vperm.xlu1 %4035, %v2912_v42   ;;  %2931 = vperm.xlu0 %4036, %v2914_v43   ;;  %vm2905_vm12 = vmor %vm2881_vm0, %vm2897_vm11  ;;  %vm2885_vm0 = vcmp.gt.f32.partialorder %v4753_v16, %v2869_v49  ;;  %vm776_vm11 = vcmask 1043459  }
 0x2a7   : > { %vm2900_vm14 = vmand %vm2892_vm4, %vm5690_vm8  ;;  %v2913_v51 = vsel %vm2905_vm12, 1, %v4282_v5  ;;  %vm780_vm12 = vcmask 1045509   ;;  %vm784_vm8 = vcmask 1047559  }
 0x2a8   : > { %vm2908_vm2 = vmor %vm2884_vm10, %vm2900_vm14  ;;  %vm778_vm10 = vcmask 1044484   ;;  %vm5691_vm14 = vcmask 64512  }
 0x2a9   : > { %v2916_v50 = vsel %vm2908_vm2, 1, %v4282_v5  ;;  %vm2899_vm5 = vmand %vm2891_vm15, %vm689_vm9  ;;  %vm772_vm9 = vcmask 1041409   ;;  %vm782_vm15 = vcmask 1046534  }
 0x2aa   : > { %2928 = vperm.xlu1 %4035, %v2913_v51   ;;  %2937 = vperm.xlu0 %4036, %v2916_v50   ;;  %vm2907_vm1 = vmor %vm2883_vm13, %vm2899_vm5 }
 0x2ab   : > { %vm2901_vm3 = vmand %vm2893_vm6, %vm691_vm7  ;;  %v2915_v53 = vsel %vm2907_vm1, 1, %v4282_v5  ;;  %vm774_vm7 = vcmask 1042434  }
 0x2ac   : > { %vm2909_vm4 = vmor %vm2885_vm0, %vm2901_vm3 }
 0x2ad   : > { %v2917_v46 = vsel %vm2909_vm4, 1, %v4282_v5  ;;  %vm5692_vm13 = vmmov %vm5691_vm14 }
 0x2ae   : > { %2934 = vperm.xlu1 %4035, %v2915_v53   ;;  %v721_v44 = vpop.permute.xlu0 %720  ;;  %vm5693_vm2 = vmmov %vm5692_vm13 }
 0x2af   : > { %v747_v56 = vrot.slane %v721_v44, %v4523_v10  ;;  %vm5694_vm6 = vmmov %vm5693_vm2 }
 0x2b0   : > { %v718_v45 = vpop.permute.xlu1 %717  ;;  %vm5697_vm4 = vmmov %vm5693_vm2 }
 0x2b1   : > { %v743_v57 = vrot.slane %v718_v45, %v4523_v10 }
 0x2b2   : > { %2940 = vperm.xlu1 %4035, %v2917_v46   ;;  %v730_v55 = vpop.permute.xlu0 %729 }
 0x2b3   : > { %v773_v62 = vsel %vm772_vm9, %v747_v56, %v743_v57  ;;  %v759_v9 = vrot.slane %v730_v55, %v4523_v10 }
 0x2b4   : > { %v724_v52 = vpop.permute.xlu1 %723 }
 0x2b5   : > { %v751_v58 = vrot.slane %v724_v52, %v4523_v10 }
 0x2b6   : > { %v1605_v54 = vpop.f32.mrb[2].mxu0  ;;  %v736_v59 = vpop.permute.xlu0 %735 }
 0x2b7   : > { %v3905_v60 = vpop.f32.mrb[3].mxu0  ;;  %v775_v63 = vsel %vm774_vm7, %v751_v58, %v773_v62  ;;  %v767_v15 = vrot.slane %v736_v59, %v4523_v10  ;;  %v1615_v31 = vrot.slane %v1605_v54, %v4525_v11  ;;  %v1643_v32 = vrot.slane %v1605_v54, %v4554_v24 }
 0x2b8   : > { %v727_v61 = vpop.permute.xlu1 %726  ;;  %v1622_v48 = vrot.slane %v1605_v54, %v4516_v6  ;;  %v1657_v34 = vrot.slane %v1605_v54, %v4569_v30  ;;  %v1629_v36 = vrot.slane %v1605_v54, %v4518_v7  ;;  %v1664_v37 = vrot.slane %v1605_v54, %v4573_v33 }
 0x2b9   : > { %v755_v5 = vrot.slane %v727_v61, %v4523_v10  ;;  %v1636_v38 = vrot.slane %v1605_v54, %v4520_v8  ;;  %v1650_v42 = vrot.slane %v1605_v54, %v4557_v27 }
 0x2ba   : > { %v4863_v0 = vpop.f32.mrb[4].mxu0  ;;  %v739_v12 = vpop.permute.xlu0 %738 }
 0x2bb   : > { %v777_v3 = vsel %vm776_vm11, %v755_v5, %v775_v63  ;;  %v3915_v4 = vpop.f32.mrb[5].mxu0  ;;  %v771_v18 = vrot.slane %v739_v12, %v4523_v10  ;;  %v2347_v39 = vrot.slane %v4863_v0, %v4525_v11  ;;  %v2375_v43 = vrot.slane %v4863_v0, %v4554_v24 }
 0x2bc   : > { %v733_v13 = vpop.permute.xlu1 %732  ;;  %v779_v16 = vsel %vm778_vm10, %v759_v9, %v777_v3  ;;  %v2354_v50 = vrot.slane %v4863_v0, %v4516_v6  ;;  %v2389_v53 = vrot.slane %v4863_v0, %v4569_v30  ;;  %v2361_v45 = vrot.slane %v4863_v0, %v4518_v7 }
 0x2bd   : > { %v763_v14 = vrot.slane %v733_v13, %v4523_v10  ;;  %v2396_v46 = vrot.slane %v4863_v0, %v4573_v33  ;;  %v2368_v56 = vrot.slane %v4863_v0, %v4520_v8  ;;  %v2382_v59 = vrot.slane %v4863_v0, %v4557_v27 }
 0x2be   : > { %v4870_v17 = vpop.f32.mrb[6].mxu0  ;;  %v4881_v35 = vpop.permute.xlu0 %891 }
 0x2bf   : > { %v781_v19 = vsel %vm780_vm12, %v763_v14, %v779_v16  ;;  %v3925_v20 = vpop.f32.mrb[7].mxu0  ;;  %v3079_v57 = vrot.slane %v4870_v17, %v4525_v11  ;;  %v3107_v60 = vrot.slane %v4870_v17, %v4554_v24  ;;  %v3086_v5 = vrot.slane %v4870_v17, %v4516_v6 }
 0x2c0   : > { %v783_v21 = vsel %vm782_vm15, %v767_v15, %v781_v19  ;;  %v4885_v47 = vpop.permute.xlu1 %884  ;;  %v3121_v63 = vrot.slane %v4870_v17, %v4569_v30  ;;  %v3093_v0 = vrot.slane %v4870_v17, %v4518_v7  ;;  %v3100_v16 = vrot.slane %v4870_v17, %v4520_v8 }
 0x2c1   : > { %v785_v22 = vsel %vm784_vm8, %v771_v18, %v783_v21 }
 0x2c2   : > { %v786_v23 = vsel %vm5691_vm14, %v785_v22, 0  ;;  %v4890_v41 = vpop.permute.xlu0 %912  ;;  %vm5698_vm14 = vmmov %vm5693_vm2 }
 0x2c3   : > { %v788_v25 = vshrl.u32 %v786_v23, 16  ;;  %v787_v28 = vand.u32 65535, %v786_v23  ;;  %v3114_v23 = vrot.slane %v4870_v17, %v4557_v27 }
 0x2c4   : > { %v4892_v49 = vpop.permute.xlu1 %898 }
 0x2c5   : > { %v790_v26 = vcvt.s32.f32 %v788_v25  ;;  %v789_v29 = vcvt.s32.f32 %v787_v28 }
 0x2c6   : > { %v4897_v51 = vpop.permute.xlu0 %926 }
 0x2c8   : > { %v4903_v44 = vpop.permute.xlu1 %905 }
 0x2c9   : > { %793 = vadd.xlane.f32.xlu0 %v790_v26 }
 0x2ca   : > { %v4909_v55 = vpop.permute.xlu0 %933 }
 0x2cc   : > { %v4911_v52 = vpop.permute.xlu1 %919 }
 0x2d6   : > { %791 = vadd.xlane.f32.xlu1 %v789_v29 }
 0x2df   : > { %1617 = vbcast.lane.b32.xlu0 %v1615_v31, 256 }
 0x2e3   : > { %1645 = vbcast.lane.b32.xlu0 %v1643_v32, 256 }
 0x2e7   : > { %1624 = vbcast.lane.b32.xlu1 %v1622_v48, 256  ;;  %1659 = vbcast.lane.b32.xlu0 %v1657_v34, 256  ;;  %v3128_v34 = vrot.slane %v4870_v17, %v4573_v33 }
 0x2eb   : > { %1631 = vbcast.lane.b32.xlu1 %v1629_v36, 256  ;;  %1666 = vbcast.lane.b32.xlu0 %v1664_v37, 256 }
 0x2ef   : > { %1638 = vbcast.lane.b32.xlu1 %v1636_v38, 256  ;;  %2349 = vbcast.lane.b32.xlu0 %v2347_v39, 256 }
 0x2f3   : > { %1652 = vbcast.lane.b32.xlu1 %v1650_v42, 256  ;;  %2377 = vbcast.lane.b32.xlu0 %v2375_v43, 256 }
 0x2f7   : > { %2356 = vbcast.lane.b32.xlu1 %v2354_v50, 256  ;;  %2391 = vbcast.lane.b32.xlu0 %v2389_v53, 256 }
 0x2fb   : > { %2363 = vbcast.lane.b32.xlu1 %v2361_v45, 256  ;;  %2398 = vbcast.lane.b32.xlu0 %v2396_v46, 256 }
 0x2ff   : > { %2370 = vbcast.lane.b32.xlu1 %v2368_v56, 256  ;;  %3081 = vbcast.lane.b32.xlu0 %v3079_v57, 256  ;;  %v1456_v58 = vpop.permute.xlu0 %1455 }
 0x300   : > { %v1481_v12 = vrot.slane %v1456_v58, %v4523_v10 }
 0x301   : > { %v1459_v54 = vpop.permute.xlu1 %1458 }
 0x302   : > { %v1485_v13 = vrot.slane %v1459_v54, %v4523_v10 }
 0x303   : > { %2384 = vbcast.lane.b32.xlu1 %v2382_v59, 256  ;;  %3109 = vbcast.lane.b32.xlu0 %v3107_v60, 256  ;;  %v1468_v61 = vpop.permute.xlu0 %1467 }
 0x304   : > { %v1510_v20 = vsel %vm772_vm9, %v1485_v13, %v1481_v12  ;;  %v1497_v28 = vrot.slane %v1468_v61, %v4523_v10 }
 0x305   : > { %v1462_v62 = vpop.permute.xlu1 %1461 }
 0x306   : > { %v1489_v14 = vrot.slane %v1462_v62, %v4523_v10 }
 0x307   : > { %3088 = vbcast.lane.b32.xlu1 %v3086_v5, 256  ;;  %3123 = vbcast.lane.b32.xlu0 %v3121_v63, 256  ;;  %v2188_v3 = vpop.permute.xlu0 %2187 }
 0x308   : > { %v1511_v21 = vsel %vm774_vm7, %v1489_v14, %v1510_v20  ;;  %v2213_v42 = vrot.slane %v2188_v3, %v4523_v10 }
 0x309   : > { %v1465_v4 = vpop.permute.xlu1 %1464 }
 0x30a   : > { %v1493_v18 = vrot.slane %v1465_v4, %v4523_v10 }
 0x30b   : > { %3095 = vbcast.lane.b32.xlu1 %v3093_v0, 256  ;;  %v1474_v9 = vpop.permute.xlu0 %1473 }
 0x30c   : > { %v1512_v25 = vsel %vm776_vm11, %v1493_v18, %v1511_v21  ;;  %v1505_v31 = vrot.slane %v1474_v9, %v4523_v10 }
 0x30d   : > { %v1471_v15 = vpop.permute.xlu1 %1470  ;;  %v1513_v32 = vsel %vm778_vm10, %v1497_v28, %v1512_v25 }
 0x30e   : > { %v1501_v26 = vrot.slane %v1471_v15, %v4523_v10 }
 0x30f   : > { %3102 = vbcast.lane.b32.xlu1 %v3100_v16, 256  ;;  %v1477_v19 = vpop.permute.xlu0 %1476 }
 0x310   : > { %v1514_v36 = vsel %vm780_vm12, %v1501_v26, %v1513_v32  ;;  %v1509_v37 = vrot.slane %v1477_v19, %v4523_v10 }
 0x311   : > { %v2191_v22 = vpop.permute.xlu1 %2190  ;;  %v1515_v53 = vsel %vm782_vm15, %v1505_v31, %v1514_v36 }
 0x312   : > { %v2217_v38 = vrot.slane %v2191_v22, %v4523_v10  ;;  %v1516_v17 = vsel %vm784_vm8, %v1509_v37, %v1515_v53 }
 0x313   : > { %3116 = vbcast.lane.b32.xlu1 %v3114_v23, 256  ;;  %v2200_v29 = vpop.permute.xlu0 %2199  ;;  %v1517_v60 = vsel %vm5692_vm13, %v1516_v17, 0  ;;  %vm5699_vm13 = vmmov %vm5693_vm2 }
 0x314   : > { %v2242_v45 = vsel %vm772_vm9, %v2217_v38, %v2213_v42  ;;  %v2229_v58 = vrot.slane %v2200_v29, %v4523_v10  ;;  %v1519_v3 = vshrl.u32 %v1517_v60, 16  ;;  %v1518_v14 = vand.u32 65535, %v1517_v60 }
 0x315   : > { %v2194_v48 = vpop.permute.xlu1 %2193 }
 0x316   : > { %v2221_v39 = vrot.slane %v2194_v48, %v4523_v10  ;;  %v1521_v13 = vcvt.s32.f32 %v1519_v3  ;;  %v1520_v23 = vcvt.s32.f32 %v1518_v14 }
 0x317   : > { %3130 = vbcast.lane.b32.xlu1 %v3128_v34, 256 }
 0x318   : > { %v2243_v56 = vsel %vm774_vm7, %v2221_v39, %v2242_v45 }
 0x319   : > { %v2920_v43 = vpop.permute.xlu0 %2919  ;;  %v2197_v50 = vpop.permute.xlu1 %2196 }
 0x31a   : > { %v2225_v46 = vrot.slane %v2197_v50, %v4523_v10  ;;  %v2945_v21 = vrot.slane %v2920_v43, %v4523_v10 }
 0x31c   : > { %v2244_v57 = vsel %vm776_vm11, %v2225_v46, %v2243_v56 }
 0x31d   : > { %v2206_v54 = vpop.permute.xlu0 %2205  ;;  %v2203_v59 = vpop.permute.xlu1 %2202  ;;  %v2245_v5 = vsel %vm778_vm10, %v2229_v58, %v2244_v57 }
 0x31e   : > { %v2233_v61 = vrot.slane %v2203_v59, %v4523_v10  ;;  %v2237_v62 = vrot.slane %v2206_v54, %v4523_v10 }
 0x320   : > { %v2246_v63 = vsel %vm780_vm12, %v2233_v61, %v2245_v5 }
 0x321   : > { %v2209_v4 = vpop.permute.xlu0 %2208  ;;  %v2923_v0 = vpop.permute.xlu1 %2922  ;;  %v2247_v12 = vsel %vm782_vm15, %v2237_v62, %v2246_v63 }
 0x322   : > { %v2241_v9 = vrot.slane %v2209_v4, %v4523_v10  ;;  %v2949_v19 = vrot.slane %v2923_v0, %v4523_v10 }
 0x324   : > { %v2248_v15 = vsel %vm784_vm8, %v2241_v9, %v2247_v12  ;;  %v2974_v28 = vsel %vm772_vm9, %v2949_v19, %v2945_v21 }
 0x325   : > { %v2926_v16 = vpop.permute.xlu1 %2925  ;;  %v2249_v18 = vsel %vm5693_vm2, %v2248_v15, 0  ;;  %v2932_v22 = vpop.permute.xlu0 %2931 }
 0x326   : > { %1524 = vadd.xlane.f32.xlu0 %v1521_v13  ;;  %v2953_v20 = vrot.slane %v2926_v16, %v4523_v10  ;;  %v2250_v25 = vand.u32 65535, %v2249_v18  ;;  %v2961_v34 = vrot.slane %v2932_v22, %v4523_v10  ;;  %v2251_v56 = vshrl.u32 %v2249_v18, 16 }
 0x328   : > { %v2975_v31 = vsel %vm774_vm7, %v2953_v20, %v2974_v28  ;;  %v2252_v48 = vcvt.s32.f32 %v2250_v25  ;;  %v2253_v54 = vcvt.s32.f32 %v2251_v56 }
 0x329   : > { %v2929_v26 = vpop.permute.xlu1 %2928  ;;  %v2938_v37 = vpop.permute.xlu0 %2937 }
 0x32a   : > { %v2957_v29 = vrot.slane %v2929_v26, %v4523_v10  ;;  %1522 = vadd.xlane.f32.xlu0 %v1520_v23  ;;  %v2969_v43 = vrot.slane %v2938_v37, %v4523_v10 }
 0x32c   : > { %v2976_v32 = vsel %vm776_vm11, %v2957_v29, %v2975_v31 }
 0x32d   : > { %v2935_v36 = vpop.permute.xlu1 %2934  ;;  %v2977_v39 = vsel %vm778_vm10, %v2961_v34, %v2976_v32 }
 0x32e   : > { %v2965_v38 = vrot.slane %v2935_v36, %v4523_v10  ;;  %2254 = vadd.xlane.f32.xlu0 %v2252_v48 }
 0x330   : > { %v2978_v42 = vsel %vm780_vm12, %v2965_v38, %v2977_v39 }
 0x331   : > { %v2941_v50 = vpop.permute.xlu1 %2940  ;;  %v2979_v45 = vsel %vm782_vm15, %v2969_v43, %v2978_v42 }
 0x332   : > { %v2973_v53 = vrot.slane %v2941_v50, %v4523_v10 }
 0x334   : > { %v2980_v46 = vsel %vm784_vm8, %v2973_v53, %v2979_v45 }
 0x335   : > { %v2981_v17 = vsel %vm5694_vm6, %v2980_v46, 0  ;;  %vm5700_vm6 = vmmov %vm5693_vm2 }
 0x336   : > { %v2982_v57 = vand.u32 65535, %v2981_v17  ;;  %v2983_v59 = vshrl.u32 %v2981_v17, 16 }
 0x338   : > { %v2984_v58 = vcvt.s32.f32 %v2982_v57  ;;  %v2985_v60 = vcvt.s32.f32 %v2983_v59 }
 0x33a   : > { %2986 = vadd.xlane.f32.xlu0 %v2984_v58 }
 0x33b   : > { %2256 = vadd.xlane.f32.xlu1 %v2253_v54 }
 0x33f   : > { %2988 = vadd.xlane.f32.xlu1 %v2985_v60 }
 0x356   : > { %v794_v61 = vpop.xlane.xlu0 %793 }
 0x357   : > { %v796_v62 = vcvt.f32.s32 %v794_v61 }
 0x359   : > { %v797_v63 = vshll.u32 %v796_v62, 16 }
 0x363   : > { %v792_v5 = vpop.xlane.xlu1 %791 }
 0x364   : > { %v795_v3 = vcvt.f32.s32 %v792_v5 }
 0x366   : > { %v4981_v4 = vadd.s32 %v797_v63, %v795_v3 }
 0x368   : > { %5695 = vst [vmem:[#allocation13_spill] sm:$0xff] %v4981_v4  ;;  %vm799_vm5 = vcmp.lt.s32.totalorder %v4981_v4, 4 }
 0x369   : > { %v4987_v0 = vsel %vm799_vm5, %v4881_v35, -1e+30  ;;  %v4992_v9 = vsel %vm799_vm5, %v4885_v47, -1e+30  ;;  %v4999_v12 = vsel %vm799_vm5, %v4903_v44, -1e+30 }
 0x36a   : > { %963 = vperm.xlu1 %4035, %v4987_v0   ;;  %960 = vperm.xlu0 %4036, %v4992_v9   ;;  %v5004_v13 = vsel %vm799_vm5, %v4892_v49, -1e+30  ;;  %v5011_v35 = vsel %vm799_vm5, %v4911_v52, -1e+30  ;;  %v5016_v47 = vsel %vm799_vm5, %v4890_v41, -1e+30  ;;  %v1618_v49 = vpop.permute.xlu0 %1617  ;;  %v1625_v41 = vpop.permute.xlu1 %1624 }
 0x36b   : > { %v5023_v44 = vsel %vm799_vm5, %v4897_v51, -1e+30  ;;  %v5029_v52 = vsel %vm799_vm5, %v4909_v55, -1e+30 }
 0x36e   : > { %969 = vperm.xlu1 %4035, %v4999_v12   ;;  %966 = vperm.xlu0 %4036, %v5004_v13   ;;  %v1646_v14 = vpop.permute.xlu0 %1645  ;;  %v1632_v16 = vpop.permute.xlu1 %1631 }
 0x372   : > { %975 = vperm.xlu1 %4035, %v5011_v35   ;;  %972 = vperm.xlu0 %4036, %v5016_v47   ;;  %v1660_v15 = vpop.permute.xlu0 %1659  ;;  %v1639_v19 = vpop.permute.xlu1 %1638 }
 0x376   : > { %978 = vperm.xlu0 %4036, %v5023_v44   ;;  %v1667_v18 = vpop.permute.xlu0 %1666  ;;  %v1653_v21 = vpop.permute.xlu1 %1652 }
 0x37a   : > { %981 = vperm.xlu0 %4036, %v5029_v52   ;;  %v2350_v20 = vpop.permute.xlu0 %2349  ;;  %v2357_v51 = vpop.permute.xlu1 %2356 }
 0x37e   : > { %v2378_v22 = vpop.permute.xlu0 %2377  ;;  %v2364_v25 = vpop.permute.xlu1 %2363 }
 0x382   : > { %v5032_v23 = vpop.permute.xlu0 %2391  ;;  %v2371_v28 = vpop.permute.xlu1 %2370 }
 0x386   : > { %v5034_v26 = vpop.permute.xlu0 %2398  ;;  %v2385_v55 = vpop.permute.xlu1 %2384 }
 0x38a   : > { %v3082_v29 = vpop.permute.xlu0 %3081  ;;  %v3089_v32 = vpop.permute.xlu1 %3088 }
 0x38e   : > { %v5036_v31 = vpop.permute.xlu0 %3109  ;;  %v3096_v34 = vpop.permute.xlu1 %3095 }
 0x392   : > { %v5038_v48 = vpop.permute.xlu0 %3123  ;;  %v3103_v39 = vpop.permute.xlu1 %3102 }
 0x396   : > { %v3117_v46 = vpop.permute.xlu1 %3116 }
 0x39a   : > { %v3131_v57 = vpop.permute.xlu1 %3130 }
 0x3b3   : > { %v1525_v36 = vpop.xlane.xlu0 %1524 }
 0x3b4   : > { %v1527_v37 = vcvt.f32.s32 %v1525_v36 }
 0x3b6   : > { %v1528_v42 = vshll.u32 %v1527_v37, 16 }
 0x3b7   : > { %v1523_v38 = vpop.xlane.xlu0 %1522 }
 0x3b8   : > { %v1526_v43 = vcvt.f32.s32 %v1523_v38 }
 0x3ba   : > { %v5040_v50 = vadd.s32 %v1528_v42, %v1526_v43 }
 0x3bb   : > { %v2255_v54 = vpop.xlane.xlu0 %2254 }
 0x3bc   : > { %vm1530_vm1 = vcmp.lt.s32.totalorder %v5040_v50, 4  ;;  %v2258_v62 = vcvt.f32.s32 %v2255_v54 }
 0x3bd   : > { %v5045_v53 = vsel %vm1530_vm1, %v1625_v41, -1e+30  ;;  %v5049_v45 = vsel %vm1530_vm1, %v1618_v49, -1e+30  ;;  %v5055_v17 = vsel %vm1530_vm1, %v1632_v16, -1e+30 }
 0x3be   : > { %1696 = vperm.xlu1 %4035, %v5045_v53   ;;  %1693 = vperm.xlu0 %4036, %v5049_v45   ;;  %v5059_v56 = vsel %vm1530_vm1, %v1646_v14, -1e+30  ;;  %v5065_v58 = vsel %vm1530_vm1, %v1639_v19, -1e+30  ;;  %v5070_v61 = vsel %vm1530_vm1, %v1653_v21, -1e+30 }
 0x3bf   : > { %v5092_v21 = vsel %vm1530_vm1, %v1660_v15, -1e+30  ;;  %v5102_v37 = vsel %vm1530_vm1, %v1667_v18, -1e+30 }
 0x3c2   : > { %1699 = vperm.xlu1 %4035, %v5055_v17   ;;  %1705 = vperm.xlu0 %4036, %v5059_v56  }
 0x3c6   : > { %1702 = vperm.xlu1 %4035, %v5065_v58  }
 0x3c7   : > { %v2987_v16 = vpop.xlane.xlu0 %2986 }
 0x3c8   : > { %v2257_v59 = vpop.xlane.xlu1 %2256 }
 0x3c9   : > { %v2259_v60 = vcvt.f32.s32 %v2257_v59 }
 0x3ca   : > { %1708 = vperm.xlu1 %4035, %v5070_v61  }
 0x3cb   : > { %v2260_v5 = vshll.u32 %v2259_v60, 16 }
 0x3cc   : > { %v2989_v3 = vpop.xlane.xlu1 %2988 }
 0x3cd   : > { %v5073_v63 = vadd.s32 %v2260_v5, %v2258_v62  ;;  %v2991_v41 = vcvt.f32.s32 %v2989_v3 }
 0x3cf   : > { %vm2262_vm0 = vcmp.lt.s32.totalorder %v5073_v63, 4 }
 0x3d0   : > { %v5078_v49 = vsel %vm2262_vm0, %v2357_v51, -1e+30  ;;  %v5082_v14 = vsel %vm2262_vm0, %v2350_v20, -1e+30  ;;  %v5088_v19 = vsel %vm2262_vm0, %v2364_v25, -1e+30  ;;  %v2990_v20 = vcvt.f32.s32 %v2987_v16 }
 0x3d1   : > { %2428 = vperm.xlu1 %4035, %v5078_v49   ;;  %2425 = vperm.xlu0 %4036, %v5082_v14   ;;  %v2992_v51 = vshll.u32 %v2991_v41, 16  ;;  %v5098_v36 = vsel %vm2262_vm0, %v2371_v28, -1e+30  ;;  %v5110_v15 = vsel %vm2262_vm0, %v2385_v55, -1e+30 }
 0x3d2   : > { %v5114_v38 = vsel %vm2262_vm0, %v2378_v22, -1e+30  ;;  %v5136_v55 = vsel %vm2262_vm0, %v5032_v23, -1e+30 }
 0x3d3   : > { %v5104_v25 = vadd.s32 %v2992_v51, %v2990_v20 }
 0x3d5   : > { %2431 = vperm.xlu1 %4035, %v5088_v19   ;;  %1711 = vperm.xlu0 %4036, %v5092_v21   ;;  %5696 = vst [vmem:[#allocation14_spill] sm:$0xff] %v5104_v25  ;;  %vm2994_vm3 = vcmp.lt.s32.totalorder %v5104_v25, 4 }
 0x3d6   : > { %v5121_v18 = vsel %vm2994_vm3, %v3089_v32, -1e+30  ;;  %v5125_v28 = vsel %vm2994_vm3, %v3082_v29, -1e+30  ;;  %v5131_v22 = vsel %vm2994_vm3, %v3096_v34, -1e+30 }
 0x3d7   : > { %v5142_v29 = vsel %vm2994_vm3, %v3103_v39, -1e+30  ;;  %v5147_v32 = vsel %vm2262_vm0, %v5034_v26, -1e+30  ;;  %v5153_v23 = vsel %vm2994_vm3, %v3117_v46, -1e+30 }
 0x3d8   : > { %v5158_v34 = vsel %vm2994_vm3, %v5036_v31, -1e+30  ;;  %v5164_v26 = vsel %vm2994_vm3, %v3131_v57, -1e+30  ;;  %v5169_v42 = vsel %vm2994_vm3, %v5038_v48, -1e+30 }
 0x3d9   : > { %2434 = vperm.xlu1 %4035, %v5098_v36   ;;  %1714 = vperm.xlu0 %4036, %v5102_v37  }
 0x3dd   : > { %2440 = vperm.xlu1 %4035, %v5110_v15   ;;  %2437 = vperm.xlu0 %4036, %v5114_v38  }
 0x3e1   : > { %3160 = vperm.xlu1 %4035, %v5121_v18   ;;  %3157 = vperm.xlu0 %4036, %v5125_v28  }
 0x3e5   : > { %3163 = vperm.xlu1 %4035, %v5131_v22   ;;  %2443 = vperm.xlu0 %4036, %v5136_v55  }
 0x3e9   : > { %3166 = vperm.xlu1 %4035, %v5142_v29   ;;  %2446 = vperm.xlu0 %4036, %v5147_v32   ;;  %v961_v39 = vpop.permute.xlu0 %960  ;;  %v964_v43 = vpop.permute.xlu1 %963 }
 0x3ea   : > { %v990_v59 = vrot.slane %v964_v43, %v4523_v10  ;;  %v986_v60 = vrot.slane %v961_v39, %v4523_v10 }
 0x3ec   : > { %v1015_v5 = vsel %vm772_vm9, %v990_v59, %v986_v60 }
 0x3ed   : > { %3172 = vperm.xlu1 %4035, %v5153_v23   ;;  %3169 = vperm.xlu0 %4036, %v5158_v34   ;;  %v967_v31 = vpop.permute.xlu0 %966  ;;  %v970_v54 = vpop.permute.xlu1 %969 }
 0x3ee   : > { %v994_v57 = vrot.slane %v967_v31, %v4523_v10  ;;  %v998_v48 = vrot.slane %v970_v54, %v4523_v10 }
 0x3f0   : > { %v1016_v3 = vsel %vm774_vm7, %v994_v57, %v1015_v5 }
 0x3f1   : > { %3178 = vperm.xlu1 %4035, %v5164_v26   ;;  %3175 = vperm.xlu0 %4036, %v5169_v42   ;;  %v973_v46 = vpop.permute.xlu0 %972  ;;  %v976_v41 = vpop.permute.xlu1 %975  ;;  %v1017_v1 = vsel %vm776_vm11, %v998_v48, %v1016_v3 }
 0x3f2   : > { %v1002_v16 = vrot.slane %v973_v46, %v4523_v10  ;;  %v1006_v20 = vrot.slane %v976_v41, %v4523_v10 }
 0x3f4   : > { %v1018_v43 = vsel %vm778_vm10, %v1002_v16, %v1017_v1 }
 0x3f5   : > { %v979_v62 = vpop.permute.xlu0 %978  ;;  %v1019_v59 = vsel %vm780_vm12, %v1006_v20, %v1018_v43 }
 0x3f6   : > { %v1010_v39 = vrot.slane %v979_v62, %v4523_v10 }
 0x3f8   : > { %v1020_v54 = vsel %vm782_vm15, %v1010_v39, %v1019_v59 }
 0x3f9   : > { %v982_v51 = vpop.permute.xlu0 %981 }
 0x3fa   : > { %v1014_v31 = vrot.slane %v982_v51, %v4523_v10 }
 0x3fc   : > { %v1021_v60 = vsel %vm784_vm8, %v1014_v31, %v1020_v54 }
 0x3fd   : > { %v1023_v57 = vsel %vm5697_vm4, %v1021_v60, -inf  ;;  %vm5701_vm4 = vmmov %vm5693_vm2 }
 0x410   : > { %1024 = vmax.xlane.f32.xlu0 %v1023_v57 }
 0x43d   : > { %v1697_v46 = vpop.permute.xlu1 %1696  ;;  %v1694_v41 = vpop.permute.xlu0 %1693 }
 0x43e   : > { %v1723_v1 = vrot.slane %v1697_v46, %v4523_v10  ;;  %v1719_v62 = vrot.slane %v1694_v41, %v4523_v10 }
 0x440   : > { %v1748_v39 = vsel %vm772_vm9, %v1723_v1, %v1719_v62 }
 0x441   : > { %v1700_v5 = vpop.permute.xlu1 %1699  ;;  %v1706_v48 = vpop.permute.xlu0 %1705 }
 0x442   : > { %v1727_v16 = vrot.slane %v1700_v5, %v4523_v10  ;;  %v1735_v46 = vrot.slane %v1706_v48, %v4523_v10 }
 0x444   : > { %v1749_v31 = vsel %vm774_vm7, %v1727_v16, %v1748_v39 }
 0x445   : > { %v1703_v2 = vpop.permute.xlu1 %1702 }
 0x446   : > { %v1731_v43 = vrot.slane %v1703_v2, %v4523_v10 }
 0x448   : > { %v1750_v60 = vsel %vm776_vm11, %v1731_v43, %v1749_v31 }
 0x449   : > { %v1709_v3 = vpop.permute.xlu1 %1708  ;;  %v1751_v5 = vsel %vm778_vm10, %v1735_v46, %v1750_v60 }
 0x44a   : > { %v1739_v57 = vrot.slane %v1709_v3, %v4523_v10 }
 0x44c   : > { %v1752_v2 = vsel %vm780_vm12, %v1739_v57, %v1751_v5 }
 0x450   : > { %v2429_v51 = vpop.permute.xlu1 %2428  ;;  %v2426_v20 = vpop.permute.xlu0 %2425 }
 0x451   : > { %v2455_v48 = vrot.slane %v2429_v51, %v4523_v10  ;;  %v2451_v31 = vrot.slane %v2426_v20, %v4523_v10 }
 0x454   : > { %v2432_v59 = vpop.permute.xlu1 %2431  ;;  %v1712_v54 = vpop.permute.xlu0 %1711 }
 0x455   : > { %v1743_v41 = vrot.slane %v1712_v54, %v4523_v10  ;;  %v2459_v54 = vrot.slane %v2432_v59, %v4523_v10 }
 0x457   : > { %v1753_v62 = vsel %vm782_vm15, %v1743_v41, %v1752_v2  ;;  %v2480_v41 = vsel %vm772_vm9, %v2455_v48, %v2451_v31 }
 0x458   : > { %v2435_v4 = vpop.permute.xlu1 %2434  ;;  %v1715_v25 = vpop.permute.xlu0 %1714  ;;  %v2481_v5 = vsel %vm774_vm7, %v2459_v54, %v2480_v41 }
 0x459   : > { %v1747_v1 = vrot.slane %v1715_v25, %v4523_v10  ;;  %v2463_v57 = vrot.slane %v2435_v4, %v4523_v10 }
 0x45b   : > { %v1754_v16 = vsel %vm784_vm8, %v1747_v1, %v1753_v62  ;;  %v2482_v62 = vsel %vm776_vm11, %v2463_v57, %v2481_v5 }
 0x45c   : > { %v2441_v39 = vpop.permute.xlu1 %2440  ;;  %v2438_v43 = vpop.permute.xlu0 %2437  ;;  %v1756_v3 = vsel %vm5698_vm14, %v1754_v16, -inf  ;;  %vm5702_vm14 = vmmov %vm5693_vm2 }
 0x45d   : > { %1757 = vmax.xlane.f32.xlu1 %v1756_v3  ;;  %v2467_v25 = vrot.slane %v2438_v43, %v4523_v10  ;;  %v2471_v51 = vrot.slane %v2441_v39, %v4523_v10 }
 0x45f   : > { %v2483_v20 = vsel %vm778_vm10, %v2467_v25, %v2482_v62 }
 0x460   : > { %v3161_v60 = vpop.permute.xlu1 %3160  ;;  %v3158_v46 = vpop.permute.xlu0 %3157  ;;  %v2484_v54 = vsel %vm780_vm12, %v2471_v51, %v2483_v20 }
 0x461   : > { %v3187_v16 = vrot.slane %v3161_v60, %v4523_v10  ;;  %v3183_v4 = vrot.slane %v3158_v46, %v4523_v10 }
 0x463   : > { %v3212_v41 = vsel %vm772_vm9, %v3187_v16, %v3183_v4 }
 0x464   : > { %v3164_v2 = vpop.permute.xlu1 %3163  ;;  %v2444_v1 = vpop.permute.xlu0 %2443 }
 0x465   : > { %v2475_v59 = vrot.slane %v2444_v1, %v4523_v10  ;;  %v3191_v48 = vrot.slane %v3164_v2, %v4523_v10 }
 0x467   : > { %v2485_v39 = vsel %vm782_vm15, %v2475_v59, %v2484_v54  ;;  %v3213_v1 = vsel %vm774_vm7, %v3191_v48, %v3212_v41 }
 0x468   : > { %v3167_v3 = vpop.permute.xlu1 %3166  ;;  %v2447_v43 = vpop.permute.xlu0 %2446 }
 0x469   : > { %v2479_v31 = vrot.slane %v2447_v43, %v4523_v10  ;;  %v3195_v57 = vrot.slane %v3167_v3, %v4523_v10 }
 0x46b   : > { %v2486_v25 = vsel %vm784_vm8, %v2479_v31, %v2485_v39  ;;  %v3214_v62 = vsel %vm776_vm11, %v3195_v57, %v3213_v1 }
 0x46c   : > { %v3173_v5 = vpop.permute.xlu1 %3172  ;;  %v3170_v60 = vpop.permute.xlu0 %3169  ;;  %v2488_v46 = vsel %vm5699_vm13, %v2486_v25, -inf  ;;  %vm5703_vm13 = vmmov %vm5693_vm2 }
 0x46d   : > { %v3199_v2 = vrot.slane %v3170_v60, %v4523_v10  ;;  %2489 = vmax.xlane.f32.xlu0 %v2488_v46  ;;  %v3203_v51 = vrot.slane %v3173_v5, %v4523_v10 }
 0x46f   : > { %v3215_v20 = vsel %vm778_vm10, %v3199_v2, %v3214_v62 }
 0x470   : > { %v3179_v59 = vpop.permute.xlu1 %3178  ;;  %v3176_v3 = vpop.permute.xlu0 %3175  ;;  %v3216_v4 = vsel %vm780_vm12, %v3203_v51, %v3215_v20 }
 0x471   : > { %v3211_v43 = vrot.slane %v3179_v59, %v4523_v10  ;;  %v3207_v16 = vrot.slane %v3176_v3, %v4523_v10 }
 0x473   : > { %v3217_v31 = vsel %vm782_vm15, %v3207_v16, %v3216_v4 }
 0x474   : > { %v3218_v48 = vsel %vm784_vm8, %v3211_v43, %v3217_v31 }
 0x475   : > { %v3220_v54 = vsel %vm5693_vm2, %v3218_v48, -inf }
 0x476   : > { %3221 = vmax.xlane.f32.xlu0 %v3220_v54 }
 0x49d   : > { %v1025_v57 = vpop.xlane.xlu0 %1024 }
 0x49e   : > { %v1030_v39 = vrot.slane %v1025_v57, %v4525_v11  ;;  %v1034_v25 = vrot.slane %v1025_v57, %v4516_v6  ;;  %v1038_v41 = vrot.slane %v1025_v57, %v4518_v7  ;;  %v1046_v5 = vrot.slane %v1025_v57, %v4554_v24 }
 0x49f   : > { %v1042_v60 = vrot.slane %v1025_v57, %v4520_v8  ;;  %v1054_v62 = vrot.slane %v1025_v57, %v4569_v30  ;;  %v1050_v3 = vrot.slane %v1025_v57, %v4557_v27  ;;  %v1058_v4 = vrot.slane %v1025_v57, %v4573_v33 }
 0x4a0   : > { %v1067_v46 = vsub.f32 %v4992_v9, %v1030_v39  ;;  %v1068_v1 = vsub.f32 %v4987_v0, %v1034_v25  ;;  %v1069_v2 = vsub.f32 %v5004_v13, %v1038_v41  ;;  %v1071_v51 = vsub.f32 %v5016_v47, %v1046_v5 }
 0x4a1   : > { %v1070_v43 = vsub.f32 %v4999_v12, %v1042_v60  ;;  %v1073_v9 = vsub.f32 %v5023_v44, %v1054_v62  ;;  %v1072_v13 = vsub.f32 %v5011_v35, %v1050_v3  ;;  %v1074_v47 = vsub.f32 %v5029_v52, %v1058_v4 }
 0x4a2   : > { %v1075_v20 = vmul.f32 1.442695, %v1067_v46  ;;  %v1077_v59 = vmul.f32 1.442695, %v1068_v1  ;;  %v1079_v16 = vmul.f32 1.442695, %v1069_v2 }
 0x4a3   : > { %v1083_v0 = vmul.f32 1.442695, %v1071_v51  ;;  %v1081_v31 = vmul.f32 1.442695, %v1070_v43  ;;  %v1087_v48 = vmul.f32 1.442695, %v1073_v9 }
 0x4a4   : > { %4037 = vpow2.f32 %v1075_v20  ;;  %v1085_v54 = vmul.f32 1.442695, %v1072_v13  ;;  %v1089_v12 = vmul.f32 1.442695, %v1074_v47 }
 0x4a5   : > { %4039 = vpow2.f32 %v1077_v59 }
 0x4a6   : > { %4041 = vpow2.f32 %v1079_v16 }
 0x4a7   : > { %4043 = vpow2.f32 %v1083_v0 }
 0x4a8   : > { %4045 = vpow2.f32 %v1081_v31 }
 0x4a9   : > { %4047 = vpow2.f32 %v1087_v48 }
 0x4aa   : > { %4049 = vpow2.f32 %v1085_v54 }
 0x4ab   : > { %4051 = vpow2.f32 %v1089_v12 }
 0x4ae   : > { %v5253_v39 = vpop.eup %4037 }
 0x4af   : > { %v5255_v25 = vpop.eup %4039  ;;  %1100 = vperm.xlu1 %4035, %v5253_v39  }
 0x4b0   : > { %1103 = vperm.xlu0 %4036, %v5255_v25   ;;  %v5259_v35 = vpop.eup %4041 }
 0x4b1   : > { %v5261_v44 = vpop.eup %4043 }
 0x4b2   : > { %v5265_v52 = vpop.eup %4045 }
 0x4b3   : > { %1106 = vperm.xlu1 %4035, %v5259_v35   ;;  %v5267_v57 = vpop.eup %4047 }
 0x4b4   : > { %1112 = vperm.xlu0 %4036, %v5261_v44   ;;  %v5271_v41 = vpop.eup %4049 }
 0x4b5   : > { %v5273_v5 = vpop.eup %4051 }
 0x4b7   : > { %1109 = vperm.xlu1 %4035, %v5265_v52  }
 0x4b8   : > { %1118 = vperm.xlu0 %4036, %v5267_v57  }
 0x4bb   : > { %1115 = vperm.xlu1 %4035, %v5271_v41  }
 0x4bc   : > { %1121 = vperm.xlu0 %4036, %v5273_v5  }
 0x4ea   : > { %v1758_v60 = vpop.xlane.xlu1 %1757 }
 0x4eb   : > { %v1763_v46 = vrot.slane %v1758_v60, %v4525_v11  ;;  %v1767_v1 = vrot.slane %v1758_v60, %v4516_v6  ;;  %v1771_v2 = vrot.slane %v1758_v60, %v4518_v7  ;;  %v1779_v62 = vrot.slane %v1758_v60, %v4554_v24 }
 0x4ec   : > { %v1775_v59 = vrot.slane %v1758_v60, %v4520_v8  ;;  %v1783_v0 = vrot.slane %v1758_v60, %v4557_v27  ;;  %v1787_v47 = vrot.slane %v1758_v60, %v4569_v30 }
 0x4ed   : > { %v1800_v51 = vsub.f32 %v5049_v45, %v1763_v46  ;;  %v1801_v20 = vsub.f32 %v5045_v53, %v1767_v1  ;;  %v1802_v3 = vsub.f32 %v5055_v17, %v1771_v2  ;;  %v1804_v43 = vsub.f32 %v5059_v56, %v1779_v62 }
 0x4ee   : > { %v1803_v13 = vsub.f32 %v5065_v58, %v1775_v59  ;;  %v1805_v45 = vsub.f32 %v5070_v61, %v1783_v0  ;;  %v1791_v46 = vrot.slane %v1758_v60, %v4573_v33  ;;  %v1806_v1 = vsub.f32 %v5092_v21, %v1787_v47 }
 0x4ef   : > { %v1808_v16 = vmul.f32 1.442695, %v1800_v51  ;;  %v1810_v4 = vmul.f32 1.442695, %v1801_v20  ;;  %v1816_v9 = vmul.f32 1.442695, %v1804_v43 }
 0x4f0   : > { %v1812_v31 = vmul.f32 1.442695, %v1802_v3  ;;  %v1814_v53 = vmul.f32 1.442695, %v1803_v13  ;;  %v1818_v17 = vmul.f32 1.442695, %v1805_v45 }
 0x4f1   : > { %4053 = vpow2.f32 %v1808_v16  ;;  %v1820_v21 = vmul.f32 1.442695, %v1806_v1 }
 0x4f2   : > { %4055 = vpow2.f32 %v1810_v4 }
 0x4f3   : > { %4057 = vpow2.f32 %v1816_v9 }
 0x4f4   : > { %4059 = vpow2.f32 %v1812_v31 }
 0x4f5   : > { %4061 = vpow2.f32 %v1814_v53 }
 0x4f6   : > { %4063 = vpow2.f32 %v1818_v17 }
 0x4fa   : > { %v5290_v56 = vpop.xlane.xlu0 %2489 }
 0x4fb   : > { %v5292_v48 = vpop.eup %4053  ;;  %v2495_v54 = vrot.slane %v5290_v56, %v4525_v11  ;;  %v2499_v58 = vrot.slane %v5290_v56, %v4516_v6  ;;  %v2503_v12 = vrot.slane %v5290_v56, %v4518_v7  ;;  %v2507_v51 = vrot.slane %v5290_v56, %v4520_v8 }
 0x4fc   : > { %v5300_v61 = vpop.eup %4055  ;;  %1833 = vperm.xlu0 %4036, %v5292_v48   ;;  %v2519_v17 = vrot.slane %v5290_v56, %v4569_v30 }
 0x4fd   : > { %v2532_v2 = vsub.f32 %v5082_v14, %v2495_v54  ;;  %v2533_v62 = vsub.f32 %v5078_v49, %v2499_v58  ;;  %1836 = vperm.xlu1 %4035, %v5300_v61   ;;  %v2534_v20 = vsub.f32 %v5088_v19, %v2503_v12  ;;  %v5311_v59 = vpop.eup %4057  ;;  %v1807_v14 = vsub.f32 %v5102_v37, %v1791_v46 }
 0x4fe   : > { %v5313_v16 = vpop.eup %4059  ;;  %v2511_v49 = vrot.slane %v5290_v56, %v4554_v24  ;;  %v2515_v19 = vrot.slane %v5290_v56, %v4557_v27  ;;  %v2535_v60 = vsub.f32 %v5098_v36, %v2507_v51 }
 0x4ff   : > { %v2540_v3 = vmul.f32 1.442695, %v2532_v2  ;;  %v2542_v43 = vmul.f32 1.442695, %v2533_v62  ;;  %v2544_v4 = vmul.f32 1.442695, %v2534_v20  ;;  %v5325_v0 = vpop.eup %4061  ;;  %v2523_v2 = vrot.slane %v5290_v56, %v4573_v33 }
 0x500   : > { %1845 = vperm.xlu0 %4036, %v5311_v59   ;;  %v1822_v37 = vmul.f32 1.442695, %v1807_v14  ;;  %v2536_v13 = vsub.f32 %v5114_v38, %v2511_v49  ;;  %v2537_v45 = vsub.f32 %v5110_v15, %v2515_v19  ;;  %v2546_v53 = vmul.f32 1.442695, %v2535_v60  ;;  %v5334_v47 = vpop.eup %4063 }
 0x501   : > { %4065 = vpow2.f32 %v2540_v3  ;;  %1839 = vperm.xlu1 %4035, %v5313_v16   ;;  %v2539_v56 = vsub.f32 %v5147_v32, %v2523_v2 }
 0x502   : > { %4067 = vpow2.f32 %v2542_v43  ;;  %v2548_v54 = vmul.f32 1.442695, %v2536_v13  ;;  %v2550_v58 = vmul.f32 1.442695, %v2537_v45 }
 0x503   : > { %v5323_v9 = vpop.xlane.xlu0 %3221  ;;  %4069 = vpow2.f32 %v1820_v21  ;;  %v2554_v32 = vmul.f32 1.442695, %v2539_v56 }
 0x504   : > { %v3227_v31 = vrot.slane %v5323_v9, %v4525_v11  ;;  %4071 = vpow2.f32 %v2544_v4  ;;  %v3231_v36 = vrot.slane %v5323_v9, %v4516_v6  ;;  %v3235_v15 = vrot.slane %v5323_v9, %v4518_v7 }
 0x505   : > { %1842 = vperm.xlu1 %4035, %v5325_v0   ;;  %4073 = vpow2.f32 %v1822_v37  ;;  %v3239_v51 = vrot.slane %v5323_v9, %v4520_v8  ;;  %v3243_v14 = vrot.slane %v5323_v9, %v4554_v24  ;;  %v3247_v21 = vrot.slane %v5323_v9, %v4557_v27 }
 0x506   : > { %v3264_v38 = vsub.f32 %v5125_v28, %v3227_v31  ;;  %4075 = vpow2.f32 %v2546_v53  ;;  %v3265_v12 = vsub.f32 %v5121_v18, %v3231_v36  ;;  %v2538_v28 = vsub.f32 %v5136_v55, %v2519_v17 }
 0x507   : > { %4077 = vpow2.f32 %v2548_v54  ;;  %v3266_v18 = vsub.f32 %v5131_v22, %v3235_v15  ;;  %v3267_v22 = vsub.f32 %v5142_v29, %v3239_v51  ;;  %v3251_v4 = vrot.slane %v5323_v9, %v4569_v30 }
 0x508   : > { %v3272_v62 = vmul.f32 1.442695, %v3264_v38  ;;  %4079 = vpow2.f32 %v2550_v58  ;;  %v3274_v20 = vmul.f32 1.442695, %v3265_v12  ;;  %v2552_v55 = vmul.f32 1.442695, %v2538_v28 }
 0x509   : > { %1848 = vperm.xlu1 %4035, %v5334_v47   ;;  %v3276_v49 = vmul.f32 1.442695, %v3266_v18  ;;  %v3268_v37 = vsub.f32 %v5158_v34, %v3243_v14  ;;  %v3255_v29 = vrot.slane %v5323_v9, %v4573_v33  ;;  %v3269_v13 = vsub.f32 %v5153_v23, %v3247_v21 }
 0x50a   : > { %4081 = vpow2.f32 %v3272_v62  ;;  %v3278_v31 = vmul.f32 1.442695, %v3267_v22  ;;  %v3270_v36 = vsub.f32 %v5169_v42, %v3251_v4 }
 0x50b   : > { %v5343_v46 = vpop.eup %4065  ;;  %4083 = vpow2.f32 %v3274_v20  ;;  %v3280_v17 = vmul.f32 1.442695, %v3268_v37  ;;  %v3271_v34 = vsub.f32 %v5164_v26, %v3255_v29  ;;  %v3282_v9 = vmul.f32 1.442695, %v3269_v13 }
 0x50c   : > { %v5345_v1 = vpop.eup %4067  ;;  %2565 = vperm.xlu0 %4036, %v5343_v46   ;;  %4085 = vpow2.f32 %v2552_v55  ;;  %v3284_v38 = vmul.f32 1.442695, %v3270_v36 }
 0x50d   : > { %2568 = vperm.xlu1 %4035, %v5345_v1   ;;  %v5355_v3 = vpop.eup %4069  ;;  %4087 = vpow2.f32 %v3276_v49  ;;  %v3286_v58 = vmul.f32 1.442695, %v3271_v34 }
 0x50e   : > { %v5357_v43 = vpop.eup %4071  ;;  %4089 = vpow2.f32 %v2554_v32 }
 0x50f   : > { %v5367_v19 = vpop.eup %4073  ;;  %4091 = vpow2.f32 %v3278_v31 }
 0x510   : > { %1851 = vperm.xlu0 %4036, %v5355_v3   ;;  %v5369_v60 = vpop.eup %4075  ;;  %4093 = vpow2.f32 %v3280_v17 }
 0x511   : > { %2571 = vperm.xlu1 %4035, %v5357_v43   ;;  %v5379_v45 = vpop.eup %4077  ;;  %4095 = vpow2.f32 %v3282_v9 }
 0x512   : > { %v5381_v53 = vpop.eup %4079  ;;  %4097 = vpow2.f32 %v3284_v38 }
 0x513   : > { %4099 = vpow2.f32 %v3286_v58 }
 0x514   : > { %1854 = vperm.xlu0 %4036, %v5367_v19   ;;  %v5387_v54 = vpop.eup %4081 }
 0x515   : > { %2574 = vperm.xlu1 %4035, %v5369_v60   ;;  %v5389_v23 = vpop.eup %4083 }
 0x516   : > { %v5393_v42 = vpop.eup %4085 }
 0x517   : > { %v5395_v15 = vpop.eup %4087 }
 0x518   : > { %2577 = vperm.xlu0 %4036, %v5379_v45   ;;  %v5399_v26 = vpop.eup %4089 }
 0x519   : > { %2580 = vperm.xlu1 %4035, %v5381_v53   ;;  %v5401_v12 = vpop.eup %4091 }
 0x51a   : > { %v5405_v2 = vpop.eup %4093 }
 0x51b   : > { %v5407_v28 = vpop.eup %4095 }
 0x51c   : > { %3297 = vperm.xlu0 %4036, %v5387_v54   ;;  %v5411_v62 = vpop.eup %4097 }
 0x51d   : > { %3300 = vperm.xlu1 %4035, %v5389_v23   ;;  %v5413_v51 = vpop.eup %4099 }
 0x520   : > { %2583 = vperm.xlu0 %4036, %v5393_v42  }
 0x521   : > { %3303 = vperm.xlu1 %4035, %v5395_v15  }
 0x524   : > { %2586 = vperm.xlu0 %4036, %v5399_v26  }
 0x525   : > { %3306 = vperm.xlu1 %4035, %v5401_v12  }
 0x528   : > { %3309 = vperm.xlu0 %4036, %v5405_v2  }
 0x529   : > { %3312 = vperm.xlu1 %4035, %v5407_v28  }
 0x52c   : > { %3315 = vperm.xlu0 %4036, %v5411_v62  }
 0x52d   : > { %3318 = vperm.xlu1 %4035, %v5413_v51  }
 0x52e   : > { %v1101_v18 = vpop.permute.xlu1 %1100 }
 0x52f   : > { %v1104_v20 = vpop.permute.xlu0 %1103  ;;  %v1126_v21 = vrot.slane %v1101_v18, %v4523_v10 }
 0x530   : > { %v1130_v22 = vrot.slane %v1104_v20, %v4523_v10 }
 0x532   : > { %v1107_v56 = vpop.permute.xlu1 %1106  ;;  %v1155_v37 = vsel %vm772_vm9, %v1130_v22, %v1126_v21 }
 0x533   : > { %v1113_v55 = vpop.permute.xlu0 %1112  ;;  %v1134_v49 = vrot.slane %v1107_v56, %v4523_v10 }
 0x534   : > { %v1142_v17 = vrot.slane %v1113_v55, %v4523_v10 }
 0x535   : > { %v1156_v29 = vsel %vm774_vm7, %v1134_v49, %v1155_v37 }
 0x536   : > { %v1110_v14 = vpop.permute.xlu1 %1109 }
 0x537   : > { %v1138_v32 = vrot.slane %v1110_v14, %v4523_v10  ;;  %v1119_v13 = vpop.permute.xlu0 %1118 }
 0x538   : > { %v1150_v38 = vrot.slane %v1119_v13, %v4523_v10 }
 0x539   : > { %v1157_v31 = vsel %vm776_vm11, %v1138_v32, %v1156_v29 }
 0x53a   : > { %v1116_v4 = vpop.permute.xlu1 %1115  ;;  %v1158_v34 = vsel %vm778_vm10, %v1142_v17, %v1157_v31 }
 0x53b   : > { %v1146_v36 = vrot.slane %v1116_v4, %v4523_v10  ;;  %v1122_v58 = vpop.permute.xlu0 %1121 }
 0x53c   : > { %v1154_v20 = vrot.slane %v1122_v58, %v4523_v10 }
 0x53d   : > { %v1159_v9 = vsel %vm780_vm12, %v1146_v36, %v1158_v34 }
 0x53e   : > { %v1160_v18 = vsel %vm782_vm15, %v1150_v38, %v1159_v9 }
 0x53f   : > { %v1161_v56 = vsel %vm784_vm8, %v1154_v20, %v1160_v18 }
 0x540   : > { %v1163_v14 = vsel %vm5700_vm6, %v1161_v56, 0.0  ;;  %vm5705_vm6 = vmmov 0  }
 0x54b   : > { %1164 = vadd.xlane.f32.xlu0 %v1163_v14 }
 0x57b   : > { %v1834_v49 = vpop.permute.xlu0 %1833 }
 0x57c   : > { %v1837_v21 = vpop.permute.xlu1 %1836  ;;  %v1859_v29 = vrot.slane %v1834_v49, %v4523_v10 }
 0x57d   : > { %v1863_v37 = vrot.slane %v1837_v21, %v4523_v10 }
 0x57f   : > { %v1846_v32 = vpop.permute.xlu0 %1845  ;;  %v1888_v34 = vsel %vm772_vm9, %v1863_v37, %v1859_v29 }
 0x580   : > { %v1840_v22 = vpop.permute.xlu1 %1839  ;;  %v1875_v56 = vrot.slane %v1846_v32, %v4523_v10 }
 0x581   : > { %v1867_v13 = vrot.slane %v1840_v22, %v4523_v10 }
 0x583   : > { %v1889_v9 = vsel %vm774_vm7, %v1867_v13, %v1888_v34 }
 0x584   : > { %v1843_v55 = vpop.permute.xlu1 %1842 }
 0x585   : > { %v1871_v36 = vrot.slane %v1843_v55, %v4523_v10 }
 0x587   : > { %v1890_v58 = vsel %vm776_vm11, %v1871_v36, %v1889_v9 }
 0x588   : > { %v1849_v4 = vpop.permute.xlu1 %1848  ;;  %v1891_v21 = vsel %vm778_vm10, %v1875_v56, %v1890_v58 }
 0x589   : > { %v1879_v18 = vrot.slane %v1849_v4, %v4523_v10 }
 0x58b   : > { %v2566_v31 = vpop.permute.xlu0 %2565  ;;  %v1892_v49 = vsel %vm780_vm12, %v1879_v18, %v1891_v21 }
 0x58c   : > { %v2569_v17 = vpop.permute.xlu1 %2568  ;;  %v2591_v9 = vrot.slane %v2566_v31, %v4523_v10 }
 0x58d   : > { %v2595_v32 = vrot.slane %v2569_v17, %v4523_v10 }
 0x58f   : > { %v1852_v38 = vpop.permute.xlu0 %1851 }
 0x590   : > { %v2572_v20 = vpop.permute.xlu1 %2571  ;;  %v1883_v14 = vrot.slane %v1852_v38, %v4523_v10 }
 0x591   : > { %v2599_v38 = vrot.slane %v2572_v20, %v4523_v10 }
 0x592   : > { %v1893_v29 = vsel %vm782_vm15, %v1883_v14, %v1892_v49  ;;  %v2620_v14 = vsel %vm772_vm9, %v2595_v32, %v2591_v9 }
 0x593   : > { %v1855_v22 = vpop.permute.xlu0 %1854 }
 0x594   : > { %v2575_v55 = vpop.permute.xlu1 %2574  ;;  %v1887_v37 = vrot.slane %v1855_v22, %v4523_v10  ;;  %v2621_v22 = vsel %vm774_vm7, %v2599_v38, %v2620_v14 }
 0x595   : > { %v2603_v18 = vrot.slane %v2575_v55, %v4523_v10 }
 0x596   : > { %v1894_v13 = vsel %vm784_vm8, %v1887_v37, %v1893_v29 }
 0x597   : > { %v2578_v36 = vpop.permute.xlu0 %2577  ;;  %v1896_v4 = vsel %vm5701_vm4, %v1894_v13, 0.0  ;;  %v2622_v37 = vsel %vm776_vm11, %v2603_v18, %v2621_v22 }
 0x598   : > { %v2581_v34 = vpop.permute.xlu1 %2580  ;;  %1897 = vadd.xlane.f32.xlu1 %v1896_v4  ;;  %v2607_v21 = vrot.slane %v2578_v36, %v4523_v10 }
 0x599   : > { %v2611_v29 = vrot.slane %v2581_v34, %v4523_v10 }
 0x59a   : > { %v2623_v31 = vsel %vm778_vm10, %v2607_v21, %v2622_v37 }
 0x59b   : > { %v3298_v58 = vpop.permute.xlu0 %3297  ;;  %v2624_v38 = vsel %vm780_vm12, %v2611_v29, %v2623_v31 }
 0x59c   : > { %v3301_v56 = vpop.permute.xlu1 %3300  ;;  %v3323_v55 = vrot.slane %v3298_v58, %v4523_v10 }
 0x59d   : > { %v3327_v13 = vrot.slane %v3301_v56, %v4523_v10 }
 0x59f   : > { %v2584_v49 = vpop.permute.xlu0 %2583  ;;  %v3352_v14 = vsel %vm772_vm9, %v3327_v13, %v3323_v55 }
 0x5a0   : > { %v3304_v17 = vpop.permute.xlu1 %3303  ;;  %v2615_v20 = vrot.slane %v2584_v49, %v4523_v10 }
 0x5a1   : > { %v3331_v36 = vrot.slane %v3304_v17, %v4523_v10 }
 0x5a2   : > { %v2625_v34 = vsel %vm782_vm15, %v2615_v20, %v2624_v38 }
 0x5a3   : > { %v2587_v4 = vpop.permute.xlu0 %2586  ;;  %v3353_v58 = vsel %vm774_vm7, %v3331_v36, %v3352_v14 }
 0x5a4   : > { %v3307_v32 = vpop.permute.xlu1 %3306  ;;  %v2619_v9 = vrot.slane %v2587_v4, %v4523_v10 }
 0x5a5   : > { %v3335_v18 = vrot.slane %v3307_v32, %v4523_v10 }
 0x5a6   : > { %v2626_v21 = vsel %vm784_vm8, %v2619_v9, %v2625_v34 }
 0x5a7   : > { %v3310_v22 = vpop.permute.xlu0 %3309  ;;  %v2628_v56 = vsel %vm5702_vm14, %v2626_v21, 0.0  ;;  %v3354_v17 = vsel %vm776_vm11, %v3335_v18, %v3353_v58 }
 0x5a8   : > { %v3313_v49 = vpop.permute.xlu1 %3312  ;;  %v3339_v37 = vrot.slane %v3310_v22, %v4523_v10  ;;  %2629 = vadd.xlane.f32.xlu0 %v2628_v56 }
 0x5a9   : > { %v3343_v29 = vrot.slane %v3313_v49, %v4523_v10 }
 0x5aa   : > { %v3355_v31 = vsel %vm778_vm10, %v3339_v37, %v3354_v17 }
 0x5ab   : > { %v3316_v20 = vpop.permute.xlu0 %3315  ;;  %v3356_v55 = vsel %vm780_vm12, %v3343_v29, %v3355_v31 }
 0x5ac   : > { %v3319_v4 = vpop.permute.xlu1 %3318  ;;  %v3347_v32 = vrot.slane %v3316_v20, %v4523_v10 }
 0x5ad   : > { %v3351_v13 = vrot.slane %v3319_v4, %v4523_v10 }
 0x5ae   : > { %v3357_v36 = vsel %vm782_vm15, %v3347_v32, %v3356_v55 }
 0x5af   : > { %v3358_v9 = vsel %vm784_vm8, %v3351_v13, %v3357_v36 }
 0x5b0   : > { %v3360_v38 = vsel %vm5703_vm13, %v3358_v9, 0.0 }
 0x5b1   : > { %3361 = vadd.xlane.f32.xlu0 %v3360_v38 }
 0x5c7   : > { %1290 = vrot.lane.b32.xlu0 %v4589_v40, %s4286_s15 }
 0x5d8   : > { %v1165_v18 = vpop.xlane.xlu0 %1164 }
 0x5d9   : > { %4101 = vrcp.f32 %v1165_v18 }
 0x5e3   : > { %v4102_v34 = vpop.eup %4101 }
 0x5e4   : > { %v1167_v21 = vmul.f32 %v4102_v34, %v1165_v18 }
 0x5e6   : > { %v1168_v14 = vsub.f32 2.0, %v1167_v21 }
 0x5e8   : > { %v1169_v22 = vmul.f32 %v4102_v34, %v1168_v14 }
 0x5ea   : > { %v1178_v56 = vrot.slane %v1169_v22, %v4516_v6  ;;  %v1174_v58 = vrot.slane %v1169_v22, %v4525_v11  ;;  %v1190_v17 = vrot.slane %v1169_v22, %v4554_v24  ;;  %v1182_v29 = vrot.slane %v1169_v22, %v4518_v7 }
 0x5eb   : > { %v1198_v4 = vrot.slane %v1169_v22, %v4569_v30  ;;  %v1186_v32 = vrot.slane %v1169_v22, %v4520_v8  ;;  %v1202_v13 = vrot.slane %v1169_v22, %v4573_v33  ;;  %v1194_v55 = vrot.slane %v1169_v22, %v4557_v27 }
 0x5ec   : > { %v1212_v49 = vmul.f32 %v5255_v25, %v1178_v56  ;;  %v1211_v37 = vmul.f32 %v5253_v39, %v1174_v58  ;;  %v1215_v31 = vmul.f32 %v5261_v44, %v1190_v17  ;;  %v1213_v20 = vmul.f32 %v5259_v35, %v1182_v29 }
 0x5ed   : > { %v1217_v25 = vmul.f32 %v5267_v57, %v1198_v4  ;;  %v1214_v39 = vmul.f32 %v5265_v52, %v1186_v32  ;;  %v1218_v44 = vmul.f32 %v5273_v5, %v1202_v13  ;;  %v1216_v35 = vmul.f32 %v5271_v41, %v1194_v55 }
 0x5ee   : > { %1231 = vperm.xlu0 %4036, %v1212_v49   ;;  %1228 = vperm.xlu1 %4035, %v1211_v37   ;;  %v5704_v4 = vmov 0.0  }
 0x5f2   : > { %1240 = vperm.xlu0 %4036, %v1215_v31   ;;  %1234 = vperm.xlu1 %4035, %v1213_v20  }
 0x5f6   : > { %1246 = vperm.xlu0 %4036, %v1217_v25   ;;  %1237 = vperm.xlu1 %4035, %v1214_v39  }
 0x5fa   : > { %1249 = vperm.xlu0 %4036, %v1218_v44   ;;  %1243 = vperm.xlu1 %4035, %v1216_v35  }
 0x625   : > { %v1898_v36 = vpop.xlane.xlu1 %1897 }
 0x626   : > { %4103 = vrcp.f32 %v1898_v36 }
 0x630   : > { %v4104_v9 = vpop.eup %4103 }
 0x631   : > { %v1900_v38 = vmul.f32 %v4104_v9, %v1898_v36 }
 0x633   : > { %v1901_v18 = vsub.f32 2.0, %v1900_v38 }
 0x635   : > { %v1902_v57 = vmul.f32 %v4104_v9, %v1901_v18  ;;  %v2630_v34 = vpop.xlane.xlu0 %2629 }
 0x636   : > { %4105 = vrcp.f32 %v2630_v34 }
 0x637   : > { %v1907_v52 = vrot.slane %v1902_v57, %v4525_v11  ;;  %v1911_v21 = vrot.slane %v1902_v57, %v4516_v6  ;;  %v1923_v41 = vrot.slane %v1902_v57, %v4554_v24  ;;  %v1915_v22 = vrot.slane %v1902_v57, %v4518_v7 }
 0x638   : > { %v1919_v49 = vrot.slane %v1902_v57, %v4520_v8  ;;  %v1927_v29 = vrot.slane %v1902_v57, %v4557_v27  ;;  %v1931_v44 = vrot.slane %v1902_v57, %v4569_v30  ;;  %v1935_v36 = vrot.slane %v1902_v57, %v4573_v33 }
 0x639   : > { %v1944_v14 = vmul.f32 %v5292_v48, %v1907_v52  ;;  %v1945_v5 = vmul.f32 %v5300_v61, %v1911_v21  ;;  %v1948_v56 = vmul.f32 %v5311_v59, %v1923_v41  ;;  %v1946_v58 = vmul.f32 %v5313_v16, %v1915_v22 }
 0x63a   : > { %v1947_v61 = vmul.f32 %v5325_v0, %v1919_v49  ;;  %v1949_v16 = vmul.f32 %v5334_v47, %v1927_v29  ;;  %v1950_v38 = vmul.f32 %v5355_v3, %v1931_v44 }
 0x63b   : > { %1961 = vperm.xlu0 %4036, %v1944_v14   ;;  %1964 = vperm.xlu1 %4035, %v1945_v5  }
 0x63e   : > { %v3362_v37 = vpop.xlane.xlu0 %3361 }
 0x63f   : > { %4107 = vrcp.f32 %v3362_v37  ;;  %1973 = vperm.xlu0 %4036, %v1948_v56   ;;  %1967 = vperm.xlu1 %4035, %v1946_v58  }
 0x640   : > { %v4106_v17 = vpop.eup %4105 }
 0x641   : > { %v2632_v48 = vmul.f32 %v4106_v17, %v2630_v34 }
 0x642   : > { %v1291_v31 = vpop.permute.xlu0 %1290 }
 0x643   : > { %v2633_v20 = vsub.f32 2.0, %v2632_v48  ;;  %1970 = vperm.xlu1 %4035, %v1947_v61   ;;  %3897 = vmatpush3.msra.mxu1 %v1291_v31 }
 0x644   : > { %3906 = vmatprep.subr.mxu1 %v5704_v4 }
 0x645   : > { %v2634_v59 = vmul.f32 %v4106_v17, %v2633_v20 }
 0x647   : > { %1976 = vperm.xlu1 %4035, %v1949_v16   ;;  %v2643_v32 = vrot.slane %v2634_v59, %v4516_v6  ;;  %v2639_v25 = vrot.slane %v2634_v59, %v4525_v11  ;;  %v2647_v55 = vrot.slane %v2634_v59, %v4518_v7  ;;  %v2651_v18 = vrot.slane %v2634_v59, %v4520_v8 }
 0x648   : > { %v2659_v52 = vrot.slane %v2634_v59, %v4557_v27  ;;  %v2655_v21 = vrot.slane %v2634_v59, %v4554_v24  ;;  %v2663_v41 = vrot.slane %v2634_v59, %v4569_v30 }
 0x649   : > { %v4108_v39 = vpop.eup %4107  ;;  %v2677_v13 = vmul.f32 %v5345_v1, %v2643_v32  ;;  %v2676_v0 = vmul.f32 %v5343_v46, %v2639_v25  ;;  %v2678_v9 = vmul.f32 %v5357_v43, %v2647_v55  ;;  %v1951_v46 = vmul.f32 %v5367_v19, %v1935_v36 }
 0x64a   : > { %v3364_v35 = vmul.f32 %v4108_v39, %v3362_v37  ;;  %v2679_v34 = vmul.f32 %v5369_v60, %v2651_v18  ;;  %v2681_v57 = vmul.f32 %v5381_v53, %v2659_v52  ;;  %v2680_v43 = vmul.f32 %v5379_v45, %v2655_v21 }
 0x64b   : > { %2696 = vperm.xlu1 %4035, %v2677_v13   ;;  %2693 = vperm.xlu0 %4036, %v2676_v0   ;;  %v2682_v45 = vmul.f32 %v5393_v42, %v2663_v41 }
 0x64c   : > { %v3365_v47 = vsub.f32 2.0, %v3364_v35 }
 0x64e   : > { %v3366_v1 = vmul.f32 %v4108_v39, %v3365_v47 }
 0x64f   : > { %2699 = vperm.xlu1 %4035, %v2678_v9   ;;  %1979 = vperm.xlu0 %4036, %v1950_v38  }
 0x650   : > { %v3375_v3 = vrot.slane %v3366_v1, %v4516_v6  ;;  %v3371_v14 = vrot.slane %v3366_v1, %v4525_v11  ;;  %v3379_v5 = vrot.slane %v3366_v1, %v4518_v7  ;;  %v3383_v6 = vrot.slane %v3366_v1, %v4520_v8 }
 0x651   : > { %v2667_v11 = vrot.slane %v2634_v59, %v4573_v33  ;;  %v3387_v7 = vrot.slane %v3366_v1, %v4554_v24  ;;  %v3391_v22 = vrot.slane %v3366_v1, %v4557_v27  ;;  %v3395_v8 = vrot.slane %v3366_v1, %v4569_v30 }
 0x652   : > { %v3409_v19 = vmul.f32 %v5389_v23, %v3375_v3  ;;  %v3408_v60 = vmul.f32 %v5387_v54, %v3371_v14  ;;  %v3410_v53 = vmul.f32 %v5395_v15, %v3379_v5  ;;  %v3411_v23 = vmul.f32 %v5401_v12, %v3383_v6 }
 0x653   : > { %2702 = vperm.xlu1 %4035, %v2679_v34   ;;  %1982 = vperm.xlu0 %4036, %v1951_v46   ;;  %v2683_v54 = vmul.f32 %v5399_v26, %v2667_v11  ;;  %v3412_v15 = vmul.f32 %v5405_v2, %v3387_v7  ;;  %v3413_v42 = vmul.f32 %v5407_v28, %v3391_v22 }
 0x654   : > { %v3399_v56 = vrot.slane %v3366_v1, %v4573_v33  ;;  %v3414_v12 = vmul.f32 %v5411_v62, %v3395_v8 }
 0x656   : > { %v3415_v26 = vmul.f32 %v5413_v51, %v3399_v56 }
 0x657   : > { %2708 = vperm.xlu1 %4035, %v2681_v57   ;;  %2705 = vperm.xlu0 %4036, %v2680_v43  }
 0x65b   : > { %3428 = vperm.xlu1 %4035, %v3409_v19   ;;  %3425 = vperm.xlu0 %4036, %v3408_v60  }
 0x65f   : > { %3431 = vperm.xlu1 %4035, %v3410_v53   ;;  %2711 = vperm.xlu0 %4036, %v2682_v45  }
 0x663   : > { %3434 = vperm.xlu1 %4035, %v3411_v23   ;;  %2714 = vperm.xlu0 %4036, %v2683_v54  }
 0x667   : > { %3437 = vperm.xlu1 %4035, %v3412_v15   ;;  %3440 = vperm.xlu0 %4036, %v3413_v42  }
 0x66b   : > { %3443 = vperm.xlu1 %4035, %v3414_v12   ;;  %3446 = vperm.xlu0 %4036, %v3415_v26  }
 0x66d   : > { %v1229_v24 = vpop.permute.xlu1 %1228  ;;  %v1232_v27 = vpop.permute.xlu0 %1231 }
 0x66e   : > { %v1254_v33 = vrot.slane %v1229_v24, %v4523_v10  ;;  %v1258_v28 = vrot.slane %v1232_v27, %v4523_v10 }
 0x66f   : > { %2023 = vrot.lane.b32.xlu1 %v4589_v40, %s4287_s27  ;;  %2755 = vrot.lane.b32.xlu0 %v4589_v40, %s4288_s28 }
 0x670   : > { %v1283_v49 = vsel %vm772_vm9, %v1258_v28, %v1254_v33 }
 0x671   : > { %v1235_v2 = vpop.permute.xlu1 %1234  ;;  %v1241_v30 = vpop.permute.xlu0 %1240 }
 0x672   : > { %v1262_v62 = vrot.slane %v1235_v2, %v4523_v10  ;;  %v1270_v61 = vrot.slane %v1241_v30, %v4523_v10 }
 0x673   : > { %3487 = vrot.lane.b32.xlu1 %v4589_v40, %s4289_s11 }
 0x674   : > { %v1284_v17 = vsel %vm774_vm7, %v1262_v62, %v1283_v49 }
 0x675   : > { %v1238_v51 = vpop.permute.xlu1 %1237  ;;  %v1247_v58 = vpop.permute.xlu0 %1246 }
 0x676   : > { %v1266_v37 = vrot.slane %v1238_v51, %v4523_v10  ;;  %v1278_v59 = vrot.slane %v1247_v58, %v4523_v10 }
 0x678   : > { %v1285_v48 = vsel %vm776_vm11, %v1266_v37, %v1284_v17 }
 0x679   : > { %v1244_v29 = vpop.permute.xlu1 %1243  ;;  %v1250_v31 = vpop.permute.xlu0 %1249  ;;  %v1286_v40 = vsel %vm778_vm10, %v1270_v61, %v1285_v48 }
 0x67a   : > { %v1274_v20 = vrot.slane %v1244_v29, %v4523_v10  ;;  %v1282_v32 = vrot.slane %v1250_v31, %v4523_v10 }
 0x67c   : > { %v1287_v16 = vsel %vm780_vm12, %v1274_v20, %v1286_v40 }
 0x67d   : > { %v1288_v25 = vsel %vm782_vm15, %v1278_v59, %v1287_v16 }
 0x67e   : > { %v1289_v39 = vsel %vm784_vm8, %v1282_v32, %v1288_v25 }
 0x67f   : > { %3899 = vmatmul.mubr.msk.f32.vlgmr.msra.gmra.mrb[4].mxu1 %vm5693_vm2, %v1289_v39 }
 0x680   : > { %3908 = vmatprep.mubr.msk.f32.mxu1 %vm5705_vm6, %v5704_v4 }
 0x6ba   : > { %v1965_v13 = vpop.permute.xlu1 %1964  ;;  %v1962_v55 = vpop.permute.xlu0 %1961 }
 0x6bb   : > { %v1991_v14 = vrot.slane %v1965_v13, %v4523_v10  ;;  %v1987_v19 = vrot.slane %v1962_v55, %v4523_v10 }
 0x6bd   : > { %v2016_v45 = vsel %vm772_vm9, %v1991_v14, %v1987_v19  ;;  %v3583_v14 = vld [vmem:[#allocation4 + $0x18] sm:$0xff] }
 0x6be   : > { %v1968_v0 = vpop.permute.xlu1 %1967  ;;  %v1974_v35 = vpop.permute.xlu0 %1973 }
 0x6bf   : > { %v1995_v41 = vrot.slane %v1968_v0, %v4523_v10  ;;  %v2003_v26 = vrot.slane %v1974_v35, %v4523_v10 }
 0x6c1   : > { %v2017_v23 = vsel %vm774_vm7, %v1995_v41, %v2016_v45 }
 0x6c2   : > { %v1971_v44 = vpop.permute.xlu1 %1970 }
 0x6c3   : > { %v1999_v53 = vrot.slane %v1971_v44, %v4523_v10 }
 0x6c5   : > { %v2018_v22 = vsel %vm776_vm11, %v1999_v53, %v2017_v23 }
 0x6c6   : > { %v1977_v36 = vpop.permute.xlu1 %1976  ;;  %v2019_v58 = vsel %vm778_vm10, %v2003_v26, %v2018_v22 }
 0x6c7   : > { %v2007_v42 = vrot.slane %v1977_v36, %v4523_v10 }
 0x6c9   : > { %v2020_v17 = vsel %vm780_vm12, %v2007_v42, %v2019_v58 }
 0x6ca   : > { %v2697_v47 = vpop.permute.xlu1 %2696  ;;  %v2694_v9 = vpop.permute.xlu0 %2693 }
 0x6cb   : > { %v2723_v54 = vrot.slane %v2697_v47, %v4523_v10  ;;  %v2719_v7 = vrot.slane %v2694_v9, %v4523_v10 }
 0x6cd   : > { %v2748_v28 = vsel %vm772_vm9, %v2723_v54, %v2719_v7 }
 0x6ce   : > { %v2700_v38 = vpop.permute.xlu1 %2699  ;;  %v1980_v18 = vpop.permute.xlu0 %1979 }
 0x6cf   : > { %v2727_v15 = vrot.slane %v2700_v38, %v4523_v10  ;;  %v2011_v24 = vrot.slane %v1980_v18, %v4523_v10 }
 0x6d1   : > { %v2749_v49 = vsel %vm774_vm7, %v2727_v15, %v2748_v28  ;;  %v2021_v31 = vsel %vm782_vm15, %v2011_v24, %v2020_v17 }
 0x6d2   : > { %v2703_v46 = vpop.permute.xlu1 %2702  ;;  %v1983_v1 = vpop.permute.xlu0 %1982 }
 0x6d3   : > { %v2731_v8 = vrot.slane %v2703_v46, %v4523_v10  ;;  %v2015_v62 = vrot.slane %v1983_v1, %v4523_v10 }
 0x6d5   : > { %v2750_v48 = vsel %vm776_vm11, %v2731_v8, %v2749_v49  ;;  %v2022_v32 = vsel %vm784_vm8, %v2015_v62, %v2021_v31 }
 0x6d6   : > { %v2709_v34 = vpop.permute.xlu1 %2708  ;;  %v2706_v52 = vpop.permute.xlu0 %2705 }
 0x6d7   : > { %v2735_v27 = vrot.slane %v2706_v52, %v4523_v10  ;;  %v2739_v61 = vrot.slane %v2709_v34, %v4523_v10 }
 0x6d9   : > { %v2751_v20 = vsel %vm778_vm10, %v2735_v27, %v2750_v48 }
 0x6da   : > { %v3429_v21 = vpop.permute.xlu1 %3428  ;;  %v3426_v57 = vpop.permute.xlu0 %3425  ;;  %v2752_v35 = vsel %vm780_vm12, %v2739_v61, %v2751_v20  ;;  %v3835_v20 = vld [vmem:[#allocation9] ss:$0 sm:$0xff] }
 0x6db   : > { %v3455_v56 = vrot.slane %v3429_v21, %v4523_v10  ;;  %v3451_v12 = vrot.slane %v3426_v57, %v4523_v10  ;;  %v3580_v21 = vld [vmem:[#allocation4] sm:$0xff]  ;;  %v3581_v57 = vld [vmem:[#allocation4 + $0x8] sm:$0xff] }
 0x6dd   : > { %v3480_v29 = vsel %vm772_vm9, %v3455_v56, %v3451_v12  ;;  %vm5706_vm9 = vmmov %vm5693_vm2  ;;  %v3832_v12 = vld [vmem:[#allocation6] ss:$0 sm:$0xff] }
 0x6de   : > { %v3432_v43 = vpop.permute.xlu1 %3431  ;;  %v2712_v3 = vpop.permute.xlu0 %2711 }
 0x6df   : > { %v3459_v2 = vrot.slane %v3432_v43, %v4523_v10  ;;  %v2743_v40 = vrot.slane %v2712_v3, %v4523_v10  ;;  %v3955_v43 = vpack.c.bf16 %v3581_v57, %v3580_v21  ;;  %v5709_v3 = vmov 0.0|0.0  }
 0x6e1   : > { %v3481_v59 = vsel %vm774_vm7, %v3459_v2, %v3480_v29  ;;  %v2753_v36 = vsel %vm782_vm15, %v2743_v40, %v2752_v35  ;;  %vm5707_vm7 = vmmov %vm5693_vm2  ;;  %3956 = vmatpush3.bf16.msra.mxu0 %v3955_v43  ;;  %v4111_v2 = vld [vmem:[%s4566_s13] sm:$0xff] }
 0x6e2   : > { %v3435_v60 = vpop.permute.xlu1 %3434  ;;  %v2715_v5 = vpop.permute.xlu0 %2714  ;;  %3957 = vmatprep.subr.bf16.mxu0 %v5709_v3  ;;  %v3834_v29 = vld [vmem:[#allocation7] ss:$0 sm:$0xff] }
 0x6e3   : > { %v3463_v51 = vrot.slane %v3435_v60, %v4523_v10  ;;  %v2747_v39 = vrot.slane %v2715_v5, %v4523_v10 }
 0x6e5   : > { %v3482_v25 = vsel %vm776_vm11, %v3463_v51, %v3481_v59  ;;  %v2754_v9 = vsel %vm784_vm8, %v2747_v39, %v2753_v36  ;;  %vm5708_vm11 = vmmov %vm5693_vm2 }
 0x6e6   : > { %v3438_v6 = vpop.permute.xlu1 %3437  ;;  %v3441_v11 = vpop.permute.xlu0 %3440 }
 0x6e7   : > { %v3467_v37 = vrot.slane %v3438_v6, %v4523_v10  ;;  %v3471_v13 = vrot.slane %v3441_v11, %v4523_v10 }
 0x6e9   : > { %v3483_v0 = vsel %vm778_vm10, %v3467_v37, %v3482_v25  ;;  %vm3576_vm10 = vcmask 130048  }
 0x6ea   : > { %v3444_v30 = vpop.permute.xlu1 %3443  ;;  %v3447_v33 = vpop.permute.xlu0 %3446  ;;  %v3484_v38 = vsel %vm780_vm12, %v3471_v13, %v3483_v0  ;;  %vm3578_vm12 = vcmask 195584  }
 0x6eb   : > { %v3475_v55 = vrot.slane %v3444_v30, %v4523_v10  ;;  %v3479_v18 = vrot.slane %v3447_v33, %v4523_v10  ;;  %v3582_v10 = vld [vmem:[#allocation4 + $0x10] sm:$0xff] }
 0x6ec   : > { %v3958_v19 = vpack.c.bf16 %v3583_v14, %v3582_v10 }
 0x6ed   : > { %v3485_v46 = vsel %vm782_vm15, %v3475_v55, %v3484_v38  ;;  %vm5712_vm15 = vmmov %vm5693_vm2 }
 0x6ee   : > { %v2024_v16 = vpop.permute.xlu1 %2023  ;;  %v2756_v44 = vpop.permute.xlu0 %2755  ;;  %v3486_v1 = vsel %vm784_vm8, %v3479_v18, %v3485_v46  ;;  %3959 = vmatpush3.bf16.msra.mxu0 %v3958_v19  ;;  %vm5713_vm8 = vcmask 261120  }
 0x6ef   : > { %3907 = vmatpush3.msra.mxu1 %v2024_v16 }
 0x6f0   : > { %3909 = vmatmul.mubr.msk.f32.vlgmr.msra.gmra.mrb[6].mxu1 %vm5706_vm9, %v2022_v32  ;;  %3916 = vmatprep.subr.mxu1 %v5704_v4 }
 0x6f1   : > { %3917 = vmatpush3.msra.mxu1 %v2756_v44  ;;  %3918 = vmatprep.mubr.msk.f32.mxu1 %vm5705_vm6, %v5704_v4 }
 0x6f2   : > { %v3488_v47 = vpop.permute.xlu1 %3487  ;;  %3926 = vmatprep.subr.mxu1 %v5704_v4 }
 0x6f4   : > { %3919 = vmatmul.mubr.msk.f32.vlgmr.msra.gmra.mrb[8].mxu1 %vm5707_vm7, %v2754_v9 }
 0x6f5   : > { %3927 = vmatpush3.msra.mxu1 %v3488_v47  ;;  %3928 = vmatprep.mubr.msk.f32.mxu1 %vm5705_vm6, %v5704_v4 }
 0x6f8   : > { %3929 = vmatmul.mubr.msk.f32.vlgmr.msra.gmra.mrb[10].mxu1 %vm5708_vm11, %v3486_v1 }
 0x752   : > { %v1361_v34 = vpop.f32.mrb[4].mxu1 }
 0x753   : > { %v3900_v52 = vpop.f32.mrb[5].mxu1  ;;  %v1365_v15 = vsel %vm799_vm5, %v1361_v34, 0.0 }
 0x7c3   : > { %v2094_v60 = vpop.f32.mrb[6].mxu1 }
 0x7c4   : > { %v2098_v4 = vsel %vm1530_vm1, %v2094_v60, 0.0  ;;  %v3910_v5 = vpop.f32.mrb[7].mxu1  ;;  %vm5714_vm1 = vmmov %vm5713_vm8 }
 0x7c5   : > { %3564 = vrot.lane.b32.xlu0 %v2098_v4, %s4290_s29  ;;  %vm5715_vm5 = vmmov %vm5714_vm1 }
 0x7c7   : > { %v2826_v41 = vpop.f32.mrb[8].mxu1 }
 0x7c8   : > { %v2830_v53 = vsel %vm2262_vm0, %v2826_v41, 0.0  ;;  %v3920_v45 = vpop.f32.mrb[9].mxu1  ;;  %vm5716_vm0 = vmmov %vm5714_vm1 }
 0x7c9   : > { %3568 = vrot.lane.b32.xlu1 %v2830_v53, %s4291_s10 }
 0x7cb   : > { %v3558_v6 = vpop.f32.mrb[10].mxu1 }
 0x7cc   : > { %v3562_v23 = vsel %vm2994_vm3, %v3558_v6, 0.0  ;;  %v3930_v54 = vpop.f32.mrb[11].mxu1 }
 0x7cd   : > { %3572 = vrot.lane.b32.xlu0 %v3562_v23, %s4292_s17 }
 0x837   : > { %v3565_v50 = vpop.permute.xlu0 %3564 }
 0x838   : > { %v3575_v63 = vsel %vm5712_vm15, %v1365_v15, %v3565_v50 }
 0x83b   : > { %v3569_v7 = vpop.permute.xlu1 %3568 }
 0x83c   : > { %v3577_v42 = vsel %vm3576_vm10, %v3575_v63, %v3569_v7 }
 0x83f   : > { %v3573_v8 = vpop.permute.xlu0 %3572 }
 0x840   : > { %v3579_v56 = vsel %vm3578_vm12, %v3577_v42, %v3573_v8 }
 0x841   : > { %3940 = vmatmul.mubr.msk.f32.vlgmr.msra.gmra.mrb[8].mxu0 %vm5713_vm8, %v3579_v56 }
 0x914   : > { %v3660_v26 = vpop.f32.mrb[8].mxu0 }
 0x915   : > { %v3661_v24 = vadd.f32 %v3832_v12, %v3660_v26  ;;  %v3941_v27 = vpop.f32.mrb[9].mxu0 }
 0x917   : > { %v3664_v30 = vadd.f32 %v4111_v2, %v3661_v24 }
 0x919   : > { %v3665_v33 = vsel %vm5714_vm1, %v3664_v30, 0.0 }
 0x91a   : > { %3666 = vadd.xlane.f32.xlu1 %v3665_v33 }
 0x9a7   : > { %v3667_v28 = vpop.xlane.xlu1 %3666 }
 0x9a8   : > { %v3669_v62 = vmul.f32 0.03125, %v3667_v28 }
 0x9aa   : > { %v3670_v51 = vsub.f32 %v3664_v30, %v3669_v62 }
 0x9ac   : > { %v3671_v58 = vmul.f32 %v3670_v51, %v3670_v51 }
 0x9ae   : > { %v3672_v49 = vsel %vm5715_vm5, %v3671_v58, 0.0 }
 0x9af   : > { %3673 = vadd.xlane.f32.xlu0 %v3672_v49 }
 0xa3c   : > { %v3674_v37 = vpop.xlane.xlu0 %3673 }
 0xa3d   : > { %v3675_v17 = vmul.f32 0.03125, %v3674_v37 }
 0xa3f   : > { %v3676_v48 = vadd.f32 1e-05, %v3675_v17 }
 0xa41   : > { %4109 = vrsqrt.f32 %v3676_v48 }
 0xa4b   : > { %v4110_v61 = vpop.eup %4109 }
 0xa4c   : > { %v3678_v31 = vmul.f32 %v4110_v61, %v3670_v51 }
 0xa4e   : > { %v3686_v59 = vmul.f32 %v3834_v29, %v3678_v31 }
 0xa50   : > { %v3694_v40 = vadd.f32 %v3835_v20, %v3686_v59 }
 0xa52   : > { %3695 = vst.msk [vmem:[%s392_s21] sm:$0xff] %vm5716_vm0, %v3694_v40 }
 0xa53 PF: > { %s22_s30 = sadd.s32 1, %s4270_s30  }
 0xa54   : > { %p19_p6 = scmp.ge.s32.totalorder %s22_s30, 4  }
 0xa56   :  { %21 = sbr.rel (!%p19_p6) target bundleno = 3 (0x3), region = 107 }
 0xa5d   :  { %3715 = vsyncpa [#allocation3], 1 }
 0xa5e   :  { %3717 = vsyncpa [#allocation3 + $0x1], 1 }
 0xa5f   :  { %3718 = vsyncpa [#allocation5], 1 }
 0xa60   :  { %3719 = vsyncpa [#allocation8], 1 }

// kernel: _lambda_.9
= control target key start
LH: loop header
LB: loop body
LE: loop exit
PB: predicated region body
PF: predicated region fallthrough
CT: control target
= control target key end

     0   :  { %s4006_s30 = smov 0   ;;  %s5177_s0 = inlined_call_operand.vmem [shape: f32[2,8,32], index: 0, kind: input, shape index: {}]   ;;  %s5178_s1 = inlined_call_operand.vmem [shape: f32[32,32], index: 1, kind: input, shape index: {}]   ;;  %s5179_s2 = inlined_call_operand.vmem [shape: f32[1,32], index: 2, kind: input, shape index: {}]   ;;  %s5180_s3 = inlined_call_operand.vmem [shape: f32[32,64], index: 3, kind: input, shape index: {}]   ;;  %s5181_s4 = inlined_call_operand.vmem [shape: f32[1,64], index: 4, kind: input, shape index: {}]   ;;  %s5182_s5 = inlined_call_operand.vmem [shape: f32[32,32], index: 5, kind: input, shape index: {}]   ;;  %s5183_s6 = inlined_call_operand.vmem [shape: f32[1,32], index: 6, kind: input, shape index: {}]   ;;  %s5184_s7 = inlined_call_operand.vmem [shape: f32[1,32], index: 7, kind: input, shape index: {}]   ;;  %s5185_s8 = inlined_call_operand.vmem [shape: f32[1,32], index: 8, kind: input, shape index: {}]   ;;  %s5186_s9 = inlined_call_operand.vmem [shape: f32[2,8,32], index: 9, kind: output, shape index: {}]  }
   0x1 LB: > { %s3684_s10 = sadd.s32 4294967295, %s3940_s30   ;;  %p3688_p0 = scmp.ge.s32.totalorder %s3940_s30, 1  ;;  %s3940_s30 = sphi %s4006_s30, %s19_s30  }
   0x2   : > { %p286_p1 = scmp.lt.s32.totalorder %s3940_s30, 3 }
   0x4   : > { %p287_p2 = pnand %p3688_p0, %p286_p1 }
   0x6   : > { %290 = sbr.rel (%p287_p2) target bundleno = 2517 (0x9d5), region = 56 }
   0xd   : > { %v414_v0 = vld [vmem:[%s5180_s3] sm:$0xff]  ;;  %v415_v1 = vld [vmem:[%s5180_s3 + $0x8] sm:$0xff]  ;;  %v495_v3 = vlaneseq  ;;  %v5195_v4 = vmov 0.0|0.0   ;;  %v416_v7 = vld [vmem:[%s5180_s3 + $0x10] sm:$0xff]  ;;  %p320_p3 = scmp.lt.s32.totalorder %s3684_s10, 1  ;;  %vm5188_vm0 = vmmov 0  }
   0xe   : > { %v329_v2 = vld [vmem:[%s5178_s1] sm:$0xff]  ;;  %3823 = vmatprep.subr.bf16.mxu1 %v5195_v4  ;;  %v3824_v5 = vpack.c.bf16 %v415_v1, %v414_v0  ;;  %3817 = vmatprep.subr.bf16.mxu0 %v5195_v4  ;;  %v330_v6 = vld [vmem:[%s5178_s1 + $0x8] sm:$0xff]  ;;  %v417_v8 = vld [vmem:[%s5180_s3 + $0x18] sm:$0xff]  ;;  %v5196_v10 = vmov 0.0   ;;  %v3945_v16 = vmov 0   ;;  %vm5187_vm2 = vcmask 261120  }
   0xf   : > { %v3818_v9 = vpack.c.bf16 %v330_v6, %v329_v2  ;;  %3763 = vmatprep.mubr.msk.f32.mxu1 %vm5188_vm0, %v5196_v10  ;;  %v331_v11 = vld [vmem:[%s5178_s1 + $0x10] sm:$0xff]  ;;  %v332_v12 = vld [vmem:[%s5178_s1 + $0x18] sm:$0xff]  ;;  %3752 = vmatprep.mubr.msk.f32.mxu0 %vm5188_vm0, %v5196_v10  ;;  %v496_v13 = vshrl.u32 %v495_v3, 7  ;;  %v498_v14 = vand.u32 127, %v495_v3  ;;  %v3827_v15 = vpack.c.bf16 %v417_v8, %v416_v7  ;;  %s5238_s10 = smov (!%p320_p3, %s3684_s10), 1  ;;  %s3946_s16 = smov 112  }
  0x10   : > { %3825 = vmatpush3.bf16.msra.mxu1 %v3824_v5  ;;  %3858 = vset.pattern.permute.xlu0 %v3945_v16  ;;  %v3821_v17 = vpack.c.bf16 %v332_v12, %v331_v11  ;;  %s3689_s27 = sshll.u32 %s5238_s10, 3  ;;  %v3693_v37 = vld [vmem:[%s5181_s4] ss:$0 sm:$0xff]  ;;  %vm5190_vm3 = vcmask 64512   ;;  %s3947_s17 = smov 120  }
  0x11   : > { %3819 = vmatpush3.bf16.msra.mxu0 %v3818_v9  ;;  %3826 = vmatprep.subr.bf16.mxu1 %v5195_v4  ;;  %v4048_v18 = vsub.s32 1, %v496_v13  ;;  %v4052_v19 = vsub.s32 2, %v496_v13  ;;  %vm561_vm1 = vcmp.lt.s32.totalorder %v498_v14, %v496_v13  ;;  %s4060_s11 = scalar_lea.vmem %s5177_s0, %s3689_s27  ;;  %v4062_v20 = vsub.s32 3, %v496_v13  ;;  %v3691_v39 = vld [vmem:[%s5179_s2] ss:$0 sm:$0xff]  ;;  %s3948_s18 = smov 104  }
  0x12   : > { %3820 = vmatprep.subr.bf16.mxu0 %v5195_v4  ;;  %3857 = vset.pattern.permute.xlu1 %v3945_v16  ;;  %v562_v21 = vsel %vm561_vm1, 1, %v3945_v16  ;;  %v4065_v22 = vsub.s32 %v498_v14, %v496_v13  ;;  %v4067_v23 = vsub.s32 0, %v496_v13  ;;  %v328_v24 = vld [vmem:[%s4060_s11] sm:$0xff]  ;;  %v4072_v27 = vsub.s32 4, %v496_v13  ;;  %s3949_s19 = smov 96   ;;  %s3950_s20 = smov 88  }
  0x13   : > { %v573_v25 = vrot.slane %v562_v21, %v4048_v18  ;;  %v580_v28 = vrot.slane %v562_v21, %v4052_v19  ;;  %v4077_v29 = vsub.s32 5, %v496_v13  ;;  %v587_v30 = vrot.slane %v562_v21, %v4062_v20  ;;  %s3951_s21 = smov 80   ;;  %s3952_s22 = smov 72  }
  0x14   : > { %3828 = vmatpush3.bf16.msra.mxu1 %v3827_v15  ;;  %v566_v26 = vrot.slane %v562_v21, %v4067_v23  ;;  %v4086_v31 = vsub.s32 6, %v496_v13  ;;  %v594_v32 = vrot.slane %v562_v21, %v4072_v27  ;;  %v4089_v33 = vsub.s32 7, %v496_v13  ;;  %s3953_s14 = smov 8   ;;  %s3954_s15 = smov 16  }
  0x15   : > { %3822 = vmatpush3.bf16.msra.mxu0 %v3821_v17  ;;  %575 = vbcast.lane.b32.xlu1 %v573_v25, 256  ;;  %v601_v34 = vrot.slane %v562_v21, %v4077_v29  ;;  %s327_s24 = scalar_lea.vmem %s5186_s9, %s3689_s27 }
  0x16   : > { %3766 = vmatprep.subr.mxu1 %v5196_v10  ;;  %568 = vbcast.lane.b32.xlu0 %v566_v26, 256  ;;  %v608_v35 = vrot.slane %v562_v21, %v4086_v31  ;;  %v615_v36 = vrot.slane %v562_v21, %v4089_v33 }
  0x17   : > { %3764 = vmatmul.mubr.msk.f32.vlgmr.msra.gmra.mrb[0].mxu1 %vm5187_vm2, %v328_v24  ;;  %3776 = vmatprep.subr.mxu0 %v5196_v10 }
  0x18   : > { %3753 = vmatmul.mubr.msk.f32.vlgmr.msra.gmra.mrb[0].mxu0 %vm5187_vm2, %v328_v24  ;;  %3768 = vmatprep.mubr.msk.f32.mxu1 %vm5188_vm0, %v5196_v10 }
  0x19   : > { %3778 = vmatprep.mubr.msk.f32.mxu0 %vm5188_vm0, %v5196_v10  ;;  %582 = vbcast.lane.b32.xlu1 %v580_v28, 256 }
  0x1a   : > { %589 = vbcast.lane.b32.xlu0 %v587_v30, 256 }
  0x1d   : > { %596 = vbcast.lane.b32.xlu1 %v594_v32, 256 }
  0x1e   : > { %603 = vbcast.lane.b32.xlu0 %v601_v34, 256 }
  0x21   : > { %610 = vbcast.lane.b32.xlu1 %v608_v35, 256 }
  0x22   : > { %617 = vbcast.lane.b32.xlu0 %v615_v36, 256 }
  0x87   : > { %v4112_v47 = vpop.permute.xlu1 %575 }
  0x88   : > { %v4114_v48 = vpop.permute.xlu0 %568  ;;  %vm5194_vm4 = vcmp.ne.s32.totalorder %v4112_v47, 0 }
  0x89   : > { %vm619_vm10 = vcmp.ne.s32.totalorder %v4114_v48, 0 }
  0x8b   : > { %v4116_v49 = vpop.permute.xlu1 %582 }
  0x8c   : > { %v4118_v50 = vpop.permute.xlu0 %589 }
  0x8f   : > { %v4120_v51 = vpop.permute.xlu1 %596 }
  0x90   : > { %v4122_v52 = vpop.permute.xlu0 %603  ;;  %vm5191_vm15 = vcmp.ne.s32.totalorder %v4120_v51, 0 }
  0x93   : > { %v4124_v53 = vpop.permute.xlu1 %610 }
  0x94   : > { %v4126_v54 = vpop.permute.xlu0 %617 }
  0xea   : > { %v491_v38 = vpop.f32.mrb[0].mxu1 }
  0xeb   : > { %v4100_v40 = vadd.f32 %v3693_v37, %v491_v38  ;;  %v3765_v41 = vpop.f32.mrb[1].mxu1  ;;  %v410_v42 = vpop.f32.mrb[0].mxu0 }
  0xec   : > { %v3754_v43 = vpop.f32.mrb[1].mxu0  ;;  %v411_v44 = vadd.f32 %v3691_v39, %v410_v42 }
  0xed   : > { %2200 = vrot.lane.b32.xlu1 %v4100_v40, %s3946_s16  ;;  %1468 = vrot.lane.b32.xlu0 %v4100_v40, %s3947_s17 }
  0xee   : > { %3767 = vmatpush3.xpose.msk.msra.mxu1 %vm5190_vm3, %v4100_v40  ;;  %v499_v45 = vmul.f32 %v411_v44, %v411_v44 }
  0xef   : > { %3771 = vmatprep.subr.mxu1 %v5196_v10 }
  0xf0   : > { %v501_v46 = vsel %vm5190_vm3, %v499_v45, 0.0 }
  0xf1   : > { %3769 = vmatmul.mubr.msk.f32.vlgmr.msra.gmra.mrb[2].mxu1 %vm5190_vm3, %v411_v44  ;;  %2198 = vrot.lane.b32.xlu1 %v411_v44, %s3946_s16 }
  0xf2   : > { %1466 = vrot.lane.b32.xlu0 %v411_v44, %s3947_s17  ;;  %3773 = vmatprep.mubr.msk.f32.mxu1 %vm5188_vm0, %v5196_v10 }
  0xf5   : > { %2930 = vrot.lane.b32.xlu1 %v411_v44, %s3948_s18 }
  0xf6   : > { %2932 = vrot.lane.b32.xlu0 %v4100_v40, %s3948_s18 }
  0xf9   : > { %2034 = vrot.lane.b32.xlu1 %v499_v45, %s3946_s16  ;;  %s3955_s16 = smov 24  }
  0xfa   : > { %1302 = vrot.lane.b32.xlu0 %v499_v45, %s3947_s17 }
  0xfe   : > { %2766 = vrot.lane.b32.xlu0 %v499_v45, %s3948_s18 }
 0x11d   : > { %502 = vadd.xlane.f32.xlu1 %v501_v46 }
 0x15f   : > { %v2201_v55 = vpop.permute.xlu1 %2200  ;;  %v1469_v56 = vpop.permute.xlu0 %1468 }
 0x160   : > { %3777 = vmatpush3.xpose.msk.msra.mxu0 %vm5190_vm3, %v1469_v56 }
 0x161   : > { %3786 = vmatprep.subr.mxu0 %v5196_v10 }
 0x163   : > { %v2199_v57 = vpop.permute.xlu1 %2198 }
 0x164   : > { %v1467_v58 = vpop.permute.xlu0 %1466 }
 0x165   : > { %3779 = vmatmul.mubr.msk.f32.vlgmr.msra.gmra.mrb[2].mxu0 %vm5190_vm3, %v1467_v58 }
 0x166   : > { %3787 = vmatpush3.xpose.msk.msra.mxu0 %vm5190_vm3, %v2201_v55  ;;  %3788 = vmatprep.mubr.msk.f32.mxu0 %vm5188_vm0, %v5196_v10 }
 0x167   : > { %3796 = vmatprep.subr.mxu0 %v5196_v10  ;;  %v2931_v59 = vpop.permute.xlu1 %2930 }
 0x168   : > { %v2933_v60 = vpop.permute.xlu0 %2932 }
 0x169   : > { %3789 = vmatmul.mubr.msk.f32.vlgmr.msra.gmra.mrb[4].mxu0 %vm5190_vm3, %v2199_v57 }
 0x16a   : > { %3797 = vmatpush3.xpose.msk.msra.mxu0 %vm5190_vm3, %v2933_v60  ;;  %3798 = vmatprep.mubr.msk.f32.mxu0 %vm5188_vm0, %v5196_v10 }
 0x16b   : > { %3829 = vmatprep.subr.bf16.mxu0 %v5195_v4  ;;  %v2035_v63 = vpop.permute.xlu1 %2034 }
 0x16c   : > { %v1303_v61 = vpop.permute.xlu0 %1302  ;;  %v2037_v1 = vsel %vm5190_vm3, %v2035_v63, 0.0 }
 0x16d   : > { %3799 = vmatmul.mubr.msk.f32.vlgmr.msra.gmra.mrb[6].mxu0 %vm5190_vm3, %v2931_v59  ;;  %v1305_v62 = vsel %vm5190_vm3, %v1303_v61, 0.0 }
 0x16e   : > { %1306 = vadd.xlane.f32.xlu0 %v1305_v62  ;;  %3814 = vmatprep.mubr.msk.f32.mxu0 %vm5188_vm0, %v5196_v10 }
 0x170   : > { %v2767_v0 = vpop.permute.xlu0 %2766 }
 0x171   : > { %v2769_v2 = vsel %vm5190_vm3, %v2767_v0, 0.0 }
 0x172   : > { %2038 = vadd.xlane.f32.xlu0 %v2037_v1  ;;  %2770 = vadd.xlane.f32.xlu1 %v2769_v2 }
 0x1aa   : > { %v503_v3 = vpop.xlane.xlu1 %502 }
 0x1ab   : > { %v512_v5 = vrot.slane %v503_v3, %v4048_v18  ;;  %v508_v6 = vrot.slane %v503_v3, %v4067_v23  ;;  %v524_v7 = vrot.slane %v503_v3, %v4072_v27  ;;  %v516_v8 = vrot.slane %v503_v3, %v4052_v19 }
 0x1ac   : > { %v532_v9 = vrot.slane %v503_v3, %v4086_v31  ;;  %v520_v12 = vrot.slane %v503_v3, %v4062_v20  ;;  %v536_v14 = vrot.slane %v503_v3, %v4089_v33  ;;  %v528_v17 = vrot.slane %v503_v3, %v4077_v29 }
 0x1ad   : > { %vm546_vm5 = vcmp.gt.f32.partialorder %v503_v3, %v512_v5  ;;  %vm554_vm6 = vcmp.eq.f32.partialorder %v503_v3, %v512_v5  ;;  %vm553_vm7 = vcmp.eq.f32.partialorder %v503_v3, %v508_v6  ;;  %vm545_vm9 = vcmp.gt.f32.partialorder %v503_v3, %v508_v6 }
 0x1ae   : > { %vm628_vm8 = vmand %vm554_vm6, %vm5194_vm4  ;;  %vm557_vm12 = vcmp.eq.f32.partialorder %v503_v3, %v524_v7  ;;  %vm549_vm14 = vcmp.gt.f32.partialorder %v503_v3, %v524_v7  ;;  %vm555_vm2 = vcmp.eq.f32.partialorder %v503_v3, %v516_v8  ;;  %vm547_vm6 = vcmp.gt.f32.partialorder %v503_v3, %v516_v8 }
 0x1af   : > { %vm636_vm11 = vmor %vm546_vm5, %vm628_vm8  ;;  %vm5192_vm8 = vcmp.ne.s32.totalorder %v4116_v49, 0  ;;  %vm559_vm0 = vcmp.eq.f32.partialorder %v503_v3, %v532_v9  ;;  %vm556_vm3 = vcmp.eq.f32.partialorder %v503_v3, %v520_v12 }
 0x1b0   : > { %v644_v11 = vsel %vm636_vm11, 1, %v3945_v16  ;;  %vm627_vm13 = vmand %vm553_vm7, %vm619_vm10 }
 0x1b1   : > { %655 = vperm.xlu0 %3858, %v644_v11   ;;  %vm635_vm1 = vmor %vm545_vm9, %vm627_vm13  ;;  %vm551_vm9 = vcmp.gt.f32.partialorder %v503_v3, %v532_v9  ;;  %vm5193_vm13 = vcmp.ne.s32.totalorder %v4124_v53, 0 }
 0x1b2   : > { %v643_v13 = vsel %vm635_vm1, 1, %v3945_v16  ;;  %vm631_vm5 = vmand %vm557_vm12, %vm5191_vm15  ;;  %vm560_vm15 = vcmp.eq.f32.partialorder %v503_v3, %v536_v14 }
 0x1b3   : > { %652 = vperm.xlu1 %3857, %v643_v13   ;;  %vm639_vm11 = vmor %vm549_vm14, %vm631_vm5  ;;  %vm548_vm14 = vcmp.gt.f32.partialorder %v503_v3, %v520_v12  ;;  %vm622_vm5 = vcmp.ne.s32.totalorder %v4118_v50, 0 }
 0x1b4   : > { %v647_v15 = vsel %vm639_vm11, 1, %v3945_v16  ;;  %vm629_vm7 = vmand %vm555_vm2, %vm5192_vm8 }
 0x1b5   : > { %664 = vperm.xlu0 %3858, %v647_v15   ;;  %vm637_vm1 = vmor %vm547_vm6, %vm629_vm7  ;;  %vm552_vm6 = vcmp.gt.f32.partialorder %v503_v3, %v536_v14  ;;  %vm626_vm7 = vcmp.ne.s32.totalorder %v4126_v54, 0 }
 0x1b6   : > { %v645_v21 = vsel %vm637_vm1, 1, %v3945_v16  ;;  %vm633_vm12 = vmand %vm559_vm0, %vm5193_vm13  ;;  %vm558_vm1 = vcmp.eq.f32.partialorder %v503_v3, %v528_v17  ;;  %vm550_vm13 = vcmp.gt.f32.partialorder %v503_v3, %v528_v17 }
 0x1b7   : > { %658 = vperm.xlu1 %3857, %v645_v21   ;;  %vm641_vm11 = vmor %vm551_vm9, %vm633_vm12  ;;  %vm624_vm9 = vcmp.ne.s32.totalorder %v4122_v52, 0 }
 0x1b8   : > { %v649_v24 = vsel %vm641_vm11, 1, %v3945_v16  ;;  %vm630_vm2 = vmand %vm556_vm3, %vm622_vm5 }
 0x1b9   : > { %670 = vperm.xlu0 %3858, %v649_v24   ;;  %vm638_vm8 = vmor %vm548_vm14, %vm630_vm2 }
 0x1ba   : > { %v646_v25 = vsel %vm638_vm8, 1, %v3945_v16  ;;  %vm634_vm0 = vmand %vm560_vm15, %vm626_vm7 }
 0x1bb   : > { %661 = vperm.xlu1 %3857, %v646_v25   ;;  %vm642_vm12 = vmor %vm552_vm6, %vm634_vm0 }
 0x1bc   : > { %v650_v26 = vsel %vm642_vm12, 1, %v3945_v16  ;;  %vm632_vm3 = vmand %vm558_vm1, %vm624_vm9 }
 0x1bd   : > { %673 = vperm.xlu0 %3858, %v650_v26   ;;  %vm640_vm11 = vmor %vm550_vm13, %vm632_vm3 }
 0x1be   : > { %v648_v28 = vsel %vm640_vm11, 1, %v3945_v16 }
 0x1bf   : > { %667 = vperm.xlu1 %3857, %v648_v28  }
 0x1c4   : > { %v807_v30 = vpop.f32.mrb[2].mxu1 }
 0x1c5   : > { %v3770_v32 = vpop.f32.mrb[3].mxu1  ;;  %v824_v34 = vrot.slane %v807_v30, %v4048_v18  ;;  %v817_v35 = vrot.slane %v807_v30, %v4067_v23  ;;  %v845_v36 = vrot.slane %v807_v30, %v4072_v27  ;;  %v831_v37 = vrot.slane %v807_v30, %v4052_v19 }
 0x1c6   : > { %v859_v38 = vrot.slane %v807_v30, %v4086_v31  ;;  %v838_v39 = vrot.slane %v807_v30, %v4062_v20  ;;  %v866_v41 = vrot.slane %v807_v30, %v4089_v33  ;;  %v852_v42 = vrot.slane %v807_v30, %v4077_v29 }
 0x1c7   : > { %826 = vbcast.lane.b32.xlu0 %v824_v34, 256  ;;  %819 = vbcast.lane.b32.xlu1 %v817_v35, 256 }
 0x1cb   : > { %847 = vbcast.lane.b32.xlu0 %v845_v36, 256  ;;  %833 = vbcast.lane.b32.xlu1 %v831_v37, 256 }
 0x1cf   : > { %861 = vbcast.lane.b32.xlu0 %v859_v38, 256  ;;  %840 = vbcast.lane.b32.xlu1 %v838_v39, 256 }
 0x1d3   : > { %868 = vbcast.lane.b32.xlu0 %v866_v41, 256  ;;  %854 = vbcast.lane.b32.xlu1 %v852_v42, 256 }
 0x1fb   : > { %v4194_v43 = vpop.xlane.xlu0 %1306 }
 0x1fc   : > { %v1312_v44 = vrot.slane %v4194_v43, %v4067_v23  ;;  %v1316_v45 = vrot.slane %v4194_v43, %v4048_v18  ;;  %v1328_v46 = vrot.slane %v4194_v43, %v4072_v27  ;;  %v1320_v55 = vrot.slane %v4194_v43, %v4052_v19 }
 0x1fd   : > { %v1324_v59 = vrot.slane %v4194_v43, %v4062_v20  ;;  %v1336_v61 = vrot.slane %v4194_v43, %v4086_v31  ;;  %v1332_v63 = vrot.slane %v4194_v43, %v4077_v29  ;;  %v1340_v1 = vrot.slane %v4194_v43, %v4089_v33 }
 0x1fe   : > { %vm1349_vm15 = vcmp.gt.f32.partialorder %v4194_v43, %v1312_v44  ;;  %vm1357_vm8 = vcmp.eq.f32.partialorder %v4194_v43, %v1312_v44  ;;  %vm1358_vm13 = vcmp.eq.f32.partialorder %v4194_v43, %v1316_v45  ;;  %vm1350_vm2 = vcmp.gt.f32.partialorder %v4194_v43, %v1316_v45 }
 0x1ff   : > { %v4207_v56 = vpop.xlane.xlu0 %2038  ;;  %vm1365_vm14 = vmand %vm1357_vm8, %vm619_vm10  ;;  %vm1361_vm1 = vcmp.eq.f32.partialorder %v4194_v43, %v1328_v46  ;;  %vm1353_vm12 = vcmp.gt.f32.partialorder %v4194_v43, %v1328_v46  ;;  %vm1359_vm11 = vcmp.eq.f32.partialorder %v4194_v43, %v1320_v55  ;;  %v4264_v9 = vpop.xlane.xlu1 %2770 }
 0x200   : > { %vm1373_vm6 = vmor %vm1349_vm15, %vm1365_vm14  ;;  %v2044_v57 = vrot.slane %v4207_v56, %v4067_v23  ;;  %vm5200_vm15 = vcmp.ne.s32.totalorder %v4120_v51, 0  ;;  %vm1351_vm14 = vcmp.gt.f32.partialorder %v4194_v43, %v1320_v55  ;;  %v2048_v3 = vrot.slane %v4207_v56, %v4048_v18 }
 0x201   : > { %v1381_v58 = vsel %vm1373_vm6, 1, %v3945_v16  ;;  %vm1366_vm0 = vmand %vm1358_vm13, %vm5194_vm4  ;;  %v2060_v6 = vrot.slane %v4207_v56, %v4072_v27  ;;  %v2052_v8 = vrot.slane %v4207_v56, %v4052_v19  ;;  %v2056_v12 = vrot.slane %v4207_v56, %v4062_v20 }
 0x202   : > { %1390 = vperm.xlu0 %3858, %v1381_v58   ;;  %vm1374_vm3 = vmor %vm1350_vm2, %vm1366_vm0  ;;  %vm2089_vm13 = vcmp.eq.f32.partialorder %v4207_v56, %v2044_v57  ;;  %vm5201_vm2 = vcmp.ne.s32.totalorder %v4116_v49, 0  ;;  %vm2081_vm4 = vcmp.gt.f32.partialorder %v4207_v56, %v2044_v57  ;;  %v2776_v14 = vrot.slane %v4264_v9, %v4067_v23 }
 0x203   : > { %v1382_v60 = vsel %vm1374_vm3, 1, %v3945_v16  ;;  %vm1369_vm8 = vmand %vm1361_vm1, %vm5200_vm15  ;;  %vm1360_vm1 = vcmp.eq.f32.partialorder %v4194_v43, %v1324_v59  ;;  %vm1352_vm15 = vcmp.gt.f32.partialorder %v4194_v43, %v1324_v59  ;;  %v2064_v17 = vrot.slane %v4207_v56, %v4077_v29 }
 0x204   : > { %1393 = vperm.xlu1 %3857, %v1382_v60   ;;  %vm1377_vm6 = vmor %vm1353_vm12, %vm1369_vm8  ;;  %v2068_v24 = vrot.slane %v4207_v56, %v4086_v31  ;;  %v2780_v26 = vrot.slane %v4264_v9, %v4048_v18  ;;  %v2072_v28 = vrot.slane %v4207_v56, %v4089_v33  ;;  %v2784_v48 = vrot.slane %v4264_v9, %v4052_v19 }
 0x205   : > { %v1385_v62 = vsel %vm1377_vm6, 1, %v3945_v16  ;;  %vm1367_vm0 = vmand %vm1359_vm11, %vm5201_vm2  ;;  %vm1363_vm11 = vcmp.eq.f32.partialorder %v4194_v43, %v1336_v61  ;;  %vm1355_vm6 = vcmp.gt.f32.partialorder %v4194_v43, %v1336_v61  ;;  %v2792_v34 = vrot.slane %v4264_v9, %v4072_v27 }
 0x206   : > { %1402 = vperm.xlu0 %3858, %v1385_v62   ;;  %vm1375_vm3 = vmor %vm1351_vm14, %vm1367_vm0  ;;  %v2788_v37 = vrot.slane %v4264_v9, %v4062_v20  ;;  %v2796_v41 = vrot.slane %v4264_v9, %v4077_v29 }
 0x207   : > { %v1383_v0 = vsel %vm1375_vm3, 1, %v3945_v16  ;;  %vm2097_vm12 = vmand %vm2089_vm13, %vm619_vm10  ;;  %vm1362_vm13 = vcmp.eq.f32.partialorder %v4194_v43, %v1332_v63  ;;  %vm1354_vm3 = vcmp.gt.f32.partialorder %v4194_v43, %v1332_v63 }
 0x208   : > { %1396 = vperm.xlu1 %3857, %v1383_v0   ;;  %vm2105_vm8 = vmor %vm2081_vm4, %vm2097_vm12  ;;  %vm5202_vm4 = vcmp.ne.s32.totalorder %v4124_v53, 0 }
 0x209   : > { %v2113_v2 = vsel %vm2105_vm8, 1, %v3945_v16  ;;  %vm1368_vm14 = vmand %vm1360_vm1, %vm622_vm5  ;;  %vm1364_vm1 = vcmp.eq.f32.partialorder %v4194_v43, %v1340_v1  ;;  %vm1356_vm8 = vcmp.gt.f32.partialorder %v4194_v43, %v1340_v1 }
 0x20a   : > { %2122 = vperm.xlu0 %3858, %v2113_v2   ;;  %vm1376_vm2 = vmor %vm1352_vm15, %vm1368_vm14 }
 0x20b   : > { %v1384_v5 = vsel %vm1376_vm2, 1, %v3945_v16  ;;  %vm1371_vm0 = vmand %vm1363_vm11, %vm5202_vm4  ;;  %vm2090_vm11 = vcmp.eq.f32.partialorder %v4207_v56, %v2048_v3  ;;  %vm2082_vm2 = vcmp.gt.f32.partialorder %v4207_v56, %v2048_v3  ;;  %vm2093_vm4 = vcmp.eq.f32.partialorder %v4207_v56, %v2060_v6 }
 0x20c   : > { %1399 = vperm.xlu1 %3857, %v1384_v5   ;;  %vm1379_vm12 = vmor %vm1355_vm6, %vm1371_vm0  ;;  %vm5203_vm0 = vcmp.ne.s32.totalorder %v4112_v47, 0 }
 0x20d   : > { %v1387_v7 = vsel %vm1379_vm12, 1, %v3945_v16  ;;  %vm1370_vm15 = vmand %vm1362_vm13, %vm624_vm9  ;;  %vm2085_vm12 = vcmp.gt.f32.partialorder %v4207_v56, %v2060_v6 }
 0x20e   : > { %1408 = vperm.xlu0 %3858, %v1387_v7   ;;  %vm1378_vm14 = vmor %vm1354_vm3, %vm1370_vm15 }
 0x20f   : > { %v1386_v11 = vsel %vm1378_vm14, 1, %v3945_v16  ;;  %vm1372_vm6 = vmand %vm1364_vm1, %vm626_vm7  ;;  %vm2091_vm1 = vcmp.eq.f32.partialorder %v4207_v56, %v2052_v8 }
 0x210   : > { %1405 = vperm.xlu1 %3857, %v1386_v11   ;;  %vm1380_vm13 = vmor %vm1356_vm8, %vm1372_vm6  ;;  %vm5204_vm8 = vcmp.ne.s32.totalorder %v4120_v51, 0  ;;  %vm2083_vm6 = vcmp.gt.f32.partialorder %v4207_v56, %v2052_v8 }
 0x211   : > { %v1388_v13 = vsel %vm1380_vm13, 1, %v3945_v16  ;;  %vm2098_vm3 = vmand %vm2090_vm11, %vm5203_vm0  ;;  %vm2092_vm11 = vcmp.eq.f32.partialorder %v4207_v56, %v2056_v12 }
 0x212   : > { %1411 = vperm.xlu0 %3858, %v1388_v13   ;;  %vm2106_vm15 = vmor %vm2082_vm2, %vm2098_vm3  ;;  %vm5205_vm2 = vcmp.ne.s32.totalorder %v4116_v49, 0  ;;  %vm2084_vm3 = vcmp.gt.f32.partialorder %v4207_v56, %v2056_v12 }
 0x213   : > { %v2114_v15 = vsel %vm2106_vm15, 1, %v3945_v16  ;;  %vm2101_vm14 = vmand %vm2093_vm4, %vm5204_vm8  ;;  %vm2821_vm4 = vcmp.eq.f32.partialorder %v4264_v9, %v2776_v14  ;;  %vm2813_vm8 = vcmp.gt.f32.partialorder %v4264_v9, %v2776_v14 }
 0x214   : > { %2125 = vperm.xlu1 %3857, %v2114_v15   ;;  %vm2109_vm13 = vmor %vm2085_vm12, %vm2101_vm14 }
 0x215   : > { %v2117_v21 = vsel %vm2109_vm13, 1, %v3945_v16  ;;  %vm2099_vm0 = vmand %vm2091_vm1, %vm5205_vm2  ;;  %vm2094_vm1 = vcmp.eq.f32.partialorder %v4207_v56, %v2064_v17  ;;  %vm2086_vm13 = vcmp.gt.f32.partialorder %v4207_v56, %v2064_v17 }
 0x216   : > { %2134 = vperm.xlu0 %3858, %v2117_v21   ;;  %vm2107_vm15 = vmor %vm2083_vm6, %vm2099_vm0  ;;  %vm2095_vm0 = vcmp.eq.f32.partialorder %v4207_v56, %v2068_v24 }
 0x217   : > { %v2115_v25 = vsel %vm2107_vm15, 1, %v3945_v16  ;;  %vm2100_vm12 = vmand %vm2092_vm11, %vm622_vm5  ;;  %vm2822_vm15 = vcmp.eq.f32.partialorder %v4264_v9, %v2780_v26 }
 0x218   : > { %2128 = vperm.xlu1 %3857, %v2115_v25   ;;  %vm2108_vm14 = vmor %vm2084_vm3, %vm2100_vm12  ;;  %vm2087_vm3 = vcmp.gt.f32.partialorder %v4207_v56, %v2068_v24 }
 0x219   : > { %vm2829_vm6 = vmand %vm2821_vm4, %vm619_vm10  ;;  %v2116_v30 = vsel %vm2108_vm14, 1, %v3945_v16  ;;  %vm5206_vm4 = vcmp.ne.s32.totalorder %v4124_v53, 0 }
 0x21a   : > { %vm2837_vm2 = vmor %vm2813_vm8, %vm2829_vm6  ;;  %vm2814_vm8 = vcmp.gt.f32.partialorder %v4264_v9, %v2780_v26  ;;  %vm2096_vm6 = vcmp.eq.f32.partialorder %v4207_v56, %v2072_v28 }
 0x21b   : > { %v2845_v32 = vsel %vm2837_vm2, 1, %v3945_v16  ;;  %vm2102_vm11 = vmand %vm2094_vm1, %vm624_vm9  ;;  %vm5207_vm1 = vcmp.ne.s32.totalorder %v4112_v47, 0  ;;  %vm2088_vm2 = vcmp.gt.f32.partialorder %v4207_v56, %v2072_v28  ;;  %v2800_v47 = vrot.slane %v4264_v9, %v4086_v31 }
 0x21c   : > { %2131 = vperm.xlu1 %3857, %v2116_v30   ;;  %2854 = vperm.xlu0 %3858, %v2845_v32   ;;  %vm2110_vm10 = vmor %vm2086_vm13, %vm2102_vm11  ;;  %vm2823_vm11 = vcmp.eq.f32.partialorder %v4264_v9, %v2784_v48 }
 0x21d   : > { %vm2103_vm12 = vmand %vm2095_vm0, %vm5206_vm4  ;;  %v2118_v35 = vsel %vm2110_vm10, 1, %v3945_v16  ;;  %vm2815_vm10 = vcmp.gt.f32.partialorder %v4264_v9, %v2784_v48 }
 0x21e   : > { %vm2111_vm14 = vmor %vm2087_vm3, %vm2103_vm12  ;;  %vm2825_vm12 = vcmp.eq.f32.partialorder %v4264_v9, %v2792_v34 }
 0x21f   : > { %v2119_v36 = vsel %vm2111_vm14, 1, %v3945_v16  ;;  %vm2830_vm13 = vmand %vm2822_vm15, %vm5207_vm1  ;;  %vm5208_vm15 = vcmp.ne.s32.totalorder %v4116_v49, 0  ;;  %vm2817_vm14 = vcmp.gt.f32.partialorder %v4264_v9, %v2792_v34  ;;  %vm2824_vm1 = vcmp.eq.f32.partialorder %v4264_v9, %v2788_v37 }
 0x220   : > { %2137 = vperm.xlu1 %3857, %v2118_v35   ;;  %2140 = vperm.xlu0 %3858, %v2119_v36   ;;  %vm2838_vm0 = vmor %vm2814_vm8, %vm2830_vm13  ;;  %vm5209_vm13 = vcmp.ne.s32.totalorder %v4120_v51, 0  ;;  %v2804_v49 = vrot.slane %v4264_v9, %v4089_v33 }
 0x221   : > { %vm2104_vm3 = vmand %vm2096_vm6, %vm626_vm7  ;;  %v2846_v38 = vsel %vm2838_vm0, 1, %v3945_v16  ;;  %vm2816_vm0 = vcmp.gt.f32.partialorder %v4264_v9, %v2788_v37 }
 0x222   : > { %vm2112_vm4 = vmor %vm2088_vm2, %vm2104_vm3 }
 0x223   : > { %v2120_v39 = vsel %vm2112_vm4, 1, %v3945_v16  ;;  %vm2831_vm8 = vmand %vm2823_vm11, %vm5208_vm15  ;;  %vm2827_vm4 = vcmp.eq.f32.partialorder %v4264_v9, %v2800_v47  ;;  %vm2826_vm15 = vcmp.eq.f32.partialorder %v4264_v9, %v2796_v41 }
 0x224   : > { %2857 = vperm.xlu1 %3857, %v2846_v38   ;;  %2143 = vperm.xlu0 %3858, %v2120_v39   ;;  %vm2839_vm6 = vmor %vm2815_vm10, %vm2831_vm8  ;;  %vm2819_vm10 = vcmp.gt.f32.partialorder %v4264_v9, %v2800_v47  ;;  %vm5210_vm8 = vcmp.ne.s32.totalorder %v4124_v53, 0 }
 0x225   : > { %vm2833_vm2 = vmand %vm2825_vm12, %vm5209_vm13  ;;  %v2847_v42 = vsel %vm2839_vm6, 1, %v3945_v16  ;;  %vm2818_vm13 = vcmp.gt.f32.partialorder %v4264_v9, %v2796_v41  ;;  %vm2828_vm6 = vcmp.eq.f32.partialorder %v4264_v9, %v2804_v49 }
 0x226   : > { %vm2841_vm3 = vmor %vm2817_vm14, %vm2833_vm2 }
 0x227   : > { %v2849_v43 = vsel %vm2841_vm3, 1, %v3945_v16  ;;  %vm2832_vm11 = vmand %vm2824_vm1, %vm622_vm5 }
 0x228   : > { %2860 = vperm.xlu1 %3857, %v2847_v42   ;;  %2866 = vperm.xlu0 %3858, %v2849_v43   ;;  %vm2840_vm12 = vmor %vm2816_vm0, %vm2832_vm11  ;;  %vm2820_vm0 = vcmp.gt.f32.partialorder %v4264_v9, %v2804_v49  ;;  %vm711_vm11 = vcmask 1043459  }
 0x229   : > { %vm2835_vm14 = vmand %vm2827_vm4, %vm5210_vm8  ;;  %v2848_v51 = vsel %vm2840_vm12, 1, %v3945_v16  ;;  %vm715_vm12 = vcmask 1045509   ;;  %vm719_vm8 = vcmask 1047559  }
 0x22a   : > { %vm2843_vm2 = vmor %vm2819_vm10, %vm2835_vm14  ;;  %vm713_vm10 = vcmask 1044484   ;;  %vm5211_vm14 = vcmask 64512  }
 0x22b   : > { %v2851_v50 = vsel %vm2843_vm2, 1, %v3945_v16  ;;  %vm2834_vm5 = vmand %vm2826_vm15, %vm624_vm9  ;;  %vm707_vm9 = vcmask 1041409   ;;  %vm717_vm15 = vcmask 1046534  }
 0x22c   : > { %2863 = vperm.xlu1 %3857, %v2848_v51   ;;  %2872 = vperm.xlu0 %3858, %v2851_v50   ;;  %vm2842_vm1 = vmor %vm2818_vm13, %vm2834_vm5 }
 0x22d   : > { %vm2836_vm3 = vmand %vm2828_vm6, %vm626_vm7  ;;  %v2850_v53 = vsel %vm2842_vm1, 1, %v3945_v16  ;;  %vm709_vm7 = vcmask 1042434  }
 0x22e   : > { %vm2844_vm4 = vmor %vm2820_vm0, %vm2836_vm3 }
 0x22f   : > { %v2852_v46 = vsel %vm2844_vm4, 1, %v3945_v16  ;;  %vm5212_vm13 = vmmov %vm5211_vm14 }
 0x230   : > { %2869 = vperm.xlu1 %3857, %v2850_v53   ;;  %v656_v44 = vpop.permute.xlu0 %655  ;;  %vm5213_vm2 = vmmov %vm5212_vm13 }
 0x231   : > { %v682_v56 = vrot.slane %v656_v44, %v4065_v22  ;;  %vm5214_vm6 = vmmov %vm5213_vm2 }
 0x232   : > { %v653_v45 = vpop.permute.xlu1 %652  ;;  %vm5217_vm4 = vmmov %vm5213_vm2 }
 0x233   : > { %v678_v57 = vrot.slane %v653_v45, %v4065_v22 }
 0x234   : > { %2875 = vperm.xlu1 %3857, %v2852_v46   ;;  %v665_v55 = vpop.permute.xlu0 %664 }
 0x235   : > { %v708_v62 = vsel %vm707_vm9, %v682_v56, %v678_v57  ;;  %v694_v3 = vrot.slane %v665_v55, %v4065_v22 }
 0x236   : > { %v659_v52 = vpop.permute.xlu1 %658 }
 0x237   : > { %v686_v58 = vrot.slane %v659_v52, %v4065_v22 }
 0x238   : > { %v1540_v54 = vpop.f32.mrb[2].mxu0  ;;  %v671_v59 = vpop.permute.xlu0 %670 }
 0x239   : > { %v3780_v60 = vpop.f32.mrb[3].mxu0  ;;  %v710_v63 = vsel %vm709_vm7, %v686_v58, %v708_v62  ;;  %v702_v8 = vrot.slane %v671_v59, %v4065_v22  ;;  %v1550_v30 = vrot.slane %v1540_v54, %v4067_v23  ;;  %v1578_v32 = vrot.slane %v1540_v54, %v4072_v27 }
 0x23a   : > { %v662_v61 = vpop.permute.xlu1 %661  ;;  %v1557_v48 = vrot.slane %v1540_v54, %v4048_v18  ;;  %v1592_v34 = vrot.slane %v1540_v54, %v4086_v31  ;;  %v1564_v36 = vrot.slane %v1540_v54, %v4052_v19  ;;  %v1599_v37 = vrot.slane %v1540_v54, %v4089_v33 }
 0x23b   : > { %v690_v16 = vrot.slane %v662_v61, %v4065_v22  ;;  %v1571_v38 = vrot.slane %v1540_v54, %v4062_v20  ;;  %v1585_v42 = vrot.slane %v1540_v54, %v4077_v29 }
 0x23c   : > { %v4374_v0 = vpop.f32.mrb[4].mxu0  ;;  %v674_v5 = vpop.permute.xlu0 %673 }
 0x23d   : > { %v712_v1 = vsel %vm711_vm11, %v690_v16, %v710_v63  ;;  %v3790_v2 = vpop.f32.mrb[5].mxu0  ;;  %v706_v12 = vrot.slane %v674_v5, %v4065_v22  ;;  %v2282_v39 = vrot.slane %v4374_v0, %v4067_v23  ;;  %v2310_v43 = vrot.slane %v4374_v0, %v4072_v27 }
 0x23e   : > { %v668_v6 = vpop.permute.xlu1 %667  ;;  %v714_v9 = vsel %vm713_vm10, %v694_v3, %v712_v1  ;;  %v2289_v50 = vrot.slane %v4374_v0, %v4048_v18  ;;  %v2324_v53 = vrot.slane %v4374_v0, %v4086_v31  ;;  %v2296_v45 = vrot.slane %v4374_v0, %v4052_v19 }
 0x23f   : > { %v698_v7 = vrot.slane %v668_v6, %v4065_v22  ;;  %v2331_v46 = vrot.slane %v4374_v0, %v4089_v33  ;;  %v2303_v56 = vrot.slane %v4374_v0, %v4062_v20  ;;  %v2317_v59 = vrot.slane %v4374_v0, %v4077_v29 }
 0x240   : > { %v4381_v11 = vpop.f32.mrb[6].mxu0  ;;  %v4392_v35 = vpop.permute.xlu0 %826 }
 0x241   : > { %v716_v13 = vsel %vm715_vm12, %v698_v7, %v714_v9  ;;  %v3800_v14 = vpop.f32.mrb[7].mxu0  ;;  %v3014_v57 = vrot.slane %v4381_v11, %v4067_v23  ;;  %v3042_v60 = vrot.slane %v4381_v11, %v4072_v27  ;;  %v3021_v16 = vrot.slane %v4381_v11, %v4048_v18 }
 0x242   : > { %v718_v15 = vsel %vm717_vm15, %v702_v8, %v716_v13  ;;  %v4396_v47 = vpop.permute.xlu1 %819  ;;  %v3056_v63 = vrot.slane %v4381_v11, %v4086_v31  ;;  %v3028_v0 = vrot.slane %v4381_v11, %v4052_v19  ;;  %v3035_v9 = vrot.slane %v4381_v11, %v4062_v20 }
 0x243   : > { %v720_v17 = vsel %vm719_vm8, %v706_v12, %v718_v15 }
 0x244   : > { %v721_v21 = vsel %vm5211_vm14, %v720_v17, 0  ;;  %v4401_v41 = vpop.permute.xlu0 %847  ;;  %vm5218_vm14 = vmmov %vm5213_vm2 }
 0x245   : > { %v723_v24 = vshrl.u32 %v721_v21, 16  ;;  %v722_v26 = vand.u32 65535, %v721_v21  ;;  %v3049_v21 = vrot.slane %v4381_v11, %v4077_v29 }
 0x246   : > { %v4403_v49 = vpop.permute.xlu1 %833 }
 0x247   : > { %v725_v25 = vcvt.s32.f32 %v723_v24  ;;  %v724_v28 = vcvt.s32.f32 %v722_v26 }
 0x248   : > { %v4408_v51 = vpop.permute.xlu0 %861 }
 0x24a   : > { %v4414_v44 = vpop.permute.xlu1 %840 }
 0x24b   : > { %728 = vadd.xlane.f32.xlu0 %v725_v25 }
 0x24c   : > { %v4420_v55 = vpop.permute.xlu0 %868 }
 0x24e   : > { %v4422_v52 = vpop.permute.xlu1 %854 }
 0x258   : > { %726 = vadd.xlane.f32.xlu1 %v724_v28 }
 0x261   : > { %1552 = vbcast.lane.b32.xlu0 %v1550_v30, 256 }
 0x265   : > { %1580 = vbcast.lane.b32.xlu0 %v1578_v32, 256 }
 0x269   : > { %1559 = vbcast.lane.b32.xlu1 %v1557_v48, 256  ;;  %1594 = vbcast.lane.b32.xlu0 %v1592_v34, 256  ;;  %v3063_v34 = vrot.slane %v4381_v11, %v4089_v33 }
 0x26d   : > { %1566 = vbcast.lane.b32.xlu1 %v1564_v36, 256  ;;  %1601 = vbcast.lane.b32.xlu0 %v1599_v37, 256 }
 0x271   : > { %1573 = vbcast.lane.b32.xlu1 %v1571_v38, 256  ;;  %2284 = vbcast.lane.b32.xlu0 %v2282_v39, 256 }
 0x275   : > { %1587 = vbcast.lane.b32.xlu1 %v1585_v42, 256  ;;  %2312 = vbcast.lane.b32.xlu0 %v2310_v43, 256 }
 0x279   : > { %2291 = vbcast.lane.b32.xlu1 %v2289_v50, 256  ;;  %2326 = vbcast.lane.b32.xlu0 %v2324_v53, 256 }
 0x27d   : > { %2298 = vbcast.lane.b32.xlu1 %v2296_v45, 256  ;;  %2333 = vbcast.lane.b32.xlu0 %v2331_v46, 256 }
 0x281   : > { %2305 = vbcast.lane.b32.xlu1 %v2303_v56, 256  ;;  %3016 = vbcast.lane.b32.xlu0 %v3014_v57, 256  ;;  %v1391_v58 = vpop.permute.xlu0 %1390 }
 0x282   : > { %v1416_v5 = vrot.slane %v1391_v58, %v4065_v22 }
 0x283   : > { %v1394_v54 = vpop.permute.xlu1 %1393 }
 0x284   : > { %v1420_v6 = vrot.slane %v1394_v54, %v4065_v22 }
 0x285   : > { %2319 = vbcast.lane.b32.xlu1 %v2317_v59, 256  ;;  %3044 = vbcast.lane.b32.xlu0 %v3042_v60, 256  ;;  %v1403_v61 = vpop.permute.xlu0 %1402 }
 0x286   : > { %v1445_v14 = vsel %vm707_vm9, %v1420_v6, %v1416_v5  ;;  %v1432_v26 = vrot.slane %v1403_v61, %v4065_v22 }
 0x287   : > { %v1397_v62 = vpop.permute.xlu1 %1396 }
 0x288   : > { %v1424_v7 = vrot.slane %v1397_v62, %v4065_v22 }
 0x289   : > { %3023 = vbcast.lane.b32.xlu1 %v3021_v16, 256  ;;  %3058 = vbcast.lane.b32.xlu0 %v3056_v63, 256  ;;  %v2123_v1 = vpop.permute.xlu0 %2122 }
 0x28a   : > { %v1446_v15 = vsel %vm709_vm7, %v1424_v7, %v1445_v14  ;;  %v2148_v42 = vrot.slane %v2123_v1, %v4065_v22 }
 0x28b   : > { %v1400_v2 = vpop.permute.xlu1 %1399 }
 0x28c   : > { %v1428_v12 = vrot.slane %v1400_v2, %v4065_v22 }
 0x28d   : > { %3030 = vbcast.lane.b32.xlu1 %v3028_v0, 256  ;;  %v1409_v3 = vpop.permute.xlu0 %1408 }
 0x28e   : > { %v1447_v24 = vsel %vm711_vm11, %v1428_v12, %v1446_v15  ;;  %v1440_v30 = vrot.slane %v1409_v3, %v4065_v22 }
 0x28f   : > { %v1406_v8 = vpop.permute.xlu1 %1405  ;;  %v1448_v32 = vsel %vm713_vm10, %v1432_v26, %v1447_v24 }
 0x290   : > { %v1436_v25 = vrot.slane %v1406_v8, %v4065_v22 }
 0x291   : > { %3037 = vbcast.lane.b32.xlu1 %v3035_v9, 256  ;;  %v1412_v13 = vpop.permute.xlu0 %1411 }
 0x292   : > { %v1449_v36 = vsel %vm715_vm12, %v1436_v25, %v1448_v32  ;;  %v1444_v37 = vrot.slane %v1412_v13, %v4065_v22 }
 0x293   : > { %v2126_v17 = vpop.permute.xlu1 %2125  ;;  %v1450_v53 = vsel %vm717_vm15, %v1440_v30, %v1449_v36 }
 0x294   : > { %v2152_v38 = vrot.slane %v2126_v17, %v4065_v22  ;;  %v1451_v11 = vsel %vm719_vm8, %v1444_v37, %v1450_v53 }
 0x295   : > { %3051 = vbcast.lane.b32.xlu1 %v3049_v21, 256  ;;  %v2135_v28 = vpop.permute.xlu0 %2134  ;;  %v1452_v60 = vsel %vm5212_vm13, %v1451_v11, 0  ;;  %vm5219_vm13 = vmmov %vm5213_vm2 }
 0x296   : > { %v2177_v45 = vsel %vm707_vm9, %v2152_v38, %v2148_v42  ;;  %v2164_v58 = vrot.slane %v2135_v28, %v4065_v22  ;;  %v1454_v1 = vshrl.u32 %v1452_v60, 16  ;;  %v1453_v7 = vand.u32 65535, %v1452_v60 }
 0x297   : > { %v2129_v48 = vpop.permute.xlu1 %2128 }
 0x298   : > { %v2156_v39 = vrot.slane %v2129_v48, %v4065_v22  ;;  %v1456_v6 = vcvt.s32.f32 %v1454_v1  ;;  %v1455_v21 = vcvt.s32.f32 %v1453_v7 }
 0x299   : > { %3065 = vbcast.lane.b32.xlu1 %v3063_v34, 256 }
 0x29a   : > { %v2178_v56 = vsel %vm709_vm7, %v2156_v39, %v2177_v45 }
 0x29b   : > { %v2855_v43 = vpop.permute.xlu0 %2854  ;;  %v2132_v50 = vpop.permute.xlu1 %2131 }
 0x29c   : > { %v2160_v46 = vrot.slane %v2132_v50, %v4065_v22  ;;  %v2880_v15 = vrot.slane %v2855_v43, %v4065_v22 }
 0x29e   : > { %v2179_v57 = vsel %vm711_vm11, %v2160_v46, %v2178_v56 }
 0x29f   : > { %v2141_v54 = vpop.permute.xlu0 %2140  ;;  %v2138_v59 = vpop.permute.xlu1 %2137  ;;  %v2180_v16 = vsel %vm713_vm10, %v2164_v58, %v2179_v57 }
 0x2a0   : > { %v2168_v61 = vrot.slane %v2138_v59, %v4065_v22  ;;  %v2172_v62 = vrot.slane %v2141_v54, %v4065_v22 }
 0x2a2   : > { %v2181_v63 = vsel %vm715_vm12, %v2168_v61, %v2180_v16 }
 0x2a3   : > { %v2144_v2 = vpop.permute.xlu0 %2143  ;;  %v2858_v0 = vpop.permute.xlu1 %2857  ;;  %v2182_v5 = vsel %vm717_vm15, %v2172_v62, %v2181_v63 }
 0x2a4   : > { %v2176_v3 = vrot.slane %v2144_v2, %v4065_v22  ;;  %v2884_v13 = vrot.slane %v2858_v0, %v4065_v22 }
 0x2a6   : > { %v2183_v8 = vsel %vm719_vm8, %v2176_v3, %v2182_v5  ;;  %v2909_v26 = vsel %vm707_vm9, %v2884_v13, %v2880_v15 }
 0x2a7   : > { %v2861_v9 = vpop.permute.xlu1 %2860  ;;  %v2184_v12 = vsel %vm5213_vm2, %v2183_v8, 0  ;;  %v2867_v17 = vpop.permute.xlu0 %2866 }
 0x2a8   : > { %1459 = vadd.xlane.f32.xlu0 %v1456_v6  ;;  %v2888_v14 = vrot.slane %v2861_v9, %v4065_v22  ;;  %v2185_v24 = vand.u32 65535, %v2184_v12  ;;  %v2896_v34 = vrot.slane %v2867_v17, %v4065_v22  ;;  %v2186_v56 = vshrl.u32 %v2184_v12, 16 }
 0x2aa   : > { %v2910_v30 = vsel %vm709_vm7, %v2888_v14, %v2909_v26  ;;  %v2187_v48 = vcvt.s32.f32 %v2185_v24  ;;  %v2188_v54 = vcvt.s32.f32 %v2186_v56 }
 0x2ab   : > { %v2864_v25 = vpop.permute.xlu1 %2863  ;;  %v2873_v37 = vpop.permute.xlu0 %2872 }
 0x2ac   : > { %v2892_v28 = vrot.slane %v2864_v25, %v4065_v22  ;;  %1457 = vadd.xlane.f32.xlu0 %v1455_v21  ;;  %v2904_v43 = vrot.slane %v2873_v37, %v4065_v22 }
 0x2ae   : > { %v2911_v32 = vsel %vm711_vm11, %v2892_v28, %v2910_v30 }
 0x2af   : > { %v2870_v36 = vpop.permute.xlu1 %2869  ;;  %v2912_v39 = vsel %vm713_vm10, %v2896_v34, %v2911_v32 }
 0x2b0   : > { %v2900_v38 = vrot.slane %v2870_v36, %v4065_v22  ;;  %2189 = vadd.xlane.f32.xlu0 %v2187_v48 }
 0x2b2   : > { %v2913_v42 = vsel %vm715_vm12, %v2900_v38, %v2912_v39 }
 0x2b3   : > { %v2876_v50 = vpop.permute.xlu1 %2875  ;;  %v2914_v45 = vsel %vm717_vm15, %v2904_v43, %v2913_v42 }
 0x2b4   : > { %v2908_v53 = vrot.slane %v2876_v50, %v4065_v22 }
 0x2b6   : > { %v2915_v46 = vsel %vm719_vm8, %v2908_v53, %v2914_v45 }
 0x2b7   : > { %v2916_v11 = vsel %vm5214_vm6, %v2915_v46, 0  ;;  %vm5220_vm6 = vmmov %vm5213_vm2 }
 0x2b8   : > { %v2917_v57 = vand.u32 65535, %v2916_v11  ;;  %v2918_v59 = vshrl.u32 %v2916_v11, 16 }
 0x2ba   : > { %v2919_v58 = vcvt.s32.f32 %v2917_v57  ;;  %v2920_v60 = vcvt.s32.f32 %v2918_v59 }
 0x2bc   : > { %2921 = vadd.xlane.f32.xlu0 %v2919_v58 }
 0x2bd   : > { %2191 = vadd.xlane.f32.xlu1 %v2188_v54 }
 0x2c1   : > { %2923 = vadd.xlane.f32.xlu1 %v2920_v60 }
 0x2d8   : > { %v729_v61 = vpop.xlane.xlu0 %728 }
 0x2d9   : > { %v731_v62 = vcvt.f32.s32 %v729_v61 }
 0x2db   : > { %v732_v63 = vshll.u32 %v731_v62, 16 }
 0x2e5   : > { %v727_v16 = vpop.xlane.xlu1 %726 }
 0x2e6   : > { %v730_v1 = vcvt.f32.s32 %v727_v16 }
 0x2e8   : > { %v4492_v2 = vadd.s32 %v732_v63, %v730_v1 }
 0x2ea   : > { %5215 = vst [vmem:[#allocation2_spill] sm:$0xff] %v4492_v2  ;;  %vm734_vm5 = vcmp.lt.s32.totalorder %v4492_v2, 4 }
 0x2eb   : > { %v4498_v0 = vsel %vm734_vm5, %v4392_v35, -1e+30  ;;  %v4503_v3 = vsel %vm734_vm5, %v4396_v47, -1e+30  ;;  %v4510_v5 = vsel %vm734_vm5, %v4414_v44, -1e+30 }
 0x2ec   : > { %898 = vperm.xlu1 %3857, %v4498_v0   ;;  %895 = vperm.xlu0 %3858, %v4503_v3   ;;  %v4515_v6 = vsel %vm734_vm5, %v4403_v49, -1e+30  ;;  %v4522_v35 = vsel %vm734_vm5, %v4422_v52, -1e+30  ;;  %v4527_v47 = vsel %vm734_vm5, %v4401_v41, -1e+30  ;;  %v1553_v49 = vpop.permute.xlu0 %1552  ;;  %v1560_v41 = vpop.permute.xlu1 %1559 }
 0x2ed   : > { %v4534_v44 = vsel %vm734_vm5, %v4408_v51, -1e+30  ;;  %v4540_v52 = vsel %vm734_vm5, %v4420_v55, -1e+30 }
 0x2f0   : > { %904 = vperm.xlu1 %3857, %v4510_v5   ;;  %901 = vperm.xlu0 %3858, %v4515_v6   ;;  %v1581_v7 = vpop.permute.xlu0 %1580  ;;  %v1567_v9 = vpop.permute.xlu1 %1566 }
 0x2f4   : > { %910 = vperm.xlu1 %3857, %v4522_v35   ;;  %907 = vperm.xlu0 %3858, %v4527_v47   ;;  %v1595_v8 = vpop.permute.xlu0 %1594  ;;  %v1574_v13 = vpop.permute.xlu1 %1573 }
 0x2f8   : > { %913 = vperm.xlu0 %3858, %v4534_v44   ;;  %v1602_v12 = vpop.permute.xlu0 %1601  ;;  %v1588_v15 = vpop.permute.xlu1 %1587 }
 0x2fc   : > { %916 = vperm.xlu0 %3858, %v4540_v52   ;;  %v2285_v14 = vpop.permute.xlu0 %2284  ;;  %v2292_v51 = vpop.permute.xlu1 %2291 }
 0x300   : > { %v2313_v17 = vpop.permute.xlu0 %2312  ;;  %v2299_v24 = vpop.permute.xlu1 %2298 }
 0x304   : > { %v4543_v21 = vpop.permute.xlu0 %2326  ;;  %v2306_v26 = vpop.permute.xlu1 %2305 }
 0x308   : > { %v4545_v25 = vpop.permute.xlu0 %2333  ;;  %v2320_v55 = vpop.permute.xlu1 %2319 }
 0x30c   : > { %v3017_v28 = vpop.permute.xlu0 %3016  ;;  %v3024_v32 = vpop.permute.xlu1 %3023 }
 0x310   : > { %v4547_v30 = vpop.permute.xlu0 %3044  ;;  %v3031_v34 = vpop.permute.xlu1 %3030 }
 0x314   : > { %v4549_v48 = vpop.permute.xlu0 %3058  ;;  %v3038_v39 = vpop.permute.xlu1 %3037 }
 0x318   : > { %v3052_v46 = vpop.permute.xlu1 %3051 }
 0x31c   : > { %v3066_v57 = vpop.permute.xlu1 %3065 }
 0x335   : > { %v1460_v36 = vpop.xlane.xlu0 %1459 }
 0x336   : > { %v1462_v37 = vcvt.f32.s32 %v1460_v36 }
 0x338   : > { %v1463_v42 = vshll.u32 %v1462_v37, 16 }
 0x339   : > { %v1458_v38 = vpop.xlane.xlu0 %1457 }
 0x33a   : > { %v1461_v43 = vcvt.f32.s32 %v1458_v38 }
 0x33c   : > { %v4551_v50 = vadd.s32 %v1463_v42, %v1461_v43 }
 0x33d   : > { %v2190_v54 = vpop.xlane.xlu0 %2189 }
 0x33e   : > { %vm1465_vm1 = vcmp.lt.s32.totalorder %v4551_v50, 4  ;;  %v2193_v62 = vcvt.f32.s32 %v2190_v54 }
 0x33f   : > { %v4556_v53 = vsel %vm1465_vm1, %v1560_v41, -1e+30  ;;  %v4560_v45 = vsel %vm1465_vm1, %v1553_v49, -1e+30  ;;  %v4566_v11 = vsel %vm1465_vm1, %v1567_v9, -1e+30 }
 0x340   : > { %1631 = vperm.xlu1 %3857, %v4556_v53   ;;  %1628 = vperm.xlu0 %3858, %v4560_v45   ;;  %v4570_v56 = vsel %vm1465_vm1, %v1581_v7, -1e+30  ;;  %v4576_v58 = vsel %vm1465_vm1, %v1574_v13, -1e+30  ;;  %v4581_v61 = vsel %vm1465_vm1, %v1588_v15, -1e+30 }
 0x341   : > { %v4603_v15 = vsel %vm1465_vm1, %v1595_v8, -1e+30  ;;  %v4613_v37 = vsel %vm1465_vm1, %v1602_v12, -1e+30 }
 0x344   : > { %1634 = vperm.xlu1 %3857, %v4566_v11   ;;  %1640 = vperm.xlu0 %3858, %v4570_v56  }
 0x348   : > { %1637 = vperm.xlu1 %3857, %v4576_v58  }
 0x349   : > { %v2922_v9 = vpop.xlane.xlu0 %2921 }
 0x34a   : > { %v2192_v59 = vpop.xlane.xlu1 %2191 }
 0x34b   : > { %v2194_v60 = vcvt.f32.s32 %v2192_v59 }
 0x34c   : > { %1643 = vperm.xlu1 %3857, %v4581_v61  }
 0x34d   : > { %v2195_v16 = vshll.u32 %v2194_v60, 16 }
 0x34e   : > { %v2924_v1 = vpop.xlane.xlu1 %2923 }
 0x34f   : > { %v4584_v63 = vadd.s32 %v2195_v16, %v2193_v62  ;;  %v2926_v41 = vcvt.f32.s32 %v2924_v1 }
 0x351   : > { %vm2197_vm0 = vcmp.lt.s32.totalorder %v4584_v63, 4 }
 0x352   : > { %v4589_v49 = vsel %vm2197_vm0, %v2292_v51, -1e+30  ;;  %v4593_v7 = vsel %vm2197_vm0, %v2285_v14, -1e+30  ;;  %v4599_v13 = vsel %vm2197_vm0, %v2299_v24, -1e+30  ;;  %v2925_v14 = vcvt.f32.s32 %v2922_v9 }
 0x353   : > { %2363 = vperm.xlu1 %3857, %v4589_v49   ;;  %2360 = vperm.xlu0 %3858, %v4593_v7   ;;  %v2927_v51 = vshll.u32 %v2926_v41, 16  ;;  %v4609_v36 = vsel %vm2197_vm0, %v2306_v26, -1e+30  ;;  %v4621_v8 = vsel %vm2197_vm0, %v2320_v55, -1e+30 }
 0x354   : > { %v4625_v38 = vsel %vm2197_vm0, %v2313_v17, -1e+30  ;;  %v4647_v55 = vsel %vm2197_vm0, %v4543_v21, -1e+30 }
 0x355   : > { %v4615_v24 = vadd.s32 %v2927_v51, %v2925_v14 }
 0x357   : > { %2366 = vperm.xlu1 %3857, %v4599_v13   ;;  %1646 = vperm.xlu0 %3858, %v4603_v15   ;;  %5216 = vst [vmem:[#allocation3_spill] sm:$0xff] %v4615_v24  ;;  %vm2929_vm3 = vcmp.lt.s32.totalorder %v4615_v24, 4 }
 0x358   : > { %v4632_v12 = vsel %vm2929_vm3, %v3024_v32, -1e+30  ;;  %v4636_v26 = vsel %vm2929_vm3, %v3017_v28, -1e+30  ;;  %v4642_v17 = vsel %vm2929_vm3, %v3031_v34, -1e+30 }
 0x359   : > { %v4653_v28 = vsel %vm2929_vm3, %v3038_v39, -1e+30  ;;  %v4658_v32 = vsel %vm2197_vm0, %v4545_v25, -1e+30  ;;  %v4664_v21 = vsel %vm2929_vm3, %v3052_v46, -1e+30 }
 0x35a   : > { %v4669_v34 = vsel %vm2929_vm3, %v4547_v30, -1e+30  ;;  %v4675_v25 = vsel %vm2929_vm3, %v3066_v57, -1e+30  ;;  %v4680_v42 = vsel %vm2929_vm3, %v4549_v48, -1e+30 }
 0x35b   : > { %2369 = vperm.xlu1 %3857, %v4609_v36   ;;  %1649 = vperm.xlu0 %3858, %v4613_v37  }
 0x35f   : > { %2375 = vperm.xlu1 %3857, %v4621_v8   ;;  %2372 = vperm.xlu0 %3858, %v4625_v38  }
 0x363   : > { %3095 = vperm.xlu1 %3857, %v4632_v12   ;;  %3092 = vperm.xlu0 %3858, %v4636_v26  }
 0x367   : > { %3098 = vperm.xlu1 %3857, %v4642_v17   ;;  %2378 = vperm.xlu0 %3858, %v4647_v55  }
 0x36b   : > { %3101 = vperm.xlu1 %3857, %v4653_v28   ;;  %2381 = vperm.xlu0 %3858, %v4658_v32   ;;  %v896_v39 = vpop.permute.xlu0 %895  ;;  %v899_v43 = vpop.permute.xlu1 %898 }
 0x36c   : > { %v925_v59 = vrot.slane %v899_v43, %v4065_v22  ;;  %v921_v60 = vrot.slane %v896_v39, %v4065_v22 }
 0x36e   : > { %v950_v16 = vsel %vm707_vm9, %v925_v59, %v921_v60 }
 0x36f   : > { %3107 = vperm.xlu1 %3857, %v4664_v21   ;;  %3104 = vperm.xlu0 %3858, %v4669_v34   ;;  %v902_v30 = vpop.permute.xlu0 %901  ;;  %v905_v54 = vpop.permute.xlu1 %904 }
 0x370   : > { %v929_v57 = vrot.slane %v902_v30, %v4065_v22  ;;  %v933_v48 = vrot.slane %v905_v54, %v4065_v22 }
 0x372   : > { %v951_v1 = vsel %vm709_vm7, %v929_v57, %v950_v16 }
 0x373   : > { %3113 = vperm.xlu1 %3857, %v4675_v25   ;;  %3110 = vperm.xlu0 %3858, %v4680_v42   ;;  %v908_v46 = vpop.permute.xlu0 %907  ;;  %v911_v41 = vpop.permute.xlu1 %910  ;;  %v952_v4 = vsel %vm711_vm11, %v933_v48, %v951_v1 }
 0x374   : > { %v937_v9 = vrot.slane %v908_v46, %v4065_v22  ;;  %v941_v14 = vrot.slane %v911_v41, %v4065_v22 }
 0x376   : > { %v953_v43 = vsel %vm713_vm10, %v937_v9, %v952_v4 }
 0x377   : > { %v914_v62 = vpop.permute.xlu0 %913  ;;  %v954_v59 = vsel %vm715_vm12, %v941_v14, %v953_v43 }
 0x378   : > { %v945_v39 = vrot.slane %v914_v62, %v4065_v22 }
 0x37a   : > { %v955_v54 = vsel %vm717_vm15, %v945_v39, %v954_v59 }
 0x37b   : > { %v917_v51 = vpop.permute.xlu0 %916 }
 0x37c   : > { %v949_v30 = vrot.slane %v917_v51, %v4065_v22 }
 0x37e   : > { %v956_v60 = vsel %vm719_vm8, %v949_v30, %v955_v54 }
 0x37f   : > { %v958_v57 = vsel %vm5217_vm4, %v956_v60, -inf  ;;  %vm5221_vm4 = vmmov %vm5213_vm2 }
 0x392   : > { %959 = vmax.xlane.f32.xlu0 %v958_v57 }
 0x3bf   : > { %v1632_v46 = vpop.permute.xlu1 %1631  ;;  %v1629_v41 = vpop.permute.xlu0 %1628 }
 0x3c0   : > { %v1658_v4 = vrot.slane %v1632_v46, %v4065_v22  ;;  %v1654_v62 = vrot.slane %v1629_v41, %v4065_v22 }
 0x3c2   : > { %v1683_v39 = vsel %vm707_vm9, %v1658_v4, %v1654_v62 }
 0x3c3   : > { %v1635_v16 = vpop.permute.xlu1 %1634  ;;  %v1641_v48 = vpop.permute.xlu0 %1640 }
 0x3c4   : > { %v1662_v9 = vrot.slane %v1635_v16, %v4065_v22  ;;  %v1670_v46 = vrot.slane %v1641_v48, %v4065_v22 }
 0x3c6   : > { %v1684_v30 = vsel %vm709_vm7, %v1662_v9, %v1683_v39 }
 0x3c7   : > { %v1638_v10 = vpop.permute.xlu1 %1637 }
 0x3c8   : > { %v1666_v43 = vrot.slane %v1638_v10, %v4065_v22 }
 0x3ca   : > { %v1685_v60 = vsel %vm711_vm11, %v1666_v43, %v1684_v30 }
 0x3cb   : > { %v1644_v1 = vpop.permute.xlu1 %1643  ;;  %v1686_v16 = vsel %vm713_vm10, %v1670_v46, %v1685_v60 }
 0x3cc   : > { %v1674_v57 = vrot.slane %v1644_v1, %v4065_v22 }
 0x3ce   : > { %v1687_v10 = vsel %vm715_vm12, %v1674_v57, %v1686_v16 }
 0x3d2   : > { %v2364_v51 = vpop.permute.xlu1 %2363  ;;  %v2361_v14 = vpop.permute.xlu0 %2360 }
 0x3d3   : > { %v2390_v48 = vrot.slane %v2364_v51, %v4065_v22  ;;  %v2386_v30 = vrot.slane %v2361_v14, %v4065_v22 }
 0x3d6   : > { %v2367_v59 = vpop.permute.xlu1 %2366  ;;  %v1647_v54 = vpop.permute.xlu0 %1646 }
 0x3d7   : > { %v1678_v41 = vrot.slane %v1647_v54, %v4065_v22  ;;  %v2394_v54 = vrot.slane %v2367_v59, %v4065_v22 }
 0x3d9   : > { %v1688_v62 = vsel %vm717_vm15, %v1678_v41, %v1687_v10  ;;  %v2415_v41 = vsel %vm707_vm9, %v2390_v48, %v2386_v30 }
 0x3da   : > { %v2370_v2 = vpop.permute.xlu1 %2369  ;;  %v1650_v24 = vpop.permute.xlu0 %1649  ;;  %v2416_v16 = vsel %vm709_vm7, %v2394_v54, %v2415_v41 }
 0x3db   : > { %v1682_v4 = vrot.slane %v1650_v24, %v4065_v22  ;;  %v2398_v57 = vrot.slane %v2370_v2, %v4065_v22 }
 0x3dd   : > { %v1689_v9 = vsel %vm719_vm8, %v1682_v4, %v1688_v62  ;;  %v2417_v62 = vsel %vm711_vm11, %v2398_v57, %v2416_v16 }
 0x3de   : > { %v2376_v39 = vpop.permute.xlu1 %2375  ;;  %v2373_v43 = vpop.permute.xlu0 %2372  ;;  %v1691_v1 = vsel %vm5218_vm14, %v1689_v9, -inf  ;;  %vm5222_vm14 = vmmov %vm5213_vm2 }
 0x3df   : > { %1692 = vmax.xlane.f32.xlu1 %v1691_v1  ;;  %v2402_v24 = vrot.slane %v2373_v43, %v4065_v22  ;;  %v2406_v51 = vrot.slane %v2376_v39, %v4065_v22 }
 0x3e1   : > { %v2418_v14 = vsel %vm713_vm10, %v2402_v24, %v2417_v62 }
 0x3e2   : > { %v3096_v60 = vpop.permute.xlu1 %3095  ;;  %v3093_v46 = vpop.permute.xlu0 %3092  ;;  %v2419_v54 = vsel %vm715_vm12, %v2406_v51, %v2418_v14 }
 0x3e3   : > { %v3122_v9 = vrot.slane %v3096_v60, %v4065_v22  ;;  %v3118_v2 = vrot.slane %v3093_v46, %v4065_v22 }
 0x3e5   : > { %v3147_v41 = vsel %vm707_vm9, %v3122_v9, %v3118_v2 }
 0x3e6   : > { %v3099_v10 = vpop.permute.xlu1 %3098  ;;  %v2379_v4 = vpop.permute.xlu0 %2378 }
 0x3e7   : > { %v2410_v59 = vrot.slane %v2379_v4, %v4065_v22  ;;  %v3126_v48 = vrot.slane %v3099_v10, %v4065_v22 }
 0x3e9   : > { %v2420_v39 = vsel %vm717_vm15, %v2410_v59, %v2419_v54  ;;  %v3148_v4 = vsel %vm709_vm7, %v3126_v48, %v3147_v41 }
 0x3ea   : > { %v3102_v1 = vpop.permute.xlu1 %3101  ;;  %v2382_v43 = vpop.permute.xlu0 %2381 }
 0x3eb   : > { %v2414_v30 = vrot.slane %v2382_v43, %v4065_v22  ;;  %v3130_v57 = vrot.slane %v3102_v1, %v4065_v22 }
 0x3ed   : > { %v2421_v24 = vsel %vm719_vm8, %v2414_v30, %v2420_v39  ;;  %v3149_v62 = vsel %vm711_vm11, %v3130_v57, %v3148_v4 }
 0x3ee   : > { %v3108_v16 = vpop.permute.xlu1 %3107  ;;  %v3105_v60 = vpop.permute.xlu0 %3104  ;;  %v2423_v46 = vsel %vm5219_vm13, %v2421_v24, -inf  ;;  %vm5223_vm13 = vmmov %vm5213_vm2 }
 0x3ef   : > { %v3134_v10 = vrot.slane %v3105_v60, %v4065_v22  ;;  %2424 = vmax.xlane.f32.xlu0 %v2423_v46  ;;  %v3138_v51 = vrot.slane %v3108_v16, %v4065_v22 }
 0x3f1   : > { %v3150_v14 = vsel %vm713_vm10, %v3134_v10, %v3149_v62 }
 0x3f2   : > { %v3114_v59 = vpop.permute.xlu1 %3113  ;;  %v3111_v1 = vpop.permute.xlu0 %3110  ;;  %v3151_v2 = vsel %vm715_vm12, %v3138_v51, %v3150_v14 }
 0x3f3   : > { %v3146_v43 = vrot.slane %v3114_v59, %v4065_v22  ;;  %v3142_v9 = vrot.slane %v3111_v1, %v4065_v22 }
 0x3f5   : > { %v3152_v30 = vsel %vm717_vm15, %v3142_v9, %v3151_v2 }
 0x3f6   : > { %v3153_v48 = vsel %vm719_vm8, %v3146_v43, %v3152_v30 }
 0x3f7   : > { %v3155_v54 = vsel %vm5213_vm2, %v3153_v48, -inf }
 0x3f8   : > { %3156 = vmax.xlane.f32.xlu0 %v3155_v54 }
 0x41f   : > { %v960_v57 = vpop.xlane.xlu0 %959 }
 0x420   : > { %v965_v39 = vrot.slane %v960_v57, %v4067_v23  ;;  %v969_v24 = vrot.slane %v960_v57, %v4048_v18  ;;  %v973_v41 = vrot.slane %v960_v57, %v4052_v19  ;;  %v981_v16 = vrot.slane %v960_v57, %v4072_v27 }
 0x421   : > { %v977_v60 = vrot.slane %v960_v57, %v4062_v20  ;;  %v989_v62 = vrot.slane %v960_v57, %v4086_v31  ;;  %v985_v1 = vrot.slane %v960_v57, %v4077_v29  ;;  %v993_v2 = vrot.slane %v960_v57, %v4089_v33 }
 0x422   : > { %v1002_v46 = vsub.f32 %v4503_v3, %v965_v39  ;;  %v1003_v4 = vsub.f32 %v4498_v0, %v969_v24  ;;  %v1004_v10 = vsub.f32 %v4515_v6, %v973_v41  ;;  %v1006_v51 = vsub.f32 %v4527_v47, %v981_v16 }
 0x423   : > { %v1005_v43 = vsub.f32 %v4510_v5, %v977_v60  ;;  %v1008_v3 = vsub.f32 %v4534_v44, %v989_v62  ;;  %v1007_v6 = vsub.f32 %v4522_v35, %v985_v1  ;;  %v1009_v47 = vsub.f32 %v4540_v52, %v993_v2 }
 0x424   : > { %v1010_v14 = vmul.f32 1.442695, %v1002_v46  ;;  %v1012_v59 = vmul.f32 1.442695, %v1003_v4  ;;  %v1014_v9 = vmul.f32 1.442695, %v1004_v10 }
 0x425   : > { %v1018_v0 = vmul.f32 1.442695, %v1006_v51  ;;  %v1016_v30 = vmul.f32 1.442695, %v1005_v43  ;;  %v1022_v48 = vmul.f32 1.442695, %v1008_v3 }
 0x426   : > { %3859 = vpow2.f32 %v1010_v14  ;;  %v1020_v54 = vmul.f32 1.442695, %v1007_v6  ;;  %v1024_v5 = vmul.f32 1.442695, %v1009_v47 }
 0x427   : > { %3861 = vpow2.f32 %v1012_v59 }
 0x428   : > { %3863 = vpow2.f32 %v1014_v9 }
 0x429   : > { %3865 = vpow2.f32 %v1018_v0 }
 0x42a   : > { %3867 = vpow2.f32 %v1016_v30 }
 0x42b   : > { %3869 = vpow2.f32 %v1022_v48 }
 0x42c   : > { %3871 = vpow2.f32 %v1020_v54 }
 0x42d   : > { %3873 = vpow2.f32 %v1024_v5 }
 0x430   : > { %v4764_v39 = vpop.eup %3859 }
 0x431   : > { %v4766_v24 = vpop.eup %3861  ;;  %1035 = vperm.xlu1 %3857, %v4764_v39  }
 0x432   : > { %1038 = vperm.xlu0 %3858, %v4766_v24   ;;  %v4770_v35 = vpop.eup %3863 }
 0x433   : > { %v4772_v44 = vpop.eup %3865 }
 0x434   : > { %v4776_v52 = vpop.eup %3867 }
 0x435   : > { %1041 = vperm.xlu1 %3857, %v4770_v35   ;;  %v4778_v57 = vpop.eup %3869 }
 0x436   : > { %1047 = vperm.xlu0 %3858, %v4772_v44   ;;  %v4782_v41 = vpop.eup %3871 }
 0x437   : > { %v4784_v16 = vpop.eup %3873 }
 0x439   : > { %1044 = vperm.xlu1 %3857, %v4776_v52  }
 0x43a   : > { %1053 = vperm.xlu0 %3858, %v4778_v57  }
 0x43d   : > { %1050 = vperm.xlu1 %3857, %v4782_v41  }
 0x43e   : > { %1056 = vperm.xlu0 %3858, %v4784_v16  }
 0x46c   : > { %v1693_v60 = vpop.xlane.xlu1 %1692 }
 0x46d   : > { %v1698_v46 = vrot.slane %v1693_v60, %v4067_v23  ;;  %v1702_v4 = vrot.slane %v1693_v60, %v4048_v18  ;;  %v1706_v10 = vrot.slane %v1693_v60, %v4052_v19  ;;  %v1714_v62 = vrot.slane %v1693_v60, %v4072_v27 }
 0x46e   : > { %v1710_v59 = vrot.slane %v1693_v60, %v4062_v20  ;;  %v1718_v0 = vrot.slane %v1693_v60, %v4077_v29  ;;  %v1722_v47 = vrot.slane %v1693_v60, %v4086_v31 }
 0x46f   : > { %v1735_v51 = vsub.f32 %v4560_v45, %v1698_v46  ;;  %v1736_v14 = vsub.f32 %v4556_v53, %v1702_v4  ;;  %v1737_v1 = vsub.f32 %v4566_v11, %v1706_v10  ;;  %v1739_v43 = vsub.f32 %v4570_v56, %v1714_v62 }
 0x470   : > { %v1738_v6 = vsub.f32 %v4576_v58, %v1710_v59  ;;  %v1740_v45 = vsub.f32 %v4581_v61, %v1718_v0  ;;  %v1726_v46 = vrot.slane %v1693_v60, %v4089_v33  ;;  %v1741_v4 = vsub.f32 %v4603_v15, %v1722_v47 }
 0x471   : > { %v1743_v9 = vmul.f32 1.442695, %v1735_v51  ;;  %v1745_v2 = vmul.f32 1.442695, %v1736_v14  ;;  %v1751_v3 = vmul.f32 1.442695, %v1739_v43 }
 0x472   : > { %v1747_v30 = vmul.f32 1.442695, %v1737_v1  ;;  %v1749_v53 = vmul.f32 1.442695, %v1738_v6  ;;  %v1753_v11 = vmul.f32 1.442695, %v1740_v45 }
 0x473   : > { %3875 = vpow2.f32 %v1743_v9  ;;  %v1755_v15 = vmul.f32 1.442695, %v1741_v4 }
 0x474   : > { %3877 = vpow2.f32 %v1745_v2 }
 0x475   : > { %3879 = vpow2.f32 %v1751_v3 }
 0x476   : > { %3881 = vpow2.f32 %v1747_v30 }
 0x477   : > { %3883 = vpow2.f32 %v1749_v53 }
 0x478   : > { %3885 = vpow2.f32 %v1753_v11 }
 0x47c   : > { %v4801_v56 = vpop.xlane.xlu0 %2424 }
 0x47d   : > { %v4803_v48 = vpop.eup %3875  ;;  %v2430_v54 = vrot.slane %v4801_v56, %v4067_v23  ;;  %v2434_v58 = vrot.slane %v4801_v56, %v4048_v18  ;;  %v2438_v5 = vrot.slane %v4801_v56, %v4052_v19  ;;  %v2442_v51 = vrot.slane %v4801_v56, %v4062_v20 }
 0x47e   : > { %v4811_v61 = vpop.eup %3877  ;;  %1768 = vperm.xlu0 %3858, %v4803_v48   ;;  %v2454_v11 = vrot.slane %v4801_v56, %v4086_v31 }
 0x47f   : > { %v2467_v10 = vsub.f32 %v4593_v7, %v2430_v54  ;;  %v2468_v62 = vsub.f32 %v4589_v49, %v2434_v58  ;;  %1771 = vperm.xlu1 %3857, %v4811_v61   ;;  %v2469_v14 = vsub.f32 %v4599_v13, %v2438_v5  ;;  %v4822_v59 = vpop.eup %3879  ;;  %v1742_v7 = vsub.f32 %v4613_v37, %v1726_v46 }
 0x480   : > { %v4824_v9 = vpop.eup %3881  ;;  %v2446_v49 = vrot.slane %v4801_v56, %v4072_v27  ;;  %v2450_v13 = vrot.slane %v4801_v56, %v4077_v29  ;;  %v2470_v60 = vsub.f32 %v4609_v36, %v2442_v51 }
 0x481   : > { %v2475_v1 = vmul.f32 1.442695, %v2467_v10  ;;  %v2477_v43 = vmul.f32 1.442695, %v2468_v62  ;;  %v2479_v2 = vmul.f32 1.442695, %v2469_v14  ;;  %v4836_v0 = vpop.eup %3883  ;;  %v2458_v10 = vrot.slane %v4801_v56, %v4089_v33 }
 0x482   : > { %1780 = vperm.xlu0 %3858, %v4822_v59   ;;  %v1757_v37 = vmul.f32 1.442695, %v1742_v7  ;;  %v2471_v6 = vsub.f32 %v4625_v38, %v2446_v49  ;;  %v2472_v45 = vsub.f32 %v4621_v8, %v2450_v13  ;;  %v2481_v53 = vmul.f32 1.442695, %v2470_v60  ;;  %v4845_v47 = vpop.eup %3885 }
 0x483   : > { %3887 = vpow2.f32 %v2475_v1  ;;  %1774 = vperm.xlu1 %3857, %v4824_v9   ;;  %v2474_v56 = vsub.f32 %v4658_v32, %v2458_v10 }
 0x484   : > { %3889 = vpow2.f32 %v2477_v43  ;;  %v2483_v54 = vmul.f32 1.442695, %v2471_v6  ;;  %v2485_v58 = vmul.f32 1.442695, %v2472_v45 }
 0x485   : > { %v4834_v3 = vpop.xlane.xlu0 %3156  ;;  %3891 = vpow2.f32 %v1755_v15  ;;  %v2489_v32 = vmul.f32 1.442695, %v2474_v56 }
 0x486   : > { %v3162_v30 = vrot.slane %v4834_v3, %v4067_v23  ;;  %3893 = vpow2.f32 %v2479_v2  ;;  %v3166_v36 = vrot.slane %v4834_v3, %v4048_v18  ;;  %v3170_v8 = vrot.slane %v4834_v3, %v4052_v19 }
 0x487   : > { %1777 = vperm.xlu1 %3857, %v4836_v0   ;;  %3895 = vpow2.f32 %v1757_v37  ;;  %v3174_v51 = vrot.slane %v4834_v3, %v4062_v20  ;;  %v3178_v7 = vrot.slane %v4834_v3, %v4072_v27  ;;  %v3182_v15 = vrot.slane %v4834_v3, %v4077_v29 }
 0x488   : > { %v3199_v38 = vsub.f32 %v4636_v26, %v3162_v30  ;;  %3897 = vpow2.f32 %v2481_v53  ;;  %v3200_v5 = vsub.f32 %v4632_v12, %v3166_v36  ;;  %v2473_v26 = vsub.f32 %v4647_v55, %v2454_v11 }
 0x489   : > { %3899 = vpow2.f32 %v2483_v54  ;;  %v3201_v12 = vsub.f32 %v4642_v17, %v3170_v8  ;;  %v3202_v17 = vsub.f32 %v4653_v28, %v3174_v51  ;;  %v3186_v2 = vrot.slane %v4834_v3, %v4086_v31 }
 0x48a   : > { %v3207_v62 = vmul.f32 1.442695, %v3199_v38  ;;  %3901 = vpow2.f32 %v2485_v58  ;;  %v3209_v14 = vmul.f32 1.442695, %v3200_v5  ;;  %v2487_v55 = vmul.f32 1.442695, %v2473_v26 }
 0x48b   : > { %1783 = vperm.xlu1 %3857, %v4845_v47   ;;  %v3211_v49 = vmul.f32 1.442695, %v3201_v12  ;;  %v3203_v37 = vsub.f32 %v4669_v34, %v3178_v7  ;;  %v3190_v28 = vrot.slane %v4834_v3, %v4089_v33  ;;  %v3204_v6 = vsub.f32 %v4664_v21, %v3182_v15 }
 0x48c   : > { %3903 = vpow2.f32 %v3207_v62  ;;  %v3213_v30 = vmul.f32 1.442695, %v3202_v17  ;;  %v3205_v36 = vsub.f32 %v4680_v42, %v3186_v2 }
 0x48d   : > { %v4854_v46 = vpop.eup %3887  ;;  %3905 = vpow2.f32 %v3209_v14  ;;  %v3215_v11 = vmul.f32 1.442695, %v3203_v37  ;;  %v3206_v34 = vsub.f32 %v4675_v25, %v3190_v28  ;;  %v3217_v3 = vmul.f32 1.442695, %v3204_v6 }
 0x48e   : > { %v4856_v4 = vpop.eup %3889  ;;  %2500 = vperm.xlu0 %3858, %v4854_v46   ;;  %3907 = vpow2.f32 %v2487_v55  ;;  %v3219_v38 = vmul.f32 1.442695, %v3205_v36 }
 0x48f   : > { %2503 = vperm.xlu1 %3857, %v4856_v4   ;;  %v4866_v1 = vpop.eup %3891  ;;  %3909 = vpow2.f32 %v3211_v49  ;;  %v3221_v58 = vmul.f32 1.442695, %v3206_v34 }
 0x490   : > { %v4868_v43 = vpop.eup %3893  ;;  %3911 = vpow2.f32 %v2489_v32 }
 0x491   : > { %v4878_v13 = vpop.eup %3895  ;;  %3913 = vpow2.f32 %v3213_v30 }
 0x492   : > { %1786 = vperm.xlu0 %3858, %v4866_v1   ;;  %v4880_v60 = vpop.eup %3897  ;;  %3915 = vpow2.f32 %v3215_v11 }
 0x493   : > { %2506 = vperm.xlu1 %3857, %v4868_v43   ;;  %v4890_v45 = vpop.eup %3899  ;;  %3917 = vpow2.f32 %v3217_v3 }
 0x494   : > { %v4892_v53 = vpop.eup %3901  ;;  %3919 = vpow2.f32 %v3219_v38 }
 0x495   : > { %3921 = vpow2.f32 %v3221_v58 }
 0x496   : > { %1789 = vperm.xlu0 %3858, %v4878_v13   ;;  %v4898_v54 = vpop.eup %3903 }
 0x497   : > { %2509 = vperm.xlu1 %3857, %v4880_v60   ;;  %v4900_v21 = vpop.eup %3905 }
 0x498   : > { %v4904_v42 = vpop.eup %3907 }
 0x499   : > { %v4906_v8 = vpop.eup %3909 }
 0x49a   : > { %2512 = vperm.xlu0 %3858, %v4890_v45   ;;  %v4910_v25 = vpop.eup %3911 }
 0x49b   : > { %2515 = vperm.xlu1 %3857, %v4892_v53   ;;  %v4912_v5 = vpop.eup %3913 }
 0x49c   : > { %v4916_v10 = vpop.eup %3915 }
 0x49d   : > { %v4918_v26 = vpop.eup %3917 }
 0x49e   : > { %3232 = vperm.xlu0 %3858, %v4898_v54   ;;  %v4922_v62 = vpop.eup %3919 }
 0x49f   : > { %3235 = vperm.xlu1 %3857, %v4900_v21   ;;  %v4924_v51 = vpop.eup %3921 }
 0x4a2   : > { %2518 = vperm.xlu0 %3858, %v4904_v42  }
 0x4a3   : > { %3238 = vperm.xlu1 %3857, %v4906_v8  }
 0x4a6   : > { %2521 = vperm.xlu0 %3858, %v4910_v25  }
 0x4a7   : > { %3241 = vperm.xlu1 %3857, %v4912_v5  }
 0x4aa   : > { %3244 = vperm.xlu0 %3858, %v4916_v10  }
 0x4ab   : > { %3247 = vperm.xlu1 %3857, %v4918_v26  }
 0x4ae   : > { %3250 = vperm.xlu0 %3858, %v4922_v62  }
 0x4af   : > { %3253 = vperm.xlu1 %3857, %v4924_v51  }
 0x4b0   : > { %v1036_v12 = vpop.permute.xlu1 %1035 }
 0x4b1   : > { %v1039_v14 = vpop.permute.xlu0 %1038  ;;  %v1061_v15 = vrot.slane %v1036_v12, %v4065_v22 }
 0x4b2   : > { %v1065_v17 = vrot.slane %v1039_v14, %v4065_v22 }
 0x4b4   : > { %v1042_v56 = vpop.permute.xlu1 %1041  ;;  %v1090_v37 = vsel %vm707_vm9, %v1065_v17, %v1061_v15 }
 0x4b5   : > { %v1048_v55 = vpop.permute.xlu0 %1047  ;;  %v1069_v49 = vrot.slane %v1042_v56, %v4065_v22 }
 0x4b6   : > { %v1077_v11 = vrot.slane %v1048_v55, %v4065_v22 }
 0x4b7   : > { %v1091_v28 = vsel %vm709_vm7, %v1069_v49, %v1090_v37 }
 0x4b8   : > { %v1045_v7 = vpop.permute.xlu1 %1044 }
 0x4b9   : > { %v1073_v32 = vrot.slane %v1045_v7, %v4065_v22  ;;  %v1054_v6 = vpop.permute.xlu0 %1053 }
 0x4ba   : > { %v1085_v38 = vrot.slane %v1054_v6, %v4065_v22 }
 0x4bb   : > { %v1092_v30 = vsel %vm711_vm11, %v1073_v32, %v1091_v28 }
 0x4bc   : > { %v1051_v2 = vpop.permute.xlu1 %1050  ;;  %v1093_v34 = vsel %vm713_vm10, %v1077_v11, %v1092_v30 }
 0x4bd   : > { %v1081_v36 = vrot.slane %v1051_v2, %v4065_v22  ;;  %v1057_v58 = vpop.permute.xlu0 %1056 }
 0x4be   : > { %v1089_v14 = vrot.slane %v1057_v58, %v4065_v22 }
 0x4bf   : > { %v1094_v3 = vsel %vm715_vm12, %v1081_v36, %v1093_v34 }
 0x4c0   : > { %v1095_v12 = vsel %vm717_vm15, %v1085_v38, %v1094_v3 }
 0x4c1   : > { %v1096_v56 = vsel %vm719_vm8, %v1089_v14, %v1095_v12 }
 0x4c2   : > { %v1098_v7 = vsel %vm5220_vm6, %v1096_v56, 0.0  ;;  %vm5225_vm6 = vmmov 0  }
 0x4cd   : > { %1099 = vadd.xlane.f32.xlu0 %v1098_v7 }
 0x4fd   : > { %v1769_v49 = vpop.permute.xlu0 %1768 }
 0x4fe   : > { %v1772_v15 = vpop.permute.xlu1 %1771  ;;  %v1794_v28 = vrot.slane %v1769_v49, %v4065_v22 }
 0x4ff   : > { %v1798_v37 = vrot.slane %v1772_v15, %v4065_v22 }
 0x501   : > { %v1781_v32 = vpop.permute.xlu0 %1780  ;;  %v1823_v34 = vsel %vm707_vm9, %v1798_v37, %v1794_v28 }
 0x502   : > { %v1775_v17 = vpop.permute.xlu1 %1774  ;;  %v1810_v56 = vrot.slane %v1781_v32, %v4065_v22 }
 0x503   : > { %v1802_v6 = vrot.slane %v1775_v17, %v4065_v22 }
 0x505   : > { %v1824_v3 = vsel %vm709_vm7, %v1802_v6, %v1823_v34 }
 0x506   : > { %v1778_v55 = vpop.permute.xlu1 %1777 }
 0x507   : > { %v1806_v36 = vrot.slane %v1778_v55, %v4065_v22 }
 0x509   : > { %v1825_v58 = vsel %vm711_vm11, %v1806_v36, %v1824_v3 }
 0x50a   : > { %v1784_v2 = vpop.permute.xlu1 %1783  ;;  %v1826_v15 = vsel %vm713_vm10, %v1810_v56, %v1825_v58 }
 0x50b   : > { %v1814_v12 = vrot.slane %v1784_v2, %v4065_v22 }
 0x50d   : > { %v2501_v30 = vpop.permute.xlu0 %2500  ;;  %v1827_v49 = vsel %vm715_vm12, %v1814_v12, %v1826_v15 }
 0x50e   : > { %v2504_v11 = vpop.permute.xlu1 %2503  ;;  %v2526_v3 = vrot.slane %v2501_v30, %v4065_v22 }
 0x50f   : > { %v2530_v32 = vrot.slane %v2504_v11, %v4065_v22 }
 0x511   : > { %v1787_v38 = vpop.permute.xlu0 %1786 }
 0x512   : > { %v2507_v14 = vpop.permute.xlu1 %2506  ;;  %v1818_v7 = vrot.slane %v1787_v38, %v4065_v22 }
 0x513   : > { %v2534_v38 = vrot.slane %v2507_v14, %v4065_v22 }
 0x514   : > { %v1828_v28 = vsel %vm717_vm15, %v1818_v7, %v1827_v49  ;;  %v2555_v7 = vsel %vm707_vm9, %v2530_v32, %v2526_v3 }
 0x515   : > { %v1790_v17 = vpop.permute.xlu0 %1789 }
 0x516   : > { %v2510_v55 = vpop.permute.xlu1 %2509  ;;  %v1822_v37 = vrot.slane %v1790_v17, %v4065_v22  ;;  %v2556_v17 = vsel %vm709_vm7, %v2534_v38, %v2555_v7 }
 0x517   : > { %v2538_v12 = vrot.slane %v2510_v55, %v4065_v22 }
 0x518   : > { %v1829_v6 = vsel %vm719_vm8, %v1822_v37, %v1828_v28 }
 0x519   : > { %v2513_v36 = vpop.permute.xlu0 %2512  ;;  %v1831_v2 = vsel %vm5221_vm4, %v1829_v6, 0.0  ;;  %v2557_v37 = vsel %vm711_vm11, %v2538_v12, %v2556_v17 }
 0x51a   : > { %v2516_v34 = vpop.permute.xlu1 %2515  ;;  %1832 = vadd.xlane.f32.xlu1 %v1831_v2  ;;  %v2542_v15 = vrot.slane %v2513_v36, %v4065_v22 }
 0x51b   : > { %v2546_v28 = vrot.slane %v2516_v34, %v4065_v22 }
 0x51c   : > { %v2558_v30 = vsel %vm713_vm10, %v2542_v15, %v2557_v37 }
 0x51d   : > { %v3233_v58 = vpop.permute.xlu0 %3232  ;;  %v2559_v38 = vsel %vm715_vm12, %v2546_v28, %v2558_v30 }
 0x51e   : > { %v3236_v56 = vpop.permute.xlu1 %3235  ;;  %v3258_v55 = vrot.slane %v3233_v58, %v4065_v22 }
 0x51f   : > { %v3262_v6 = vrot.slane %v3236_v56, %v4065_v22 }
 0x521   : > { %v2519_v49 = vpop.permute.xlu0 %2518  ;;  %v3287_v7 = vsel %vm707_vm9, %v3262_v6, %v3258_v55 }
 0x522   : > { %v3239_v11 = vpop.permute.xlu1 %3238  ;;  %v2550_v14 = vrot.slane %v2519_v49, %v4065_v22 }
 0x523   : > { %v3266_v36 = vrot.slane %v3239_v11, %v4065_v22 }
 0x524   : > { %v2560_v34 = vsel %vm717_vm15, %v2550_v14, %v2559_v38 }
 0x525   : > { %v2522_v2 = vpop.permute.xlu0 %2521  ;;  %v3288_v58 = vsel %vm709_vm7, %v3266_v36, %v3287_v7 }
 0x526   : > { %v3242_v32 = vpop.permute.xlu1 %3241  ;;  %v2554_v3 = vrot.slane %v2522_v2, %v4065_v22 }
 0x527   : > { %v3270_v12 = vrot.slane %v3242_v32, %v4065_v22 }
 0x528   : > { %v2561_v15 = vsel %vm719_vm8, %v2554_v3, %v2560_v34 }
 0x529   : > { %v3245_v17 = vpop.permute.xlu0 %3244  ;;  %v2563_v56 = vsel %vm5222_vm14, %v2561_v15, 0.0  ;;  %v3289_v11 = vsel %vm711_vm11, %v3270_v12, %v3288_v58 }
 0x52a   : > { %v3248_v49 = vpop.permute.xlu1 %3247  ;;  %v3274_v37 = vrot.slane %v3245_v17, %v4065_v22  ;;  %2564 = vadd.xlane.f32.xlu0 %v2563_v56 }
 0x52b   : > { %v3278_v28 = vrot.slane %v3248_v49, %v4065_v22 }
 0x52c   : > { %v3290_v30 = vsel %vm713_vm10, %v3274_v37, %v3289_v11 }
 0x52d   : > { %v3251_v14 = vpop.permute.xlu0 %3250  ;;  %v3291_v55 = vsel %vm715_vm12, %v3278_v28, %v3290_v30 }
 0x52e   : > { %v3254_v2 = vpop.permute.xlu1 %3253  ;;  %v3282_v32 = vrot.slane %v3251_v14, %v4065_v22 }
 0x52f   : > { %v3286_v6 = vrot.slane %v3254_v2, %v4065_v22 }
 0x530   : > { %v3292_v36 = vsel %vm717_vm15, %v3282_v32, %v3291_v55 }
 0x531   : > { %v3293_v3 = vsel %vm719_vm8, %v3286_v6, %v3292_v36 }
 0x532   : > { %v3295_v38 = vsel %vm5223_vm13, %v3293_v3, 0.0 }
 0x533   : > { %3296 = vadd.xlane.f32.xlu0 %v3295_v38 }
 0x549   : > { %1225 = vrot.lane.b32.xlu0 %v4100_v40, %s3949_s19 }
 0x55a   : > { %v1100_v12 = vpop.xlane.xlu0 %1099 }
 0x55b   : > { %3923 = vrcp.f32 %v1100_v12 }
 0x565   : > { %v3924_v34 = vpop.eup %3923 }
 0x566   : > { %v1102_v15 = vmul.f32 %v3924_v34, %v1100_v12 }
 0x568   : > { %v1103_v7 = vsub.f32 2.0, %v1102_v15 }
 0x56a   : > { %v1104_v17 = vmul.f32 %v3924_v34, %v1103_v7 }
 0x56c   : > { %v1113_v56 = vrot.slane %v1104_v17, %v4048_v18  ;;  %v1109_v58 = vrot.slane %v1104_v17, %v4067_v23  ;;  %v1125_v11 = vrot.slane %v1104_v17, %v4072_v27  ;;  %v1117_v28 = vrot.slane %v1104_v17, %v4052_v19 }
 0x56d   : > { %v1133_v2 = vrot.slane %v1104_v17, %v4086_v31  ;;  %v1121_v32 = vrot.slane %v1104_v17, %v4062_v20  ;;  %v1137_v6 = vrot.slane %v1104_v17, %v4089_v33  ;;  %v1129_v55 = vrot.slane %v1104_v17, %v4077_v29 }
 0x56e   : > { %v1147_v49 = vmul.f32 %v4766_v24, %v1113_v56  ;;  %v1146_v37 = vmul.f32 %v4764_v39, %v1109_v58  ;;  %v1150_v30 = vmul.f32 %v4772_v44, %v1125_v11  ;;  %v1148_v14 = vmul.f32 %v4770_v35, %v1117_v28 }
 0x56f   : > { %v1152_v24 = vmul.f32 %v4778_v57, %v1133_v2  ;;  %v1149_v39 = vmul.f32 %v4776_v52, %v1121_v32  ;;  %v1153_v44 = vmul.f32 %v4784_v16, %v1137_v6  ;;  %v1151_v35 = vmul.f32 %v4782_v41, %v1129_v55 }
 0x570   : > { %1166 = vperm.xlu0 %3858, %v1147_v49   ;;  %1163 = vperm.xlu1 %3857, %v1146_v37   ;;  %v5224_v2 = vmov 0.0  }
 0x574   : > { %1175 = vperm.xlu0 %3858, %v1150_v30   ;;  %1169 = vperm.xlu1 %3857, %v1148_v14  }
 0x578   : > { %1181 = vperm.xlu0 %3858, %v1152_v24   ;;  %1172 = vperm.xlu1 %3857, %v1149_v39  }
 0x57c   : > { %1184 = vperm.xlu0 %3858, %v1153_v44   ;;  %1178 = vperm.xlu1 %3857, %v1151_v35  }
 0x5a7   : > { %v1833_v36 = vpop.xlane.xlu1 %1832 }
 0x5a8   : > { %3925 = vrcp.f32 %v1833_v36 }
 0x5b2   : > { %v3926_v3 = vpop.eup %3925 }
 0x5b3   : > { %v1835_v38 = vmul.f32 %v3926_v3, %v1833_v36 }
 0x5b5   : > { %v1836_v12 = vsub.f32 2.0, %v1835_v38 }
 0x5b7   : > { %v1837_v57 = vmul.f32 %v3926_v3, %v1836_v12  ;;  %v2565_v34 = vpop.xlane.xlu0 %2564 }
 0x5b8   : > { %3927 = vrcp.f32 %v2565_v34 }
 0x5b9   : > { %v1842_v52 = vrot.slane %v1837_v57, %v4067_v23  ;;  %v1846_v15 = vrot.slane %v1837_v57, %v4048_v18  ;;  %v1858_v41 = vrot.slane %v1837_v57, %v4072_v27  ;;  %v1850_v17 = vrot.slane %v1837_v57, %v4052_v19 }
 0x5ba   : > { %v1854_v49 = vrot.slane %v1837_v57, %v4062_v20  ;;  %v1862_v28 = vrot.slane %v1837_v57, %v4077_v29  ;;  %v1866_v44 = vrot.slane %v1837_v57, %v4086_v31  ;;  %v1870_v36 = vrot.slane %v1837_v57, %v4089_v33 }
 0x5bb   : > { %v1879_v7 = vmul.f32 %v4803_v48, %v1842_v52  ;;  %v1880_v16 = vmul.f32 %v4811_v61, %v1846_v15  ;;  %v1883_v56 = vmul.f32 %v4822_v59, %v1858_v41  ;;  %v1881_v58 = vmul.f32 %v4824_v9, %v1850_v17 }
 0x5bc   : > { %v1882_v61 = vmul.f32 %v4836_v0, %v1854_v49  ;;  %v1884_v9 = vmul.f32 %v4845_v47, %v1862_v28  ;;  %v1885_v38 = vmul.f32 %v4866_v1, %v1866_v44 }
 0x5bd   : > { %1896 = vperm.xlu0 %3858, %v1879_v7   ;;  %1899 = vperm.xlu1 %3857, %v1880_v16  }
 0x5c0   : > { %v3297_v37 = vpop.xlane.xlu0 %3296 }
 0x5c1   : > { %3929 = vrcp.f32 %v3297_v37  ;;  %1908 = vperm.xlu0 %3858, %v1883_v56   ;;  %1902 = vperm.xlu1 %3857, %v1881_v58  }
 0x5c2   : > { %v3928_v11 = vpop.eup %3927 }
 0x5c3   : > { %v2567_v48 = vmul.f32 %v3928_v11, %v2565_v34 }
 0x5c4   : > { %v1226_v30 = vpop.permute.xlu0 %1225 }
 0x5c5   : > { %v2568_v14 = vsub.f32 2.0, %v2567_v48  ;;  %1905 = vperm.xlu1 %3857, %v1882_v61   ;;  %3772 = vmatpush3.msra.mxu1 %v1226_v30 }
 0x5c6   : > { %3781 = vmatprep.subr.mxu1 %v5224_v2 }
 0x5c7   : > { %v2569_v59 = vmul.f32 %v3928_v11, %v2568_v14 }
 0x5c9   : > { %1911 = vperm.xlu1 %3857, %v1884_v9   ;;  %v2578_v32 = vrot.slane %v2569_v59, %v4048_v18  ;;  %v2574_v24 = vrot.slane %v2569_v59, %v4067_v23  ;;  %v2582_v55 = vrot.slane %v2569_v59, %v4052_v19  ;;  %v2586_v12 = vrot.slane %v2569_v59, %v4062_v20 }
 0x5ca   : > { %v2594_v52 = vrot.slane %v2569_v59, %v4077_v29  ;;  %v2590_v15 = vrot.slane %v2569_v59, %v4072_v27  ;;  %v2598_v41 = vrot.slane %v2569_v59, %v4086_v31 }
 0x5cb   : > { %v3930_v39 = vpop.eup %3929  ;;  %v2612_v6 = vmul.f32 %v4856_v4, %v2578_v32  ;;  %v2611_v0 = vmul.f32 %v4854_v46, %v2574_v24  ;;  %v2613_v3 = vmul.f32 %v4868_v43, %v2582_v55  ;;  %v1886_v46 = vmul.f32 %v4878_v13, %v1870_v36 }
 0x5cc   : > { %v3299_v35 = vmul.f32 %v3930_v39, %v3297_v37  ;;  %v2614_v34 = vmul.f32 %v4880_v60, %v2586_v12  ;;  %v2616_v57 = vmul.f32 %v4892_v53, %v2594_v52  ;;  %v2615_v43 = vmul.f32 %v4890_v45, %v2590_v15 }
 0x5cd   : > { %2631 = vperm.xlu1 %3857, %v2612_v6   ;;  %2628 = vperm.xlu0 %3858, %v2611_v0   ;;  %v2617_v45 = vmul.f32 %v4904_v42, %v2598_v41 }
 0x5ce   : > { %v3300_v47 = vsub.f32 2.0, %v3299_v35 }
 0x5d0   : > { %v3301_v4 = vmul.f32 %v3930_v39, %v3300_v47 }
 0x5d1   : > { %2634 = vperm.xlu1 %3857, %v2613_v3   ;;  %1914 = vperm.xlu0 %3858, %v1885_v38  }
 0x5d2   : > { %v3310_v1 = vrot.slane %v3301_v4, %v4048_v18  ;;  %v3306_v7 = vrot.slane %v3301_v4, %v4067_v23  ;;  %v3314_v16 = vrot.slane %v3301_v4, %v4052_v19  ;;  %v3318_v18 = vrot.slane %v3301_v4, %v4062_v20 }
 0x5d3   : > { %v2602_v23 = vrot.slane %v2569_v59, %v4089_v33  ;;  %v3322_v19 = vrot.slane %v3301_v4, %v4072_v27  ;;  %v3326_v17 = vrot.slane %v3301_v4, %v4077_v29  ;;  %v3330_v20 = vrot.slane %v3301_v4, %v4086_v31 }
 0x5d4   : > { %v3344_v13 = vmul.f32 %v4900_v21, %v3310_v1  ;;  %v3343_v60 = vmul.f32 %v4898_v54, %v3306_v7  ;;  %v3345_v53 = vmul.f32 %v4906_v8, %v3314_v16  ;;  %v3346_v21 = vmul.f32 %v4912_v5, %v3318_v18 }
 0x5d5   : > { %2637 = vperm.xlu1 %3857, %v2614_v34   ;;  %1917 = vperm.xlu0 %3858, %v1886_v46   ;;  %v2618_v54 = vmul.f32 %v4910_v25, %v2602_v23  ;;  %v3347_v8 = vmul.f32 %v4916_v10, %v3322_v19  ;;  %v3348_v42 = vmul.f32 %v4918_v26, %v3326_v17 }
 0x5d6   : > { %v3334_v56 = vrot.slane %v3301_v4, %v4089_v33  ;;  %v3349_v5 = vmul.f32 %v4922_v62, %v3330_v20 }
 0x5d8   : > { %v3350_v25 = vmul.f32 %v4924_v51, %v3334_v56 }
 0x5d9   : > { %2643 = vperm.xlu1 %3857, %v2616_v57   ;;  %2640 = vperm.xlu0 %3858, %v2615_v43  }
 0x5dd   : > { %3363 = vperm.xlu1 %3857, %v3344_v13   ;;  %3360 = vperm.xlu0 %3858, %v3343_v60  }
 0x5e1   : > { %3366 = vperm.xlu1 %3857, %v3345_v53   ;;  %2646 = vperm.xlu0 %3858, %v2617_v45  }
 0x5e5   : > { %3369 = vperm.xlu1 %3857, %v3346_v21   ;;  %2649 = vperm.xlu0 %3858, %v2618_v54  }
 0x5e9   : > { %3372 = vperm.xlu1 %3857, %v3347_v8   ;;  %3375 = vperm.xlu0 %3858, %v3348_v42  }
 0x5ed   : > { %3378 = vperm.xlu1 %3857, %v3349_v5   ;;  %3381 = vperm.xlu0 %3858, %v3350_v25  }
 0x5ef   : > { %v1164_v27 = vpop.permute.xlu1 %1163  ;;  %v1167_v29 = vpop.permute.xlu0 %1166 }
 0x5f0   : > { %v1189_v33 = vrot.slane %v1164_v27, %v4065_v22  ;;  %v1193_v26 = vrot.slane %v1167_v29, %v4065_v22 }
 0x5f1   : > { %1958 = vrot.lane.b32.xlu1 %v4100_v40, %s3950_s20  ;;  %2690 = vrot.lane.b32.xlu0 %v4100_v40, %s3951_s21 }
 0x5f2   : > { %v1218_v49 = vsel %vm707_vm9, %v1193_v26, %v1189_v33 }
 0x5f3   : > { %v1170_v10 = vpop.permute.xlu1 %1169  ;;  %v1176_v31 = vpop.permute.xlu0 %1175 }
 0x5f4   : > { %v1197_v62 = vrot.slane %v1170_v10, %v4065_v22  ;;  %v1205_v61 = vrot.slane %v1176_v31, %v4065_v22 }
 0x5f5   : > { %3422 = vrot.lane.b32.xlu1 %v4100_v40, %s3952_s22 }
 0x5f6   : > { %v1219_v11 = vsel %vm709_vm7, %v1197_v62, %v1218_v49 }
 0x5f7   : > { %v1173_v51 = vpop.permute.xlu1 %1172  ;;  %v1182_v58 = vpop.permute.xlu0 %1181 }
 0x5f8   : > { %v1201_v37 = vrot.slane %v1173_v51, %v4065_v22  ;;  %v1213_v59 = vrot.slane %v1182_v58, %v4065_v22 }
 0x5fa   : > { %v1220_v48 = vsel %vm711_vm11, %v1201_v37, %v1219_v11 }
 0x5fb   : > { %v1179_v28 = vpop.permute.xlu1 %1178  ;;  %v1185_v30 = vpop.permute.xlu0 %1184  ;;  %v1221_v40 = vsel %vm713_vm10, %v1205_v61, %v1220_v48 }
 0x5fc   : > { %v1209_v14 = vrot.slane %v1179_v28, %v4065_v22  ;;  %v1217_v32 = vrot.slane %v1185_v30, %v4065_v22 }
 0x5fe   : > { %v1222_v9 = vsel %vm715_vm12, %v1209_v14, %v1221_v40 }
 0x5ff   : > { %v1223_v24 = vsel %vm717_vm15, %v1213_v59, %v1222_v9 }
 0x600   : > { %v1224_v39 = vsel %vm719_vm8, %v1217_v32, %v1223_v24 }
 0x601   : > { %3774 = vmatmul.mubr.msk.f32.vlgmr.msra.gmra.mrb[4].mxu1 %vm5213_vm2, %v1224_v39 }
 0x602   : > { %3783 = vmatprep.mubr.msk.f32.mxu1 %vm5225_vm6, %v5224_v2 }
 0x63c   : > { %v1900_v6 = vpop.permute.xlu1 %1899  ;;  %v1897_v55 = vpop.permute.xlu0 %1896 }
 0x63d   : > { %v1926_v7 = vrot.slane %v1900_v6, %v4065_v22  ;;  %v1922_v13 = vrot.slane %v1897_v55, %v4065_v22 }
 0x63f   : > { %v1951_v45 = vsel %vm707_vm9, %v1926_v7, %v1922_v13 }
 0x640   : > { %v1903_v0 = vpop.permute.xlu1 %1902  ;;  %v1909_v35 = vpop.permute.xlu0 %1908 }
 0x641   : > { %v1930_v41 = vrot.slane %v1903_v0, %v4065_v22  ;;  %v1938_v25 = vrot.slane %v1909_v35, %v4065_v22 }
 0x643   : > { %v1952_v21 = vsel %vm709_vm7, %v1930_v41, %v1951_v45 }
 0x644   : > { %v1906_v44 = vpop.permute.xlu1 %1905 }
 0x645   : > { %v1934_v53 = vrot.slane %v1906_v44, %v4065_v22 }
 0x647   : > { %v1953_v17 = vsel %vm711_vm11, %v1934_v53, %v1952_v21 }
 0x648   : > { %v1912_v36 = vpop.permute.xlu1 %1911  ;;  %v1954_v58 = vsel %vm713_vm10, %v1938_v25, %v1953_v17 }
 0x649   : > { %v1942_v42 = vrot.slane %v1912_v36, %v4065_v22 }
 0x64b   : > { %v1955_v11 = vsel %vm715_vm12, %v1942_v42, %v1954_v58 }
 0x64c   : > { %v2632_v47 = vpop.permute.xlu1 %2631  ;;  %v2629_v3 = vpop.permute.xlu0 %2628 }
 0x64d   : > { %v2658_v54 = vrot.slane %v2632_v47, %v4065_v22  ;;  %v2654_v19 = vrot.slane %v2629_v3, %v4065_v22 }
 0x64f   : > { %v2683_v26 = vsel %vm707_vm9, %v2658_v54, %v2654_v19 }
 0x650   : > { %v2635_v38 = vpop.permute.xlu1 %2634  ;;  %v1915_v12 = vpop.permute.xlu0 %1914 }
 0x651   : > { %v2662_v8 = vrot.slane %v2635_v38, %v4065_v22  ;;  %v1946_v27 = vrot.slane %v1915_v12, %v4065_v22 }
 0x653   : > { %v2684_v49 = vsel %vm709_vm7, %v2662_v8, %v2683_v26  ;;  %v1956_v30 = vsel %vm717_vm15, %v1946_v27, %v1955_v11 }
 0x654   : > { %v2638_v46 = vpop.permute.xlu1 %2637  ;;  %v1918_v4 = vpop.permute.xlu0 %1917 }
 0x655   : > { %v2666_v20 = vrot.slane %v2638_v46, %v4065_v22  ;;  %v1950_v62 = vrot.slane %v1918_v4, %v4065_v22 }
 0x657   : > { %v2685_v48 = vsel %vm711_vm11, %v2666_v20, %v2684_v49  ;;  %v1957_v32 = vsel %vm719_vm8, %v1950_v62, %v1956_v30 }
 0x658   : > { %v2644_v34 = vpop.permute.xlu1 %2643  ;;  %v2641_v52 = vpop.permute.xlu0 %2640 }
 0x659   : > { %v2670_v29 = vrot.slane %v2641_v52, %v4065_v22  ;;  %v2674_v61 = vrot.slane %v2644_v34, %v4065_v22 }
 0x65b   : > { %v2686_v14 = vsel %vm713_vm10, %v2670_v29, %v2685_v48 }
 0x65c   : > { %v3364_v15 = vpop.permute.xlu1 %3363  ;;  %v3361_v57 = vpop.permute.xlu0 %3360  ;;  %v2687_v35 = vsel %vm715_vm12, %v2674_v61, %v2686_v14  ;;  %v3710_v14 = vld [vmem:[%s5185_s8] ss:$0 sm:$0xff] }
 0x65d   : > { %v3390_v56 = vrot.slane %v3364_v15, %v4065_v22  ;;  %v3386_v5 = vrot.slane %v3361_v57, %v4065_v22  ;;  %v3515_v15 = vld [vmem:[%s5182_s5] sm:$0xff] }
 0x65f   : > { %v3415_v28 = vsel %vm707_vm9, %v3390_v56, %v3386_v5  ;;  %vm5226_vm9 = vmmov %vm5213_vm2  ;;  %v3707_v5 = vld [vmem:[%s5183_s6] ss:$0 sm:$0xff] }
 0x660   : > { %v3367_v43 = vpop.permute.xlu1 %3366  ;;  %v2647_v1 = vpop.permute.xlu0 %2646 }
 0x661   : > { %v3394_v10 = vrot.slane %v3367_v43, %v4065_v22  ;;  %v2678_v40 = vrot.slane %v2647_v1, %v4065_v22  ;;  %v5229_v43 = vmov 0.0|0.0   ;;  %v3518_v1 = vld [vmem:[%s5182_s5 + $0x18] sm:$0xff] }
 0x663   : > { %v3416_v59 = vsel %vm709_vm7, %v3394_v10, %v3415_v28  ;;  %v2688_v36 = vsel %vm717_vm15, %v2678_v40, %v2687_v35  ;;  %vm5227_vm7 = vmmov %vm5213_vm2  ;;  %v3933_v10 = vld [vmem:[%s4060_s11] sm:$0xff] }
 0x664   : > { %v3370_v60 = vpop.permute.xlu1 %3369  ;;  %v2650_v16 = vpop.permute.xlu0 %2649  ;;  %v3709_v28 = vld [vmem:[%s5184_s7] ss:$0 sm:$0xff] }
 0x665   : > { %v3398_v51 = vrot.slane %v3370_v60, %v4065_v22  ;;  %v2682_v39 = vrot.slane %v2650_v16, %v4065_v22 }
 0x667   : > { %v3417_v24 = vsel %vm711_vm11, %v3398_v51, %v3416_v59  ;;  %v2689_v3 = vsel %vm719_vm8, %v2682_v39, %v2688_v36  ;;  %vm5228_vm11 = vmmov %vm5213_vm2 }
 0x668   : > { %v3373_v18 = vpop.permute.xlu1 %3372  ;;  %v3376_v23 = vpop.permute.xlu0 %3375 }
 0x669   : > { %v3402_v37 = vrot.slane %v3373_v18, %v4065_v22  ;;  %v3406_v6 = vrot.slane %v3376_v23, %v4065_v22 }
 0x66b   : > { %v3418_v0 = vsel %vm713_vm10, %v3402_v37, %v3417_v24  ;;  %vm3511_vm10 = vcmask 130048  }
 0x66c   : > { %v3379_v31 = vpop.permute.xlu1 %3378  ;;  %v3382_v33 = vpop.permute.xlu0 %3381  ;;  %v3419_v38 = vsel %vm715_vm12, %v3406_v6, %v3418_v0  ;;  %vm3513_vm12 = vcmask 195584  }
 0x66d   : > { %v3410_v55 = vrot.slane %v3379_v31, %v4065_v22  ;;  %v3414_v12 = vrot.slane %v3382_v33, %v4065_v22  ;;  %v3516_v22 = vld [vmem:[%s5182_s5 + $0x8] sm:$0xff] }
 0x66e   : > { %v3830_v57 = vpack.c.bf16 %v3516_v22, %v3515_v15 }
 0x66f   : > { %v3420_v46 = vsel %vm717_vm15, %v3410_v55, %v3419_v38  ;;  %vm5232_vm15 = vmmov %vm5213_vm2 }
 0x670   : > { %v1959_v9 = vpop.permute.xlu1 %1958  ;;  %v2691_v44 = vpop.permute.xlu0 %2690  ;;  %v3421_v4 = vsel %vm719_vm8, %v3414_v12, %v3420_v46  ;;  %3831 = vmatpush3.bf16.msra.mxu0 %v3830_v57  ;;  %vm5233_vm8 = vcmask 261120  }
 0x671   : > { %3782 = vmatpush3.msra.mxu1 %v1959_v9  ;;  %3832 = vmatprep.subr.bf16.mxu0 %v5229_v43 }
 0x672   : > { %3784 = vmatmul.mubr.msk.f32.vlgmr.msra.gmra.mrb[6].mxu1 %vm5226_vm9, %v1957_v32  ;;  %3791 = vmatprep.subr.mxu1 %v5224_v2 }
 0x673   : > { %3792 = vmatpush3.msra.mxu1 %v2691_v44  ;;  %3793 = vmatprep.mubr.msk.f32.mxu1 %vm5225_vm6, %v5224_v2 }
 0x674   : > { %v3423_v47 = vpop.permute.xlu1 %3422  ;;  %3801 = vmatprep.subr.mxu1 %v5224_v2 }
 0x676   : > { %3794 = vmatmul.mubr.msk.f32.vlgmr.msra.gmra.mrb[8].mxu1 %vm5227_vm7, %v2689_v3 }
 0x677   : > { %3802 = vmatpush3.msra.mxu1 %v3423_v47  ;;  %3803 = vmatprep.mubr.msk.f32.mxu1 %vm5225_vm6, %v5224_v2  ;;  %v3517_v2 = vld [vmem:[%s5182_s5 + $0x10] sm:$0xff] }
 0x678   : > { %v3833_v7 = vpack.c.bf16 %v3518_v1, %v3517_v2 }
 0x67a   : > { %3804 = vmatmul.mubr.msk.f32.vlgmr.msra.gmra.mrb[10].mxu1 %vm5228_vm11, %v3421_v4  ;;  %3834 = vmatpush3.bf16.msra.mxu0 %v3833_v7 }
 0x6d4   : > { %v1296_v34 = vpop.f32.mrb[4].mxu1 }
 0x6d5   : > { %v3775_v52 = vpop.f32.mrb[5].mxu1  ;;  %v1300_v8 = vsel %vm734_vm5, %v1296_v34, 0.0 }
 0x745   : > { %v2029_v13 = vpop.f32.mrb[6].mxu1 }
 0x746   : > { %v2033_v60 = vsel %vm1465_vm1, %v2029_v13, 0.0  ;;  %v3785_v16 = vpop.f32.mrb[7].mxu1  ;;  %vm5234_vm1 = vmmov %vm5233_vm8 }
 0x747   : > { %3499 = vrot.lane.b32.xlu0 %v2033_v60, %s3953_s14  ;;  %vm5235_vm5 = vmmov %vm5234_vm1 }
 0x749   : > { %v2761_v41 = vpop.f32.mrb[8].mxu1 }
 0x74a   : > { %v2765_v53 = vsel %vm2197_vm0, %v2761_v41, 0.0  ;;  %v3795_v45 = vpop.f32.mrb[9].mxu1  ;;  %vm5236_vm0 = vmmov %vm5234_vm1 }
 0x74b   : > { %3503 = vrot.lane.b32.xlu1 %v2765_v53, %s3954_s15 }
 0x74d   : > { %v3493_v18 = vpop.f32.mrb[10].mxu1 }
 0x74e   : > { %v3497_v21 = vsel %vm2929_vm3, %v3493_v18, 0.0  ;;  %v3805_v54 = vpop.f32.mrb[11].mxu1 }
 0x74f   : > { %3507 = vrot.lane.b32.xlu0 %v3497_v21, %s3955_s16 }
 0x7b9   : > { %v3500_v50 = vpop.permute.xlu0 %3499 }
 0x7ba   : > { %v3510_v63 = vsel %vm5232_vm15, %v1300_v8, %v3500_v50 }
 0x7bd   : > { %v3504_v19 = vpop.permute.xlu1 %3503 }
 0x7be   : > { %v3512_v42 = vsel %vm3511_vm10, %v3510_v63, %v3504_v19 }
 0x7c1   : > { %v3508_v20 = vpop.permute.xlu0 %3507 }
 0x7c2   : > { %v3514_v56 = vsel %vm3513_vm12, %v3512_v42, %v3508_v20 }
 0x7c3   : > { %3815 = vmatmul.mubr.msk.f32.vlgmr.msra.gmra.mrb[8].mxu0 %vm5233_vm8, %v3514_v56 }
 0x896   : > { %v3595_v25 = vpop.f32.mrb[8].mxu0 }
 0x897   : > { %v3596_v27 = vadd.f32 %v3707_v5, %v3595_v25  ;;  %v3816_v29 = vpop.f32.mrb[9].mxu0 }
 0x899   : > { %v3599_v31 = vadd.f32 %v3933_v10, %v3596_v27 }
 0x89b   : > { %v3600_v33 = vsel %vm5234_vm1, %v3599_v31, 0.0 }
 0x89c   : > { %3601 = vadd.xlane.f32.xlu1 %v3600_v33 }
 0x929   : > { %v3602_v26 = vpop.xlane.xlu1 %3601 }
 0x92a   : > { %v3604_v62 = vmul.f32 0.03125, %v3602_v26 }
 0x92c   : > { %v3605_v51 = vsub.f32 %v3599_v31, %v3604_v62 }
 0x92e   : > { %v3606_v58 = vmul.f32 %v3605_v51, %v3605_v51 }
 0x930   : > { %v3607_v49 = vsel %vm5235_vm5, %v3606_v58, 0.0 }
 0x931   : > { %3608 = vadd.xlane.f32.xlu0 %v3607_v49 }
 0x9be   : > { %v3609_v37 = vpop.xlane.xlu0 %3608 }
 0x9bf   : > { %v3610_v11 = vmul.f32 0.03125, %v3609_v37 }
 0x9c1   : > { %v3611_v48 = vadd.f32 1e-05, %v3610_v11 }
 0x9c3   : > { %3931 = vrsqrt.f32 %v3611_v48 }
 0x9cd   : > { %v3932_v61 = vpop.eup %3931 }
 0x9ce   : > { %v3613_v30 = vmul.f32 %v3932_v61, %v3605_v51 }
 0x9d0   : > { %v3621_v59 = vmul.f32 %v3709_v28, %v3613_v30 }
 0x9d2   : > { %v3629_v40 = vadd.f32 %v3710_v14, %v3621_v59 }
 0x9d4   : > { %3630 = vst.msk [vmem:[%s327_s24] sm:$0xff] %vm5236_vm0, %v3629_v40 }
 0x9d5 PF: > { %s19_s30 = sadd.s32 1, %s3940_s30  }
 0x9d6   : > { %p16_p4 = scmp.ge.s32.totalorder %s19_s30, 4  }
 0x9d8   :  { %18 = sbr.rel (!%p16_p4) target bundleno = 1 (0x1), region = 86 }

</bundles_post_ra>
